<compile_context>
chip_gen: v6e
topology: v6e:2x2x1
jax: 0.10.0
libtpu: 0.0.40
codegen_flags: <defaults>
</compile_context>

<pallas_src>
import functools

import jax
import jax.numpy as jnp
from jax.experimental import pallas as pl
from jax.experimental.pallas import tpu as pltpu


# -----------------------------------------------------------------------------
# Fused kernel: entire LiteRCAN trunk for ONE image per grid step.
#   conv1(9x9, 3->32)+ReLU -> 4x [conv3x3+ReLU -> conv3x3 -> CA -> +residual]
#   -> conv2(3x3, 32->48) -> clip(0, 1)   (clip commutes with PixelShuffle)
# -----------------------------------------------------------------------------
def _lite_rcan_kernel(xpad_ref, c1w_ref, c1b_ref, rbw_ref, rbb_ref,
                      caw1_ref, cab1_ref, caw2_ref, cab2_ref,
                      c2w_ref, c2b_ref, o_ref, pad_ref, *, H, W, C, n_iter):
    HW = H * W
    f32 = jnp.float32
    bf16 = jnp.bfloat16

    # ---- conv_1: 9x9, 3->32, im2col built in-kernel from the padded image ----
    xp1 = xpad_ref[...]                                   # (H+8, W+8, 3) bf16
    c1w = c1w_ref[...]                                    # (9, 27, C)   bf16
    acc = jnp.zeros((HW, C), f32)
    for ky in range(9):                                   # 9 accumulating dots, K=27
        band = xp1[ky:ky + H]                             # (H, W+8, 3)
        cols = [band[:, kx:kx + W, :] for kx in range(9)]
        p = jnp.concatenate(cols, axis=-1).reshape(HW, 27)
        acc = acc + jnp.dot(p, c1w[ky], preferred_element_type=f32)
    X = jnp.maximum(acc + c1b_ref[...], 0.0)              # (HW, C) f32

    # ---- persistent padded-halo scratch: zero once, interior rewritten ------
    pad_ref[...] = jnp.zeros((H + 2, W + 2, C), f32)

    def conv3x3(x2d, w3, b):
        # 'same' 3x3 conv of an (HW, C) activation: 3 accumulating K=3C matmuls.
        pad_ref[pl.ds(1, H), pl.ds(1, W), :] = x2d.reshape(H, W, C)
        xp = pad_ref[...].astype(bf16)                    # one cast per conv
        a = jnp.zeros((HW, w3.shape[-1]), f32)
        for ky in range(3):
            band = xp[ky:ky + H]                          # (H, W+2, C)
            cols = [band[:, kx:kx + W, :] for kx in range(3)]
            pch = jnp.concatenate(cols, axis=-1).reshape(HW, 3 * C)
            a = a + jnp.dot(pch, w3[ky], preferred_element_type=f32)
        return a + b

    # Shared residual-block / channel-attention weights: read once, reuse 4x.
    rbw = rbw_ref[...]                                    # (2, 3, 3C, C) bf16
    rbb = rbb_ref[...]                                    # (2, C)        f32
    caw1, cab1 = caw1_ref[...], cab1_ref[...]             # f32
    caw2, cab2 = caw2_ref[...], cab2_ref[...]             # f32
    mean_row = jnp.full((1, HW), 1.0 / HW, f32)           # avg-pool as MXU dot

    def rb_body(_, Xc):
        y = jnp.maximum(conv3x3(Xc, rbw[0], rbb[0:1]), 0.0)       # conv + ReLU
        y = conv3x3(y, rbw[1], rbb[1:2])                          # conv
        # ChannelAttention: avgpool -> 1x1(32->2) -> ReLU -> 1x1(2->32) -> sigmoid
        avg = jnp.dot(mean_row, y, preferred_element_type=f32)    # (1, C)
        h = jnp.maximum(jnp.dot(avg, caw1, preferred_element_type=f32) + cab1, 0.0)
        z = jnp.dot(h, caw2, preferred_element_type=f32) + cab2
        s = 1.0 / (1.0 + jnp.exp(-z))                             # sigmoid (1, C)
        return y * s + Xc                                         # CA(y) + residual

    X = jax.lax.fori_loop(0, n_iter, rb_body, X)          # self.i = 4 (shared weights)

    # ---- conv_2 (3x3, 32->48) + clip; store lane-dense as (Cout2, HW) -------
    out = conv3x3(X, c2w_ref[...], c2b_ref[...])          # (HW, 48) f32
    o_ref[...] = jnp.clip(out, 0.0, 1.0).T                # (48, HW), HW % 128 == 0


# -----------------------------------------------------------------------------
# Wrapper
# -----------------------------------------------------------------------------
def lite_rcan_forward(x, p):
    scale, C, n_iter = 4, 32, 4
    N, H, W, Cin = x.shape
    HW = H * W
    Cout2 = 3 * scale * scale                             # 48

    # Raw padded image in bf16 (12 B/px in HBM, not a 972 B/px im2col tensor).
    xpad = jnp.pad(x, ((0, 0), (4, 4), (4, 4), (0, 0))).astype(jnp.bfloat16)

    # Weights: (kh, kw, cin, cout) -> (kh, kw*cin, cout), bf16 for the MXU.
    c1w = p["c1_w"].reshape(9, 9 * Cin, C).astype(jnp.bfloat16)
    rbw = jnp.stack([p["rb1_w"].reshape(3, 3 * C, C),
                     p["rb2_w"].reshape(3, 3 * C, C)]).astype(jnp.bfloat16)
    rbb = jnp.concatenate([p["rb1_b"], p["rb2_b"]], axis=0)        # (2, C) f32
    c2w = p["c2_w"].reshape(3, 3 * C, Cout2).astype(jnp.bfloat16)
    chid = p["ca_w1"].shape[1]                            # 32 // 16 = 2

    def const(shape):  # whole-array block, resident across the batch grid
        return pl.BlockSpec(shape, lambda n: (0,) * len(shape))

    kernel = functools.partial(_lite_rcan_kernel, H=H, W=W, C=C, n_iter=n_iter)
    out = pl.pallas_call(
        kernel,
        grid=(N,),
        out_shape=jax.ShapeDtypeStruct((N, Cout2, HW), jnp.float32),
        in_specs=[
            pl.BlockSpec((None, H + 8, W + 8, Cin), lambda n: (n, 0, 0, 0)),
            const((9, 9 * Cin, C)), const((1, C)),         # conv_1 w / b
            const((2, 3, 3 * C, C)), const((2, C)),        # residual conv w / b (packed)
            const((C, chid)), const((1, chid)),            # CA fc1
            const((chid, C)), const((1, C)),               # CA fc2
            const((3, 3 * C, Cout2)), const((1, Cout2)),   # conv_2 w / b
        ],
        out_specs=pl.BlockSpec((None, Cout2, HW), lambda n: (n, 0, 0)),
        scratch_shapes=[pltpu.VMEM((H + 2, W + 2, C), jnp.float32)],  # padded halo
        compiler_params=pltpu.CompilerParams(
            dimension_semantics=("parallel",),             # batch across TCs (v7x)
            vmem_limit_bytes=32 * 1024 * 1024),
    )(xpad, c1w, p["c1_b"], rbw, rbb,
      p["ca_w1"], p["ca_b1"], p["ca_w2"], p["ca_b2"], c2w, p["c2_b"])

    # PixelShuffle(4). Kernel output is (N, Cout2, HW), Cout2 = c*r*r + i*r + j;
    # the in-kernel transpose (lane-dense store) folds into this reshape chain.
    r = scale
    Cout = Cout2 // (r * r)
    X = out.reshape(N, Cout, r, r, H, W)
    X = jnp.transpose(X, (0, 4, 2, 5, 3, 1))              # (N, H, r, W, r, Cout)
    return X.reshape(N, H * r, W * r, Cout)


# -----------------------------------------------------------------------------
# Deterministic parameter init (matching the module's shapes / init scheme)
# -----------------------------------------------------------------------------
def init_params(key):
    ks = jax.random.split(key, 8)
    C, red = 32, 16
    return {
        "c1_w": jax.random.normal(ks[0], (9, 9, 3, 32), jnp.float32) * 0.001,
        "c1_b": jnp.zeros((1, 32), jnp.float32),
        "rb1_w": jax.random.normal(ks[1], (3, 3, 32, 32), jnp.float32) * 0.001,
        "rb1_b": jnp.zeros((1, 32), jnp.float32),
        "rb2_w": jax.random.normal(ks[2], (3, 3, 32, 32), jnp.float32) * 0.001,
        "rb2_b": jnp.zeros((1, 32), jnp.float32),
        # ChannelAttention 1x1 convs (PyTorch default init -> deterministic uniform)
        "ca_w1": jax.random.uniform(ks[3], (C, C // red), jnp.float32,
                                    -1.0 / jnp.sqrt(float(C)), 1.0 / jnp.sqrt(float(C))),
        "ca_b1": jax.random.uniform(ks[4], (1, C // red), jnp.float32,
                                    -1.0 / jnp.sqrt(float(C)), 1.0 / jnp.sqrt(float(C))),
        "ca_w2": jax.random.uniform(ks[5], (C // red, C), jnp.float32,
                                    -1.0 / jnp.sqrt(float(C // red)), 1.0 / jnp.sqrt(float(C // red))),
        "ca_b2": jax.random.uniform(ks[6], (1, C), jnp.float32,
                                    -1.0 / jnp.sqrt(float(C // red)), 1.0 / jnp.sqrt(float(C // red))),
        "c2_w": jax.random.normal(ks[7], (3, 3, 32, 48), jnp.float32) * 0.001,
        "c2_b": jnp.zeros((1, 48), jnp.float32),
    }


if __name__ == "__main__":
    key = jax.random.PRNGKey(0)
    k_in, k_par = jax.random.split(key)
    # NHWC input, equivalent to PyTorch NCHW (2, 3, 16, 16)
    x = jax.random.uniform(k_in, (2, 16, 16, 3), jnp.float32)
    params = init_params(k_par)

    out = jax.jit(lite_rcan_forward)(x, params)
    out = jax.block_until_ready(out)

    assert out.shape == (2, 64, 64, 3), out.shape
    assert bool(jnp.all(out >= 0.0)) and bool(jnp.all(out <= 1.0))
    print("KERNEL_OK")
</pallas_src>

<mosaic_0001>
module attributes {stable_mosaic.version = 11 : i64} {
  func.func @_lite_rcan_kernel(%arg0: i32, %arg1: memref<1x24x24x3xbf16, #tpu.memory_space<vmem>>, %arg2: memref<9x27x32xbf16, #tpu.memory_space<vmem>>, %arg3: memref<1x32xf32, #tpu.memory_space<vmem>>, %arg4: memref<2x3x96x32xbf16, #tpu.memory_space<vmem>>, %arg5: memref<2x32xf32, #tpu.memory_space<vmem>>, %arg6: memref<32x2xf32, #tpu.memory_space<vmem>>, %arg7: memref<1x2xf32, #tpu.memory_space<vmem>>, %arg8: memref<2x32xf32, #tpu.memory_space<vmem>>, %arg9: memref<1x32xf32, #tpu.memory_space<vmem>>, %arg10: memref<3x96x48xbf16, #tpu.memory_space<vmem>>, %arg11: memref<1x48xf32, #tpu.memory_space<vmem>>, %arg12: memref<1x48x256xf32, #tpu.memory_space<vmem>>, %arg13: memref<18x18x32xf32, #tpu.memory_space<vmem>>) attributes {dimension_semantics = [#tpu.dimension_semantics<parallel>], iteration_bounds = array<i64: 2>, scalar_prefetch = 0 : i64, scratch_operands = 1 : i64, tpu.core_type = #tpu.core_type<tc>, window_params = [{transform_indices = @transform_0, window_bounds = array<i64: 1, 24, 24, 3>}, {pipeline_mode = #tpu.pipeline_mode<synchronous>, transform_indices = @transform_1, window_bounds = array<i64: 9, 27, 32>}, {pipeline_mode = #tpu.pipeline_mode<synchronous>, transform_indices = @transform_2, window_bounds = array<i64: 1, 32>}, {pipeline_mode = #tpu.pipeline_mode<synchronous>, transform_indices = @transform_3, window_bounds = array<i64: 2, 3, 96, 32>}, {pipeline_mode = #tpu.pipeline_mode<synchronous>, transform_indices = @transform_4, window_bounds = array<i64: 2, 32>}, {pipeline_mode = #tpu.pipeline_mode<synchronous>, transform_indices = @transform_5, window_bounds = array<i64: 32, 2>}, {pipeline_mode = #tpu.pipeline_mode<synchronous>, transform_indices = @transform_6, window_bounds = array<i64: 1, 2>}, {pipeline_mode = #tpu.pipeline_mode<synchronous>, transform_indices = @transform_7, window_bounds = array<i64: 2, 32>}, {pipeline_mode = #tpu.pipeline_mode<synchronous>, transform_indices = @transform_8, window_bounds = array<i64: 1, 32>}, {pipeline_mode = #tpu.pipeline_mode<synchronous>, transform_indices = @transform_9, window_bounds = array<i64: 3, 96, 48>}, {pipeline_mode = #tpu.pipeline_mode<synchronous>, transform_indices = @transform_10, window_bounds = array<i64: 1, 48>}, {transform_indices = @transform_11, window_bounds = array<i64: 1, 48, 256>}]} {
    %c0 = arith.constant 0 : index
    %c0_0 = arith.constant 0 : index
    %c0_1 = arith.constant 0 : index
    %c0_2 = arith.constant 0 : index
    %0 = vector.load %arg1[%c0, %c0_0, %c0_1, %c0_2] : memref<1x24x24x3xbf16, #tpu.memory_space<vmem>>, vector<1x24x24x3xbf16>
    %1 = vector.shape_cast %0 : vector<1x24x24x3xbf16> to vector<24x24x3xbf16>
    %c0_3 = arith.constant 0 : index
    %c0_4 = arith.constant 0 : index
    %c0_5 = arith.constant 0 : index
    %2 = vector.load %arg2[%c0_3, %c0_4, %c0_5] : memref<9x27x32xbf16, #tpu.memory_space<vmem>>, vector<9x27x32xbf16>
    %cst = arith.constant 0.000000e+00 : f32
    %3 = vector.broadcast %cst : f32 to vector<256x32xf32>
    %4 = vector.extract_strided_slice %1 {offsets = [0, 0, 0], sizes = [16, 24, 3], strides = [1, 1, 1]} : vector<24x24x3xbf16> to vector<16x24x3xbf16>
    %5 = vector.extract_strided_slice %4 {offsets = [0, 0, 0], sizes = [16, 16, 3], strides = [1, 1, 1]} : vector<16x24x3xbf16> to vector<16x16x3xbf16>
    %6 = vector.extract_strided_slice %4 {offsets = [0, 1, 0], sizes = [16, 16, 3], strides = [1, 1, 1]} : vector<16x24x3xbf16> to vector<16x16x3xbf16>
    %7 = vector.extract_strided_slice %4 {offsets = [0, 2, 0], sizes = [16, 16, 3], strides = [1, 1, 1]} : vector<16x24x3xbf16> to vector<16x16x3xbf16>
    %8 = vector.extract_strided_slice %4 {offsets = [0, 3, 0], sizes = [16, 16, 3], strides = [1, 1, 1]} : vector<16x24x3xbf16> to vector<16x16x3xbf16>
    %9 = vector.extract_strided_slice %4 {offsets = [0, 4, 0], sizes = [16, 16, 3], strides = [1, 1, 1]} : vector<16x24x3xbf16> to vector<16x16x3xbf16>
    %10 = vector.extract_strided_slice %4 {offsets = [0, 5, 0], sizes = [16, 16, 3], strides = [1, 1, 1]} : vector<16x24x3xbf16> to vector<16x16x3xbf16>
    %11 = vector.extract_strided_slice %4 {offsets = [0, 6, 0], sizes = [16, 16, 3], strides = [1, 1, 1]} : vector<16x24x3xbf16> to vector<16x16x3xbf16>
    %12 = vector.extract_strided_slice %4 {offsets = [0, 7, 0], sizes = [16, 16, 3], strides = [1, 1, 1]} : vector<16x24x3xbf16> to vector<16x16x3xbf16>
    %13 = vector.extract_strided_slice %4 {offsets = [0, 8, 0], sizes = [16, 16, 3], strides = [1, 1, 1]} : vector<16x24x3xbf16> to vector<16x16x3xbf16>
    %14 = tpu.concatenate %5, %6, %7, %8, %9, %10, %11, %12, %13 in 2 : vector<16x16x3xbf16>, vector<16x16x3xbf16>, vector<16x16x3xbf16>, vector<16x16x3xbf16>, vector<16x16x3xbf16>, vector<16x16x3xbf16>, vector<16x16x3xbf16>, vector<16x16x3xbf16>, vector<16x16x3xbf16> -> vector<16x16x27xbf16>
    %15 = vector.shape_cast %14 : vector<16x16x27xbf16> to vector<256x27xbf16>
    %16 = vector.extract_strided_slice %2 {offsets = [0, 0, 0], sizes = [1, 27, 32], strides = [1, 1, 1]} : vector<9x27x32xbf16> to vector<1x27x32xbf16>
    %17 = vector.shape_cast %16 : vector<1x27x32xbf16> to vector<27x32xbf16>
    %cst_6 = arith.constant dense<0.000000e+00> : vector<256x32xf32>
    %18 = tpu.matmul %15, %17, %cst_6 {dimension_numbers = #tpu.dot_dimension_numbers<[1], [0], [0], [1], [0, 0, 1, 1], [], []>} : vector<256x27xbf16>, vector<27x32xbf16>, vector<256x32xf32> -> vector<256x32xf32>
    %19 = arith.addf %3, %18 : vector<256x32xf32>
    %20 = vector.extract_strided_slice %1 {offsets = [1, 0, 0], sizes = [16, 24, 3], strides = [1, 1, 1]} : vector<24x24x3xbf16> to vector<16x24x3xbf16>
    %21 = vector.extract_strided_slice %20 {offsets = [0, 0, 0], sizes = [16, 16, 3], strides = [1, 1, 1]} : vector<16x24x3xbf16> to vector<16x16x3xbf16>
    %22 = vector.extract_strided_slice %20 {offsets = [0, 1, 0], sizes = [16, 16, 3], strides = [1, 1, 1]} : vector<16x24x3xbf16> to vector<16x16x3xbf16>
    %23 = vector.extract_strided_slice %20 {offsets = [0, 2, 0], sizes = [16, 16, 3], strides = [1, 1, 1]} : vector<16x24x3xbf16> to vector<16x16x3xbf16>
    %24 = vector.extract_strided_slice %20 {offsets = [0, 3, 0], sizes = [16, 16, 3], strides = [1, 1, 1]} : vector<16x24x3xbf16> to vector<16x16x3xbf16>
    %25 = vector.extract_strided_slice %20 {offsets = [0, 4, 0], sizes = [16, 16, 3], strides = [1, 1, 1]} : vector<16x24x3xbf16> to vector<16x16x3xbf16>
    %26 = vector.extract_strided_slice %20 {offsets = [0, 5, 0], sizes = [16, 16, 3], strides = [1, 1, 1]} : vector<16x24x3xbf16> to vector<16x16x3xbf16>
    %27 = vector.extract_strided_slice %20 {offsets = [0, 6, 0], sizes = [16, 16, 3], strides = [1, 1, 1]} : vector<16x24x3xbf16> to vector<16x16x3xbf16>
    %28 = vector.extract_strided_slice %20 {offsets = [0, 7, 0], sizes = [16, 16, 3], strides = [1, 1, 1]} : vector<16x24x3xbf16> to vector<16x16x3xbf16>
    %29 = vector.extract_strided_slice %20 {offsets = [0, 8, 0], sizes = [16, 16, 3], strides = [1, 1, 1]} : vector<16x24x3xbf16> to vector<16x16x3xbf16>
    %30 = tpu.concatenate %21, %22, %23, %24, %25, %26, %27, %28, %29 in 2 : vector<16x16x3xbf16>, vector<16x16x3xbf16>, vector<16x16x3xbf16>, vector<16x16x3xbf16>, vector<16x16x3xbf16>, vector<16x16x3xbf16>, vector<16x16x3xbf16>, vector<16x16x3xbf16>, vector<16x16x3xbf16> -> vector<16x16x27xbf16>
    %31 = vector.shape_cast %30 : vector<16x16x27xbf16> to vector<256x27xbf16>
    %32 = vector.extract_strided_slice %2 {offsets = [1, 0, 0], sizes = [1, 27, 32], strides = [1, 1, 1]} : vector<9x27x32xbf16> to vector<1x27x32xbf16>
    %33 = vector.shape_cast %32 : vector<1x27x32xbf16> to vector<27x32xbf16>
    %cst_7 = arith.constant dense<0.000000e+00> : vector<256x32xf32>
    %34 = tpu.matmul %31, %33, %cst_7 {dimension_numbers = #tpu.dot_dimension_numbers<[1], [0], [0], [1], [0, 0, 1, 1], [], []>} : vector<256x27xbf16>, vector<27x32xbf16>, vector<256x32xf32> -> vector<256x32xf32>
    %35 = arith.addf %19, %34 : vector<256x32xf32>
    %36 = vector.extract_strided_slice %1 {offsets = [2, 0, 0], sizes = [16, 24, 3], strides = [1, 1, 1]} : vector<24x24x3xbf16> to vector<16x24x3xbf16>
    %37 = vector.extract_strided_slice %36 {offsets = [0, 0, 0], sizes = [16, 16, 3], strides = [1, 1, 1]} : vector<16x24x3xbf16> to vector<16x16x3xbf16>
    %38 = vector.extract_strided_slice %36 {offsets = [0, 1, 0], sizes = [16, 16, 3], strides = [1, 1, 1]} : vector<16x24x3xbf16> to vector<16x16x3xbf16>
    %39 = vector.extract_strided_slice %36 {offsets = [0, 2, 0], sizes = [16, 16, 3], strides = [1, 1, 1]} : vector<16x24x3xbf16> to vector<16x16x3xbf16>
    %40 = vector.extract_strided_slice %36 {offsets = [0, 3, 0], sizes = [16, 16, 3], strides = [1, 1, 1]} : vector<16x24x3xbf16> to vector<16x16x3xbf16>
    %41 = vector.extract_strided_slice %36 {offsets = [0, 4, 0], sizes = [16, 16, 3], strides = [1, 1, 1]} : vector<16x24x3xbf16> to vector<16x16x3xbf16>
    %42 = vector.extract_strided_slice %36 {offsets = [0, 5, 0], sizes = [16, 16, 3], strides = [1, 1, 1]} : vector<16x24x3xbf16> to vector<16x16x3xbf16>
    %43 = vector.extract_strided_slice %36 {offsets = [0, 6, 0], sizes = [16, 16, 3], strides = [1, 1, 1]} : vector<16x24x3xbf16> to vector<16x16x3xbf16>
    %44 = vector.extract_strided_slice %36 {offsets = [0, 7, 0], sizes = [16, 16, 3], strides = [1, 1, 1]} : vector<16x24x3xbf16> to vector<16x16x3xbf16>
    %45 = vector.extract_strided_slice %36 {offsets = [0, 8, 0], sizes = [16, 16, 3], strides = [1, 1, 1]} : vector<16x24x3xbf16> to vector<16x16x3xbf16>
    %46 = tpu.concatenate %37, %38, %39, %40, %41, %42, %43, %44, %45 in 2 : vector<16x16x3xbf16>, vector<16x16x3xbf16>, vector<16x16x3xbf16>, vector<16x16x3xbf16>, vector<16x16x3xbf16>, vector<16x16x3xbf16>, vector<16x16x3xbf16>, vector<16x16x3xbf16>, vector<16x16x3xbf16> -> vector<16x16x27xbf16>
    %47 = vector.shape_cast %46 : vector<16x16x27xbf16> to vector<256x27xbf16>
    %48 = vector.extract_strided_slice %2 {offsets = [2, 0, 0], sizes = [1, 27, 32], strides = [1, 1, 1]} : vector<9x27x32xbf16> to vector<1x27x32xbf16>
    %49 = vector.shape_cast %48 : vector<1x27x32xbf16> to vector<27x32xbf16>
    %cst_8 = arith.constant dense<0.000000e+00> : vector<256x32xf32>
    %50 = tpu.matmul %47, %49, %cst_8 {dimension_numbers = #tpu.dot_dimension_numbers<[1], [0], [0], [1], [0, 0, 1, 1], [], []>} : vector<256x27xbf16>, vector<27x32xbf16>, vector<256x32xf32> -> vector<256x32xf32>
    %51 = arith.addf %35, %50 : vector<256x32xf32>
    %52 = vector.extract_strided_slice %1 {offsets = [3, 0, 0], sizes = [16, 24, 3], strides = [1, 1, 1]} : vector<24x24x3xbf16> to vector<16x24x3xbf16>
    %53 = vector.extract_strided_slice %52 {offsets = [0, 0, 0], sizes = [16, 16, 3], strides = [1, 1, 1]} : vector<16x24x3xbf16> to vector<16x16x3xbf16>
    %54 = vector.extract_strided_slice %52 {offsets = [0, 1, 0], sizes = [16, 16, 3], strides = [1, 1, 1]} : vector<16x24x3xbf16> to vector<16x16x3xbf16>
    %55 = vector.extract_strided_slice %52 {offsets = [0, 2, 0], sizes = [16, 16, 3], strides = [1, 1, 1]} : vector<16x24x3xbf16> to vector<16x16x3xbf16>
    %56 = vector.extract_strided_slice %52 {offsets = [0, 3, 0], sizes = [16, 16, 3], strides = [1, 1, 1]} : vector<16x24x3xbf16> to vector<16x16x3xbf16>
    %57 = vector.extract_strided_slice %52 {offsets = [0, 4, 0], sizes = [16, 16, 3], strides = [1, 1, 1]} : vector<16x24x3xbf16> to vector<16x16x3xbf16>
    %58 = vector.extract_strided_slice %52 {offsets = [0, 5, 0], sizes = [16, 16, 3], strides = [1, 1, 1]} : vector<16x24x3xbf16> to vector<16x16x3xbf16>
    %59 = vector.extract_strided_slice %52 {offsets = [0, 6, 0], sizes = [16, 16, 3], strides = [1, 1, 1]} : vector<16x24x3xbf16> to vector<16x16x3xbf16>
    %60 = vector.extract_strided_slice %52 {offsets = [0, 7, 0], sizes = [16, 16, 3], strides = [1, 1, 1]} : vector<16x24x3xbf16> to vector<16x16x3xbf16>
    %61 = vector.extract_strided_slice %52 {offsets = [0, 8, 0], sizes = [16, 16, 3], strides = [1, 1, 1]} : vector<16x24x3xbf16> to vector<16x16x3xbf16>
    %62 = tpu.concatenate %53, %54, %55, %56, %57, %58, %59, %60, %61 in 2 : vector<16x16x3xbf16>, vector<16x16x3xbf16>, vector<16x16x3xbf16>, vector<16x16x3xbf16>, vector<16x16x3xbf16>, vector<16x16x3xbf16>, vector<16x16x3xbf16>, vector<16x16x3xbf16>, vector<16x16x3xbf16> -> vector<16x16x27xbf16>
    %63 = vector.shape_cast %62 : vector<16x16x27xbf16> to vector<256x27xbf16>
    %64 = vector.extract_strided_slice %2 {offsets = [3, 0, 0], sizes = [1, 27, 32], strides = [1, 1, 1]} : vector<9x27x32xbf16> to vector<1x27x32xbf16>
    %65 = vector.shape_cast %64 : vector<1x27x32xbf16> to vector<27x32xbf16>
    %cst_9 = arith.constant dense<0.000000e+00> : vector<256x32xf32>
    %66 = tpu.matmul %63, %65, %cst_9 {dimension_numbers = #tpu.dot_dimension_numbers<[1], [0], [0], [1], [0, 0, 1, 1], [], []>} : vector<256x27xbf16>, vector<27x32xbf16>, vector<256x32xf32> -> vector<256x32xf32>
    %67 = arith.addf %51, %66 : vector<256x32xf32>
    %68 = vector.extract_strided_slice %1 {offsets = [4, 0, 0], sizes = [16, 24, 3], strides = [1, 1, 1]} : vector<24x24x3xbf16> to vector<16x24x3xbf16>
    %69 = vector.extract_strided_slice %68 {offsets = [0, 0, 0], sizes = [16, 16, 3], strides = [1, 1, 1]} : vector<16x24x3xbf16> to vector<16x16x3xbf16>
    %70 = vector.extract_strided_slice %68 {offsets = [0, 1, 0], sizes = [16, 16, 3], strides = [1, 1, 1]} : vector<16x24x3xbf16> to vector<16x16x3xbf16>
    %71 = vector.extract_strided_slice %68 {offsets = [0, 2, 0], sizes = [16, 16, 3], strides = [1, 1, 1]} : vector<16x24x3xbf16> to vector<16x16x3xbf16>
    %72 = vector.extract_strided_slice %68 {offsets = [0, 3, 0], sizes = [16, 16, 3], strides = [1, 1, 1]} : vector<16x24x3xbf16> to vector<16x16x3xbf16>
    %73 = vector.extract_strided_slice %68 {offsets = [0, 4, 0], sizes = [16, 16, 3], strides = [1, 1, 1]} : vector<16x24x3xbf16> to vector<16x16x3xbf16>
    %74 = vector.extract_strided_slice %68 {offsets = [0, 5, 0], sizes = [16, 16, 3], strides = [1, 1, 1]} : vector<16x24x3xbf16> to vector<16x16x3xbf16>
    %75 = vector.extract_strided_slice %68 {offsets = [0, 6, 0], sizes = [16, 16, 3], strides = [1, 1, 1]} : vector<16x24x3xbf16> to vector<16x16x3xbf16>
    %76 = vector.extract_strided_slice %68 {offsets = [0, 7, 0], sizes = [16, 16, 3], strides = [1, 1, 1]} : vector<16x24x3xbf16> to vector<16x16x3xbf16>
    %77 = vector.extract_strided_slice %68 {offsets = [0, 8, 0], sizes = [16, 16, 3], strides = [1, 1, 1]} : vector<16x24x3xbf16> to vector<16x16x3xbf16>
    %78 = tpu.concatenate %69, %70, %71, %72, %73, %74, %75, %76, %77 in 2 : vector<16x16x3xbf16>, vector<16x16x3xbf16>, vector<16x16x3xbf16>, vector<16x16x3xbf16>, vector<16x16x3xbf16>, vector<16x16x3xbf16>, vector<16x16x3xbf16>, vector<16x16x3xbf16>, vector<16x16x3xbf16> -> vector<16x16x27xbf16>
    %79 = vector.shape_cast %78 : vector<16x16x27xbf16> to vector<256x27xbf16>
    %80 = vector.extract_strided_slice %2 {offsets = [4, 0, 0], sizes = [1, 27, 32], strides = [1, 1, 1]} : vector<9x27x32xbf16> to vector<1x27x32xbf16>
    %81 = vector.shape_cast %80 : vector<1x27x32xbf16> to vector<27x32xbf16>
    %cst_10 = arith.constant dense<0.000000e+00> : vector<256x32xf32>
    %82 = tpu.matmul %79, %81, %cst_10 {dimension_numbers = #tpu.dot_dimension_numbers<[1], [0], [0], [1], [0, 0, 1, 1], [], []>} : vector<256x27xbf16>, vector<27x32xbf16>, vector<256x32xf32> -> vector<256x32xf32>
    %83 = arith.addf %67, %82 : vector<256x32xf32>
    %84 = vector.extract_strided_slice %1 {offsets = [5, 0, 0], sizes = [16, 24, 3], strides = [1, 1, 1]} : vector<24x24x3xbf16> to vector<16x24x3xbf16>
    %85 = vector.extract_strided_slice %84 {offsets = [0, 0, 0], sizes = [16, 16, 3], strides = [1, 1, 1]} : vector<16x24x3xbf16> to vector<16x16x3xbf16>
    %86 = vector.extract_strided_slice %84 {offsets = [0, 1, 0], sizes = [16, 16, 3], strides = [1, 1, 1]} : vector<16x24x3xbf16> to vector<16x16x3xbf16>
    %87 = vector.extract_strided_slice %84 {offsets = [0, 2, 0], sizes = [16, 16, 3], strides = [1, 1, 1]} : vector<16x24x3xbf16> to vector<16x16x3xbf16>
    %88 = vector.extract_strided_slice %84 {offsets = [0, 3, 0], sizes = [16, 16, 3], strides = [1, 1, 1]} : vector<16x24x3xbf16> to vector<16x16x3xbf16>
    %89 = vector.extract_strided_slice %84 {offsets = [0, 4, 0], sizes = [16, 16, 3], strides = [1, 1, 1]} : vector<16x24x3xbf16> to vector<16x16x3xbf16>
    %90 = vector.extract_strided_slice %84 {offsets = [0, 5, 0], sizes = [16, 16, 3], strides = [1, 1, 1]} : vector<16x24x3xbf16> to vector<16x16x3xbf16>
    %91 = vector.extract_strided_slice %84 {offsets = [0, 6, 0], sizes = [16, 16, 3], strides = [1, 1, 1]} : vector<16x24x3xbf16> to vector<16x16x3xbf16>
    %92 = vector.extract_strided_slice %84 {offsets = [0, 7, 0], sizes = [16, 16, 3], strides = [1, 1, 1]} : vector<16x24x3xbf16> to vector<16x16x3xbf16>
    %93 = vector.extract_strided_slice %84 {offsets = [0, 8, 0], sizes = [16, 16, 3], strides = [1, 1, 1]} : vector<16x24x3xbf16> to vector<16x16x3xbf16>
    %94 = tpu.concatenate %85, %86, %87, %88, %89, %90, %91, %92, %93 in 2 : vector<16x16x3xbf16>, vector<16x16x3xbf16>, vector<16x16x3xbf16>, vector<16x16x3xbf16>, vector<16x16x3xbf16>, vector<16x16x3xbf16>, vector<16x16x3xbf16>, vector<16x16x3xbf16>, vector<16x16x3xbf16> -> vector<16x16x27xbf16>
    %95 = vector.shape_cast %94 : vector<16x16x27xbf16> to vector<256x27xbf16>
    %96 = vector.extract_strided_slice %2 {offsets = [5, 0, 0], sizes = [1, 27, 32], strides = [1, 1, 1]} : vector<9x27x32xbf16> to vector<1x27x32xbf16>
    %97 = vector.shape_cast %96 : vector<1x27x32xbf16> to vector<27x32xbf16>
    %cst_11 = arith.constant dense<0.000000e+00> : vector<256x32xf32>
    %98 = tpu.matmul %95, %97, %cst_11 {dimension_numbers = #tpu.dot_dimension_numbers<[1], [0], [0], [1], [0, 0, 1, 1], [], []>} : vector<256x27xbf16>, vector<27x32xbf16>, vector<256x32xf32> -> vector<256x32xf32>
    %99 = arith.addf %83, %98 : vector<256x32xf32>
    %100 = vector.extract_strided_slice %1 {offsets = [6, 0, 0], sizes = [16, 24, 3], strides = [1, 1, 1]} : vector<24x24x3xbf16> to vector<16x24x3xbf16>
    %101 = vector.extract_strided_slice %100 {offsets = [0, 0, 0], sizes = [16, 16, 3], strides = [1, 1, 1]} : vector<16x24x3xbf16> to vector<16x16x3xbf16>
    %102 = vector.extract_strided_slice %100 {offsets = [0, 1, 0], sizes = [16, 16, 3], strides = [1, 1, 1]} : vector<16x24x3xbf16> to vector<16x16x3xbf16>
    %103 = vector.extract_strided_slice %100 {offsets = [0, 2, 0], sizes = [16, 16, 3], strides = [1, 1, 1]} : vector<16x24x3xbf16> to vector<16x16x3xbf16>
    %104 = vector.extract_strided_slice %100 {offsets = [0, 3, 0], sizes = [16, 16, 3], strides = [1, 1, 1]} : vector<16x24x3xbf16> to vector<16x16x3xbf16>
    %105 = vector.extract_strided_slice %100 {offsets = [0, 4, 0], sizes = [16, 16, 3], strides = [1, 1, 1]} : vector<16x24x3xbf16> to vector<16x16x3xbf16>
    %106 = vector.extract_strided_slice %100 {offsets = [0, 5, 0], sizes = [16, 16, 3], strides = [1, 1, 1]} : vector<16x24x3xbf16> to vector<16x16x3xbf16>
    %107 = vector.extract_strided_slice %100 {offsets = [0, 6, 0], sizes = [16, 16, 3], strides = [1, 1, 1]} : vector<16x24x3xbf16> to vector<16x16x3xbf16>
    %108 = vector.extract_strided_slice %100 {offsets = [0, 7, 0], sizes = [16, 16, 3], strides = [1, 1, 1]} : vector<16x24x3xbf16> to vector<16x16x3xbf16>
    %109 = vector.extract_strided_slice %100 {offsets = [0, 8, 0], sizes = [16, 16, 3], strides = [1, 1, 1]} : vector<16x24x3xbf16> to vector<16x16x3xbf16>
    %110 = tpu.concatenate %101, %102, %103, %104, %105, %106, %107, %108, %109 in 2 : vector<16x16x3xbf16>, vector<16x16x3xbf16>, vector<16x16x3xbf16>, vector<16x16x3xbf16>, vector<16x16x3xbf16>, vector<16x16x3xbf16>, vector<16x16x3xbf16>, vector<16x16x3xbf16>, vector<16x16x3xbf16> -> vector<16x16x27xbf16>
    %111 = vector.shape_cast %110 : vector<16x16x27xbf16> to vector<256x27xbf16>
    %112 = vector.extract_strided_slice %2 {offsets = [6, 0, 0], sizes = [1, 27, 32], strides = [1, 1, 1]} : vector<9x27x32xbf16> to vector<1x27x32xbf16>
    %113 = vector.shape_cast %112 : vector<1x27x32xbf16> to vector<27x32xbf16>
    %cst_12 = arith.constant dense<0.000000e+00> : vector<256x32xf32>
    %114 = tpu.matmul %111, %113, %cst_12 {dimension_numbers = #tpu.dot_dimension_numbers<[1], [0], [0], [1], [0, 0, 1, 1], [], []>} : vector<256x27xbf16>, vector<27x32xbf16>, vector<256x32xf32> -> vector<256x32xf32>
    %115 = arith.addf %99, %114 : vector<256x32xf32>
    %116 = vector.extract_strided_slice %1 {offsets = [7, 0, 0], sizes = [16, 24, 3], strides = [1, 1, 1]} : vector<24x24x3xbf16> to vector<16x24x3xbf16>
    %117 = vector.extract_strided_slice %116 {offsets = [0, 0, 0], sizes = [16, 16, 3], strides = [1, 1, 1]} : vector<16x24x3xbf16> to vector<16x16x3xbf16>
    %118 = vector.extract_strided_slice %116 {offsets = [0, 1, 0], sizes = [16, 16, 3], strides = [1, 1, 1]} : vector<16x24x3xbf16> to vector<16x16x3xbf16>
    %119 = vector.extract_strided_slice %116 {offsets = [0, 2, 0], sizes = [16, 16, 3], strides = [1, 1, 1]} : vector<16x24x3xbf16> to vector<16x16x3xbf16>
    %120 = vector.extract_strided_slice %116 {offsets = [0, 3, 0], sizes = [16, 16, 3], strides = [1, 1, 1]} : vector<16x24x3xbf16> to vector<16x16x3xbf16>
    %121 = vector.extract_strided_slice %116 {offsets = [0, 4, 0], sizes = [16, 16, 3], strides = [1, 1, 1]} : vector<16x24x3xbf16> to vector<16x16x3xbf16>
    %122 = vector.extract_strided_slice %116 {offsets = [0, 5, 0], sizes = [16, 16, 3], strides = [1, 1, 1]} : vector<16x24x3xbf16> to vector<16x16x3xbf16>
    %123 = vector.extract_strided_slice %116 {offsets = [0, 6, 0], sizes = [16, 16, 3], strides = [1, 1, 1]} : vector<16x24x3xbf16> to vector<16x16x3xbf16>
    %124 = vector.extract_strided_slice %116 {offsets = [0, 7, 0], sizes = [16, 16, 3], strides = [1, 1, 1]} : vector<16x24x3xbf16> to vector<16x16x3xbf16>
    %125 = vector.extract_strided_slice %116 {offsets = [0, 8, 0], sizes = [16, 16, 3], strides = [1, 1, 1]} : vector<16x24x3xbf16> to vector<16x16x3xbf16>
    %126 = tpu.concatenate %117, %118, %119, %120, %121, %122, %123, %124, %125 in 2 : vector<16x16x3xbf16>, vector<16x16x3xbf16>, vector<16x16x3xbf16>, vector<16x16x3xbf16>, vector<16x16x3xbf16>, vector<16x16x3xbf16>, vector<16x16x3xbf16>, vector<16x16x3xbf16>, vector<16x16x3xbf16> -> vector<16x16x27xbf16>
    %127 = vector.shape_cast %126 : vector<16x16x27xbf16> to vector<256x27xbf16>
    %128 = vector.extract_strided_slice %2 {offsets = [7, 0, 0], sizes = [1, 27, 32], strides = [1, 1, 1]} : vector<9x27x32xbf16> to vector<1x27x32xbf16>
    %129 = vector.shape_cast %128 : vector<1x27x32xbf16> to vector<27x32xbf16>
    %cst_13 = arith.constant dense<0.000000e+00> : vector<256x32xf32>
    %130 = tpu.matmul %127, %129, %cst_13 {dimension_numbers = #tpu.dot_dimension_numbers<[1], [0], [0], [1], [0, 0, 1, 1], [], []>} : vector<256x27xbf16>, vector<27x32xbf16>, vector<256x32xf32> -> vector<256x32xf32>
    %131 = arith.addf %115, %130 : vector<256x32xf32>
    %132 = vector.extract_strided_slice %1 {offsets = [8, 0, 0], sizes = [16, 24, 3], strides = [1, 1, 1]} : vector<24x24x3xbf16> to vector<16x24x3xbf16>
    %133 = vector.extract_strided_slice %132 {offsets = [0, 0, 0], sizes = [16, 16, 3], strides = [1, 1, 1]} : vector<16x24x3xbf16> to vector<16x16x3xbf16>
    %134 = vector.extract_strided_slice %132 {offsets = [0, 1, 0], sizes = [16, 16, 3], strides = [1, 1, 1]} : vector<16x24x3xbf16> to vector<16x16x3xbf16>
    %135 = vector.extract_strided_slice %132 {offsets = [0, 2, 0], sizes = [16, 16, 3], strides = [1, 1, 1]} : vector<16x24x3xbf16> to vector<16x16x3xbf16>
    %136 = vector.extract_strided_slice %132 {offsets = [0, 3, 0], sizes = [16, 16, 3], strides = [1, 1, 1]} : vector<16x24x3xbf16> to vector<16x16x3xbf16>
    %137 = vector.extract_strided_slice %132 {offsets = [0, 4, 0], sizes = [16, 16, 3], strides = [1, 1, 1]} : vector<16x24x3xbf16> to vector<16x16x3xbf16>
    %138 = vector.extract_strided_slice %132 {offsets = [0, 5, 0], sizes = [16, 16, 3], strides = [1, 1, 1]} : vector<16x24x3xbf16> to vector<16x16x3xbf16>
    %139 = vector.extract_strided_slice %132 {offsets = [0, 6, 0], sizes = [16, 16, 3], strides = [1, 1, 1]} : vector<16x24x3xbf16> to vector<16x16x3xbf16>
    %140 = vector.extract_strided_slice %132 {offsets = [0, 7, 0], sizes = [16, 16, 3], strides = [1, 1, 1]} : vector<16x24x3xbf16> to vector<16x16x3xbf16>
    %141 = vector.extract_strided_slice %132 {offsets = [0, 8, 0], sizes = [16, 16, 3], strides = [1, 1, 1]} : vector<16x24x3xbf16> to vector<16x16x3xbf16>
    %142 = tpu.concatenate %133, %134, %135, %136, %137, %138, %139, %140, %141 in 2 : vector<16x16x3xbf16>, vector<16x16x3xbf16>, vector<16x16x3xbf16>, vector<16x16x3xbf16>, vector<16x16x3xbf16>, vector<16x16x3xbf16>, vector<16x16x3xbf16>, vector<16x16x3xbf16>, vector<16x16x3xbf16> -> vector<16x16x27xbf16>
    %143 = vector.shape_cast %142 : vector<16x16x27xbf16> to vector<256x27xbf16>
    %144 = vector.extract_strided_slice %2 {offsets = [8, 0, 0], sizes = [1, 27, 32], strides = [1, 1, 1]} : vector<9x27x32xbf16> to vector<1x27x32xbf16>
    %145 = vector.shape_cast %144 : vector<1x27x32xbf16> to vector<27x32xbf16>
    %cst_14 = arith.constant dense<0.000000e+00> : vector<256x32xf32>
    %146 = tpu.matmul %143, %145, %cst_14 {dimension_numbers = #tpu.dot_dimension_numbers<[1], [0], [0], [1], [0, 0, 1, 1], [], []>} : vector<256x27xbf16>, vector<27x32xbf16>, vector<256x32xf32> -> vector<256x32xf32>
    %147 = arith.addf %131, %146 : vector<256x32xf32>
    %c0_15 = arith.constant 0 : index
    %c0_16 = arith.constant 0 : index
    %148 = vector.load %arg3[%c0_15, %c0_16] : memref<1x32xf32, #tpu.memory_space<vmem>>, vector<1x32xf32>
    %149 = vector.broadcast %148 : vector<1x32xf32> to vector<256x32xf32>
    %150 = arith.addf %147, %149 : vector<256x32xf32>
    %cst_17 = arith.constant 0.000000e+00 : f32
    %151 = vector.broadcast %cst_17 : f32 to vector<256x32xf32>
    %152 = arith.maximumf %150, %151 : vector<256x32xf32>
    %cst_18 = arith.constant 0.000000e+00 : f32
    %153 = vector.broadcast %cst_18 : f32 to vector<18x18x32xf32>
    %c0_19 = arith.constant 0 : index
    %c0_20 = arith.constant 0 : index
    %c0_21 = arith.constant 0 : index
    %154 = vector.load %arg13[%c0_19, %c0_20, %c0_21] : memref<18x18x32xf32, #tpu.memory_space<vmem>>, vector<18x18x32xf32>
    tpu.vector_store %arg13[%c0_19, %c0_20, %c0_21], %153 {strides = array<i32>} : memref<18x18x32xf32, #tpu.memory_space<vmem>>, vector<18x18x32xf32>,
    %c0_22 = arith.constant 0 : index
    %c0_23 = arith.constant 0 : index
    %c0_24 = arith.constant 0 : index
    %c0_25 = arith.constant 0 : index
    %155 = vector.load %arg4[%c0_22, %c0_23, %c0_24, %c0_25] : memref<2x3x96x32xbf16, #tpu.memory_space<vmem>>, vector<2x3x96x32xbf16>
    %c0_26 = arith.constant 0 : index
    %c0_27 = arith.constant 0 : index
    %156 = vector.load %arg5[%c0_26, %c0_27] : memref<2x32xf32, #tpu.memory_space<vmem>>, vector<2x32xf32>
    %c0_28 = arith.constant 0 : index
    %c0_29 = arith.constant 0 : index
    %157 = vector.load %arg6[%c0_28, %c0_29] : memref<32x2xf32, #tpu.memory_space<vmem>>, vector<32x2xf32>
    %c0_30 = arith.constant 0 : index
    %c0_31 = arith.constant 0 : index
    %158 = vector.load %arg7[%c0_30, %c0_31] : memref<1x2xf32, #tpu.memory_space<vmem>>, vector<1x2xf32>
    %c0_32 = arith.constant 0 : index
    %c0_33 = arith.constant 0 : index
    %159 = vector.load %arg8[%c0_32, %c0_33] : memref<2x32xf32, #tpu.memory_space<vmem>>, vector<2x32xf32>
    %c0_34 = arith.constant 0 : index
    %c0_35 = arith.constant 0 : index
    %160 = vector.load %arg9[%c0_34, %c0_35] : memref<1x32xf32, #tpu.memory_space<vmem>>, vector<1x32xf32>
    %cst_36 = arith.constant 3.906250e-03 : f32
    %161 = vector.broadcast %cst_36 : f32 to vector<1x256xf32>
    %c0_i32 = arith.constant 0 : i32
    %c4_i32 = arith.constant 4 : i32
    %162 = arith.addi %c0_i32, %c4_i32 : i32
    %c1_i32 = arith.constant 1 : i32
    %163 = scf.for %arg14 = %c0_i32 to %162 step %c1_i32 iter_args(%arg15 = %152) -> (vector<256x32xf32>)  : i32 {
      %211 = vector.extract_strided_slice %155 {offsets = [0, 0, 0, 0], sizes = [1, 3, 96, 32], strides = [1, 1, 1, 1]} : vector<2x3x96x32xbf16> to vector<1x3x96x32xbf16>
      %212 = vector.shape_cast %211 : vector<1x3x96x32xbf16> to vector<3x96x32xbf16>
      %213 = vector.extract_strided_slice %156 {offsets = [0, 0], sizes = [1, 32], strides = [1, 1]} : vector<2x32xf32> to vector<1x32xf32>
      %214 = vector.shape_cast %arg15 : vector<256x32xf32> to vector<16x16x32xf32>
      %c1_56 = arith.constant 1 : index
      %c1_57 = arith.constant 1 : index
      %c0_58 = arith.constant 0 : index
      %215 = vector.load %arg13[%c1_56, %c1_57, %c0_58] : memref<18x18x32xf32, #tpu.memory_space<vmem>>, vector<16x16x32xf32>
      tpu.vector_store %arg13[%c1_56, %c1_57, %c0_58], %214 {strides = array<i32>} : memref<18x18x32xf32, #tpu.memory_space<vmem>>, vector<16x16x32xf32>,
      %c0_59 = arith.constant 0 : index
      %c0_60 = arith.constant 0 : index
      %c0_61 = arith.constant 0 : index
      %216 = vector.load %arg13[%c0_59, %c0_60, %c0_61] : memref<18x18x32xf32, #tpu.memory_space<vmem>>, vector<18x18x32xf32>
      %217 = arith.truncf %216 : vector<18x18x32xf32> to vector<18x18x32xbf16>
      %cst_62 = arith.constant 0.000000e+00 : f32
      %218 = vector.broadcast %cst_62 : f32 to vector<256x32xf32>
      %219 = vector.extract_strided_slice %217 {offsets = [0, 0, 0], sizes = [16, 18, 32], strides = [1, 1, 1]} : vector<18x18x32xbf16> to vector<16x18x32xbf16>
      %220 = vector.extract_strided_slice %219 {offsets = [0, 0, 0], sizes = [16, 16, 32], strides = [1, 1, 1]} : vector<16x18x32xbf16> to vector<16x16x32xbf16>
      %221 = vector.extract_strided_slice %219 {offsets = [0, 1, 0], sizes = [16, 16, 32], strides = [1, 1, 1]} : vector<16x18x32xbf16> to vector<16x16x32xbf16>
      %222 = vector.extract_strided_slice %219 {offsets = [0, 2, 0], sizes = [16, 16, 32], strides = [1, 1, 1]} : vector<16x18x32xbf16> to vector<16x16x32xbf16>
      %223 = tpu.concatenate %220, %221, %222 in 2 : vector<16x16x32xbf16>, vector<16x16x32xbf16>, vector<16x16x32xbf16> -> vector<16x16x96xbf16>
      %224 = vector.shape_cast %223 : vector<16x16x96xbf16> to vector<256x96xbf16>
      %225 = vector.extract_strided_slice %212 {offsets = [0, 0, 0], sizes = [1, 96, 32], strides = [1, 1, 1]} : vector<3x96x32xbf16> to vector<1x96x32xbf16>
      %226 = vector.shape_cast %225 : vector<1x96x32xbf16> to vector<96x32xbf16>
      %cst_63 = arith.constant dense<0.000000e+00> : vector<256x32xf32>
      %227 = tpu.matmul %224, %226, %cst_63 {dimension_numbers = #tpu.dot_dimension_numbers<[1], [0], [0], [1], [0, 0, 1, 1], [], []>} : vector<256x96xbf16>, vector<96x32xbf16>, vector<256x32xf32> -> vector<256x32xf32>
      %228 = arith.addf %218, %227 : vector<256x32xf32>
      %229 = vector.extract_strided_slice %217 {offsets = [1, 0, 0], sizes = [16, 18, 32], strides = [1, 1, 1]} : vector<18x18x32xbf16> to vector<16x18x32xbf16>
      %230 = vector.extract_strided_slice %229 {offsets = [0, 0, 0], sizes = [16, 16, 32], strides = [1, 1, 1]} : vector<16x18x32xbf16> to vector<16x16x32xbf16>
      %231 = vector.extract_strided_slice %229 {offsets = [0, 1, 0], sizes = [16, 16, 32], strides = [1, 1, 1]} : vector<16x18x32xbf16> to vector<16x16x32xbf16>
      %232 = vector.extract_strided_slice %229 {offsets = [0, 2, 0], sizes = [16, 16, 32], strides = [1, 1, 1]} : vector<16x18x32xbf16> to vector<16x16x32xbf16>
      %233 = tpu.concatenate %230, %231, %232 in 2 : vector<16x16x32xbf16>, vector<16x16x32xbf16>, vector<16x16x32xbf16> -> vector<16x16x96xbf16>
      %234 = vector.shape_cast %233 : vector<16x16x96xbf16> to vector<256x96xbf16>
      %235 = vector.extract_strided_slice %212 {offsets = [1, 0, 0], sizes = [1, 96, 32], strides = [1, 1, 1]} : vector<3x96x32xbf16> to vector<1x96x32xbf16>
      %236 = vector.shape_cast %235 : vector<1x96x32xbf16> to vector<96x32xbf16>
      %cst_64 = arith.constant dense<0.000000e+00> : vector<256x32xf32>
      %237 = tpu.matmul %234, %236, %cst_64 {dimension_numbers = #tpu.dot_dimension_numbers<[1], [0], [0], [1], [0, 0, 1, 1], [], []>} : vector<256x96xbf16>, vector<96x32xbf16>, vector<256x32xf32> -> vector<256x32xf32>
      %238 = arith.addf %228, %237 : vector<256x32xf32>
      %239 = vector.extract_strided_slice %217 {offsets = [2, 0, 0], sizes = [16, 18, 32], strides = [1, 1, 1]} : vector<18x18x32xbf16> to vector<16x18x32xbf16>
      %240 = vector.extract_strided_slice %239 {offsets = [0, 0, 0], sizes = [16, 16, 32], strides = [1, 1, 1]} : vector<16x18x32xbf16> to vector<16x16x32xbf16>
      %241 = vector.extract_strided_slice %239 {offsets = [0, 1, 0], sizes = [16, 16, 32], strides = [1, 1, 1]} : vector<16x18x32xbf16> to vector<16x16x32xbf16>
      %242 = vector.extract_strided_slice %239 {offsets = [0, 2, 0], sizes = [16, 16, 32], strides = [1, 1, 1]} : vector<16x18x32xbf16> to vector<16x16x32xbf16>
      %243 = tpu.concatenate %240, %241, %242 in 2 : vector<16x16x32xbf16>, vector<16x16x32xbf16>, vector<16x16x32xbf16> -> vector<16x16x96xbf16>
      %244 = vector.shape_cast %243 : vector<16x16x96xbf16> to vector<256x96xbf16>
      %245 = vector.extract_strided_slice %212 {offsets = [2, 0, 0], sizes = [1, 96, 32], strides = [1, 1, 1]} : vector<3x96x32xbf16> to vector<1x96x32xbf16>
      %246 = vector.shape_cast %245 : vector<1x96x32xbf16> to vector<96x32xbf16>
      %cst_65 = arith.constant dense<0.000000e+00> : vector<256x32xf32>
      %247 = tpu.matmul %244, %246, %cst_65 {dimension_numbers = #tpu.dot_dimension_numbers<[1], [0], [0], [1], [0, 0, 1, 1], [], []>} : vector<256x96xbf16>, vector<96x32xbf16>, vector<256x32xf32> -> vector<256x32xf32>
      %248 = arith.addf %238, %247 : vector<256x32xf32>
      %249 = vector.broadcast %213 : vector<1x32xf32> to vector<256x32xf32>
      %250 = arith.addf %248, %249 : vector<256x32xf32>
      %cst_66 = arith.constant 0.000000e+00 : f32
      %251 = vector.broadcast %cst_66 : f32 to vector<256x32xf32>
      %252 = arith.maximumf %250, %251 : vector<256x32xf32>
      %253 = vector.extract_strided_slice %155 {offsets = [1, 0, 0, 0], sizes = [1, 3, 96, 32], strides = [1, 1, 1, 1]} : vector<2x3x96x32xbf16> to vector<1x3x96x32xbf16>
      %254 = vector.shape_cast %253 : vector<1x3x96x32xbf16> to vector<3x96x32xbf16>
      %255 = vector.extract_strided_slice %156 {offsets = [1, 0], sizes = [1, 32], strides = [1, 1]} : vector<2x32xf32> to vector<1x32xf32>
      %256 = vector.shape_cast %252 : vector<256x32xf32> to vector<16x16x32xf32>
      %c1_67 = arith.constant 1 : index
      %c1_68 = arith.constant 1 : index
      %c0_69 = arith.constant 0 : index
      %257 = vector.load %arg13[%c1_67, %c1_68, %c0_69] : memref<18x18x32xf32, #tpu.memory_space<vmem>>, vector<16x16x32xf32>
      tpu.vector_store %arg13[%c1_67, %c1_68, %c0_69], %256 {strides = array<i32>} : memref<18x18x32xf32, #tpu.memory_space<vmem>>, vector<16x16x32xf32>,
      %c0_70 = arith.constant 0 : index
      %c0_71 = arith.constant 0 : index
      %c0_72 = arith.constant 0 : index
      %258 = vector.load %arg13[%c0_70, %c0_71, %c0_72] : memref<18x18x32xf32, #tpu.memory_space<vmem>>, vector<18x18x32xf32>
      %259 = arith.truncf %258 : vector<18x18x32xf32> to vector<18x18x32xbf16>
      %cst_73 = arith.constant 0.000000e+00 : f32
      %260 = vector.broadcast %cst_73 : f32 to vector<256x32xf32>
      %261 = vector.extract_strided_slice %259 {offsets = [0, 0, 0], sizes = [16, 18, 32], strides = [1, 1, 1]} : vector<18x18x32xbf16> to vector<16x18x32xbf16>
      %262 = vector.extract_strided_slice %261 {offsets = [0, 0, 0], sizes = [16, 16, 32], strides = [1, 1, 1]} : vector<16x18x32xbf16> to vector<16x16x32xbf16>
      %263 = vector.extract_strided_slice %261 {offsets = [0, 1, 0], sizes = [16, 16, 32], strides = [1, 1, 1]} : vector<16x18x32xbf16> to vector<16x16x32xbf16>
      %264 = vector.extract_strided_slice %261 {offsets = [0, 2, 0], sizes = [16, 16, 32], strides = [1, 1, 1]} : vector<16x18x32xbf16> to vector<16x16x32xbf16>
      %265 = tpu.concatenate %262, %263, %264 in 2 : vector<16x16x32xbf16>, vector<16x16x32xbf16>, vector<16x16x32xbf16> -> vector<16x16x96xbf16>
      %266 = vector.shape_cast %265 : vector<16x16x96xbf16> to vector<256x96xbf16>
      %267 = vector.extract_strided_slice %254 {offsets = [0, 0, 0], sizes = [1, 96, 32], strides = [1, 1, 1]} : vector<3x96x32xbf16> to vector<1x96x32xbf16>
      %268 = vector.shape_cast %267 : vector<1x96x32xbf16> to vector<96x32xbf16>
      %cst_74 = arith.constant dense<0.000000e+00> : vector<256x32xf32>
      %269 = tpu.matmul %266, %268, %cst_74 {dimension_numbers = #tpu.dot_dimension_numbers<[1], [0], [0], [1], [0, 0, 1, 1], [], []>} : vector<256x96xbf16>, vector<96x32xbf16>, vector<256x32xf32> -> vector<256x32xf32>
      %270 = arith.addf %260, %269 : vector<256x32xf32>
      %271 = vector.extract_strided_slice %259 {offsets = [1, 0, 0], sizes = [16, 18, 32], strides = [1, 1, 1]} : vector<18x18x32xbf16> to vector<16x18x32xbf16>
      %272 = vector.extract_strided_slice %271 {offsets = [0, 0, 0], sizes = [16, 16, 32], strides = [1, 1, 1]} : vector<16x18x32xbf16> to vector<16x16x32xbf16>
      %273 = vector.extract_strided_slice %271 {offsets = [0, 1, 0], sizes = [16, 16, 32], strides = [1, 1, 1]} : vector<16x18x32xbf16> to vector<16x16x32xbf16>
      %274 = vector.extract_strided_slice %271 {offsets = [0, 2, 0], sizes = [16, 16, 32], strides = [1, 1, 1]} : vector<16x18x32xbf16> to vector<16x16x32xbf16>
      %275 = tpu.concatenate %272, %273, %274 in 2 : vector<16x16x32xbf16>, vector<16x16x32xbf16>, vector<16x16x32xbf16> -> vector<16x16x96xbf16>
      %276 = vector.shape_cast %275 : vector<16x16x96xbf16> to vector<256x96xbf16>
      %277 = vector.extract_strided_slice %254 {offsets = [1, 0, 0], sizes = [1, 96, 32], strides = [1, 1, 1]} : vector<3x96x32xbf16> to vector<1x96x32xbf16>
      %278 = vector.shape_cast %277 : vector<1x96x32xbf16> to vector<96x32xbf16>
      %cst_75 = arith.constant dense<0.000000e+00> : vector<256x32xf32>
      %279 = tpu.matmul %276, %278, %cst_75 {dimension_numbers = #tpu.dot_dimension_numbers<[1], [0], [0], [1], [0, 0, 1, 1], [], []>} : vector<256x96xbf16>, vector<96x32xbf16>, vector<256x32xf32> -> vector<256x32xf32>
      %280 = arith.addf %270, %279 : vector<256x32xf32>
      %281 = vector.extract_strided_slice %259 {offsets = [2, 0, 0], sizes = [16, 18, 32], strides = [1, 1, 1]} : vector<18x18x32xbf16> to vector<16x18x32xbf16>
      %282 = vector.extract_strided_slice %281 {offsets = [0, 0, 0], sizes = [16, 16, 32], strides = [1, 1, 1]} : vector<16x18x32xbf16> to vector<16x16x32xbf16>
      %283 = vector.extract_strided_slice %281 {offsets = [0, 1, 0], sizes = [16, 16, 32], strides = [1, 1, 1]} : vector<16x18x32xbf16> to vector<16x16x32xbf16>
      %284 = vector.extract_strided_slice %281 {offsets = [0, 2, 0], sizes = [16, 16, 32], strides = [1, 1, 1]} : vector<16x18x32xbf16> to vector<16x16x32xbf16>
      %285 = tpu.concatenate %282, %283, %284 in 2 : vector<16x16x32xbf16>, vector<16x16x32xbf16>, vector<16x16x32xbf16> -> vector<16x16x96xbf16>
      %286 = vector.shape_cast %285 : vector<16x16x96xbf16> to vector<256x96xbf16>
      %287 = vector.extract_strided_slice %254 {offsets = [2, 0, 0], sizes = [1, 96, 32], strides = [1, 1, 1]} : vector<3x96x32xbf16> to vector<1x96x32xbf16>
      %288 = vector.shape_cast %287 : vector<1x96x32xbf16> to vector<96x32xbf16>
      %cst_76 = arith.constant dense<0.000000e+00> : vector<256x32xf32>
      %289 = tpu.matmul %286, %288, %cst_76 {dimension_numbers = #tpu.dot_dimension_numbers<[1], [0], [0], [1], [0, 0, 1, 1], [], []>} : vector<256x96xbf16>, vector<96x32xbf16>, vector<256x32xf32> -> vector<256x32xf32>
      %290 = arith.addf %280, %289 : vector<256x32xf32>
      %291 = vector.broadcast %255 : vector<1x32xf32> to vector<256x32xf32>
      %292 = arith.addf %290, %291 : vector<256x32xf32>
      %cst_77 = arith.constant dense<0.000000e+00> : vector<1x32xf32>
      %293 = tpu.matmul %161, %292, %cst_77 {dimension_numbers = #tpu.dot_dimension_numbers<[1], [0], [0], [1], [0, 0, 1, 1], [], []>} : vector<1x256xf32>, vector<256x32xf32>, vector<1x32xf32> -> vector<1x32xf32>
      %cst_78 = arith.constant dense<0.000000e+00> : vector<1x2xf32>
      %294 = tpu.matmul %293, %157, %cst_78 {dimension_numbers = #tpu.dot_dimension_numbers<[1], [0], [0], [1], [0, 0, 1, 1], [], []>} : vector<1x32xf32>, vector<32x2xf32>, vector<1x2xf32> -> vector<1x2xf32>
      %295 = arith.addf %294, %158 : vector<1x2xf32>
      %cst_79 = arith.constant 0.000000e+00 : f32
      %296 = vector.broadcast %cst_79 : f32 to vector<1x2xf32>
      %297 = arith.maximumf %295, %296 : vector<1x2xf32>
      %cst_80 = arith.constant dense<0.000000e+00> : vector<1x32xf32>
      %298 = tpu.matmul %297, %159, %cst_80 {dimension_numbers = #tpu.dot_dimension_numbers<[1], [0], [0], [1], [0, 0, 1, 1], [], []>} : vector<1x2xf32>, vector<2x32xf32>, vector<1x32xf32> -> vector<1x32xf32>
      %299 = arith.addf %298, %160 : vector<1x32xf32>
      %cst_81 = arith.constant 0.000000e+00 : f32
      %300 = vector.broadcast %cst_81 : f32 to vector<1x32xf32>
      %301 = arith.subf %300, %299 : vector<1x32xf32>
      %302 = math.exp %301 : vector<1x32xf32>
      %cst_82 = arith.constant 1.000000e+00 : f32
      %303 = vector.broadcast %cst_82 : f32 to vector<1x32xf32>
      %304 = arith.addf %303, %302 : vector<1x32xf32>
      %cst_83 = arith.constant 1.000000e+00 : f32
      %305 = vector.broadcast %cst_83 : f32 to vector<1x32xf32>
      %306 = arith.divf %305, %304 : vector<1x32xf32>
      %307 = vector.broadcast %306 : vector<1x32xf32> to vector<256x32xf32>
      %308 = arith.mulf %292, %307 : vector<256x32xf32>
      %309 = arith.addf %308, %arg15 : vector<256x32xf32>
      scf.yield %309 : vector<256x32xf32>
    }
    %c0_37 = arith.constant 0 : index
    %c0_38 = arith.constant 0 : index
    %c0_39 = arith.constant 0 : index
    %164 = vector.load %arg10[%c0_37, %c0_38, %c0_39] : memref<3x96x48xbf16, #tpu.memory_space<vmem>>, vector<3x96x48xbf16>
    %c0_40 = arith.constant 0 : index
    %c0_41 = arith.constant 0 : index
    %165 = vector.load %arg11[%c0_40, %c0_41] : memref<1x48xf32, #tpu.memory_space<vmem>>, vector<1x48xf32>
    %166 = vector.shape_cast %163 : vector<256x32xf32> to vector<16x16x32xf32>
    %c1 = arith.constant 1 : index
    %c1_42 = arith.constant 1 : index
    %c0_43 = arith.constant 0 : index
    %167 = vector.load %arg13[%c1, %c1_42, %c0_43] : memref<18x18x32xf32, #tpu.memory_space<vmem>>, vector<16x16x32xf32>
    tpu.vector_store %arg13[%c1, %c1_42, %c0_43], %166 {strides = array<i32>} : memref<18x18x32xf32, #tpu.memory_space<vmem>>, vector<16x16x32xf32>,
    %c0_44 = arith.constant 0 : index
    %c0_45 = arith.constant 0 : index
    %c0_46 = arith.constant 0 : index
    %168 = vector.load %arg13[%c0_44, %c0_45, %c0_46] : memref<18x18x32xf32, #tpu.memory_space<vmem>>, vector<18x18x32xf32>
    %169 = arith.truncf %168 : vector<18x18x32xf32> to vector<18x18x32xbf16>
    %cst_47 = arith.constant 0.000000e+00 : f32
    %170 = vector.broadcast %cst_47 : f32 to vector<256x48xf32>
    %171 = vector.extract_strided_slice %169 {offsets = [0, 0, 0], sizes = [16, 18, 32], strides = [1, 1, 1]} : vector<18x18x32xbf16> to vector<16x18x32xbf16>
    %172 = vector.extract_strided_slice %171 {offsets = [0, 0, 0], sizes = [16, 16, 32], strides = [1, 1, 1]} : vector<16x18x32xbf16> to vector<16x16x32xbf16>
    %173 = vector.extract_strided_slice %171 {offsets = [0, 1, 0], sizes = [16, 16, 32], strides = [1, 1, 1]} : vector<16x18x32xbf16> to vector<16x16x32xbf16>
    %174 = vector.extract_strided_slice %171 {offsets = [0, 2, 0], sizes = [16, 16, 32], strides = [1, 1, 1]} : vector<16x18x32xbf16> to vector<16x16x32xbf16>
    %175 = tpu.concatenate %172, %173, %174 in 2 : vector<16x16x32xbf16>, vector<16x16x32xbf16>, vector<16x16x32xbf16> -> vector<16x16x96xbf16>
    %176 = vector.shape_cast %175 : vector<16x16x96xbf16> to vector<256x96xbf16>
    %177 = vector.extract_strided_slice %164 {offsets = [0, 0, 0], sizes = [1, 96, 48], strides = [1, 1, 1]} : vector<3x96x48xbf16> to vector<1x96x48xbf16>
    %178 = vector.shape_cast %177 : vector<1x96x48xbf16> to vector<96x48xbf16>
    %cst_48 = arith.constant dense<0.000000e+00> : vector<256x48xf32>
    %179 = tpu.matmul %176, %178, %cst_48 {dimension_numbers = #tpu.dot_dimension_numbers<[1], [0], [0], [1], [0, 0, 1, 1], [], []>} : vector<256x96xbf16>, vector<96x48xbf16>, vector<256x48xf32> -> vector<256x48xf32>
    %180 = arith.addf %170, %179 : vector<256x48xf32>
    %181 = vector.extract_strided_slice %169 {offsets = [1, 0, 0], sizes = [16, 18, 32], strides = [1, 1, 1]} : vector<18x18x32xbf16> to vector<16x18x32xbf16>
    %182 = vector.extract_strided_slice %181 {offsets = [0, 0, 0], sizes = [16, 16, 32], strides = [1, 1, 1]} : vector<16x18x32xbf16> to vector<16x16x32xbf16>
    %183 = vector.extract_strided_slice %181 {offsets = [0, 1, 0], sizes = [16, 16, 32], strides = [1, 1, 1]} : vector<16x18x32xbf16> to vector<16x16x32xbf16>
    %184 = vector.extract_strided_slice %181 {offsets = [0, 2, 0], sizes = [16, 16, 32], strides = [1, 1, 1]} : vector<16x18x32xbf16> to vector<16x16x32xbf16>
    %185 = tpu.concatenate %182, %183, %184 in 2 : vector<16x16x32xbf16>, vector<16x16x32xbf16>, vector<16x16x32xbf16> -> vector<16x16x96xbf16>
    %186 = vector.shape_cast %185 : vector<16x16x96xbf16> to vector<256x96xbf16>
    %187 = vector.extract_strided_slice %164 {offsets = [1, 0, 0], sizes = [1, 96, 48], strides = [1, 1, 1]} : vector<3x96x48xbf16> to vector<1x96x48xbf16>
    %188 = vector.shape_cast %187 : vector<1x96x48xbf16> to vector<96x48xbf16>
    %cst_49 = arith.constant dense<0.000000e+00> : vector<256x48xf32>
    %189 = tpu.matmul %186, %188, %cst_49 {dimension_numbers = #tpu.dot_dimension_numbers<[1], [0], [0], [1], [0, 0, 1, 1], [], []>} : vector<256x96xbf16>, vector<96x48xbf16>, vector<256x48xf32> -> vector<256x48xf32>
    %190 = arith.addf %180, %189 : vector<256x48xf32>
    %191 = vector.extract_strided_slice %169 {offsets = [2, 0, 0], sizes = [16, 18, 32], strides = [1, 1, 1]} : vector<18x18x32xbf16> to vector<16x18x32xbf16>
    %192 = vector.extract_strided_slice %191 {offsets = [0, 0, 0], sizes = [16, 16, 32], strides = [1, 1, 1]} : vector<16x18x32xbf16> to vector<16x16x32xbf16>
    %193 = vector.extract_strided_slice %191 {offsets = [0, 1, 0], sizes = [16, 16, 32], strides = [1, 1, 1]} : vector<16x18x32xbf16> to vector<16x16x32xbf16>
    %194 = vector.extract_strided_slice %191 {offsets = [0, 2, 0], sizes = [16, 16, 32], strides = [1, 1, 1]} : vector<16x18x32xbf16> to vector<16x16x32xbf16>
    %195 = tpu.concatenate %192, %193, %194 in 2 : vector<16x16x32xbf16>, vector<16x16x32xbf16>, vector<16x16x32xbf16> -> vector<16x16x96xbf16>
    %196 = vector.shape_cast %195 : vector<16x16x96xbf16> to vector<256x96xbf16>
    %197 = vector.extract_strided_slice %164 {offsets = [2, 0, 0], sizes = [1, 96, 48], strides = [1, 1, 1]} : vector<3x96x48xbf16> to vector<1x96x48xbf16>
    %198 = vector.shape_cast %197 : vector<1x96x48xbf16> to vector<96x48xbf16>
    %cst_50 = arith.constant dense<0.000000e+00> : vector<256x48xf32>
    %199 = tpu.matmul %196, %198, %cst_50 {dimension_numbers = #tpu.dot_dimension_numbers<[1], [0], [0], [1], [0, 0, 1, 1], [], []>} : vector<256x96xbf16>, vector<96x48xbf16>, vector<256x48xf32> -> vector<256x48xf32>
    %200 = arith.addf %190, %199 : vector<256x48xf32>
    %201 = vector.broadcast %165 : vector<1x48xf32> to vector<256x48xf32>
    %202 = arith.addf %200, %201 : vector<256x48xf32>
    %cst_51 = arith.constant 0.000000e+00 : f32
    %cst_52 = arith.constant 1.000000e+00 : f32
    %203 = vector.broadcast %cst_51 : f32 to vector<256x48xf32>
    %204 = arith.maximumf %203, %202 : vector<256x48xf32>
    %205 = vector.broadcast %cst_52 : f32 to vector<256x48xf32>
    %206 = arith.minimumf %205, %204 : vector<256x48xf32>
    %207 = tpu.transpose %206, [1, 0] : vector<256x48xf32> -> vector<48x256xf32>
    %c0_53 = arith.constant 0 : index
    %c0_54 = arith.constant 0 : index
    %c0_55 = arith.constant 0 : index
    %208 = vector.load %arg12[%c0_53, %c0_54, %c0_55] : memref<1x48x256xf32, #tpu.memory_space<vmem>>, vector<1x48x256xf32>
    %209 = vector.shape_cast %208 : vector<1x48x256xf32> to vector<48x256xf32>
    %210 = vector.shape_cast %207 : vector<48x256xf32> to vector<1x48x256xf32>
    tpu.vector_store %arg12[%c0_53, %c0_54, %c0_55], %210 {strides = array<i32>} : memref<1x48x256xf32, #tpu.memory_space<vmem>>, vector<1x48x256xf32>,
    return
  }
  func.func @transform_0(%arg0: i32) -> (i32, i32, i32, i32) {
    %c0_i32 = arith.constant 0 : i32
    %c0_i32_0 = arith.constant 0 : i32
    %c0_i32_1 = arith.constant 0 : i32
    %c0_i32_2 = arith.constant 0 : i32
    return %arg0, %c0_i32, %c0_i32_0, %c0_i32_1 : i32, i32, i32, i32
  }
  func.func @transform_1(%arg0: i32) -> (i32, i32, i32) {
    %c0_i32 = arith.constant 0 : i32
    %c0_i32_0 = arith.constant 0 : i32
    %c0_i32_1 = arith.constant 0 : i32
    %c0_i32_2 = arith.constant 0 : i32
    return %c0_i32, %c0_i32_0, %c0_i32_1 : i32, i32, i32
  }
  func.func @transform_2(%arg0: i32) -> (i32, i32) {
    %c0_i32 = arith.constant 0 : i32
    %c0_i32_0 = arith.constant 0 : i32
    %c0_i32_1 = arith.constant 0 : i32
    return %c0_i32, %c0_i32_0 : i32, i32
  }
  func.func @transform_3(%arg0: i32) -> (i32, i32, i32, i32) {
    %c0_i32 = arith.constant 0 : i32
    %c0_i32_0 = arith.constant 0 : i32
    %c0_i32_1 = arith.constant 0 : i32
    %c0_i32_2 = arith.constant 0 : i32
    %c0_i32_3 = arith.constant 0 : i32
    return %c0_i32, %c0_i32_0, %c0_i32_1, %c0_i32_2 : i32, i32, i32, i32
  }
  func.func @transform_4(%arg0: i32) -> (i32, i32) {
    %c0_i32 = arith.constant 0 : i32
    %c0_i32_0 = arith.constant 0 : i32
    %c0_i32_1 = arith.constant 0 : i32
    return %c0_i32, %c0_i32_0 : i32, i32
  }
  func.func @transform_5(%arg0: i32) -> (i32, i32) {
    %c0_i32 = arith.constant 0 : i32
    %c0_i32_0 = arith.constant 0 : i32
    %c0_i32_1 = arith.constant 0 : i32
    return %c0_i32, %c0_i32_0 : i32, i32
  }
  func.func @transform_6(%arg0: i32) -> (i32, i32) {
    %c0_i32 = arith.constant 0 : i32
    %c0_i32_0 = arith.constant 0 : i32
    %c0_i32_1 = arith.constant 0 : i32
    return %c0_i32, %c0_i32_0 : i32, i32
  }
  func.func @transform_7(%arg0: i32) -> (i32, i32) {
    %c0_i32 = arith.constant 0 : i32
    %c0_i32_0 = arith.constant 0 : i32
    %c0_i32_1 = arith.constant 0 : i32
    return %c0_i32, %c0_i32_0 : i32, i32
  }
  func.func @transform_8(%arg0: i32) -> (i32, i32) {
    %c0_i32 = arith.constant 0 : i32
    %c0_i32_0 = arith.constant 0 : i32
    %c0_i32_1 = arith.constant 0 : i32
    return %c0_i32, %c0_i32_0 : i32, i32
  }
  func.func @transform_9(%arg0: i32) -> (i32, i32, i32) {
    %c0_i32 = arith.constant 0 : i32
    %c0_i32_0 = arith.constant 0 : i32
    %c0_i32_1 = arith.constant 0 : i32
    %c0_i32_2 = arith.constant 0 : i32
    return %c0_i32, %c0_i32_0, %c0_i32_1 : i32, i32, i32
  }
  func.func @transform_10(%arg0: i32) -> (i32, i32) {
    %c0_i32 = arith.constant 0 : i32
    %c0_i32_0 = arith.constant 0 : i32
    %c0_i32_1 = arith.constant 0 : i32
    return %c0_i32, %c0_i32_0 : i32, i32
  }
  func.func @transform_11(%arg0: i32) -> (i32, i32, i32) {
    %c0_i32 = arith.constant 0 : i32
    %c0_i32_0 = arith.constant 0 : i32
    %c0_i32_1 = arith.constant 0 : i32
    return %arg0, %c0_i32, %c0_i32_0 : i32, i32, i32
  }
}

</mosaic_0001>

<bundles_post_ra>
// kernel: lite_rcan_forward.1
= control target key start
LH: loop header
LB: loop body
LE: loop exit
PB: predicated region body
PF: predicated region fallthrough
CT: control target
= control target key end

     0   :  { %16 = vsyncpa [#allocation4], 0  ;;  %s17522_s0 = inlined_call_operand.vmem [shape: bf16[2,24,24,3], index: 0, kind: input, shape index: {}]   ;;  %s17523_s1 = inlined_call_operand.vmem [shape: bf16[9,27,32], index: 1, kind: input, shape index: {}]   ;;  %s17524_s2 = inlined_call_operand.hbm [shape: f32[1,32], index: 2, kind: input, shape index: {}]   ;;  %s17525_s3 = inlined_call_operand.vmem [shape: bf16[2,3,96,32], index: 3, kind: input, shape index: {}]   ;;  %s17526_s4 = inlined_call_operand.vmem [shape: f32[2,32], index: 4, kind: input, shape index: {}]   ;;  %s17527_s5 = inlined_call_operand.vmem [shape: f32[32,2], index: 5, kind: input, shape index: {}]   ;;  %s17528_s6 = inlined_call_operand.hbm [shape: f32[1,2], index: 6, kind: input, shape index: {}]   ;;  %s17529_s7 = inlined_call_operand.hbm [shape: f32[2,32], index: 7, kind: input, shape index: {}]   ;;  %s17530_s8 = inlined_call_operand.hbm [shape: f32[1,32], index: 8, kind: input, shape index: {}]   ;;  %s17531_s9 = inlined_call_operand.vmem [shape: bf16[3,96,48], index: 9, kind: input, shape index: {}]   ;;  %s17532_s10 = inlined_call_operand.hbm [shape: f32[1,48], index: 10, kind: input, shape index: {}]   ;;  %s17533_s11 = inlined_call_operand.vmem [shape: f32[2,48,256], index: 11, kind: output, shape index: {}]  }
   0x1   :  { %17 = vsyncpa [#allocation6], 0 }
   0x2   :  { %18 = vsyncpa [#allocation9], 0  ;;  %s11791_s17 = smov 0  }
   0x3 LB: > { %s11709_s18 = smov [#allocation5]   ;;  %s11797_s20 = sadd.s32 4294967295, %s11575_s17   ;;  %s11575_s17 = sphi %s11791_s17, %s24_s17  }
   0x4   : > { %s327_s19 = sshll.u32 %s11709_s18, 4  ;;  %p9233_p0 = scmp.ge.s32.totalorder %s11575_s17, 1  ;;  %s328_s19 = int_to_ptr.vmem [resolvable:$true] %s327_s19 }
   0x5   : > { %p291_p1 = scmp.lt.s32.totalorder %s11575_s17, 3  ;;  %p10879_p2 = scmp.eq.s32.totalorder %s11797_s20, 0 }
   0x6   : > { %s11710_s22 = smov [#allocation8]   ;;  %s11711_s24 = smov [#allocation3]  }
   0x7   : > { %p11802_p3 = pnand %p9233_p0, %p291_p1  ;;  %s349_s23 = sshll.u32 %s11710_s22, 4  ;;  %s11808_s23 = int_to_ptr.vmem [resolvable:$true] %s349_s23 }
   0x8   : > { %s307_s25 = sshll.u32 %s11711_s24, 4  ;;  %s11712_s27 = smov [#allocation7]   ;;  %s11816_s25 = int_to_ptr.vmem [resolvable:$true] %s307_s25 }
   0x9   : > { %p10863_p4 = pneg %p11802_p3  ;;  %s338_s28 = sshll.u32 %s11712_s27, 4  ;;  %s11818_s28 = int_to_ptr.vmem [resolvable:$true] %s338_s28 }
   0xa   : > { %s11306_s30 = scalar_lea.vmem %s328_s19, 16  ;;  %s11313_s12 = scalar_lea.vmem %s328_s19, 32 }
   0xb   : > { %p11812_p5 = pnand %p10879_p2, %p10863_p4  ;;  %p11307_p7 = scmp.ne.s32.totalorder %s328_s19, %s11306_s30 }
   0xc   : > { %p11314_p10 = scmp.lt.s32.totalorder %s328_s19, %s328_s19  ;;  %p11315_p11 = scmp.lt.s32.totalorder %s11313_s12, %s11306_s30 }
   0xd   : > { %p11822_p6 = pneg %p11812_p5 }
   0xe   : > { %p11316_p12 = por %p11315_p11, %p11314_p10 }
   0xf   : > { %p11309_p8 = pnand %p11307_p7, %p11822_p6 }
  0x11   : > { %p11310_p9 = pneg %p11309_p8 }
  0x13   : > { %p11317_p13 = pnand %p11316_p12, %p11310_p9 }
  0x15   : > { %11320 = shalt.err (!%p11317_p13)
}
  0x16   : > { %10869 = dma.hbm_to_vmem [thread:$0]  (!%p11812_p5), %s17528_s6, 16, %s328_s19, [#allocation6]  }
  0x17   : > { %s11332_s15 = scalar_lea.vmem %s11808_s23, 16  ;;  %s11339_s16 = scalar_lea.vmem %s11808_s23, 32 }
  0x18   : > { %p11333_p0 = scmp.ne.s32.totalorder %s11808_s23, %s11332_s15  ;;  %p11340_p7 = scmp.lt.s32.totalorder %s11808_s23, %s11808_s23 }
  0x19   : > { %p11341_p8 = scmp.lt.s32.totalorder %s11339_s16, %s11332_s15 }
  0x1a   : > { %p11335_p1 = pnand %p11333_p0, %p11822_p6 }
  0x1b   : > { %p11342_p9 = por %p11341_p8, %p11340_p7 }
  0x1c   : > { %p11336_p4 = pneg %p11335_p1 }
  0x1e   : > { %p11343_p10 = pnand %p11342_p9, %p11336_p4 }
  0x20   : > { %11346 = shalt.err (!%p11343_p10)
}
  0x21   : > { %10875 = dma.hbm_to_vmem [thread:$0]  (!%p11812_p5), %s17530_s8, 16, %s11808_s23, [#allocation9]  }
  0x22   : > { %s11358_s19 = scalar_lea.vmem %s11816_s25, 16  ;;  %s11365_s24 = scalar_lea.vmem %s11816_s25, 32 }
  0x23   : > { %p11359_p11 = scmp.ne.s32.totalorder %s11816_s25, %s11358_s19  ;;  %p11366_p0 = scmp.lt.s32.totalorder %s11816_s25, %s11816_s25 }
  0x24   : > { %p11367_p1 = scmp.lt.s32.totalorder %s11365_s24, %s11358_s19 }
  0x25   : > { %p11361_p12 = pnand %p11359_p11, %p11822_p6 }
  0x26   : > { %p11368_p4 = por %p11367_p1, %p11366_p0 }
  0x27   : > { %p11362_p13 = pneg %p11361_p12 }
  0x29   : > { %p11369_p7 = pnand %p11368_p4, %p11362_p13 }
  0x2b   : > { %11372 = shalt.err (!%p11369_p7)
}
  0x2c   : > { %10866 = dma.hbm_to_vmem [thread:$0]  (!%p11812_p5), %s17524_s2, 16, %s11816_s25, [#allocation4]  }
  0x2d   : > { %s11384_s23 = scalar_lea.vmem %s11818_s28, 32  ;;  %p11392_p11 = scmp.lt.s32.totalorder %s11818_s28, %s11818_s28 }
  0x2e   : > { %p11385_p8 = scmp.ne.s32.totalorder %s11818_s28, %s11384_s23  ;;  %p11393_p12 = scmp.lt.s32.totalorder %s11384_s23, %s11384_s23 }
  0x30   : > { %p11387_p9 = pnand %p11385_p8, %p11822_p6  ;;  %p11394_p13 = por %p11393_p12, %p11392_p11 }
  0x32   : > { %p11388_p10 = pneg %p11387_p9 }
  0x34   : > { %p11395_p0 = pnand %p11394_p13, %p11388_p10 }
  0x36   : > { %11398 = shalt.err (!%p11395_p0)
}
  0x37   : > { %10872 = dma.hbm_to_vmem [thread:$0]  (!%p11812_p5), %s17529_s7, 32, %s11818_s28, [#allocation6]  }
  0x38   : > { %s11713_s25 = smov [#allocation10]  }
  0x39   : > { %s363_s14 = sshll.u32 %s11713_s25, 4  ;;  %s364_s14 = int_to_ptr.vmem [resolvable:$true] %s363_s14 }
  0x3a   : > { %s11410_s15 = scalar_lea.vmem %s364_s14, 16  ;;  %s11417_s16 = scalar_lea.vmem %s364_s14, 32 }
  0x3b   : > { %p11411_p1 = scmp.ne.s32.totalorder %s364_s14, %s11410_s15  ;;  %p11418_p8 = scmp.lt.s32.totalorder %s364_s14, %s364_s14 }
  0x3c   : > { %p11419_p9 = scmp.lt.s32.totalorder %s11417_s16, %s11410_s15 }
  0x3d   : > { %p11413_p4 = pnand %p11411_p1, %p11822_p6 }
  0x3e   : > { %p11420_p10 = por %p11419_p9, %p11418_p8 }
  0x3f   : > { %p11414_p7 = pneg %p11413_p4 }
  0x41   : > { %p11421_p11 = pnand %p11420_p10, %p11414_p7 }
  0x43   : > { %11424 = shalt.err (!%p11421_p11)
}
  0x44   : > { %10878 = dma.hbm_to_vmem [thread:$0]  (!%p11812_p5), %s17532_s10, 16, %s364_s14, [#allocation9]  }
  0x45   : > { %384 = sbr.rel (%p11802_p3) target bundleno = 3153 (0xc51), region = 64 }
  0x4a   : > { %11562 = dma.done.wait (%p10879_p2), [#allocation4], 16  }
  0x4b   : > { %11564 = vsyncadd (%p10879_p2), [#allocation4], 4294967280 }
  0x4c   : > { %11566 = dma.done.wait (%p10879_p2), [#allocation6], 48  }
  0x4d   : > { %11568 = vsyncadd (%p10879_p2), [#allocation6], 4294967248 }
  0x4e   : > { %11570 = dma.done.wait (%p10879_p2), [#allocation9], 32  }
  0x4f   : > { %11572 = vsyncadd (%p10879_p2), [#allocation9], 4294967264  ;;  %vm17549_vm0 = vcmask 261120   ;;  %vm4540_vm1 = vcmask 254976   ;;  %p440_p3 = scmp.lt.s32.totalorder %s11797_s20, 1  ;;  %v11714_v0 = vmov 0.0  }
  0x50   : > { %4538 = vst.msk [vmem:[#allocation2] sm:$0xff] %vm17549_vm0, %v11714_v0  ;;  %4539 = vst.msk [vmem:[#allocation2 + $0x8] sm:$0xff] %vm17549_vm0, %v11714_v0  ;;  %v11957_v1 = vld [vmem:[%s17525_s3] sm:$0xf]  ;;  %v11962_v2 = vld [vmem:[%s17525_s3 + $0x4] sm:$0xf] }
  0x51   : > { %4541 = vst.msk [vmem:[#allocation2 + $0x10] sm:$0x3] %vm4540_vm1, %v11714_v0  ;;  %4544 = vst.msk [vmem:[#allocation2 + $0x28] sm:$0x3] %vm4540_vm1, %v11714_v0  ;;  %s18206_s20 = smov (!%p440_p3, %s11797_s20), 1  ;;  %vm912_vm3 = vcmask 1046528  }
  0x52   : > { %4542 = vst.msk [vmem:[#allocation2 + $0x18] sm:$0xff] %vm17549_vm0, %v11714_v0  ;;  %4543 = vst.msk [vmem:[#allocation2 + $0x20] sm:$0xff] %vm17549_vm0, %v11714_v0  ;;  %s10842_s21 = smul.u32 96, %s18206_s20  ;;  %v11967_v3 = vld [vmem:[%s17525_s3 + $0x8] sm:$0xf]  ;;  %vm1170_vm4 = vcmask 1045504  }
  0x53   : > { %4545 = vst.msk [vmem:[#allocation2 + $0x30] sm:$0xff] %vm17549_vm0, %v11714_v0  ;;  %4546 = vst.msk [vmem:[#allocation2 + $0x38] sm:$0xff] %vm17549_vm0, %v11714_v0  ;;  %s10841_s26 = smul.u32 288, %s18206_s20  ;;  %v11977_v4 = vld [vmem:[%s17525_s3 + $0xc] sm:$0xf]  ;;  %s11715_s12 = smov 6  }
  0x54   : > { %4547 = vst.msk [vmem:[#allocation2 + $0x40] sm:$0x3] %vm4540_vm1, %v11714_v0  ;;  %4550 = vst.msk [vmem:[#allocation2 + $0x58] sm:$0x3] %vm4540_vm1, %v11714_v0  ;;  %s11972_s13 = scalar_lea.vmem %s17533_s11, %s10842_s21  ;;  %v11982_v5 = vld [vmem:[%s17525_s3 + $0x10] sm:$0xf] }
  0x55   : > { %4548 = vst.msk [vmem:[#allocation2 + $0x48] sm:$0xff] %vm17549_vm0, %v11714_v0  ;;  %4549 = vst.msk [vmem:[#allocation2 + $0x50] sm:$0xff] %vm17549_vm0, %v11714_v0  ;;  %v11987_v6 = vld [vmem:[%s17525_s3 + $0x14] sm:$0xf]  ;;  %v11992_v7 = vld [vmem:[%s17525_s3 + $0x18] sm:$0xf]  ;;  %s12324_s22 = scalar_lea.vmem %s17522_s0, %s10841_s26 }
  0x56   : > { %4551 = vst.msk [vmem:[#allocation2 + $0x60] sm:$0xff] %vm17549_vm0, %v11714_v0  ;;  %4552 = vst.msk [vmem:[#allocation2 + $0x68] sm:$0xff] %vm17549_vm0, %v11714_v0  ;;  %v11997_v8 = vld [vmem:[%s17525_s3 + $0x1c] sm:$0xf]  ;;  %v12002_v9 = vld [vmem:[%s17525_s3 + $0x20] sm:$0xf] }
  0x57   : > { %4553 = vst.msk [vmem:[#allocation2 + $0x70] sm:$0x3] %vm4540_vm1, %v11714_v0  ;;  %4556 = vst.msk [vmem:[#allocation2 + $0x88] sm:$0x3] %vm4540_vm1, %v11714_v0  ;;  %v12007_v10 = vld [vmem:[%s17525_s3 + $0x24] sm:$0xf] }
  0x58   : > { %4554 = vst.msk [vmem:[#allocation2 + $0x78] sm:$0xff] %vm17549_vm0, %v11714_v0  ;;  %4555 = vst.msk [vmem:[#allocation2 + $0x80] sm:$0xff] %vm17549_vm0, %v11714_v0  ;;  %v12012_v11 = vld [vmem:[%s17525_s3 + $0x28] sm:$0xf]  ;;  %v12017_v12 = vld [vmem:[%s17525_s3 + $0x2c] sm:$0xf] }
  0x59   : > { %4557 = vst.msk [vmem:[#allocation2 + $0x90] sm:$0xff] %vm17549_vm0, %v11714_v0  ;;  %4558 = vst.msk [vmem:[#allocation2 + $0x98] sm:$0xff] %vm17549_vm0, %v11714_v0  ;;  %v12022_v13 = vld [vmem:[%s17525_s3 + $0x30] sm:$0xf]  ;;  %v12027_v14 = vld [vmem:[%s17525_s3 + $0x34] sm:$0xf] }
  0x5a   : > { %4559 = vst.msk [vmem:[#allocation2 + $0xa0] sm:$0x3] %vm4540_vm1, %v11714_v0  ;;  %4562 = vst.msk [vmem:[#allocation2 + $0xb8] sm:$0x3] %vm4540_vm1, %v11714_v0  ;;  %v12032_v15 = vld [vmem:[%s17525_s3 + $0x38] sm:$0xf] }
  0x5b   : > { %4560 = vst.msk [vmem:[#allocation2 + $0xa8] sm:$0xff] %vm17549_vm0, %v11714_v0  ;;  %4561 = vst.msk [vmem:[#allocation2 + $0xb0] sm:$0xff] %vm17549_vm0, %v11714_v0  ;;  %v12037_v16 = vld [vmem:[%s17525_s3 + $0x3c] sm:$0xf]  ;;  %v12042_v17 = vld [vmem:[%s17525_s3 + $0x40] sm:$0xf] }
  0x5c   : > { %4563 = vst.msk [vmem:[#allocation2 + $0xc0] sm:$0xff] %vm17549_vm0, %v11714_v0  ;;  %4564 = vst.msk [vmem:[#allocation2 + $0xc8] sm:$0xff] %vm17549_vm0, %v11714_v0  ;;  %v12047_v18 = vld [vmem:[%s17525_s3 + $0x44] sm:$0xf]  ;;  %v12052_v19 = vld [vmem:[%s17525_s3 + $0x48] sm:$0xf] }
  0x5d   : > { %4565 = vst.msk [vmem:[#allocation2 + $0xd0] sm:$0x3] %vm4540_vm1, %v11714_v0  ;;  %4568 = vst.msk [vmem:[#allocation2 + $0xe8] sm:$0x3] %vm4540_vm1, %v11714_v0  ;;  %v12057_v20 = vld [vmem:[%s17525_s3 + $0x4c] sm:$0xf] }
  0x5e   : > { %4566 = vst.msk [vmem:[#allocation2 + $0xd8] sm:$0xff] %vm17549_vm0, %v11714_v0  ;;  %4567 = vst.msk [vmem:[#allocation2 + $0xe0] sm:$0xff] %vm17549_vm0, %v11714_v0  ;;  %v12062_v21 = vld [vmem:[%s17525_s3 + $0x50] sm:$0xf]  ;;  %v12067_v22 = vld [vmem:[%s17525_s3 + $0x54] sm:$0xf] }
  0x5f   : > { %4569 = vst.msk [vmem:[#allocation2 + $0xf0] sm:$0xff] %vm17549_vm0, %v11714_v0  ;;  %4570 = vst.msk [vmem:[#allocation2 + $0xf8] sm:$0xff] %vm17549_vm0, %v11714_v0  ;;  %v12072_v23 = vld [vmem:[%s17525_s3 + $0x58] sm:$0xf]  ;;  %v12077_v24 = vld [vmem:[%s17525_s3 + $0x5c] sm:$0xf] }
  0x60   : > { %4571 = vst.msk [vmem:[#allocation2 + $0x100] sm:$0x3] %vm4540_vm1, %v11714_v0  ;;  %4574 = vst.msk [vmem:[#allocation2 + $0x118] sm:$0x3] %vm4540_vm1, %v11714_v0  ;;  %v12082_v25 = vld [vmem:[%s17525_s3 + $0x60] sm:$0xf] }
  0x61   : > { %4572 = vst.msk [vmem:[#allocation2 + $0x108] sm:$0xff] %vm17549_vm0, %v11714_v0  ;;  %4573 = vst.msk [vmem:[#allocation2 + $0x110] sm:$0xff] %vm17549_vm0, %v11714_v0  ;;  %v12087_v26 = vld [vmem:[%s17525_s3 + $0x64] sm:$0xf]  ;;  %v12092_v27 = vld [vmem:[%s17525_s3 + $0x68] sm:$0xf] }
  0x62   : > { %4575 = vst.msk [vmem:[#allocation2 + $0x120] sm:$0xff] %vm17549_vm0, %v11714_v0  ;;  %4576 = vst.msk [vmem:[#allocation2 + $0x128] sm:$0xff] %vm17549_vm0, %v11714_v0  ;;  %v12097_v28 = vld [vmem:[%s17525_s3 + $0x6c] sm:$0xf]  ;;  %v12102_v29 = vld [vmem:[%s17525_s3 + $0x70] sm:$0xf] }
  0x63   : > { %4577 = vst.msk [vmem:[#allocation2 + $0x130] sm:$0x3] %vm4540_vm1, %v11714_v0  ;;  %4580 = vst.msk [vmem:[#allocation2 + $0x148] sm:$0x3] %vm4540_vm1, %v11714_v0  ;;  %v12107_v30 = vld [vmem:[%s17525_s3 + $0x74] sm:$0xf] }
  0x64   : > { %4578 = vst.msk [vmem:[#allocation2 + $0x138] sm:$0xff] %vm17549_vm0, %v11714_v0  ;;  %4579 = vst.msk [vmem:[#allocation2 + $0x140] sm:$0xff] %vm17549_vm0, %v11714_v0  ;;  %v12112_v31 = vld [vmem:[%s17525_s3 + $0x78] sm:$0xf]  ;;  %v12117_v32 = vld [vmem:[%s17525_s3 + $0x7c] sm:$0xf] }
  0x65   : > { %4581 = vst.msk [vmem:[#allocation2 + $0x150] sm:$0xff] %vm17549_vm0, %v11714_v0  ;;  %4582 = vst.msk [vmem:[#allocation2 + $0x158] sm:$0xff] %vm17549_vm0, %v11714_v0  ;;  %v12122_v33 = vld [vmem:[%s17525_s3 + $0x80] sm:$0xf]  ;;  %v12127_v34 = vld [vmem:[%s17525_s3 + $0x84] sm:$0xf] }
  0x66   : > { %4583 = vst.msk [vmem:[#allocation2 + $0x160] sm:$0x3] %vm4540_vm1, %v11714_v0  ;;  %4586 = vst.msk [vmem:[#allocation2 + $0x178] sm:$0x3] %vm4540_vm1, %v11714_v0  ;;  %v12132_v35 = vld [vmem:[%s17525_s3 + $0x88] sm:$0xf] }
  0x67   : > { %4584 = vst.msk [vmem:[#allocation2 + $0x168] sm:$0xff] %vm17549_vm0, %v11714_v0  ;;  %4585 = vst.msk [vmem:[#allocation2 + $0x170] sm:$0xff] %vm17549_vm0, %v11714_v0  ;;  %v12137_v36 = vld [vmem:[%s17525_s3 + $0x8c] sm:$0xf]  ;;  %v12142_v37 = vld [vmem:[%s17525_s3 + $0x90] sm:$0xf] }
  0x68   : > { %4587 = vst.msk [vmem:[#allocation2 + $0x180] sm:$0xff] %vm17549_vm0, %v11714_v0  ;;  %4588 = vst.msk [vmem:[#allocation2 + $0x188] sm:$0xff] %vm17549_vm0, %v11714_v0  ;;  %v12147_v38 = vld [vmem:[%s17525_s3 + $0x94] sm:$0xf]  ;;  %v12152_v39 = vld [vmem:[%s17525_s3 + $0x98] sm:$0xf] }
  0x69   : > { %4589 = vst.msk [vmem:[#allocation2 + $0x190] sm:$0x3] %vm4540_vm1, %v11714_v0  ;;  %4592 = vst.msk [vmem:[#allocation2 + $0x1a8] sm:$0x3] %vm4540_vm1, %v11714_v0  ;;  %v12157_v40 = vld [vmem:[%s17525_s3 + $0x9c] sm:$0xf] }
  0x6a   : > { %4590 = vst.msk [vmem:[#allocation2 + $0x198] sm:$0xff] %vm17549_vm0, %v11714_v0  ;;  %4591 = vst.msk [vmem:[#allocation2 + $0x1a0] sm:$0xff] %vm17549_vm0, %v11714_v0  ;;  %v12162_v41 = vld [vmem:[%s17525_s3 + $0xa0] sm:$0xf]  ;;  %v12167_v42 = vld [vmem:[%s17525_s3 + $0xa4] sm:$0xf] }
  0x6b   : > { %17619 = vst [vmem:[#allocation14_spill] sm:$0xff] %v11957_v1  ;;  %17620 = vst [vmem:[#allocation15_spill] sm:$0xff] %v11962_v2  ;;  %v12172_v43 = vld [vmem:[%s17525_s3 + $0xa8] sm:$0xf]  ;;  %v12177_v44 = vld [vmem:[%s17525_s3 + $0xac] sm:$0xf] }
  0x6c   : > { %17621 = vst [vmem:[#allocation16_spill] sm:$0xff] %v11967_v3  ;;  %17622 = vst [vmem:[#allocation17_spill] sm:$0xff] %v11977_v4  ;;  %v12182_v45 = vld [vmem:[%s17525_s3 + $0xb0] sm:$0xf]  ;;  %v12187_v46 = vld [vmem:[%s17525_s3 + $0xb4] sm:$0xf] }
  0x6d   : > { %17623 = vst [vmem:[#allocation18_spill] sm:$0xff] %v11982_v5  ;;  %17624 = vst [vmem:[#allocation19_spill] sm:$0xff] %v11987_v6  ;;  %v12192_v47 = vld [vmem:[%s17525_s3 + $0xb8] sm:$0xf]  ;;  %v12197_v48 = vld [vmem:[%s17525_s3 + $0xbc] sm:$0xf] }
  0x6e   : > { %17625 = vst [vmem:[#allocation20_spill] sm:$0xff] %v11992_v7  ;;  %17626 = vst [vmem:[#allocation21_spill] sm:$0xff] %v11997_v8  ;;  %v12202_v49 = vld [vmem:[%s17525_s3 + $0xc0] sm:$0xf]  ;;  %v12207_v50 = vld [vmem:[%s17525_s3 + $0xc4] sm:$0xf] }
  0x6f   : > { %17627 = vst [vmem:[#allocation22_spill] sm:$0xff] %v12002_v9  ;;  %17628 = vst [vmem:[#allocation23_spill] sm:$0xff] %v12007_v10  ;;  %v12212_v51 = vld [vmem:[%s17525_s3 + $0xc8] sm:$0xf]  ;;  %v12217_v52 = vld [vmem:[%s17525_s3 + $0xcc] sm:$0xf] }
  0x70   : > { %17629 = vst [vmem:[#allocation24_spill] sm:$0xff] %v12012_v11  ;;  %17630 = vst [vmem:[#allocation25_spill] sm:$0xff] %v12017_v12  ;;  %v12222_v53 = vld [vmem:[%s17525_s3 + $0xd0] sm:$0xf]  ;;  %v12227_v54 = vld [vmem:[%s17525_s3 + $0xd4] sm:$0xf] }
  0x71   : > { %17631 = vst [vmem:[#allocation26_spill] sm:$0xff] %v12022_v13  ;;  %17632 = vst [vmem:[#allocation27_spill] sm:$0xff] %v12027_v14  ;;  %v12232_v55 = vld [vmem:[%s17525_s3 + $0xd8] sm:$0xf]  ;;  %v12237_v56 = vld [vmem:[%s17525_s3 + $0xdc] sm:$0xf] }
  0x72   : > { %17633 = vst [vmem:[#allocation28_spill] sm:$0xff] %v12032_v15  ;;  %17634 = vst [vmem:[#allocation29_spill] sm:$0xff] %v12037_v16  ;;  %v12242_v57 = vld [vmem:[%s17525_s3 + $0xe0] sm:$0xf]  ;;  %v12247_v58 = vld [vmem:[%s17525_s3 + $0xe4] sm:$0xf] }
  0x73   : > { %17635 = vst [vmem:[#allocation30_spill] sm:$0xff] %v12042_v17  ;;  %17636 = vst [vmem:[#allocation31_spill] sm:$0xff] %v12047_v18  ;;  %v12252_v59 = vld [vmem:[%s17525_s3 + $0xe8] sm:$0xf]  ;;  %v12257_v60 = vld [vmem:[%s17525_s3 + $0xec] sm:$0xf] }
  0x74   : > { %17637 = vst [vmem:[#allocation32_spill] sm:$0xff] %v12052_v19  ;;  %17638 = vst [vmem:[#allocation33_spill] sm:$0xff] %v12057_v20  ;;  %v12262_v61 = vld [vmem:[%s17525_s3 + $0xf0] sm:$0xf]  ;;  %v12267_v62 = vld [vmem:[%s17525_s3 + $0xf4] sm:$0xf] }
  0x75   : > { %17639 = vst [vmem:[#allocation34_spill] sm:$0xff] %v12062_v21  ;;  %17640 = vst [vmem:[#allocation35_spill] sm:$0xff] %v12067_v22  ;;  %v12272_v63 = vld [vmem:[%s17525_s3 + $0xf8] sm:$0xf]  ;;  %v12277_v0 = vld [vmem:[%s17525_s3 + $0xfc] sm:$0xf] }
  0x76   : > { %17641 = vst [vmem:[#allocation36_spill] sm:$0xff] %v12072_v23  ;;  %17642 = vst [vmem:[#allocation37_spill] sm:$0xff] %v12077_v24  ;;  %vm687_vm2 = vsmask.f32 7424  ;;  %s11716_s25 = smov 3   ;;  %s11717_s14 = smov 12  }
  0x77   : > { %17643 = vst [vmem:[#allocation38_spill] sm:$0xff] %v12082_v25  ;;  %17644 = vst [vmem:[#allocation39_spill] sm:$0xff] %v12087_v26  ;;  %vm993_vm5 = vsmask.f32 6400  ;;  %s11718_s15 = smov 9   ;;  %vm1396_vm7 = vcmask 1044480  }
  0x78   : > { %17645 = vst [vmem:[#allocation40_spill] sm:$0xff] %v12092_v27  ;;  %17646 = vst [vmem:[#allocation41_spill] sm:$0xff] %v12097_v28  ;;  %vm1251_vm6 = vsmask.f32 5376  ;;  %s11719_s16 = smov 15   ;;  %s11720_s18 = smov 18  }
  0x79   : > { %17647 = vst [vmem:[#allocation42_spill] sm:$0xff] %v12102_v29  ;;  %17648 = vst [vmem:[#allocation43_spill] sm:$0xff] %v12107_v30  ;;  %vm1477_vm8 = vsmask.f32 4352  ;;  %s11721_s28 = smov 21   ;;  %s11722_s29 = smov 24  }
  0x7a   : > { %17649 = vst [vmem:[#allocation44_spill] sm:$0xff] %v12112_v31  ;;  %17650 = vst [vmem:[#allocation45_spill] sm:$0xff] %v12117_v32  ;;  %vm1670_vm9 = vcmask 23552   ;;  %vm1703_vm10 = vcmask 48128   ;;  %vm1736_vm11 = vcmask 72704   ;;  %vm1769_vm12 = vcmask 97280  }
  0x7b   : > { %17651 = vst [vmem:[#allocation46_spill] sm:$0xff] %v12122_v33  ;;  %17652 = vst [vmem:[#allocation47_spill] sm:$0xff] %v12127_v34  ;;  %vm1802_vm13 = vcmask 121856   ;;  %vm1835_vm14 = vcmask 146432   ;;  %vm1868_vm15 = vcmask 171008   ;;  %vm1901_vm1 = vcmask 195584  }
  0x7c   : > { %17653 = vst [vmem:[#allocation48_spill] sm:$0xff] %v12132_v35  ;;  %17654 = vst [vmem:[#allocation49_spill] sm:$0xff] %v12137_v36  ;;  %vm2030_vm0 = vcmask 220160  }
  0x7d   : > { %17655 = vst [vmem:[#allocation50_spill] sm:$0xff] %v12142_v37  ;;  %17656 = vst [vmem:[#allocation51_spill] sm:$0xff] %v12147_v38  ;;  %v12282_v37 = vld [vmem:[%s17525_s3 + $0x100] sm:$0xf]  ;;  %v12344_v38 = vld [vmem:[%s17527_s5 + $0x10] sm:$0xff] }
  0x7e   : > { %17657 = vst [vmem:[#allocation52_spill] sm:$0xff] %v12152_v39  ;;  %17658 = vst [vmem:[#allocation53_spill] sm:$0xff] %v12157_v40  ;;  %v12349_v39 = vld [vmem:[%s17527_s5 + $0x18] sm:$0xff]  ;;  %v12351_v40 = vld [vmem:[#allocation5] sm:$0x1] }
  0x7f   : > { %17659 = vst [vmem:[#allocation54_spill] sm:$0xff] %v12162_v41  ;;  %17660 = vst [vmem:[#allocation55_spill] sm:$0xff] %v12167_v42  ;;  %v12355_v41 = vld [vmem:[#allocation8] sm:$0x1]  ;;  %v481_v42 = vld [vmem:[%s12324_s22 + $0x78] sm:$0xf] }
  0x80   : > { %17661 = vst [vmem:[#allocation56_spill] sm:$0xff] %v12172_v43  ;;  %17662 = vst [vmem:[#allocation57_spill] sm:$0xff] %v12177_v44  ;;  %v12362_v43 = vld [vmem:[%s12324_s22 + $0x80] sm:$0xf] }
  0x81   : > { %17663 = vst [vmem:[#allocation58_spill] sm:$0xff] %v12182_v45  ;;  %17664 = vst [vmem:[#allocation59_spill] sm:$0xff] %v12187_v46 }
  0x82   : > { %17665 = vst [vmem:[#allocation60_spill] sm:$0xff] %v12192_v47  ;;  %17666 = vst [vmem:[#allocation61_spill] sm:$0xff] %v12197_v48 }
  0x83   : > { %17667 = vst [vmem:[#allocation62_spill] sm:$0xff] %v12202_v49  ;;  %17668 = vst [vmem:[#allocation63_spill] sm:$0xff] %v12207_v50 }
  0x84   : > { %17669 = vst [vmem:[#allocation64_spill] sm:$0xff] %v12212_v51  ;;  %17670 = vst [vmem:[#allocation65_spill] sm:$0xff] %v12217_v52 }
  0x85   : > { %17671 = vst [vmem:[#allocation66_spill] sm:$0xff] %v12222_v53  ;;  %17672 = vst [vmem:[#allocation67_spill] sm:$0xff] %v12227_v54 }
  0x86   : > { %17673 = vst [vmem:[#allocation68_spill] sm:$0xff] %v12232_v55  ;;  %17674 = vst [vmem:[#allocation69_spill] sm:$0xff] %v12237_v56  ;;  %v12417_v56 = vld [vmem:[%s12324_s22 + $0x1c] sm:$0xf] }
  0x87   : > { %17675 = vst [vmem:[#allocation70_spill] sm:$0xff] %v12242_v57  ;;  %17676 = vst [vmem:[#allocation71_spill] sm:$0xff] %v12247_v58 }
  0x88   : > { %17677 = vst [vmem:[#allocation72_spill] sm:$0xff] %v12252_v59  ;;  %17678 = vst [vmem:[#allocation73_spill] sm:$0xff] %v12257_v60 }
  0x89   : > { %17679 = vst [vmem:[#allocation74_spill] sm:$0xff] %v12262_v61  ;;  %17680 = vst [vmem:[#allocation75_spill] sm:$0xff] %v12267_v62  ;;  %v12287_v61 = vld [vmem:[%s17525_s3 + $0x104] sm:$0xf]  ;;  %v12292_v62 = vld [vmem:[%s17525_s3 + $0x108] sm:$0xf] }
  0x8a   : > { %17681 = vst [vmem:[#allocation76_spill] sm:$0xff] %v12272_v63  ;;  %17682 = vst [vmem:[#allocation77_spill] sm:$0xff] %v12277_v0  ;;  %v12297_v63 = vld [vmem:[%s17525_s3 + $0x10c] sm:$0xf]  ;;  %v12302_v0 = vld [vmem:[%s17525_s3 + $0x110] sm:$0xf] }
  0x8b   : > { %17683 = vst [vmem:[#allocation78_spill] sm:$0xff] %v12282_v37  ;;  %17684 = vst [vmem:[#allocation79_spill] sm:$0xff] %v12287_v61  ;;  %v12307_v37 = vld [vmem:[%s17525_s3 + $0x114] sm:$0xf]  ;;  %v12312_v61 = vld [vmem:[%s17525_s3 + $0x118] sm:$0xf] }
  0x8c   : > { %17685 = vst [vmem:[#allocation80_spill] sm:$0xff] %v12292_v62  ;;  %17686 = vst [vmem:[#allocation81_spill] sm:$0xff] %v12297_v63  ;;  %v12317_v62 = vld [vmem:[%s17525_s3 + $0x11c] sm:$0xf]  ;;  %v12329_v63 = vld [vmem:[%s17526_s4] sm:$0x3] }
  0x8d   : > { %17687 = vst [vmem:[#allocation82_spill] sm:$0xff] %v12302_v0  ;;  %17688 = vst [vmem:[#allocation83_spill] sm:$0xff] %v12307_v37  ;;  %v12334_v0 = vld [vmem:[%s17527_s5] sm:$0xff]  ;;  %v12339_v37 = vld [vmem:[%s17527_s5 + $0x8] sm:$0xff] }
  0x8e   : > { %17689 = vst [vmem:[#allocation84_spill] sm:$0xff] %v12312_v61  ;;  %17690 = vst [vmem:[#allocation85_spill] sm:$0xff] %v12317_v62  ;;  %v12390_v61 = vld [vmem:[%s12324_s22 + $0x14] sm:$0xf] }
  0x8f   : > { %17691 = vst [vmem:[#allocation86_spill] sm:$0xff] %v12329_v63  ;;  %17692 = vst [vmem:[#allocation87_spill] sm:$0xff] %v12334_v0  ;;  %v12353_v0 = vld [vmem:[#allocation7] sm:$0x3]  ;;  %v457_v63 = vld [vmem:[%s12324_s22 + $0x18] sm:$0xf] }
  0x90   : > { %17693 = vst [vmem:[#allocation88_spill] sm:$0xff] %v12339_v37  ;;  %17694 = vst [vmem:[#allocation89_spill] sm:$0xff] %v12344_v38  ;;  %v12359_v37 = vld [vmem:[%s12324_s22 + $0x7c] sm:$0xf]  ;;  %v478_v38 = vld [vmem:[%s12324_s22 + $0x6c] sm:$0xf]  ;;  %v12442_v28 = vcombine.low %v457_v63, %v12417_v56 }
  0x91   : > { %17695 = vst [vmem:[#allocation90_spill] sm:$0xff] %v12349_v39  ;;  %17696 = vst [vmem:[#allocation91_spill] sm:$0xff] %v12351_v40  ;;  %v12366_v44 = vcombine.low %v481_v42, %v12359_v37  ;;  %v12370_v39 = vcombine.low %v12362_v43, %v12362_v43  ;;  %v12373_v40 = vld [vmem:[%s12324_s22 + $0x70] sm:$0xf] }
  0x92   : > { %17697 = vst [vmem:[#allocation92_spill] sm:$0xff] %v12353_v0  ;;  %17698 = vst [vmem:[#allocation93_spill] sm:$0xff] %v12355_v41  ;;  %v12376_v0 = vld [vmem:[%s12324_s22 + $0x74] sm:$0xf]  ;;  %v454_v41 = vld [vmem:[%s12324_s22 + $0xc] sm:$0xf]  ;;  %v12380_v45 = vcombine.low %v478_v38, %v12373_v40  ;;  %v12399_v38 = vcombine.low %v12390_v61, %v12390_v61 }
  0x93   : > { %v12384_v46 = vcombine.low %v12376_v0, %v12376_v0  ;;  %v12387_v42 = vld [vmem:[%s12324_s22 + $0x10] sm:$0xf]  ;;  %v943_v62 = vrot.slane %v12366_v44, 1  ;;  %v944_v47 = vrot.slane %v12370_v39, 1  ;;  %v12423_v59 = vshrl.u32 %v12366_v44, 16  ;;  %17699 = vst [vmem:[#allocation94_spill] sm:$0xff] %v12442_v28 }
  0x94   : > { %v12395_v48 = vcombine.low %v454_v41, %v12387_v42  ;;  %v940_v49 = vrot.slane %v12380_v45, 1  ;;  %v12404_v51 = vshrl.u32 %v12380_v45, 16  ;;  %v12407_v52 = vshll.u32 %v12380_v45, 16 }
  0x95   : > { %v941_v50 = vrot.slane %v12384_v46, 1  ;;  %v945_v53 = vsel %vm912_vm3, %v943_v62, %v944_v47  ;;  %v12412_v41 = vshll.u32 %v12384_v46, 16  ;;  %v917_v55 = vrot.slane %v12399_v38, 1  ;;  %v12429_v62 = vld [vmem:[%s12324_s22 + $0x20] sm:$0xf] }
  0x96   : > { %v916_v54 = vrot.slane %v12395_v48, 1  ;;  %981 = vrot.lane.b32.xlu0 %v945_v53, %s11715_s12  ;;  %v801_v58 = vrot.slane %v12407_v52, 1  ;;  %v12426_v47 = vshll.u32 %v12366_v44, 16  ;;  %v12435_v53 = vshll.u32 %v12370_v39, 16 }
  0x97   : > { %v942_v57 = vsel %vm912_vm3, %v940_v49, %v941_v50  ;;  %v806_v60 = vrot.slane %v12412_v41, 1  ;;  %v1198_v49 = vrot.slane %v12380_v45, 2  ;;  %v1199_v27 = vrot.slane %v12384_v46, 2 }
  0x98   : > { %979 = vrot.lane.b32.xlu1 %v942_v57, %s11715_s12  ;;  %v918_v25 = vsel %vm912_vm3, %v916_v54, %v917_v55  ;;  %v802_v50 = vor.u32 %v801_v58, %v12404_v51  ;;  %v813_v26 = vrot.slane %v12426_v47, 1  ;;  %v818_v57 = vrot.slane %v12435_v53, 1 }
  0x99   : > { %v12447_v29 = vcombine.low %v12429_v62, %v12429_v62  ;;  %v12450_v54 = vshrl.u32 %v12395_v48, 16  ;;  %v12453_v55 = vshll.u32 %v12395_v48, 16  ;;  %v1200_v31 = vsel %vm1170_vm4, %v1198_v49, %v1199_v27 }
  0x9a   : > { %v807_v58 = vsel %vm687_vm2, %v802_v50, %v806_v60  ;;  %v814_v30 = vor.u32 %v813_v26, %v12423_v59  ;;  %v12459_v63 = vshrl.u32 %v12442_v28, 16  ;;  %v12464_v32 = vshll.u32 %v12442_v28, 16 }
  0x9b   : > { %898 = vrot.lane.b32.xlu0 %v807_v58, %s11716_s25  ;;  %v12467_v33 = vshll.u32 %v12447_v29, 16  ;;  %v705_v60 = vrot.slane %v12453_v55, 1  ;;  %v12471_v26 = vshll.u32 %v12399_v38, 16  ;;  %v1084_v49 = vrot.slane %v12423_v59, 1 }
  0x9c   : > { %963 = vrot.lane.b32.xlu1 %v918_v25, %s11715_s12  ;;  %v819_v27 = vsel %vm687_vm2, %v814_v30, %v818_v57  ;;  %v1085_v50 = vrot.slane %v12426_v47, 2  ;;  %v12477_v58 = vshrl.u32 %v12370_v39, 16  ;;  %v717_v25 = vrot.slane %v12464_v32, 1 }
  0x9d   : > { %v722_v34 = vrot.slane %v12467_v33, 1  ;;  %v706_v1 = vor.u32 %v705_v60, %v12450_v54  ;;  %v710_v2 = vrot.slane %v12471_v26, 1  ;;  %v1090_v4 = vrot.slane %v12435_v53, 2 }
  0x9e   : > { %v1089_v3 = vrot.slane %v12477_v58, 1  ;;  %v1075_v30 = vrot.slane %v12404_v51, 1  ;;  %v718_v57 = vor.u32 %v717_v25, %v12459_v63  ;;  %v1086_v5 = vor.u32 %v1085_v50, %v1084_v49 }
  0x9f   : > { %900 = vrot.lane.b32.xlu0 %v819_v27, %s11716_s25  ;;  %v1076_v6 = vrot.slane %v12407_v52, 2  ;;  %v12491_v60 = vshrl.u32 %v12384_v46, 16  ;;  %v711_v7 = vsel %vm687_vm2, %v706_v1, %v710_v2  ;;  %v1081_v9 = vrot.slane %v12412_v41, 2 }
  0xa0   : > { %1237 = vrot.lane.b32.xlu1 %v1200_v31, %s11717_s14  ;;  %v1091_v8 = vor.u32 %v1090_v4, %v1089_v3  ;;  %v723_v10 = vsel %vm687_vm2, %v718_v57, %v722_v34  ;;  %v1003_v31 = vrot.slane %v12450_v54, 1  ;;  %v919_v49 = vrot.slane %v12442_v28, 1 }
  0xa1   : > { %v1077_v27 = vor.u32 %v1076_v6, %v1075_v30  ;;  %v1080_v11 = vrot.slane %v12491_v60, 1  ;;  %v920_v50 = vrot.slane %v12447_v29, 1  ;;  %v1004_v25 = vrot.slane %v12453_v55, 2 }
  0xa2   : > { %v12502_v12 = vshrl.u32 %v12399_v38, 16  ;;  %v1092_v1 = vsel %vm993_vm5, %v1086_v5, %v1091_v8  ;;  %v1009_v3 = vrot.slane %v12471_v26, 2  ;;  %v1315_v34 = vrot.slane %v12404_v51, 2 }
  0xa3   : > { %884 = vrot.lane.b32.xlu0 %v723_v10, %s11716_s25  ;;  %v1082_v2 = vor.u32 %v1081_v9, %v1080_v11  ;;  %v1005_v4 = vor.u32 %v1004_v25, %v1003_v31  ;;  %v1316_v30 = vrot.slane %v12407_v52, 3  ;;  %v1318_v35 = vrot.slane %v12491_v60, 2 }
  0xa4   : > { %882 = vrot.lane.b32.xlu1 %v711_v7, %s11716_s25  ;;  %v1008_v6 = vrot.slane %v12502_v12, 1  ;;  %v1319_v10 = vrot.slane %v12412_v41, 3  ;;  %v921_v7 = vsel %vm912_vm3, %v919_v49, %v920_v50  ;;  %v1201_v5 = vrot.slane %v12366_v44, 2 }
  0xa5   : > { %v1083_v57 = vsel %vm993_vm5, %v1077_v27, %v1082_v2  ;;  %v1202_v8 = vrot.slane %v12370_v39, 2  ;;  %v1317_v9 = vor.u32 %v1316_v30, %v1315_v34  ;;  %v1012_v11 = vrot.slane %v12459_v63, 1 }
  0xa6   : > { %v1010_v36 = vor.u32 %v1009_v3, %v1008_v6  ;;  %v12521_v27 = vshrl.u32 %v12447_v29, 16  ;;  %v1320_v25 = vor.u32 %v1319_v10, %v1318_v35  ;;  %v1013_v49 = vrot.slane %v12464_v32, 2 }
  0xa7   : > { %1158 = vrot.lane.b32.xlu0 %v1092_v1, %s11718_s15  ;;  %v1018_v50 = vrot.slane %v12467_v33, 2  ;;  %v1174_v2 = vrot.slane %v12395_v48, 2  ;;  %v1175_v3 = vrot.slane %v12399_v38, 2  ;;  %v1322_v6 = vrot.slane %v12423_v59, 2 }
  0xa8   : > { %1156 = vrot.lane.b32.xlu1 %v1083_v57, %s11718_s15  ;;  %v1011_v31 = vsel %vm993_vm5, %v1005_v4, %v1010_v36  ;;  %v1017_v1 = vrot.slane %v12521_v27, 1  ;;  %v1323_v34 = vrot.slane %v12426_v47, 3  ;;  %v1325_v35 = vrot.slane %v12477_v58, 2 }
  0xa9   : > { %v1326_v36 = vrot.slane %v12435_v53, 3  ;;  %v1203_v4 = vsel %vm1170_vm4, %v1201_v5, %v1202_v8  ;;  %v1321_v30 = vsel %vm1251_vm6, %v1317_v9, %v1320_v25  ;;  %v1014_v57 = vor.u32 %v1013_v49, %v1012_v11 }
  0xaa   : > { %v1019_v10 = vor.u32 %v1018_v50, %v1017_v1  ;;  %v1176_v13 = vsel %vm1170_vm4, %v1174_v2, %v1175_v3  ;;  %v1424_v14 = vrot.slane %v12380_v45, 3  ;;  %v1425_v15 = vrot.slane %v12384_v46, 3 }
  0xab   : > { %965 = vrot.lane.b32.xlu0 %v921_v7, %s11715_s12  ;;  %v1324_v7 = vor.u32 %v1323_v34, %v1322_v6  ;;  %v1259_v5 = vrot.slane %v12450_v54, 2  ;;  %v1260_v9 = vrot.slane %v12453_v55, 3  ;;  %v1262_v11 = vrot.slane %v12502_v12, 2  ;;  %v484_v6 = vld [vmem:[%s12324_s22 + $0x84] sm:$0xf] }
  0xac   : > { %1140 = vrot.lane.b32.xlu1 %v1011_v31, %s11718_s15  ;;  %v1327_v31 = vor.u32 %v1326_v36, %v1325_v35  ;;  %v1020_v8 = vsel %vm993_vm5, %v1014_v57, %v1019_v10  ;;  %v1263_v25 = vrot.slane %v12471_v26, 3  ;;  %v1177_v49 = vrot.slane %v12442_v28, 2 }
  0xad   : > { %v1178_v50 = vrot.slane %v12447_v29, 2  ;;  %v1426_v1 = vsel %vm1396_vm7, %v1424_v14, %v1425_v15  ;;  %v1541_v2 = vrot.slane %v12404_v51, 3  ;;  %v1542_v3 = vrot.slane %v12407_v52, 4 }
  0xae   : > { %v1328_v46 = vsel %vm1251_vm6, %v1324_v7, %v1327_v31  ;;  %v1261_v34 = vor.u32 %v1260_v9, %v1259_v5  ;;  %v1264_v35 = vor.u32 %v1263_v25, %v1262_v11  ;;  %v1544_v36 = vrot.slane %v12491_v60, 3  ;;  %v12575_v5 = vld [vmem:[%s12324_s22 + $0x8c] sm:$0xf] }
  0xaf   : > { %1239 = vrot.lane.b32.xlu0 %v1203_v4, %s11717_s14  ;;  %v1545_v4 = vrot.slane %v12412_v41, 4  ;;  %v1267_v57 = vrot.slane %v12464_v32, 3  ;;  %v1269_v14 = vrot.slane %v12521_v27, 2  ;;  %v1270_v15 = vrot.slane %v12467_v33, 3 }
  0xb0   : > { %1382 = vrot.lane.b32.xlu1 %v1321_v30, %s11719_s16  ;;  %v12559_v30 = vld [vmem:[%s12324_s22 + $0x88] sm:$0xf]  ;;  %v1179_v51 = vsel %vm1170_vm4, %v1177_v49, %v1178_v50  ;;  %v1427_v52 = vrot.slane %v12366_v44, 3  ;;  %v1428_v41 = vrot.slane %v12370_v39, 3  ;;  %v1265_v60 = vsel %vm1251_vm6, %v1261_v34, %v1264_v35 }
  0xb1   : > { %v1543_v10 = vor.u32 %v1542_v3, %v1541_v2  ;;  %v1546_v7 = vor.u32 %v1545_v4, %v1544_v36  ;;  %v12572_v31 = vcombine.low %v484_v6, %v12559_v30  ;;  %v1271_v9 = vor.u32 %v1270_v15, %v1269_v14  ;;  %v487_v6 = vld [vmem:[%s12324_s22 + $0x90] sm:$0xf]  ;;  %v12615_v14 = vld [vmem:[%s12324_s22 + $0x98] sm:$0xf] }
  0xb2   : > { %v1400_v11 = vrot.slane %v12395_v48, 3  ;;  %v1401_v25 = vrot.slane %v12399_v38, 3  ;;  %v1548_v39 = vrot.slane %v12423_v59, 3  ;;  %v1549_v49 = vrot.slane %v12426_v47, 4  ;;  %v12596_v59 = vld [vmem:[%s12324_s22 + $0x94] sm:$0xf] }
  0xb3   : > { %1142 = vrot.lane.b32.xlu0 %v1020_v8, %s11718_s15  ;;  %17700 = vst [vmem:[#allocation95_spill] sm:$0xff] %v12572_v31  ;;  %v1551_v50 = vrot.slane %v12477_v58, 3  ;;  %v1547_v2 = vsel %vm1477_vm8, %v1543_v10, %v1546_v7  ;;  %v12589_v3 = vcombine.low %v12575_v5, %v12575_v5  ;;  %v12592_v38 = vshll.u32 %v12572_v31, 16 }
  0xb4   : > { %1221 = vrot.lane.b32.xlu1 %v1176_v13, %s11717_s14  ;;  %v1266_v13 = vrot.slane %v12459_v63, 2  ;;  %v1402_v47 = vsel %vm1396_vm7, %v1400_v11, %v1401_v25  ;;  %v1550_v58 = vor.u32 %v1549_v49, %v1548_v39  ;;  %v12603_v35 = vshrl.u32 %v12572_v31, 16 }
  0xb5   : > { %v825_v36 = vrot.slane %v12592_v38, 1  ;;  %v12607_v4 = vshll.u32 %v12589_v3, 16  ;;  %v1403_v15 = vrot.slane %v12442_v28, 3  ;;  %v9282_v10 = vcombine.low %v12417_v56, %v12429_v62 }
  0xb6   : > { %v1268_v8 = vor.u32 %v1267_v57, %v1266_v13  ;;  %v12610_v13 = vcombine.low %v487_v6, %v12596_v59  ;;  %v9289_v57 = vcombine.low %v12373_v40, %v12376_v0  ;;  %v1488_v40 = vrot.slane %v12502_v12, 3 }
  0xb7   : > { %1384 = vrot.lane.b32.xlu0 %v1328_v46, %s11719_s16  ;;  %v1552_v46 = vrot.slane %v12435_v53, 4  ;;  %v1489_v0 = vrot.slane %v12471_v26, 4  ;;  %v826_v7 = vor.u32 %v825_v36, %v12603_v35  ;;  %v946_v6 = vrot.slane %v12572_v31, 1 }
  0xb8   : > { %1463 = vrot.lane.b32.xlu1 %v1426_v1, %s11720_s18  ;;  %v1429_v1 = vsel %vm1396_vm7, %v1427_v52, %v1428_v41  ;;  %v1272_v53 = vsel %vm1251_vm6, %v1268_v8, %v1271_v9  ;;  %17701 = vst [vmem:[#allocation96_spill] sm:$0xff] %v12610_v13  ;;  %v1485_v52 = vrot.slane %v12450_v54, 3  ;;  %v1486_v41 = vrot.slane %v12453_v55, 4  ;;  %v460_v8 = vld [vmem:[%s12324_s22 + $0x24] sm:$0xf] }
  0xb9   : > { %v1553_v34 = vor.u32 %v1552_v46, %v1551_v50  ;;  %v12632_v54 = vcombine.low %v12615_v14, %v12615_v14  ;;  %v12635_v55 = vshll.u32 %v12610_v13, 16  ;;  %v12639_v9 = vld [vmem:[%s12324_s22 + $0x28] sm:$0xf]  ;;  %v1490_v11 = vor.u32 %v1489_v0, %v1488_v40  ;;  %v12653_v46 = vld [vmem:[%s12324_s22 + $0x2c] sm:$0xf] }
  0xba   : > { %v1487_v26 = vor.u32 %v1486_v41, %v1485_v52  ;;  %v12645_v25 = vshrl.u32 %v12610_v13, 16  ;;  %v1496_v36 = vrot.slane %v12467_v33, 4  ;;  %v17719_v21 = vcombine.low %v12639_v9, %v12653_v46 }
  0xbb   : > { %1223 = vrot.lane.b32.xlu0 %v1179_v51, %s11717_s14  ;;  %v1404_v51 = vrot.slane %v12447_v29, 3  ;;  %v830_v29 = vrot.slane %v12607_v4, 1  ;;  %v837_v49 = vrot.slane %v12635_v55, 1  ;;  %v12650_v50 = vshll.u32 %v12632_v54, 16 }
  0xbc   : > { %1366 = vrot.lane.b32.xlu1 %v1265_v60, %s11719_s16  ;;  %v1554_v60 = vsel %vm1477_vm8, %v1550_v58, %v1553_v34  ;;  %v1493_v58 = vrot.slane %v12464_v32, 4  ;;  %v1495_v34 = vrot.slane %v12521_v27, 3  ;;  %v12680_v32 = vld [vmem:[%s12324_s22 + $0x34] sm:$0xf] }
  0xbd   : > { %v1405_v12 = vsel %vm1396_vm7, %v1403_v15, %v1404_v51  ;;  %v831_v39 = vsel %vm687_vm2, %v826_v7, %v830_v29  ;;  %v463_v51 = vld [vmem:[%s12324_s22 + $0x30] sm:$0xf]  ;;  %v12694_v7 = vshrl.u32 %v12589_v3, 16 }
  0xbe   : > { %v1497_v52 = vor.u32 %v1496_v36, %v1495_v34  ;;  %v12697_v29 = vcombine.low %v463_v51, %v12680_v32 }
  0xbf   : > { %1465 = vrot.lane.b32.xlu0 %v1429_v1, %s11720_s18  ;;  %v12656_v1 = vcombine.low %v460_v8, %v12639_v9  ;;  %v12700_v8 = vld [vmem:[%s12324_s22 + $0x38] sm:$0xf] }
  0xc0   : > { %1608 = vrot.lane.b32.xlu1 %v1547_v2, %s11721_s28  ;;  %v9290_v2 = vcombine.low %v12359_v37, %v12362_v43  ;;  %v1491_v37 = vsel %vm1477_vm8, %v1487_v26, %v1490_v11  ;;  %v838_v43 = vor.u32 %v837_v49, %v12645_v25  ;;  %17703 = vst [vmem:[#allocation98_spill] sm:$0xff] %v12697_v29  ;;  %v949_v26 = vrot.slane %v12610_v13, 1 }
  0xc1   : > { %17702 = vst [vmem:[#allocation97_spill] sm:$0xff] %v12656_v1  ;;  %v12676_v15 = vshll.u32 %v12656_v1, 16  ;;  %v12686_v41 = vshrl.u32 %v12656_v1, 16  ;;  %v950_v11 = vrot.slane %v12632_v54, 1  ;;  %v925_v62 = vrot.slane %v12697_v29, 1 }
  0xc3   : > { %1368 = vrot.lane.b32.xlu0 %v1272_v53, %s11719_s16  ;;  %v1492_v53 = vrot.slane %v12459_v63, 3  ;;  %v842_v63 = vrot.slane %v12650_v50, 1  ;;  %v729_v0 = vrot.slane %v12676_v15, 1  ;;  %v951_v34 = vsel %vm912_vm3, %v949_v26, %v950_v11 }
  0xc4   : > { %1447 = vrot.lane.b32.xlu1 %v1402_v47, %s11720_s18  ;;  %v947_v47 = vrot.slane %v12589_v3, 1  ;;  %v1108_v11 = vrot.slane %v12650_v50, 2  ;;  %v1273_v18 = vrot.slane %v12686_v41, 2  ;;  %v1274_v19 = vrot.slane %v12676_v15, 3 }
  0xc5   : > { %v1494_v33 = vor.u32 %v1493_v58, %v1492_v53  ;;  %v843_v40 = vsel %vm687_vm2, %v838_v43, %v842_v63  ;;  %v12717_v53 = vcombine.low %v12700_v8, %v12700_v8  ;;  %v12720_v58 = vshll.u32 %v12697_v29, 16 }
  0xc6   : > { %v948_v27 = vsel %vm912_vm3, %v946_v6, %v947_v47  ;;  %v1094_v6 = vrot.slane %v12592_v38, 2  ;;  %v1099_v47 = vrot.slane %v12607_v4, 2  ;;  %v12729_v43 = vshrl.u32 %v12632_v54, 16 }
  0xc7   : > { %1610 = vrot.lane.b32.xlu0 %v1554_v60, %s11721_s28  ;;  %v1498_v49 = vsel %vm1477_vm8, %v1494_v33, %v1497_v52  ;;  %v12734_v33 = vshll.u32 %v12717_v53, 16  ;;  %v922_v52 = vrot.slane %v12656_v1, 1 }
  0xc8   : > { %1656 = vrot.lane.b32.xlu1 %v9289_v57, %s11722_s29  ;;  %v12670_v57 = vcombine.low %v12653_v46, %v12653_v46  ;;  %v1107_v26 = vrot.slane %v12729_v43, 1 }
  0xca   : > { %v12689_v60 = vshll.u32 %v12670_v57, 16 }
  0xcb   : > { %902 = vrot.lane.b32.xlu0 %v831_v39, %s11716_s25  ;;  %v1093_v39 = vrot.slane %v12603_v35, 1 }
  0xcc   : > { %1449 = vrot.lane.b32.xlu1 %v1405_v12, %s11720_s18  ;;  %v9281_v12 = vcombine.low %v12387_v42, %v12390_v61  ;;  %v730_v61 = vor.u32 %v729_v0, %v12686_v41  ;;  %v1098_v42 = vrot.slane %v12694_v7, 1  ;;  %v1102_v0 = vrot.slane %v12645_v25, 1 }
  0xcd   : > { %v1095_v36 = vor.u32 %v1094_v6, %v1093_v39  ;;  %v12748_v6 = vshrl.u32 %v12670_v57, 16  ;;  %v1027_v17 = vrot.slane %v12689_v60, 2 }
  0xce   : > { %v1100_v51 = vor.u32 %v1099_v47, %v1098_v42  ;;  %v1205_v42 = vrot.slane %v12589_v3, 2 }
  0xcf   : > { %1592 = vrot.lane.b32.xlu0 %v1491_v37, %s11721_s28  ;;  %v12726_v37 = vshrl.u32 %v12697_v29, 16  ;;  %v1026_v16 = vrot.slane %v12748_v6, 1 }
  0xd0   : > { %1658 = vrot.lane.b32.xlu1 %v9290_v2, %s11722_s29  ;;  %v734_v2 = vrot.slane %v12689_v60, 1  ;;  %v1101_v39 = vsel %vm993_vm5, %v1095_v36, %v1100_v51  ;;  %v1109_v36 = vor.u32 %v1108_v11, %v1107_v26  ;;  %v1022_v51 = vrot.slane %v12676_v15, 2 }
  0xd1   : > { %v1028_v26 = vor.u32 %v1027_v17, %v1026_v16  ;;  %v1332_v11 = vrot.slane %v12694_v7, 2  ;;  %v1030_v16 = vrot.slane %v12726_v37, 1  ;;  %v1031_v17 = vrot.slane %v12720_v58, 2 }
  0xd2   : > { %v735_v63 = vsel %vm687_vm2, %v730_v61, %v734_v2  ;;  %v746_v2 = vrot.slane %v12734_v33, 1  ;;  %v1204_v61 = vrot.slane %v12572_v31, 2 }
  0xd3   : > { %904 = vrot.lane.b32.xlu0 %v843_v40, %s11716_s25  ;;  %v923_v40 = vrot.slane %v12670_v57, 1 }
  0xd4   : > { %983 = vrot.lane.b32.xlu1 %v948_v27, %s11715_s12  ;;  %v741_v27 = vrot.slane %v12720_v58, 1  ;;  %v1206_v56 = vsel %vm1170_vm4, %v1204_v61, %v1205_v42  ;;  %v1207_v42 = vrot.slane %v12610_v13, 2 }
  0xd5   : > { %v924_v47 = vsel %vm912_vm3, %v922_v52, %v923_v40  ;;  %v1329_v40 = vrot.slane %v12603_v35, 2 }
  0xd7   : > { %1594 = vrot.lane.b32.xlu0 %v1498_v49, %s11721_s28  ;;  %v742_v49 = vor.u32 %v741_v27, %v12726_v37 }
  0xd8   : > { %1640 = vrot.lane.b32.xlu1 %v9281_v12, %s11722_s29  ;;  %v1103_v12 = vrot.slane %v12635_v55, 2 }
  0xd9   : > { %v747_v27 = vsel %vm687_vm2, %v742_v49, %v746_v2  ;;  %v1333_v49 = vrot.slane %v12607_v4, 3  ;;  %v12778_v2 = vshrl.u32 %v12717_v53, 16 }
  0xdb   : > { %886 = vrot.lane.b32.xlu0 %v735_v63, %s11716_s25  ;;  %v1021_v63 = vrot.slane %v12686_v41, 1 }
  0xdc   : > { %985 = vrot.lane.b32.xlu1 %v951_v34, %s11715_s12  ;;  %v1104_v34 = vor.u32 %v1103_v12, %v1102_v0  ;;  %v1330_v12 = vrot.slane %v12592_v38, 3 }
  0xdd   : > { %v1023_v52 = vor.u32 %v1022_v51, %v1021_v63  ;;  %v1334_v51 = vor.u32 %v1333_v49, %v1332_v11  ;;  %v1032_v49 = vor.u32 %v1031_v17, %v1030_v16  ;;  %v1276_v17 = vrot.slane %v12748_v6, 2 }
  0xde   : > { %v1110_v0 = vsel %vm993_vm5, %v1104_v34, %v1109_v36  ;;  %v1331_v34 = vor.u32 %v1330_v12, %v1329_v40  ;;  %v1180_v40 = vrot.slane %v12656_v1, 2  ;;  %v1181_v12 = vrot.slane %v12670_v57, 2 }
  0xdf   : > { %1160 = vrot.lane.b32.xlu0 %v1101_v39, %s11718_s15  ;;  %v1029_v63 = vsel %vm993_vm5, %v1023_v52, %v1028_v26  ;;  %v1339_v52 = vrot.slane %v12729_v43, 2  ;;  %v1340_v26 = vrot.slane %v12650_v50, 3  ;;  %v1431_v39 = vrot.slane %v12589_v3, 3 }
  0xe0   : > { %1642 = vrot.lane.b32.xlu1 %v9282_v10, %s11722_s29  ;;  %v926_v10 = vrot.slane %v12717_v53, 1  ;;  %v1335_v11 = vsel %vm1251_vm6, %v1331_v34, %v1334_v51  ;;  %v1182_v16 = vsel %vm1170_vm4, %v1180_v40, %v1181_v12  ;;  %v1277_v51 = vrot.slane %v12689_v60, 3 }
  0xe1   : > { %v1556_v12 = vrot.slane %v12592_v38, 4  ;;  %v1283_v38 = vrot.slane %v12778_v2, 2 }
  0xe2   : > { %v927_v61 = vsel %vm912_vm3, %v925_v62, %v926_v10  ;;  %v1036_v62 = vrot.slane %v12734_v33, 2  ;;  %v1278_v40 = vor.u32 %v1277_v51, %v1276_v17  ;;  %v1562_v17 = vrot.slane %v12645_v25, 3 }
  0xe3   : > { %888 = vrot.lane.b32.xlu0 %v747_v27, %s11716_s25  ;;  %v1035_v27 = vrot.slane %v12778_v2, 1  ;;  %v1563_v51 = vrot.slane %v12635_v55, 4 }
  0xe4   : > { %967 = vrot.lane.b32.xlu1 %v924_v47, %s11715_s12  ;;  %v1208_v47 = vrot.slane %v12632_v54, 2 }
  0xe6   : > { %v1209_v10 = vsel %vm1170_vm4, %v1207_v42, %v1208_v47  ;;  %v1037_v42 = vor.u32 %v1036_v62, %v1035_v27  ;;  %v1183_v27 = vrot.slane %v12697_v29, 2  ;;  %v1184_v62 = vrot.slane %v12717_v53, 2 }
  0xe7   : > { %1162 = vrot.lane.b32.xlu0 %v1110_v0, %s11718_s15  ;;  %v1336_v0 = vrot.slane %v12645_v25, 2  ;;  %v493_v25 = vld [vmem:[%s12324_s22 + $0xa8] sm:$0xf] }
  0xe8   : > { %1241 = vrot.lane.b32.xlu1 %v1206_v56, %s11717_s14  ;;  %v1337_v56 = vrot.slane %v12635_v55, 3  ;;  %v1038_v34 = vsel %vm993_vm5, %v1032_v49, %v1037_v42  ;;  %v12826_v49 = vld [vmem:[%s12324_s22 + $0xa0] sm:$0xf]  ;;  %v1185_v42 = vsel %vm1170_vm4, %v1183_v27, %v1184_v62 }
  0xea   : > { %v1338_v36 = vor.u32 %v1337_v56, %v1336_v0  ;;  %v1275_v0 = vor.u32 %v1274_v19, %v1273_v18  ;;  %v1555_v56 = vrot.slane %v12603_v35, 3  ;;  %v1280_v18 = vrot.slane %v12726_v37, 2 }
  0xeb   : > { %969 = vrot.lane.b32.xlu0 %v927_v61, %s11715_s12  ;;  %v1430_v61 = vrot.slane %v12572_v31, 3  ;;  %v1281_v19 = vrot.slane %v12720_v58, 3  ;;  %v1284_v35 = vrot.slane %v12734_v33, 3 }
  0xec   : > { %1144 = vrot.lane.b32.xlu1 %v1029_v63, %s11718_s15  ;;  %v1341_v63 = vor.u32 %v1340_v26, %v1339_v52  ;;  %v1558_v52 = vrot.slane %v12694_v7, 3  ;;  %v1559_v26 = vrot.slane %v12607_v4, 4  ;;  %v1279_v4 = vsel %vm1251_vm6, %v1275_v0, %v1278_v40  ;;  %v12863_v40 = vld [vmem:[%s12324_s22 + $0xac] sm:$0xf] }
  0xed   : > { %v1557_v7 = vor.u32 %v1556_v12, %v1555_v56  ;;  %v1282_v27 = vor.u32 %v1281_v19, %v1280_v18  ;;  %v1285_v62 = vor.u32 %v1284_v35, %v1283_v38  ;;  %17706 = vst [vmem:[#allocation101_spill] sm:$0xff] %v12863_v40  ;;  %v1564_v12 = vor.u32 %v1563_v51, %v1562_v17  ;;  %v12887_v35 = vld [vmem:[%s12324_s22 + $0xb0] sm:$0xf] }
  0xee   : > { %v1342_v3 = vsel %vm1251_vm6, %v1338_v36, %v1341_v63  ;;  %v1433_v36 = vrot.slane %v12610_v13, 3  ;;  %v12881_v19 = vcombine.low %v493_v25, %v12863_v40  ;;  %17709 = vst [vmem:[#allocation104_spill] sm:$0xff] %v12887_v35  ;;  %v1500_v51 = vrot.slane %v12676_v15, 4 }
  0xef   : > { %1243 = vrot.lane.b32.xlu0 %v1209_v10, %s11717_s14  ;;  %v1432_v10 = vsel %vm1396_vm7, %v1430_v61, %v1431_v39  ;;  %v1434_v39 = vrot.slane %v12632_v54, 3  ;;  %v1560_v61 = vor.u32 %v1559_v26, %v1558_v52  ;;  %v12842_v54 = vld [vmem:[%s12324_s22 + $0xa4] sm:$0xf]  ;;  %v1286_v52 = vsel %vm1251_vm6, %v1282_v27, %v1285_v62 }
  0xf0   : > { %1386 = vrot.lane.b32.xlu1 %v1335_v11, %s11719_s16  ;;  %v490_v11 = vld [vmem:[%s12324_s22 + $0x9c] sm:$0xf]  ;;  %17705 = vst [vmem:[#allocation100_spill] sm:$0xff] %v12842_v54  ;;  %17707 = vst [vmem:[#allocation102_spill] sm:$0xff] %v12881_v19  ;;  %v1502_v27 = vrot.slane %v12748_v6, 3  ;;  %v1503_v62 = vrot.slane %v12689_v60, 4  ;;  %v17711_v60 = vcombine.low %v12559_v30, %v12575_v5 }
  0xf1   : > { %v12839_v63 = vcombine.low %v490_v11, %v12826_v49  ;;  %v1435_v0 = vsel %vm1396_vm7, %v1433_v36, %v1434_v39  ;;  %v1561_v56 = vsel %vm1477_vm8, %v1557_v7, %v1560_v61  ;;  %v1409_v7 = vrot.slane %v12697_v29, 3 }
  0xf2   : > { %v1410_v61 = vrot.slane %v12717_v53, 3  ;;  %v1504_v25 = vor.u32 %v1503_v62, %v1502_v27  ;;  %v1510_v62 = vrot.slane %v12734_v33, 4  ;;  %v955_v30 = vrot.slane %v12881_v19, 1 }
  0xf3   : > { %1146 = vrot.lane.b32.xlu0 %v1038_v34, %s11718_s15  ;;  %17704 = vst [vmem:[#allocation99_spill] sm:$0xff] %v12839_v63  ;;  %v1406_v34 = vrot.slane %v12656_v1, 3  ;;  %v12859_v55 = vshll.u32 %v12839_v63, 16  ;;  %v12873_v11 = vshrl.u32 %v12839_v63, 16  ;;  %v1210_v13 = vrot.slane %v12839_v63, 2 }
  0xf4   : > { %1225 = vrot.lane.b32.xlu1 %v1182_v16, %s11717_s14  ;;  %v1407_v16 = vrot.slane %v12670_v57, 3  ;;  %v12856_v57 = vcombine.low %v12842_v54, %v12842_v54  ;;  %v1411_v15 = vsel %vm1396_vm7, %v1409_v7, %v1410_v61  ;;  %v1506_v7 = vrot.slane %v12726_v37, 3 }
  0xf5   : > { %v849_v39 = vrot.slane %v12859_v55, 1 }
  0xf6   : > { %v12878_v18 = vshll.u32 %v12856_v57, 16 }
  0xf7   : > { %1388 = vrot.lane.b32.xlu0 %v1342_v3, %s11719_s16  ;;  %v1565_v3 = vrot.slane %v12729_v43, 3  ;;  %v11215_v43 = vld [vmem:[%s17523_s1 + $0x18] sm:$0x3f]   ;;  %v850_v53 = vor.u32 %v849_v39, %v12873_v11  ;;  %v952_v39 = vrot.slane %v12839_v63, 1 }
  0xf8   : > { %1467 = vrot.lane.b32.xlu1 %v1432_v10, %s11720_s18  ;;  %v1566_v10 = vrot.slane %v12650_v50, 4  ;;  %v1408_v50 = vsel %vm1396_vm7, %v1406_v34, %v1407_v16  ;;  %v1499_v34 = vrot.slane %v12686_v41, 3  ;;  %v11216_v16 = vld [vmem:[%s17523_s1 + $0x10] sm:$0xff]   ;;  %v854_v41 = vrot.slane %v12878_v18, 1 }
  0xfa   : > { %v1567_v26 = vor.u32 %v1566_v10, %v1565_v3  ;;  %v12906_v3 = vcombine.low %v12887_v35, %v12887_v35  ;;  %v12909_v10 = vshll.u32 %v12881_v19, 16  ;;  %v1501_v6 = vor.u32 %v1500_v51, %v1499_v34 }
  0xfb   : > { %1227 = vrot.lane.b32.xlu0 %v1185_v42, %s11717_s14  ;;  %v11723_v42 = vmov 65535   ;;  %v1507_v34 = vrot.slane %v12720_v58, 4  ;;  %v469_v58 = vld [vmem:[%s12324_s22 + $0x48] sm:$0xf] }
  0xfc   : > { %1370 = vrot.lane.b32.xlu1 %v1279_v4, %s11719_s16  ;;  %v2065_v36 = vsel %vm1396_vm7, 4294967295, %v11723_v42  ;;  %v1568_v17 = vsel %vm1477_vm8, %v1564_v12, %v1567_v26  ;;  %v861_v26 = vrot.slane %v12909_v10, 1  ;;  %v12932_v42 = vshll.u32 %v12906_v3, 16 }
  0xfd   : > { %v12884_v38 = vsel %vm1170_vm4, %v2065_v36, 0  ;;  %v12935_v36 = vld [vmem:[%s12324_s22 + $0x44] sm:$0xf]  ;;  %v1505_v61 = vsel %vm1477_vm8, %v1501_v6, %v1504_v25  ;;  %v956_v47 = vrot.slane %v12906_v3, 1  ;;  %v13028_v23 = vshrl.u32 %v12906_v3, 16 }
  0xfe   : > { %17708 = vst [vmem:[#allocation103_spill] sm:$0xff] %v12884_v38  ;;  %v2068_v4 = vand.u32 %v11215_v43, %v12884_v38  ;;  %v12922_v43 = vshrl.u32 %v12881_v19, 16  ;;  %17713 = vst [vmem:[#allocation107_spill] sm:$0xff] %v12935_v36  ;;  %v866_v37 = vrot.slane %v12932_v42, 1  ;;  %v1211_v38 = vrot.slane %v12856_v57, 2 }
  0xff   : > { %1469 = vrot.lane.b32.xlu0 %v1435_v0, %s11720_s18  ;;  %v466_v0 = vld [vmem:[%s12324_s22 + $0x3c] sm:$0xf] }
 0x100   : > { %1612 = vrot.lane.b32.xlu1 %v1561_v56, %s11721_s28  ;;  %v12913_v56 = vld [vmem:[%s12324_s22 + $0x40] sm:$0xf]  ;;  %10825 = vmatprep.subr.bf16.mxu1 %v2068_v4  ;;  %v862_v27 = vor.u32 %v861_v26, %v12922_v43 }
 0x101   : > { %17710 = vst [vmem:[#allocation105_spill] sm:$0xff] %v12913_v56  ;;  %10089 = vmatprep.subr.bf16.mxu0 %v2068_v4  ;;  %10827 = vmatpush3.bf16.msra.mxu1 %v2068_v4 }
 0x102   : > { %10090 = vmatpush3.bf16.msra.mxu0 %v2068_v4  ;;  %10826 = vmatprep.subr.bf16.mxu1 %v11216_v16  ;;  %v953_v4 = vrot.slane %v12856_v57, 1  ;;  %v867_v26 = vsel %vm687_vm2, %v862_v27, %v866_v37  ;;  %v1111_v27 = vrot.slane %v12873_v11, 1 }
 0x103   : > { %1372 = vrot.lane.b32.xlu0 %v1286_v52, %s11719_s16  ;;  %10091 = vmatprep.subr.bf16.mxu0 %v11216_v16  ;;  %v855_v52 = vsel %vm687_vm2, %v850_v53, %v854_v41 }
 0x104   : > { %1451 = vrot.lane.b32.xlu1 %v1408_v50, %s11720_s18  ;;  %v12925_v50 = vcombine.low %v466_v0, %v12913_v56  ;;  %v12965_v0 = vld [vmem:[%s12324_s22 + $0x4c] sm:$0xf] }
 0x105   : > { %10828 = vmatpush3.bf16.msra.mxu1 %v11216_v16  ;;  %17714 = vst [vmem:[#allocation108_spill] sm:$0xff] %v12965_v0 }
 0x106   : > { %17712 = vst [vmem:[#allocation106_spill] sm:$0xff] %v12925_v50  ;;  %10092 = vmatpush3.bf16.msra.mxu0 %v11216_v16  ;;  %v12953_v51 = vshll.u32 %v12925_v50, 16  ;;  %v1509_v16 = vrot.slane %v12778_v2, 3  ;;  %v17715_v2 = vcombine.low %v12596_v59, %v12615_v14  ;;  %v12976_v33 = vshrl.u32 %v12925_v50, 16 }
 0x107   : > { %1614 = vrot.lane.b32.xlu0 %v1568_v17, %s11721_s28  ;;  %v12950_v17 = vcombine.low %v12935_v36, %v12935_v36  ;;  %v928_v46 = vrot.slane %v12925_v50, 1 }
 0x108   : > { %1660 = vrot.lane.b32.xlu1 %v17711_v60, %s11722_s29  ;;  %v12927_v12 = vpop.permute.xlu0 %981  ;;  %v954_v60 = vsel %vm912_vm3, %v952_v39, %v953_v4  ;;  %v753_v6 = vrot.slane %v12953_v51, 1  ;;  %v1508_v39 = vor.u32 %v1507_v34, %v1506_v7  ;;  %v1511_v4 = vor.u32 %v1510_v62, %v1509_v16 }
 0x109   : > { %v12980_v25 = vshll.u32 %v12950_v17, 16  ;;  %v1112_v7 = vrot.slane %v12859_v55, 2  ;;  %v1117_v62 = vrot.slane %v12878_v18, 2  ;;  %v13055_v1 = vshrl.u32 %v12950_v17, 16 }
 0x10a   : > { %v12939_v5 = vpop.permute.xlu1 %979  ;;  %v754_v34 = vor.u32 %v753_v6, %v12976_v33  ;;  %v957_v6 = vsel %vm912_vm3, %v955_v30, %v956_v47  ;;  %v1040_v36 = vrot.slane %v12953_v51, 2 }
 0x10b   : > { %906 = vrot.lane.b32.xlu0 %v855_v52, %s11716_s25  ;;  %v12983_v52 = vshrl.u32 %v12856_v57, 16  ;;  %v758_v37 = vrot.slane %v12980_v25, 1  ;;  %v1044_v56 = vrot.slane %v13055_v1, 1  ;;  %v1045_v35 = vrot.slane %v12980_v25, 2 }
 0x10c   : > { %1453 = vrot.lane.b32.xlu1 %v1411_v15, %s11720_s18 }
 0x10d   : > { %v12959_v53 = vpop.permute.xlu0 %898  ;;  %v1116_v16 = vrot.slane %v12983_v52, 1 }
 0x10e   : > { %v12961_v41 = vpop.permute.xlu1 %963 }
 0x10f   : > { %1596 = vrot.lane.b32.xlu0 %v1505_v61, %s11721_s28  ;;  %v12987_v61 = vcombine.low %v469_v58, %v12965_v0  ;;  %v1512_v58 = vsel %vm1477_vm8, %v1508_v39, %v1511_v4  ;;  %v759_v39 = vsel %vm687_vm2, %v754_v34, %v758_v37  ;;  %v1113_v4 = vor.u32 %v1112_v7, %v1111_v27 }
 0x110   : > { %1662 = vrot.lane.b32.xlu1 %v17715_v2, %s11722_s29  ;;  %v12994_v2 = vld [vmem:[%s12324_s22 + $0x50] sm:$0xf]  ;;  %v1118_v22 = vor.u32 %v1117_v62, %v1116_v16  ;;  %v929_v27 = vrot.slane %v12950_v17, 1  ;;  %v1120_v7 = vrot.slane %v12922_v43, 1  ;;  %v1121_v34 = vrot.slane %v12909_v10, 2 }
 0x111   : > { %17716 = vst [vmem:[#allocation109_spill] sm:$0xff] %v12987_v61  ;;  %v12989_v59 = vpop.permute.xlu0 %900  ;;  %17717 = vst [vmem:[#allocation110_spill] sm:$0xff] %v12994_v2  ;;  %v13011_v15 = vcombine.low %v12994_v2, %v12994_v2  ;;  %v13014_v20 = vshll.u32 %v12987_v61, 16  ;;  %v13031_v24 = vshrl.u32 %v12987_v61, 16  ;;  %v1125_v37 = vrot.slane %v13028_v23, 1 }
 0x112   : > { %v12991_v14 = vpop.permute.xlu1 %1237  ;;  %v1126_v16 = vrot.slane %v12932_v42, 2  ;;  %v1119_v62 = vsel %vm993_vm5, %v1113_v4, %v1118_v22  ;;  %v17721_v22 = vcombine.low %v12680_v32, %v12700_v8  ;;  %v1122_v4 = vor.u32 %v1121_v34, %v1120_v7 }
 0x113   : > { %908 = vrot.lane.b32.xlu0 %v867_v26, %s11716_s25  ;;  %v765_v29 = vrot.slane %v13014_v20, 1  ;;  %v13035_v47 = vshll.u32 %v13011_v15, 16  ;;  %v1039_v2 = vrot.slane %v12976_v33, 1  ;;  %v1212_v32 = vsel %vm1170_vm4, %v1210_v13, %v1211_v38 }
 0x114   : > { %987 = vrot.lane.b32.xlu1 %v954_v60, %s11715_s12  ;;  %v1127_v31 = vor.u32 %v1126_v16, %v1125_v37  ;;  %v931_v8 = vrot.slane %v12987_v61, 1  ;;  %v1346_v7 = vrot.slane %v12983_v52, 2  ;;  %v1347_v34 = vrot.slane %v12878_v18, 3 }
 0x115   : > { %v13016_v26 = vpop.permute.xlu0 %884  ;;  %v770_v30 = vrot.slane %v13035_v47, 1  ;;  %v1041_v16 = vor.u32 %v1040_v36, %v1039_v2  ;;  %v1046_v13 = vor.u32 %v1045_v35, %v1044_v56  ;;  %v13089_v38 = vshrl.u32 %v13011_v15, 16 }
 0x116   : > { %17718 = vst [vmem:[#allocation111_spill] sm:$0xff] %v13016_v26  ;;  %v13018_v60 = vpop.permute.xlu1 %882  ;;  %v1128_v37 = vsel %vm993_vm5, %v1122_v4, %v1127_v31  ;;  %v1348_v28 = vor.u32 %v1347_v34, %v1346_v7  ;;  %v1048_v31 = vrot.slane %v13031_v24, 1  ;;  %v1049_v35 = vrot.slane %v13014_v20, 2 }
 0x117   : > { %1598 = vrot.lane.b32.xlu0 %v1512_v58, %s11721_s28  ;;  %v766_v58 = vor.u32 %v765_v29, %v13031_v24  ;;  %v930_v29 = vsel %vm912_vm3, %v928_v46, %v929_v27  ;;  %v932_v46 = vrot.slane %v13011_v15, 1  ;;  %v1344_v27 = vrot.slane %v12859_v55, 3 }
 0x118   : > { %1644 = vrot.lane.b32.xlu1 %v17719_v21, %s11722_s29  ;;  %v1047_v36 = vsel %vm993_vm5, %v1041_v16, %v1046_v13  ;;  %v1053_v2 = vrot.slane %v13089_v38, 1  ;;  %v1054_v4 = vrot.slane %v13035_v47, 2  ;;  %v1350_v7 = vrot.slane %v12922_v43, 2 }
 0x119   : > { %v13039_v9 = vpop.permute.xlu0 %1158  ;;  %v771_v0 = vsel %vm687_vm2, %v766_v58, %v770_v30  ;;  %v1343_v30 = vrot.slane %v12873_v11, 2  ;;  %v933_v56 = vsel %vm912_vm3, %v931_v8, %v932_v46  ;;  %v1353_v16 = vrot.slane %v13028_v23, 2 }
 0x11a   : > { %v13041_v21 = vpop.permute.xlu1 %1156  ;;  %v1055_v34 = vor.u32 %v1054_v4, %v1053_v2  ;;  %v1354_v13 = vrot.slane %v12932_v42, 3 }
 0x11b   : > { %890 = vrot.lane.b32.xlu0 %v759_v39, %s11716_s25 }
 0x11c   : > { %989 = vrot.lane.b32.xlu1 %v957_v6, %s11715_s12 }
 0x11d   : > { %v13057_v39 = vpop.permute.xlu0 %965 }
 0x11e   : > { %17720 = vst [vmem:[#allocation112_spill] sm:$0xff] %v13057_v39  ;;  %v13059_v6 = vpop.permute.xlu1 %1140  ;;  %v1345_v39 = vor.u32 %v1344_v27, %v1343_v30  ;;  %v1187_v30 = vrot.slane %v12950_v17, 2  ;;  %v1050_v27 = vor.u32 %v1049_v35, %v1048_v31  ;;  %v1436_v31 = vrot.slane %v12839_v63, 3 }
 0x11f   : > { %1164 = vrot.lane.b32.xlu0 %v1119_v62, %s11718_s15  ;;  %v1290_v35 = vrot.slane %v13055_v1, 2 }
 0x120   : > { %1646 = vrot.lane.b32.xlu1 %v17721_v22, %s11722_s29  ;;  %v1213_v22 = vrot.slane %v12881_v19, 2  ;;  %v1349_v46 = vsel %vm1251_vm6, %v1345_v39, %v1348_v28  ;;  %v1287_v28 = vrot.slane %v12976_v33, 2  ;;  %v1288_v39 = vrot.slane %v12953_v51, 3 }
 0x121   : > { %v13074_v62 = vpop.permute.xlu0 %1239  ;;  %v1056_v2 = vsel %vm993_vm5, %v1050_v27, %v1055_v34  ;;  %v1569_v34 = vrot.slane %v12873_v11, 3  ;;  %v1440_v11 = vrot.slane %v12906_v3, 3 }
 0x122   : > { %v13076_v40 = vpop.permute.xlu1 %1382  ;;  %v1289_v27 = vor.u32 %v1288_v39, %v1287_v28  ;;  %v1573_v28 = vrot.slane %v12878_v18, 4  ;;  %v496_v39 = vld [vmem:[%s12324_s22 + $0xb4] sm:$0xf]  ;;  %v1294_v18 = vrot.slane %v13031_v24, 2 }
 0x123   : > { %892 = vrot.lane.b32.xlu0 %v771_v0, %s11716_s25 }
 0x124   : > { %971 = vrot.lane.b32.xlu1 %v930_v29, %s11715_s12  ;;  %v1214_v29 = vrot.slane %v12906_v3, 2 }
 0x125   : > { %v13091_v58 = vpop.permute.xlu0 %1142 }
 0x126   : > { %17722 = vst [vmem:[#allocation113_spill] sm:$0xff] %v13091_v58  ;;  %v13093_v0 = vpop.permute.xlu1 %1221  ;;  %v1215_v8 = vsel %vm1170_vm4, %v1213_v22, %v1214_v29  ;;  %v1690_v29 = vsel %vm1670_vm9, %v12380_v45, %v12959_v53  ;;  %v1189_v53 = vrot.slane %v12987_v61, 2 }
 0x127   : > { %1166 = vrot.lane.b32.xlu0 %v1128_v37, %s11718_s15  ;;  %v1351_v37 = vrot.slane %v12909_v10, 3 }
 0x128   : > { %1245 = vrot.lane.b32.xlu1 %v1212_v32, %s11717_s14  ;;  %v1186_v32 = vrot.slane %v12925_v50, 2 }
 0x129   : > { %v13105_v58 = vpop.permute.xlu0 %1384  ;;  %v1352_v4 = vor.u32 %v1351_v37, %v1350_v7  ;;  %v1570_v37 = vrot.slane %v12859_v55, 4  ;;  %v1439_v55 = vrot.slane %v12881_v19, 3 }
 0x12a   : > { %v13107_v26 = vpop.permute.xlu1 %1463  ;;  %v1188_v22 = vsel %vm1170_vm4, %v1186_v32, %v1187_v30  ;;  %v1355_v32 = vor.u32 %v1354_v13, %v1353_v16  ;;  %v1437_v30 = vrot.slane %v12856_v57, 3  ;;  %v1572_v13 = vrot.slane %v12983_v52, 3 }
 0x12b   : > { %973 = vrot.lane.b32.xlu0 %v933_v56, %s11715_s12 }
 0x12c   : > { %1148 = vrot.lane.b32.xlu1 %v1047_v36, %s11718_s15  ;;  %v1291_v36 = vrot.slane %v12980_v25, 3  ;;  %v1356_v16 = vsel %vm1251_vm6, %v1352_v4, %v1355_v32  ;;  %v1571_v32 = vor.u32 %v1570_v37, %v1569_v34  ;;  %v1576_v34 = vrot.slane %v12922_v43, 3 }
 0x12d   : > { %v13119_v54 = vpop.permute.xlu0 %1223  ;;  %v1577_v37 = vrot.slane %v12909_v10, 4 }
 0x12e   : > { %17723 = vst [vmem:[#allocation114_spill] sm:$0xff] %v13119_v54  ;;  %v13121_v56 = vpop.permute.xlu1 %1366  ;;  %v1292_v7 = vor.u32 %v1291_v36, %v1290_v35  ;;  %v13164_v36 = vld [vmem:[%s12324_s22 + $0xbc] sm:$0xf] }
 0x12f   : > { %1247 = vrot.lane.b32.xlu0 %v1215_v8, %s11717_s14  ;;  %v1190_v8 = vrot.slane %v13011_v15, 2  ;;  %v13202_v43 = vcombine.low %v13164_v36, %v13164_v36 }
 0x130   : > { %1390 = vrot.lane.b32.xlu1 %v1349_v46, %s11719_s16  ;;  %v1723_v46 = vsel %vm1703_vm10, %v1690_v29, %v12939_v5  ;;  %v1438_v5 = vsel %vm1396_vm7, %v1436_v31, %v1437_v30  ;;  %v1295_v31 = vrot.slane %v13014_v20, 3  ;;  %v1293_v3 = vsel %vm1251_vm6, %v1289_v27, %v1292_v7 }
 0x131   : > { %v13136_v54 = vpop.permute.xlu0 %1465  ;;  %v1756_v57 = vsel %vm1736_vm11, %v1723_v46, %v13041_v21  ;;  %v13154_v21 = vld [vmem:[%s12324_s22 + $0xb8] sm:$0xf]  ;;  %v1191_v35 = vsel %vm1170_vm4, %v1189_v53, %v1190_v8  ;;  %v1297_v30 = vrot.slane %v13089_v38, 2  ;;  %v1574_v53 = vor.u32 %v1573_v28, %v1572_v13 }
 0x132   : > { %v1609_v45 = vpop.permute.xlu1 %1608  ;;  %v1789_v52 = vsel %vm1769_vm12, %v1756_v57, %v12991_v14  ;;  %v1298_v8 = vrot.slane %v13035_v47, 3  ;;  %v13182_v46 = vcombine.low %v496_v39, %v13154_v21  ;;  %v1441_v7 = vsel %vm1396_vm7, %v1439_v55, %v1440_v11 }
 0x133   : > { %1150 = vrot.lane.b32.xlu0 %v1056_v2, %s11718_s15  ;;  %v1822_v4 = vsel %vm1802_vm13, %v1789_v52, %v13076_v40  ;;  %v1692_v40 = vsel %vm1670_vm9, %v12366_v44, %v12989_v59  ;;  %v1580_v13 = vrot.slane %v12932_v42, 4  ;;  %v1296_v44 = vor.u32 %v1295_v31, %v1294_v18  ;;  %v17750_v2 = vld [vmem:[#allocation110_spill] sm:$0xff] }
 0x134   : > { %1229 = vrot.lane.b32.xlu1 %v1188_v22, %s11717_s14  ;;  %v1855_v14 = vsel %vm1835_vm14, %v1822_v4, %v13107_v26  ;;  %17724 = vst [vmem:[#allocation115_spill] sm:$0xff] %v13182_v46  ;;  %v1412_v59 = vrot.slane %v12925_v50, 3  ;;  %v1725_v10 = vsel %vm1703_vm10, %v1692_v40, %v12927_v12  ;;  %v1299_v42 = vor.u32 %v1298_v8, %v1297_v30 }
 0x135   : > { %v13156_v29 = vpop.permute.xlu0 %1368  ;;  %v1888_v57 = vsel %vm1868_vm15, %v1855_v14, %v1609_v45  ;;  %v1413_v45 = vrot.slane %v12950_v17, 3  ;;  %v13210_v28 = vshll.u32 %v13182_v46, 16  ;;  %v1758_v17 = vsel %vm1736_vm11, %v1725_v10, %v13039_v9 }
 0x136   : > { %v13158_v22 = vpop.permute.xlu1 %1447  ;;  %v1791_v12 = vsel %vm1769_vm12, %v1758_v17, %v13074_v62  ;;  %v1578_v55 = vor.u32 %v1577_v37, %v1576_v34  ;;  %v13226_v9 = vshll.u32 %v13202_v43, 16  ;;  %v1300_v62 = vsel %vm1251_vm6, %v1296_v44, %v1299_v42  ;;  %v13252_v37 = vld [vmem:[%s12324_s22 + $0x58] sm:$0xf]  ;;  %v472_v17 = vld [vmem:[%s12324_s22 + $0x54] sm:$0xf] }
 0x137   : > { %1392 = vrot.lane.b32.xlu0 %v1356_v16, %s11719_s16  ;;  %v1824_v52 = vsel %vm1802_vm13, %v1791_v12, %v13105_v58  ;;  %v1414_v18 = vsel %vm1396_vm7, %v1412_v59, %v1413_v45  ;;  %v13232_v4 = vshrl.u32 %v13182_v46, 16  ;;  %v873_v58 = vrot.slane %v13210_v28, 1  ;;  %17728 = vst [vmem:[#allocation119_spill] sm:$0xff] %v13252_v37 }
 0x138   : > { %1471 = vrot.lane.b32.xlu1 %v1438_v5, %s11720_s18  ;;  %v1579_v5 = vrot.slane %v13028_v23, 3  ;;  %v1575_v23 = vsel %vm1477_vm8, %v1571_v32, %v1574_v53  ;;  %v1857_v31 = vsel %vm1835_vm14, %v1824_v52, %v13136_v54  ;;  %v13237_v32 = vld [vmem:[%s12324_s22 + $0xc4] sm:$0xf]  ;;  %v1674_v30 = vsel %vm1670_vm9, %v12395_v48, %v13018_v60  ;;  %v13255_v48 = vld [vmem:[%s12324_s22 + $0x5c] sm:$0xf] }
 0x139   : > { %v1611_v16 = vpop.permute.xlu0 %1610  ;;  %17726 = vst [vmem:[#allocation117_spill] sm:$0xff] %v13237_v32  ;;  %v1415_v8 = vrot.slane %v12987_v61, 3  ;;  %v1416_v40 = vrot.slane %v13011_v15, 3  ;;  %v1514_v34 = vrot.slane %v12953_v51, 4  ;;  %17729 = vst [vmem:[#allocation120_spill] sm:$0xff] %v13255_v48  ;;  %v878_v60 = vrot.slane %v13226_v9, 1 }
 0x13a   : > { %v1657_v27 = vpop.permute.xlu1 %1656  ;;  %v1581_v11 = vor.u32 %v1580_v13, %v1579_v5  ;;  %v1890_v14 = vsel %vm1868_vm15, %v1857_v31, %v1611_v16  ;;  %v1516_v15 = vrot.slane %v13055_v1, 3  ;;  %v13262_v16 = vld [vmem:[%s12324_s22 + $0xc8] sm:$0xf]  ;;  %v874_v13 = vor.u32 %v873_v58, %v13232_v4 }
 0x13b   : > { %v13191_v26 = vsel %vm1901_vm1, %v1888_v57, %v1657_v27  ;;  %1231 = vrot.lane.b32.xlu0 %v1191_v35, %s11717_s14  ;;  %v1517_v44 = vrot.slane %v12980_v25, 4  ;;  %v1520_v1 = vrot.slane %v13031_v24, 3  ;;  %v1524_v42 = vrot.slane %v13035_v47, 4  ;;  %v17749_v51 = vld [vmem:[#allocation108_spill] sm:$0xff] }
 0x13c   : > { %17725 = vst [vmem:[#allocation116_spill] sm:$0xff] %v13191_v26  ;;  %1374 = vrot.lane.b32.xlu1 %v1293_v3, %s11719_s16  ;;  %10109 = vmatprep.mubr.msk.bf16.mxu1 %vm2030_vm0, %v13191_v26  ;;  %v499_v3 = vld [vmem:[%s12324_s22 + $0xc0] sm:$0xf]  ;;  %v1582_v27 = vsel %vm1477_vm8, %v1578_v55, %v1581_v11  ;;  %v1417_v25 = vsel %vm1396_vm7, %v1415_v8, %v1416_v40  ;;  %v958_v55 = vrot.slane %v13182_v46, 1  ;;  %v959_v58 = vrot.slane %v13202_v43, 1 }
 0x13d   : > { %v13214_v39 = vpop.permute.xlu0 %902  ;;  %v13265_v5 = vcombine.low %v499_v3, %v13237_v32  ;;  %v13291_v24 = vcombine.low %v13262_v16, %v13262_v16  ;;  %v879_v52 = vsel %vm687_vm2, %v874_v13, %v878_v60  ;;  %v17734_v8 = vld [vmem:[#allocation94_spill] sm:$0xff]  ;;  %v13340_v13 = vshrl.u32 %v13202_v43, 16 }
 0x13e   : > { %v13216_v35 = vpop.permute.xlu1 %1449 }
 0x13f   : > { %1473 = vrot.lane.b32.xlu0 %v1441_v7, %s11720_s18  ;;  %v1513_v7 = vrot.slane %v12976_v33, 3  ;;  %v1707_v33 = vsel %vm1703_vm10, %v1674_v30, %v12961_v41  ;;  %v1523_v41 = vrot.slane %v13089_v38, 3 }
 0x140   : > { %1616 = vrot.lane.b32.xlu1 %v1575_v23, %s11721_s28  ;;  %v1740_v59 = vsel %vm1736_vm11, %v1707_v33, %v13059_v6  ;;  %v1521_v23 = vrot.slane %v13014_v20, 4  ;;  %v17730_v20 = vld [vmem:[#allocation100_spill] sm:$0xff] }
 0x141   : > { %v1593_v54 = vpop.permute.xlu0 %1592  ;;  %v1773_v12 = vsel %vm1769_vm12, %v1740_v59, %v13093_v0  ;;  %v17731_v38 = vcombine.low %v12826_v49, %v17730_v20  ;;  %v1515_v47 = vor.u32 %v1514_v34, %v1513_v7  ;;  %v13302_v0 = vshll.u32 %v13265_v5, 16  ;;  %v17735_v34 = vld [vmem:[#allocation112_spill] sm:$0xff]  ;;  %v17737_v59 = vld [vmem:[#allocation113_spill] sm:$0xff] }
 0x142   : > { %v1659_v53 = vpop.permute.xlu1 %1658  ;;  %v1806_v6 = vsel %vm1802_vm13, %v1773_v12, %v13121_v56  ;;  %v13308_v56 = vcombine.low %v472_v17, %v13252_v37  ;;  %v1522_v3 = vor.u32 %v1521_v23, %v1520_v1  ;;  %v1525_v30 = vor.u32 %v1524_v42, %v1523_v41  ;;  %v13344_v1 = vld [vmem:[%s12324_s22 + $0x64] sm:$0xf] }
 0x143   : > { %v13246_v57 = vsel %vm1901_vm1, %v1890_v14, %v1659_v53  ;;  %1376 = vrot.lane.b32.xlu0 %v1300_v62, %s11719_s16  ;;  %v1839_v11 = vsel %vm1835_vm14, %v1806_v6, %v13158_v22  ;;  %v13316_v22 = vshll.u32 %v13291_v24, 16  ;;  %v17733_v53 = vld [vmem:[#allocation111_spill] sm:$0xff]  ;;  %v13329_v7 = vcombine.low %v13255_v48, %v13255_v48  ;;  %v17738_v6 = vld [vmem:[#allocation114_spill] sm:$0xff] }
 0x144   : > { %17727 = vst [vmem:[#allocation118_spill] sm:$0xff] %v13246_v57  ;;  %1455 = vrot.lane.b32.xlu1 %v1414_v18, %s11720_s18  ;;  %10110 = vmatmul.mubr.msk.bf16.vlgmr.msra.gmra.mxu1 %vm2030_vm0, %v13246_v57  ;;  %v1518_v18 = vor.u32 %v1517_v44, %v1516_v15  ;;  %v1872_v31 = vsel %vm1868_vm15, %v1839_v11, %v1593_v54  ;;  %v13324_v54 = vshrl.u32 %v13265_v5, 16  ;;  %v13337_v33 = vshll.u32 %v13308_v56, 16  ;;  %v475_v44 = vld [vmem:[%s12324_s22 + $0x60] sm:$0xf] }
 0x145   : > { %v13278_v45 = vpop.permute.xlu0 %904  ;;  %v1676_v40 = vsel %vm1670_vm9, %v17734_v8, %v17733_v53  ;;  %17736 = vst [vmem:[#allocation111_spill] sm:$0xff] %v13344_v1  ;;  %v960_v17 = vsel %vm912_vm3, %v958_v55, %v959_v58  ;;  %v1526_v12 = vsel %vm1477_vm8, %v1522_v3, %v1525_v30  ;;  %v1130_v11 = vrot.slane %v13210_v28, 2  ;;  %v17739_v55 = vld [vmem:[#allocation101_spill] sm:$0xff] }
 0x146   : > { %v13280_v10 = vpop.permute.xlu1 %983  ;;  %v1709_v60 = vsel %vm1703_vm10, %v1676_v40, %v17735_v34  ;;  %v1519_v15 = vsel %vm1477_vm8, %v1515_v47, %v1518_v18  ;;  %v13359_v47 = vshrl.u32 %v13308_v56, 16  ;;  %v17740_v18 = vld [vmem:[#allocation104_spill] sm:$0xff]  ;;  %v13371_v58 = vshll.u32 %v13329_v7, 16 }
 0x147   : > { %1618 = vrot.lane.b32.xlu0 %v1582_v27, %s11721_s28  ;;  %v1947_v27 = vrot.slane %v13302_v0, 1  ;;  %v1742_v23 = vsel %vm1736_vm11, %v1709_v60, %v17737_v59  ;;  %v13374_v3 = vcombine.low %v475_v44, %v13344_v1  ;;  %v1134_v53 = vrot.slane %v13340_v13, 1  ;;  %v13385_v60 = vld [vmem:[%s12324_s22 + $0x68] sm:$0xf] }
 0x148   : > { %1664 = vrot.lane.b32.xlu1 %v17731_v38, %s11722_s29  ;;  %v1775_v20 = vsel %vm1769_vm12, %v1742_v23, %v17738_v6  ;;  %v1952_v38 = vrot.slane %v13316_v22, 1  ;;  %v1135_v8 = vrot.slane %v13226_v9, 2  ;;  %17742 = vst [vmem:[#allocation94_spill] sm:$0xff] %v13385_v60  ;;  %v17751_v57 = vcombine.low %v17749_v51, %v17750_v2 }
 0x149   : > { %v1595_v62 = vpop.permute.xlu0 %1594  ;;  %v13394_v59 = vshll.u32 %v13374_v3, 16  ;;  %v1058_v61 = vrot.slane %v13337_v33, 2  ;;  %v1063_v48 = vrot.slane %v13371_v58, 2  ;;  %v937_v51 = vrot.slane %v13374_v3, 1 }
 0x14a   : > { %v1641_v49 = vpop.permute.xlu1 %1640  ;;  %v1136_v6 = vor.u32 %v1135_v8, %v1134_v53  ;;  %v13425_v53 = vshrl.u32 %v13291_v24, 16 }
 0x14b   : > { %v13313_v14 = vsel %vm1901_vm1, %v1872_v31, %v1641_v49  ;;  %910 = vrot.lane.b32.xlu0 %v879_v52, %s11716_s25  ;;  %v1808_v52 = vsel %vm1802_vm13, %v1775_v20, %v13156_v29  ;;  %v17741_v31 = vcombine.low %v17739_v55, %v17740_v18  ;;  %v1948_v49 = vor.u32 %v1947_v27, %v13324_v54  ;;  %v17746_v55 = vld [vmem:[#allocation107_spill] sm:$0xff] }
 0x14c   : > { %17732 = vst [vmem:[#allocation100_spill] sm:$0xff] %v13313_v14  ;;  %1457 = vrot.lane.b32.xlu1 %v1417_v25, %s11720_s18  ;;  %10093 = vmatprep.mubr.msk.bf16.mxu0 %vm2030_vm0, %v13313_v14  ;;  %v1129_v25 = vrot.slane %v13232_v4, 1  ;;  %v1841_v30 = vsel %vm1835_vm14, %v1808_v52, %v13216_v35  ;;  %v777_v29 = vrot.slane %v13337_v33, 1  ;;  %v782_v35 = vrot.slane %v13371_v58, 1  ;;  %v17745_v52 = vld [vmem:[#allocation105_spill] sm:$0xff] }
 0x14d   : > { %v13348_v41 = vpop.permute.xlu0 %886  ;;  %v1874_v40 = vsel %vm1868_vm15, %v1841_v30, %v1595_v62  ;;  %v1953_v62 = vsel %vm687_vm2, %v1948_v49, %v1952_v38  ;;  %v13402_v20 = vcombine.low %v13385_v60, %v13385_v60  ;;  %v17747_v18 = vcombine.low %v17745_v52, %v17746_v55 }
 0x14e   : > { %v13350_v42 = vpop.permute.xlu1 %985  ;;  %v1131_v44 = vor.u32 %v1130_v11, %v1129_v25  ;;  %v778_v23 = vor.u32 %v777_v29, %v13359_v47  ;;  %v1956_v25 = vrot.slane %v13265_v5, 1  ;;  %v1957_v11 = vrot.slane %v13291_v24, 1 }
 0x14f   : > { %1600 = vrot.lane.b32.xlu0 %v1519_v15, %s11721_s28  ;;  %v13416_v38 = vshrl.u32 %v13374_v3, 16  ;;  %v13422_v29 = vshll.u32 %v13402_v20, 16  ;;  %v1966_v55 = vrot.slane %v13425_v53, 1 }
 0x150   : > { %1666 = vrot.lane.b32.xlu1 %v17741_v31, %s11722_s29  ;;  %v789_v31 = vrot.slane %v13394_v59, 1  ;;  %v783_v49 = vsel %vm687_vm2, %v778_v23, %v782_v35  ;;  %v1137_v30 = vsel %vm993_vm5, %v1131_v44, %v1136_v6  ;;  %v935_v44 = vrot.slane %v13329_v7, 1 }
 0x151   : > { %v13382_v34 = vpop.permute.xlu0 %1160  ;;  %v1961_v23 = vrot.slane %v13324_v54, 1  ;;  %v1962_v6 = vrot.slane %v13302_v0, 2  ;;  %v794_v52 = vrot.slane %v13422_v29, 1 }
 0x152   : > { %v1643_v27 = vpop.permute.xlu1 %1642  ;;  %v790_v35 = vor.u32 %v789_v31, %v13416_v38  ;;  %v1216_v31 = vrot.slane %v13182_v46, 2 }
 0x153   : > { %v13388_v15 = vsel %vm1901_vm1, %v1874_v40, %v1643_v27  ;;  %991 = vrot.lane.b32.xlu0 %v960_v17, %s11715_s12  ;;  %v1958_v27 = vsel %vm912_vm3, %v1956_v25, %v1957_v11  ;;  %v1967_v25 = vrot.slane %v13316_v22, 2  ;;  %v13443_v11 = vshrl.u32 %v13329_v7, 16 }
 0x154   : > { %17743 = vst [vmem:[#allocation112_spill] sm:$0xff] %v13388_v15  ;;  %1602 = vrot.lane.b32.xlu1 %v1526_v12, %s11721_s28  ;;  %10094 = vmatmul.mubr.msk.bf16.vlgmr.msra.gmra.mxu0 %vm2030_vm0, %v13388_v15  ;;  %v1963_v14 = vor.u32 %v1962_v6, %v1961_v23  ;;  %v1057_v15 = vrot.slane %v13359_v47, 1  ;;  %v795_v50 = vsel %vm687_vm2, %v790_v35, %v794_v52  ;;  %v1357_v35 = vrot.slane %v13232_v4, 2 }
 0x155   : > { %v13404_v17 = vpop.permute.xlu0 %888  ;;  %v1968_v19 = vor.u32 %v1967_v25, %v1966_v55  ;;  %v1062_v63 = vrot.slane %v13443_v11, 1  ;;  %v13474_v23 = vshrl.u32 %v13402_v20, 16  ;;  %v1360_v55 = vrot.slane %v13340_v13, 2 }
 0x156   : > { %17744 = vst [vmem:[#allocation113_spill] sm:$0xff] %v13404_v17  ;;  %v13406_v12 = vpop.permute.xlu1 %967  ;;  %v1361_v25 = vrot.slane %v13226_v9, 3  ;;  %v1977_v17 = vrot.slane %v13324_v54, 2 }
 0x157   : > { %1648 = vrot.lane.b32.xlu0 %v17747_v18, %s11722_s29  ;;  %v1969_v6 = vsel %vm993_vm5, %v1963_v14, %v1968_v19  ;;  %v1064_v52 = vor.u32 %v1063_v48, %v1062_v63  ;;  %v1067_v63 = vrot.slane %v13394_v59, 2  ;;  %v1071_v19 = vrot.slane %v13474_v23, 1 }
 0x158   : > { %1954 = vrot.lane.b32.xlu1 %v1953_v62, %s11716_s25  ;;  %v934_v62 = vrot.slane %v13308_v56, 1  ;;  %v1072_v48 = vrot.slane %v13422_v29, 2  ;;  %v1362_v1 = vor.u32 %v1361_v25, %v1360_v55  ;;  %v1981_v55 = vrot.slane %v13316_v22, 3 }
 0x159   : > { %v13427_v8 = vpop.permute.xlu0 %1162 }
 0x15a   : > { %v13429_v40 = vpop.permute.xlu1 %1241  ;;  %v936_v26 = vsel %vm912_vm3, %v934_v62, %v935_v44  ;;  %v1059_v62 = vor.u32 %v1058_v61, %v1057_v15  ;;  %v1358_v44 = vrot.slane %v13210_v28, 3  ;;  %v1066_v15 = vrot.slane %v13416_v38, 1 }
 0x15b   : > { %894 = vrot.lane.b32.xlu0 %v783_v49, %s11716_s25 }
 0x15c   : > { %1168 = vrot.lane.b32.xlu1 %v1137_v30, %s11718_s15  ;;  %v1217_v30 = vrot.slane %v13202_v43, 2  ;;  %v1065_v14 = vsel %vm993_vm5, %v1059_v62, %v1064_v52  ;;  %v1978_v62 = vrot.slane %v13302_v0, 3  ;;  %v1980_v52 = vrot.slane %v13425_v53, 2 }
 0x15d   : > { %v13445_v18 = vpop.permute.xlu0 %969 }
 0x15e   : > { %17748 = vst [vmem:[#allocation114_spill] sm:$0xff] %v13445_v18  ;;  %v13447_v49 = vpop.permute.xlu1 %1144  ;;  %v1073_v18 = vor.u32 %v1072_v48, %v1071_v19  ;;  %v1301_v19 = vrot.slane %v13359_v47, 2  ;;  %v1982_v48 = vor.u32 %v1981_v55, %v1980_v52 }
 0x15f   : > { %1650 = vrot.lane.b32.xlu0 %v17751_v57, %s11722_s29  ;;  %v1218_v57 = vsel %vm1170_vm4, %v1216_v31, %v1217_v30  ;;  %v1359_v30 = vor.u32 %v1358_v44, %v1357_v35 }
 0x160   : > { %1959 = vrot.lane.b32.xlu1 %v1958_v27, %s11715_s12  ;;  %v938_v27 = vrot.slane %v13402_v20, 1 }
 0x161   : > { %v13462_v37 = vpop.permute.xlu0 %1243  ;;  %v1363_v35 = vsel %vm1251_vm6, %v1359_v30, %v1362_v1  ;;  %v1304_v30 = vrot.slane %v13443_v11, 2 }
 0x162   : > { %v13464_v2 = vpop.permute.xlu1 %1386  ;;  %v939_v61 = vsel %vm912_vm3, %v937_v51, %v938_v27  ;;  %v1973_v51 = vrot.slane %v13291_v24, 2 }
 0x163   : > { %896 = vrot.lane.b32.xlu0 %v795_v50, %s11716_s25 }
 0x164   : > { %975 = vrot.lane.b32.xlu1 %v936_v26, %s11715_s12  ;;  %v1972_v26 = vrot.slane %v13265_v5, 2 }
 0x165   : > { %v13479_v31 = vpop.permute.xlu0 %1146 }
 0x166   : > { %17752 = vst [vmem:[#allocation101_spill] sm:$0xff] %v13479_v31  ;;  %v13481_v50 = vpop.permute.xlu1 %1225  ;;  %v1068_v31 = vor.u32 %v1067_v63, %v1066_v15  ;;  %v1974_v44 = vsel %vm1170_vm4, %v1972_v26, %v1973_v51  ;;  %v1442_v15 = vrot.slane %v13182_v46, 3  ;;  %v1443_v26 = vrot.slane %v13202_v43, 3  ;;  %v451_v46 = vld [vmem:[%s12324_s22] sm:$0xf] }
 0x167   : > { %1249 = vrot.lane.b32.xlu0 %v1218_v57, %s11717_s14  ;;  %v1192_v57 = vrot.slane %v13308_v56, 2  ;;  %v1979_v63 = vor.u32 %v1978_v62, %v1977_v17  ;;  %v1305_v51 = vrot.slane %v13371_v58, 3  ;;  %v1587_v43 = vrot.slane %v13226_v9, 4  ;;  %v17754_v17 = vld [vmem:[#allocation95_spill] sm:$0xff] }
 0x168   : > { %1970 = vrot.lane.b32.xlu1 %v1969_v6, %s11718_s15  ;;  %v1193_v6 = vrot.slane %v13329_v7, 2  ;;  %v1074_v1 = vsel %vm993_vm5, %v1068_v31, %v1073_v18  ;;  %v1586_v18 = vrot.slane %v13340_v13, 3  ;;  %v1694_v31 = vsel %vm1670_vm9, %v17754_v17, %v13214_v39 }
 0x169   : > { %v13493_v27 = vpop.permute.xlu0 %1388  ;;  %v1444_v62 = vsel %vm1396_vm7, %v1442_v15, %v1443_v26  ;;  %v1727_v13 = vsel %vm1703_vm10, %v1694_v31, %v13280_v10  ;;  %v1983_v9 = vsel %vm1251_vm6, %v1979_v63, %v1982_v48  ;;  %v1306_v55 = vor.u32 %v1305_v51, %v1304_v30  ;;  %v11243_v48 = vld [vmem:[%s17523_s1 + $0x8] sm:$0x3f]  }
 0x16a   : > { %v1468_v60 = vpop.permute.xlu1 %1467  ;;  %v1760_v39 = vsel %vm1736_vm11, %v1727_v13, %v13382_v34  ;;  %v1588_v15 = vor.u32 %v1587_v43, %v1586_v18  ;;  %v1986_v26 = vrot.slane %v13265_v5, 3  ;;  %v1987_v63 = vrot.slane %v13291_v24, 3 }
 0x16b   : > { %977 = vrot.lane.b32.xlu0 %v939_v61, %s11715_s12  ;;  %v1194_v61 = vsel %vm1170_vm4, %v1192_v57, %v1193_v6  ;;  %v1793_v10 = vsel %vm1769_vm12, %v1760_v39, %v13429_v40  ;;  %v1309_v34 = vrot.slane %v13394_v59, 3  ;;  %v1311_v30 = vrot.slane %v13474_v23, 2 }
 0x16c   : > { %1152 = vrot.lane.b32.xlu1 %v1065_v14, %s11718_s15  ;;  %v1302_v14 = vrot.slane %v13337_v33, 3  ;;  %v1312_v24 = vrot.slane %v13422_v29, 3  ;;  %v1418_v13 = vrot.slane %v13308_v56, 3 }
 0x16d   : > { %v13505_v25 = vpop.permute.xlu0 %1227 }
 0x16e   : > { %17753 = vst [vmem:[#allocation104_spill] sm:$0xff] %v13505_v25  ;;  %v13507_v32 = vpop.permute.xlu1 %1370  ;;  %v1303_v52 = vor.u32 %v1302_v14, %v1301_v19  ;;  %v13545_v25 = vld [vmem:[%s12324_s22 + $0x4] sm:$0xf]  ;;  %v1308_v19 = vrot.slane %v13416_v38, 2  ;;  %v1826_v14 = vsel %vm1802_vm13, %v1793_v10, %v13464_v2  ;;  %v1994_v10 = vrot.slane %v13425_v53, 3 }
 0x16f   : > { %1394 = vrot.lane.b32.xlu0 %v1363_v35, %s11719_s16  ;;  %v1583_v35 = vrot.slane %v13232_v4, 3  ;;  %v1195_v4 = vrot.slane %v13374_v3, 2  ;;  %v1859_v40 = vsel %vm1835_vm14, %v1826_v14, %v1468_v60  ;;  %v1988_v60 = vsel %vm1396_vm7, %v1986_v26, %v1987_v63 }
 0x170   : > { %1975 = vrot.lane.b32.xlu1 %v1974_v44, %s11717_s14  ;;  %v1584_v44 = vrot.slane %v13210_v28, 4  ;;  %v1196_v28 = vrot.slane %v13402_v20, 2  ;;  %v1995_v63 = vrot.slane %v13316_v22, 4 }
 0x171   : > { %v13519_v57 = vpop.permute.xlu0 %1469 }
 0x172   : > { %v1613_v6 = vpop.permute.xlu1 %1612  ;;  %v1197_v51 = vsel %vm1170_vm4, %v1195_v4, %v1196_v28  ;;  %v1310_v4 = vor.u32 %v1309_v34, %v1308_v19  ;;  %v1419_v28 = vrot.slane %v13329_v7, 3  ;;  %v1992_v7 = vrot.slane %v13302_v0, 4 }
 0x173   : > { %1154 = vrot.lane.b32.xlu0 %v1074_v1, %s11718_s15  ;;  %v1892_v43 = vsel %vm1868_vm15, %v1859_v40, %v1613_v6  ;;  %v11244_v6 = vld [vmem:[%s17523_s1 + $0x28] sm:$0x3f]  }
 0x174   : > { %1233 = vrot.lane.b32.xlu1 %v1194_v61, %s11717_s14  ;;  %v1585_v61 = vor.u32 %v1584_v44, %v1583_v35  ;;  %v1307_v35 = vsel %vm1251_vm6, %v1303_v52, %v1306_v55  ;;  %v17755_v44 = vld [vmem:[#allocation103_spill] sm:$0xff]  ;;  %v17757_v55 = vld [vmem:[#allocation96_spill] sm:$0xff] }
 0x175   : > { %v13538_v1 = vpop.permute.xlu0 %1372  ;;  %v2245_v18 = vand.u32 %v11243_v48, %v17755_v44  ;;  %v13577_v52 = vld [vmem:[%s12324_s22 + $0x8] sm:$0xf] }
 0x176   : > { %v13540_v17 = vpop.permute.xlu1 %1451  ;;  %v13604_v0 = vcombine.low %v13577_v52, %v13577_v52 }
 0x177   : > { %1475 = vrot.lane.b32.xlu0 %v1444_v62, %s11720_s18  ;;  %v1589_v62 = vsel %vm1477_vm8, %v1585_v61, %v1588_v15  ;;  %10125 = vmatprep.subr.bf16.mxu1 %v2245_v18  ;;  %v1313_v61 = vor.u32 %v1312_v24, %v1311_v30  ;;  %v1991_v15 = vrot.slane %v13324_v54, 3  ;;  %v1996_v24 = vor.u32 %v1995_v63, %v1994_v10 }
 0x178   : > { %1984 = vrot.lane.b32.xlu1 %v1983_v9, %s11719_s16  ;;  %v13569_v9 = vcombine.low %v451_v46, %v13545_v25  ;;  %v1696_v46 = vsel %vm1670_vm9, %v17757_v55, %v13278_v45  ;;  %10126 = vmatpush3.bf16.msra.mxu1 %v2245_v18  ;;  %v2507_v45 = vand.u32 %v11244_v6, %v17755_v44  ;;  %v13625_v18 = vshll.u32 %v13604_v0, 16 }
 0x179   : > { %v1615_v2 = vpop.permute.xlu0 %1614  ;;  %v1729_v26 = vsel %vm1703_vm10, %v1696_v46, %v13350_v42  ;;  %v1314_v14 = vsel %vm1251_vm6, %v1310_v4, %v1313_v61  ;;  %v1993_v30 = vor.u32 %v1992_v7, %v1991_v15  ;;  %v1531_v46 = vrot.slane %v13371_v58, 4 }
 0x17a   : > { %v1661_v31 = vpop.permute.xlu1 %1660  ;;  %v1762_v19 = vsel %vm1736_vm11, %v1729_v26, %v13427_v8  ;;  %v13607_v42 = vshll.u32 %v13569_v9, 16  ;;  %10161 = vmatprep.subr.bf16.mxu0 %v2507_v45  ;;  %v1420_v8 = vsel %vm1396_vm7, %v1418_v13, %v1419_v28  ;;  %v1527_v13 = vrot.slane %v13359_v47, 3 }
 0x17b   : > { %v13572_v39 = vsel %vm1901_vm1, %v1892_v43, %v1661_v31  ;;  %1235 = vrot.lane.b32.xlu0 %v1197_v51, %s11717_s14  ;;  %v1795_v22 = vsel %vm1769_vm12, %v1762_v19, %v13462_v37  ;;  %10162 = vmatpush3.bf16.msra.mxu0 %v2507_v45  ;;  %v1997_v4 = vsel %vm1477_vm8, %v1993_v30, %v1996_v24  ;;  %v1530_v28 = vrot.slane %v13443_v11, 3  ;;  %v17762_v19 = vld [vmem:[#allocation113_spill] sm:$0xff]  ;;  %v11247_v30 = vld [vmem:[%s17523_s1 + $0x20] sm:$0xff]  }
 0x17c   : > { %17756 = vst [vmem:[#allocation105_spill] sm:$0xff] %v13572_v39  ;;  %1378 = vrot.lane.b32.xlu1 %v1307_v35, %s11719_s16  ;;  %10113 = vmatprep.mubr.msk.bf16.mxu1 %vm2030_vm0, %v13572_v39  ;;  %v1828_v53 = vsel %vm1802_vm13, %v1795_v22, %v13493_v27  ;;  %v13621_v27 = vshrl.u32 %v13569_v9, 16  ;;  %v693_v35 = vrot.slane %v13607_v42, 1  ;;  %v1535_v15 = vrot.slane %v13394_v59, 4  ;;  %v17763_v22 = vld [vmem:[#allocation98_spill] sm:$0xff] }
 0x17d   : > { %v13598_v34 = vpop.permute.xlu0 %906  ;;  %v1861_v48 = vsel %vm1835_vm14, %v1828_v53, %v13519_v57  ;;  %v17759_v57 = vld [vmem:[#allocation97_spill] sm:$0xff]  ;;  %v1537_v7 = vrot.slane %v13474_v23, 3  ;;  %v1538_v58 = vrot.slane %v13422_v29, 4  ;;  %v1532_v29 = vor.u32 %v1531_v46, %v1530_v28  ;;  %v17764_v24 = vld [vmem:[#allocation114_spill] sm:$0xff]  ;;  %10163 = vmatprep.subr.bf16.mxu0 %v11247_v30 }
 0x17e   : > { %v13600_v54 = vpop.permute.xlu1 %1453  ;;  %v1894_v37 = vsel %vm1868_vm15, %v1861_v48, %v1615_v2  ;;  %v1678_v31 = vsel %vm1670_vm9, %v17759_v57, %v13348_v41  ;;  %v1421_v2 = vrot.slane %v13374_v3, 3  ;;  %v1528_v41 = vrot.slane %v13337_v33, 4 }
 0x17f   : > { %1620 = vrot.lane.b32.xlu0 %v1589_v62, %s11721_s28  ;;  %v1422_v62 = vrot.slane %v13402_v20, 3  ;;  %v694_v47 = vor.u32 %v693_v35, %v13621_v27  ;;  %v1534_v33 = vrot.slane %v13416_v38, 3  ;;  %v1680_v53 = vsel %vm1670_vm9, %v17763_v22, %v17762_v19  ;;  %v17765_v35 = vld [vmem:[#allocation101_spill] sm:$0xff]  ;;  %10164 = vmatpush3.bf16.msra.mxu0 %v11247_v30  ;;  %v17771_v30 = vld [vmem:[#allocation119_spill] sm:$0xff] }
 0x180   : > { %1989 = vrot.lane.b32.xlu1 %v1988_v60, %s11720_s18  ;;  %v1711_v60 = vsel %vm1703_vm10, %v1678_v31, %v13406_v12  ;;  %v698_v12 = vrot.slane %v13625_v18, 1  ;;  %v1529_v10 = vor.u32 %v1528_v41, %v1527_v13  ;;  %v1539_v48 = vor.u32 %v1538_v58, %v1537_v7  ;;  %v502_v7 = vld [vmem:[%s12324_s22 + $0xcc] sm:$0xf]  ;;  %v13728_v58 = vld [vmem:[%s12324_s22 + $0xd0] sm:$0xf] }
 0x181   : > { %v1597_v40 = vpop.permute.xlu0 %1596  ;;  %v1744_v6 = vsel %vm1736_vm11, %v1711_v60, %v13447_v49  ;;  %v17760_v49 = vcombine.low %v13154_v21, %v13164_v36  ;;  %v1423_v38 = vsel %vm1396_vm7, %v1421_v2, %v1422_v62  ;;  %v11245_v21 = vld [vmem:[%s17523_s1] sm:$0xff]   ;;  %v913_v13 = vrot.slane %v13569_v9, 1  ;;  %v13750_v22 = vld [vmem:[%s12324_s22 + $0xd4] sm:$0xf] }
 0x182   : > { %v1663_v51 = vpop.permute.xlu1 %1662  ;;  %v1777_v61 = vsel %vm1769_vm12, %v1744_v6, %v13481_v50  ;;  %v699_v23 = vsel %vm687_vm2, %v694_v47, %v698_v12  ;;  %10127 = vmatprep.subr.bf16.mxu1 %v11245_v21  ;;  %v1533_v62 = vsel %vm1477_vm8, %v1529_v10, %v1532_v29  ;;  %v914_v60 = vrot.slane %v13604_v0, 1 }
 0x183   : > { %v13628_v43 = vsel %vm1901_vm1, %v1894_v37, %v1663_v51  ;;  %1380 = vrot.lane.b32.xlu0 %v1314_v14, %s11719_s16  ;;  %v1810_v11 = vsel %vm1802_vm13, %v1777_v61, %v13507_v32  ;;  %v13671_v32 = vshrl.u32 %v13604_v0, 16  ;;  %v994_v14 = vrot.slane %v13621_v27, 1  ;;  %10128 = vmatpush3.bf16.msra.mxu1 %v11245_v21 }
 0x184   : > { %17758 = vst [vmem:[#allocation107_spill] sm:$0xff] %v13628_v43  ;;  %1459 = vrot.lane.b32.xlu1 %v1420_v8, %s11720_s18  ;;  %10114 = vmatmul.mubr.msk.bf16.gmra.mxu1 %vm2030_vm0, %v13628_v43  ;;  %v1843_v50 = vsel %vm1835_vm14, %v1810_v11, %v13540_v17  ;;  %v17761_v17 = vld [vmem:[#allocation117_spill] sm:$0xff]  ;;  %v1536_v8 = vor.u32 %v1535_v15, %v1534_v33  ;;  %v995_v37 = vrot.slane %v13607_v42, 2  ;;  %v1000_v51 = vrot.slane %v13625_v18, 2  ;;  %v17776_v43 = vld [vmem:[#allocation99_spill] sm:$0xff] }
 0x185   : > { %v13647_v55 = vpop.permute.xlu0 %908  ;;  %v1876_v36 = vsel %vm1868_vm15, %v1843_v50, %v1597_v40  ;;  %v9298_v45 = vcombine.low %v17761_v17, %v13262_v16  ;;  %v1713_v16 = vsel %vm1703_vm10, %v1680_v53, %v17764_v24  ;;  %v999_v40 = vrot.slane %v13671_v32, 1  ;;  %v17769_v17 = vld [vmem:[#allocation94_spill] sm:$0xff]  ;;  %v17772_v24 = vld [vmem:[#allocation120_spill] sm:$0xff] }
 0x186   : > { %v13649_v20 = vpop.permute.xlu1 %987  ;;  %v1746_v57 = vsel %vm1736_vm11, %v1713_v16, %v17765_v35  ;;  %v1540_v47 = vsel %vm1477_vm8, %v1536_v8, %v1539_v48  ;;  %v996_v12 = vor.u32 %v995_v37, %v994_v14  ;;  %v1171_v15 = vrot.slane %v13569_v9, 2 }
 0x187   : > { %1668 = vrot.lane.b32.xlu0 %v17760_v49, %s11722_s29  ;;  %v1001_v46 = vor.u32 %v1000_v51, %v999_v40  ;;  %v915_v49 = vsel %vm912_vm3, %v913_v13, %v914_v60  ;;  %v1252_v50 = vrot.slane %v13621_v27, 2  ;;  %v1255_v21 = vrot.slane %v13671_v32, 2 }
 0x188   : > { %1998 = vrot.lane.b32.xlu1 %v1997_v4, %s11721_s28  ;;  %v17766_v4 = vld [vmem:[#allocation104_spill] sm:$0xff]  ;;  %v13744_v10 = vcombine.low %v502_v7, %v13728_v58  ;;  %v1397_v48 = vrot.slane %v13569_v9, 3  ;;  %v1398_v14 = vrot.slane %v13604_v0, 3  ;;  %v17773_v16 = vcombine.low %v17771_v30, %v17772_v24  ;;  %v13836_v30 = vld [vmem:[%s12324_s22 + $0xe0] sm:$0xf] }
 0x189   : > { %v1599_v26 = vpop.permute.xlu0 %1598  ;;  %v1779_v41 = vsel %vm1769_vm12, %v1746_v57, %v17766_v4  ;;  %v1478_v37 = vrot.slane %v13621_v27, 3  ;;  %v1479_v40 = vrot.slane %v13607_v42, 4  ;;  %v1481_v51 = vrot.slane %v13671_v32, 3  ;;  %v11249_v27 = vld [vmem:[%s17523_s1 + $0x38] sm:$0x3f]  }
 0x18a   : > { %v1645_v59 = vpop.permute.xlu1 %1644  ;;  %v1812_v28 = vsel %vm1802_vm13, %v1779_v41, %v13538_v1  ;;  %17768 = vst [vmem:[#allocation110_spill] sm:$0xff] %v13744_v10  ;;  %v1482_v35 = vrot.slane %v13625_v18, 4  ;;  %v13772_v13 = vshll.u32 %v13744_v10, 16  ;;  %v11250_v32 = vld [vmem:[%s17523_s1 + $0x48] sm:$0x3f]   ;;  %v1399_v60 = vsel %vm1396_vm7, %v1397_v48, %v1398_v14 }
 0x18b   : > { %v13679_v63 = vsel %vm1901_vm1, %v1876_v36, %v1645_v59  ;;  %880 = vrot.lane.b32.xlu0 %v699_v23, %s11716_s25  ;;  %v1845_v6 = vsel %vm1835_vm14, %v1812_v28, %v13600_v54  ;;  %v1172_v54 = vrot.slane %v13604_v0, 2  ;;  %v1256_v36 = vrot.slane %v13625_v18, 3  ;;  %v508_v24 = vld [vmem:[%s12324_s22 + $0xe4] sm:$0xf] }
 0x18c   : > { %1461 = vrot.lane.b32.xlu1 %v1423_v38, %s11720_s18  ;;  %10097 = vmatprep.mubr.msk.bf16.mxu0 %vm2030_vm0, %v13679_v63  ;;  %v1878_v61 = vsel %vm1868_vm15, %v1845_v6, %v1599_v26  ;;  %v1253_v38 = vrot.slane %v13607_v42, 3  ;;  %v1002_v26 = vsel %vm993_vm5, %v996_v12, %v1001_v46  ;;  %v13769_v0 = vcombine.low %v13750_v22, %v13750_v22 }
 0x18d   : > { %v13701_v31 = vpop.permute.xlu0 %890  ;;  %v1173_v29 = vsel %vm1170_vm4, %v1171_v15, %v1172_v54  ;;  %v1257_v8 = vor.u32 %v1256_v36, %v1255_v21  ;;  %v13780_v18 = vand.u32 %v11249_v27, %v17755_v44  ;;  %v1480_v4 = vor.u32 %v1479_v40, %v1478_v37  ;;  %v13807_v15 = vld [vmem:[%s12324_s22 + $0xdc] sm:$0xf] }
 0x18e   : > { %v13703_v2 = vpop.permute.xlu1 %989  ;;  %v1254_v53 = vor.u32 %v1253_v38, %v1252_v50  ;;  %v1483_v41 = vor.u32 %v1482_v35, %v1481_v51  ;;  %v13788_v28 = vshrl.u32 %v13769_v0, 16  ;;  %v13795_v12 = vshrl.u32 %v13744_v10, 16 }
 0x18f   : > { %1604 = vrot.lane.b32.xlu0 %v1533_v62, %s11721_s28  ;;  %17774 = vst [vmem:[#allocation95_spill] sm:$0xff] %v13780_v18  ;;  %v2421_v46 = vrot.slane %v13772_v13, 1  ;;  %10197 = vmatprep.subr.bf16.mxu1 %v13780_v18  ;;  %v9280_v54 = vcombine.low %v13545_v25, %v13577_v52  ;;  %v2430_v7 = vrot.slane %v13744_v10, 1  ;;  %v2431_v50 = vrot.slane %v13769_v0, 1 }
 0x190   : > { %2001 = vrot.lane.b32.xlu1 %v9298_v45, %s11722_s29  ;;  %v17770_v45 = vld [vmem:[#allocation111_spill] sm:$0xff]  ;;  %v1258_v42 = vsel %vm1251_vm6, %v1254_v53, %v1257_v8  ;;  %v2435_v38 = vrot.slane %v13795_v12, 1  ;;  %v2436_v21 = vrot.slane %v13772_v13, 2  ;;  %v2440_v36 = vrot.slane %v13788_v28, 1 }
 0x191   : > { %v13718_v33 = vpop.permute.xlu0 %1164  ;;  %v9288_v19 = vcombine.low %v17770_v45, %v17769_v17  ;;  %v2422_v17 = vor.u32 %v2421_v46, %v13795_v12  ;;  %v2446_v53 = vrot.slane %v13744_v10, 2  ;;  %v2447_v8 = vrot.slane %v13769_v0, 2 }
 0x192   : > { %v1647_v11 = vpop.permute.xlu1 %1646  ;;  %v2451_v48 = vrot.slane %v13795_v12, 2  ;;  %v2452_v14 = vrot.slane %v13772_v13, 3  ;;  %v2432_v37 = vsel %vm912_vm3, %v2430_v7, %v2431_v50  ;;  %v2437_v40 = vor.u32 %v2436_v21, %v2435_v38  ;;  %v13866_v38 = vld [vmem:[%s12324_s22 + $0xec] sm:$0xf] }
 0x193   : > { %v13722_v1 = vsel %vm1901_vm1, %v1878_v61, %v1647_v11  ;;  %961 = vrot.lane.b32.xlu0 %v915_v49, %s11715_s12  ;;  %v13799_v61 = vshll.u32 %v13769_v0, 16  ;;  %v13803_v11 = vand.u32 %v11250_v32, %v17755_v44  ;;  %v505_v49 = vld [vmem:[%s12324_s22 + $0xd8] sm:$0xf]  ;;  %v2454_v32 = vrot.slane %v13788_v28, 2 }
 0x194   : > { %17767 = vst [vmem:[#allocation108_spill] sm:$0xff] %v13722_v1  ;;  %1606 = vrot.lane.b32.xlu1 %v1540_v47, %s11721_s28  ;;  %10098 = vmatmul.mubr.msk.bf16.gmra.mxu0 %vm2030_vm0, %v13722_v1  ;;  %v2460_v7 = vrot.slane %v13744_v10, 3  ;;  %v2461_v50 = vrot.slane %v13769_v0, 3  ;;  %v1698_v39 = vsel %vm1670_vm9, %v17776_v43, %v13598_v34 }
 0x195   : > { %v13739_v59 = vpop.permute.xlu0 %892  ;;  %17775 = vst [vmem:[#allocation96_spill] sm:$0xff] %v13803_v11  ;;  %10233 = vmatprep.subr.bf16.mxu0 %v13803_v11  ;;  %v2426_v45 = vrot.slane %v13799_v61, 1  ;;  %v1731_v11 = vsel %vm1703_vm10, %v1698_v39, %v13649_v20 }
 0x196   : > { %v13741_v23 = vpop.permute.xlu1 %971  ;;  %v1764_v34 = vsel %vm1736_vm11, %v1731_v11, %v13718_v33 }
 0x197   : > { %1652 = vrot.lane.b32.xlu0 %v17773_v16, %s11722_s29  ;;  %v13840_v16 = vld [vmem:[%s12324_s22 + $0xe8] sm:$0xf] }
 0x198   : > { %1138 = vrot.lane.b32.xlu1 %v1002_v26, %s11718_s15  ;;  %v2441_v26 = vrot.slane %v13799_v61, 2  ;;  %v13859_v46 = vcombine.low %v508_v24, %v13840_v16 }
 0x199   : > { %v13763_v57 = vpop.permute.xlu0 %1166 }
 0x19a   : > { %v13765_v62 = vpop.permute.xlu1 %1245  ;;  %v2442_v51 = vor.u32 %v2441_v26, %v2440_v36  ;;  %v2465_v36 = vrot.slane %v13795_v12, 3  ;;  %v2466_v26 = vrot.slane %v13772_v13, 4  ;;  %v13885_v12 = vcombine.low %v13866_v38, %v13866_v38 }
 0x19b   : > { %1654 = vrot.lane.b32.xlu0 %v9288_v19, %s11722_s29  ;;  %v13828_v19 = vcombine.low %v505_v49, %v13807_v15  ;;  %v2448_v49 = vsel %vm1170_vm4, %v2446_v53, %v2447_v8  ;;  %v2469_v8 = vrot.slane %v13799_v61, 4  ;;  %v13888_v13 = vshll.u32 %v13859_v46, 16 }
 0x19c   : > { %1219 = vrot.lane.b32.xlu1 %v1173_v29, %s11717_s14  ;;  %v1484_v29 = vsel %vm1477_vm8, %v1480_v4, %v1483_v41  ;;  %v13856_v41 = vcombine.low %v13836_v30, %v13836_v30  ;;  %v2443_v21 = vsel %vm993_vm5, %v2437_v40, %v2442_v51  ;;  %v3019_v39 = vrot.slane %v13885_v12, 1 }
 0x19d   : > { %v13790_v6 = vpop.permute.xlu0 %973  ;;  %v13852_v4 = vshll.u32 %v13828_v19, 16  ;;  %v13877_v0 = vshrl.u32 %v13828_v19, 16  ;;  %v1797_v20 = vsel %vm1769_vm12, %v1764_v34, %v13765_v62 }
 0x19e   : > { %v13792_v47 = vpop.permute.xlu1 %1148  ;;  %v13894_v24 = vshrl.u32 %v13856_v41, 16 }
 0x19f   : > { %1364 = vrot.lane.b32.xlu0 %v1258_v42, %s11719_s16  ;;  %v2427_v42 = vsel %vm687_vm2, %v2422_v17, %v2426_v45 }
 0x1a0   : > { %1445 = vrot.lane.b32.xlu1 %v1399_v60, %s11720_s18  ;;  %v2455_v60 = vrot.slane %v13799_v61, 3  ;;  %v2467_v61 = vor.u32 %v2466_v26, %v2465_v36  ;;  %v2725_v36 = vrot.slane %v13856_v41, 1  ;;  %v2734_v26 = vrot.slane %v13894_v24, 1 }
 0x1a1   : > { %v13820_v25 = vpop.permute.xlu0 %1247  ;;  %v2748_v11 = vrot.slane %v13894_v24, 2 }
 0x1a2   : > { %v13822_v52 = vpop.permute.xlu1 %1390  ;;  %v2456_v53 = vor.u32 %v2455_v60, %v2454_v32  ;;  %v9337_v32 = vcombine.low %v13728_v58, %v13750_v22  ;;  %v2729_v58 = vrot.slane %v13877_v0, 1  ;;  %v2730_v22 = vrot.slane %v13852_v4, 2 }
 0x1a3   : > { %1590 = vrot.lane.b32.xlu0 %v1484_v29, %s11721_s28  ;;  %v2468_v29 = vrot.slane %v13788_v28, 3  ;;  %v2462_v28 = vsel %vm1396_vm7, %v2460_v7, %v2461_v50  ;;  %v13906_v7 = vshrl.u32 %v13859_v46, 16  ;;  %v3009_v50 = vrot.slane %v13888_v13, 1 }
 0x1a4   : > { %1638 = vrot.lane.b32.xlu1 %v9280_v54, %s11722_s29  ;;  %v2453_v54 = vor.u32 %v2452_v14, %v2451_v48  ;;  %v2715_v48 = vrot.slane %v13852_v4, 1  ;;  %v13881_v14 = vshll.u32 %v13856_v41, 16  ;;  %v2731_v18 = vor.u32 %v2730_v22, %v2729_v58 }
 0x1a5   : > { %v13844_v35 = vpop.permute.xlu0 %1150  ;;  %v2746_v58 = vrot.slane %v13852_v4, 3  ;;  %v1830_v33 = vsel %vm1802_vm13, %v1797_v20, %v13822_v52 }
 0x1a6   : > { %v13846_v27 = vpop.permute.xlu1 %1229  ;;  %v2457_v51 = vsel %vm1251_vm6, %v2453_v54, %v2456_v53  ;;  %v2716_v60 = vor.u32 %v2715_v48, %v13877_v0  ;;  %v2724_v54 = vrot.slane %v13828_v19, 1  ;;  %v2749_v22 = vrot.slane %v13881_v14, 3 }
 0x1a7   : > { %2428 = vrot.lane.b32.xlu0 %v2427_v42, %s11716_s25  ;;  %v2470_v42 = vor.u32 %v2469_v8, %v2468_v29  ;;  %v2735_v29 = vrot.slane %v13881_v14, 2 }
 0x1a8   : > { %2433 = vrot.lane.b32.xlu1 %v2432_v37, %s11715_s12  ;;  %v2726_v44 = vsel %vm912_vm3, %v2724_v54, %v2725_v36  ;;  %v2745_v36 = vrot.slane %v13877_v0, 2 }
 0x1a9   : > { %v13873_v17 = vpop.permute.xlu0 %1392  ;;  %v2471_v48 = vsel %vm1477_vm8, %v2467_v61, %v2470_v42  ;;  %v2736_v61 = vor.u32 %v2735_v29, %v2734_v26  ;;  %v2740_v42 = vrot.slane %v13828_v19, 2  ;;  %v3023_v26 = vrot.slane %v13906_v7, 1 }
 0x1aa   : > { %v1472_v45 = vpop.permute.xlu1 %1471 }
 0x1ab   : > { %2444 = vrot.lane.b32.xlu0 %v2443_v21, %s11718_s15  ;;  %v13910_v21 = vshll.u32 %v13885_v12, 16  ;;  %v1863_v29 = vsel %vm1835_vm14, %v1830_v33, %v1472_v45  ;;  %v2737_v34 = vsel %vm993_vm5, %v2731_v18, %v2736_v61  ;;  %v17777_v45 = vld [vmem:[#allocation102_spill] sm:$0xff]  ;;  %v2747_v33 = vor.u32 %v2746_v58, %v2745_v36 }
 0x1ac   : > { %2449 = vrot.lane.b32.xlu1 %v2448_v49, %s11717_s14  ;;  %v2720_v49 = vrot.slane %v13881_v14, 1  ;;  %v2750_v61 = vor.u32 %v2749_v22, %v2748_v11  ;;  %v3035_v36 = vrot.slane %v13885_v12, 2  ;;  %v3039_v58 = vrot.slane %v13906_v7, 2 }
 0x1ad   : > { %v13896_v37 = vpop.permute.xlu0 %1231  ;;  %v3014_v10 = vrot.slane %v13910_v21, 1  ;;  %v3040_v11 = vrot.slane %v13888_v13, 3 }
 0x1ae   : > { %v13898_v40 = vpop.permute.xlu1 %1374 }
 0x1af   : > { %2458 = vrot.lane.b32.xlu0 %v2457_v51, %s11719_s16  ;;  %v2721_v51 = vsel %vm687_vm2, %v2716_v60, %v2720_v49  ;;  %v2741_v60 = vrot.slane %v13856_v41, 2  ;;  %v3018_v49 = vrot.slane %v13859_v46, 1 }
 0x1b0   : > { %2463 = vrot.lane.b32.xlu1 %v2462_v28, %s11720_s18  ;;  %v3010_v28 = vor.u32 %v3009_v50, %v13906_v7  ;;  %v13936_v50 = vshrl.u32 %v13885_v12, 16 }
 0x1b1   : > { %v13920_v53 = vpop.permute.xlu0 %1473  ;;  %v2742_v1 = vsel %vm1170_vm4, %v2740_v42, %v2741_v60 }
 0x1b2   : > { %v1617_v8 = vpop.permute.xlu1 %1616  ;;  %v3015_v54 = vsel %vm687_vm2, %v3010_v28, %v3014_v10  ;;  %v3024_v10 = vrot.slane %v13888_v13, 2  ;;  %v3028_v62 = vrot.slane %v13936_v50, 1  ;;  %v3042_v22 = vrot.slane %v13936_v50, 2 }
 0x1b3   : > { %2472 = vrot.lane.b32.xlu0 %v2471_v48, %s11721_s28  ;;  %v3029_v48 = vrot.slane %v13910_v21, 2  ;;  %v1896_v52 = vsel %vm1868_vm15, %v1863_v29, %v1617_v8  ;;  %v3020_v8 = vsel %vm912_vm3, %v3018_v49, %v3019_v39  ;;  %v2754_v49 = vrot.slane %v13828_v19, 3 }
 0x1b4   : > { %2475 = vrot.lane.b32.xlu1 %v9337_v32, %s11722_s29  ;;  %v3025_v29 = vor.u32 %v3024_v10, %v3023_v26  ;;  %v2755_v39 = vrot.slane %v13856_v41, 3  ;;  %v3043_v41 = vrot.slane %v13910_v21, 3  ;;  %v511_v26 = vld [vmem:[%s12324_s22 + $0xf0] sm:$0xf]  ;;  %v14000_v10 = vld [vmem:[%s12324_s22 + $0xf4] sm:$0xf] }
 0x1b5   : > { %v13940_v43 = vpop.permute.xlu0 %1376  ;;  %v3030_v42 = vor.u32 %v3029_v48, %v3028_v62  ;;  %v2759_v48 = vrot.slane %v13877_v0, 3 }
 0x1b6   : > { %v13942_v32 = vpop.permute.xlu1 %1455 }
 0x1b7   : > { %2722 = vrot.lane.b32.xlu0 %v2721_v51, %s11716_s25  ;;  %v1700_v51 = vsel %vm1670_vm9, %v17777_v45, %v13647_v55  ;;  %v3031_v62 = vsel %vm993_vm5, %v3025_v29, %v3030_v42 }
 0x1b8   : > { %2727 = vrot.lane.b32.xlu1 %v2726_v44, %s11715_s12  ;;  %v1733_v18 = vsel %vm1703_vm10, %v1700_v51, %v13703_v2  ;;  %v3034_v2 = vrot.slane %v13859_v46, 2  ;;  %v2751_v51 = vsel %vm1251_vm6, %v2747_v33, %v2750_v61  ;;  %v14027_v33 = vld [vmem:[%s12324_s22 + $0xf8] sm:$0xf] }
 0x1b9   : > { %v1619_v28 = vpop.permute.xlu0 %1618  ;;  %v1766_v55 = vsel %vm1736_vm11, %v1733_v18, %v13763_v57  ;;  %v2763_v18 = vrot.slane %v13881_v14, 4  ;;  %v3041_v14 = vor.u32 %v3040_v11, %v3039_v58  ;;  %v3057_v58 = vrot.slane %v13910_v21, 4  ;;  %v514_v11 = vld [vmem:[%s12324_s22 + $0xfc] sm:$0xf] }
 0x1ba   : > { %v1665_v44 = vpop.permute.xlu1 %1664  ;;  %v3036_v0 = vsel %vm1170_vm4, %v3034_v2, %v3035_v36  ;;  %v3056_v36 = vrot.slane %v13936_v50, 3 }
 0x1bb   : > { %v13966_v20 = vsel %vm1901_vm1, %v1896_v52, %v1665_v44  ;;  %2738 = vrot.lane.b32.xlu0 %v2737_v34, %s11718_s15 }
 0x1bc   : > { %10117 = vmatprep.mubr.msk.bf16.mxu1 %vm2030_vm0, %v13966_v20  ;;  %3016 = vrot.lane.b32.xlu1 %v3015_v54, %s11716_s25  ;;  %v1799_v54 = vsel %vm1769_vm12, %v1766_v55, %v13820_v25  ;;  %v3053_v55 = vrot.slane %v13906_v7, 3 }
 0x1bd   : > { %v13981_v60 = vpop.permute.xlu0 %910  ;;  %v1832_v57 = vsel %vm1802_vm13, %v1799_v54, %v13873_v17  ;;  %v2760_v17 = vrot.slane %v13852_v4, 4  ;;  %v14018_v4 = vcombine.low %v511_v26, %v14000_v10 }
 0x1be   : > { %v13983_v52 = vpop.permute.xlu1 %1457  ;;  %v1865_v25 = vsel %vm1835_vm14, %v1832_v57, %v13920_v53 }
 0x1bf   : > { %2743 = vrot.lane.b32.xlu0 %v2742_v1, %s11717_s14  ;;  %v1898_v44 = vsel %vm1868_vm15, %v1865_v25, %v1619_v28  ;;  %v2756_v1 = vsel %vm1396_vm7, %v2754_v49, %v2755_v39  ;;  %v17778_v28 = vld [vmem:[#allocation106_spill] sm:$0xff]  ;;  %v2761_v42 = vor.u32 %v2760_v17, %v2759_v48  ;;  %v3058_v17 = vor.u32 %v3057_v58, %v3056_v36 }
 0x1c0   : > { %3021 = vrot.lane.b32.xlu1 %v3020_v8, %s11715_s12  ;;  %v2762_v8 = vrot.slane %v13894_v24, 3  ;;  %v1682_v29 = vsel %vm1670_vm9, %v17778_v28, %v13701_v31  ;;  %v3044_v24 = vor.u32 %v3043_v41, %v3042_v22  ;;  %v3054_v31 = vrot.slane %v13888_v13, 4 }
 0x1c1   : > { %v1601_v34 = vpop.permute.xlu0 %1600  ;;  %v1715_v61 = vsel %vm1703_vm10, %v1682_v29, %v13741_v23  ;;  %v14042_v23 = vld [vmem:[%s12324_s22 + $0x100] sm:$0xf]  ;;  %v14048_v13 = vcombine.low %v14027_v33, %v14027_v33  ;;  %v3049_v22 = vrot.slane %v13885_v12, 3 }
 0x1c2   : > { %v1667_v45 = vpop.permute.xlu1 %1666  ;;  %v1748_v49 = vsel %vm1736_vm11, %v1715_v61, %v13792_v47  ;;  %v2764_v54 = vor.u32 %v2763_v18, %v2762_v8  ;;  %v14051_v47 = vshll.u32 %v14018_v4, 16  ;;  %v3045_v21 = vsel %vm1251_vm6, %v3041_v14, %v3044_v24 }
 0x1c3   : > { %v14013_v53 = vsel %vm1901_vm1, %v1898_v44, %v1667_v45  ;;  %2752 = vrot.lane.b32.xlu0 %v2751_v51, %s11719_s16  ;;  %v1781_v57 = vsel %vm1769_vm12, %v1748_v49, %v13846_v27  ;;  %v3048_v27 = vrot.slane %v13859_v46, 3  ;;  %v14063_v41 = vcombine.low %v514_v11, %v14042_v23  ;;  %v14070_v44 = vld [vmem:[%s12324_s22 + $0x104] sm:$0xf] }
 0x1c4   : > { %10118 = vmatmul.mubr.msk.bf16.gmra.mxu1 %vm2030_vm0, %v14013_v53  ;;  %3032 = vrot.lane.b32.xlu1 %v3031_v62, %s11718_s15  ;;  %v1814_v7 = vsel %vm1802_vm13, %v1781_v57, %v13898_v40  ;;  %v2765_v62 = vsel %vm1477_vm8, %v2761_v42, %v2764_v54  ;;  %v3055_v48 = vor.u32 %v3054_v31, %v3053_v55  ;;  %v14076_v45 = vshrl.u32 %v14018_v4, 16 }
 0x1c5   : > { %v14036_v39 = vpop.permute.xlu0 %991  ;;  %v1847_v50 = vsel %vm1835_vm14, %v1814_v7, %v13942_v32  ;;  %17779 = vst [vmem:[#allocation97_spill] sm:$0xff] %v14063_v41  ;;  %v3303_v12 = vrot.slane %v14051_v47, 1  ;;  %v14080_v51 = vshll.u32 %v14048_v13, 16  ;;  %v9358_v18 = vcombine.low %v13807_v15, %v13836_v30 }
 0x1c6   : > { %v1603_v2 = vpop.permute.xlu1 %1602  ;;  %v1880_v26 = vsel %vm1868_vm15, %v1847_v50, %v1601_v34  ;;  %v17780_v34 = vld [vmem:[#allocation109_spill] sm:$0xff]  ;;  %v14096_v28 = vcombine.low %v14070_v44, %v14070_v44  ;;  %v14109_v30 = vshrl.u32 %v14048_v13, 16  ;;  %v9379_v61 = vcombine.low %v13840_v16, %v13866_v38 }
 0x1c7   : > { %2757 = vrot.lane.b32.xlu0 %v2756_v1, %s11720_s18  ;;  %v1684_v8 = vsel %vm1670_vm9, %v17780_v34, %v13739_v59  ;;  %v14099_v59 = vshll.u32 %v14063_v41, 16  ;;  %v3304_v42 = vor.u32 %v3303_v12, %v14076_v45  ;;  %v3308_v55 = vrot.slane %v14080_v51, 1 }
 0x1c8   : > { %3037 = vrot.lane.b32.xlu1 %v3036_v0, %s11717_s14  ;;  %v1717_v1 = vsel %vm1703_vm10, %v1684_v8, %v13790_v6  ;;  %v3050_v0 = vsel %vm1396_vm7, %v3048_v27, %v3049_v22  ;;  %v3059_v6 = vsel %vm1477_vm8, %v3055_v48, %v3058_v17  ;;  %v3312_v31 = vrot.slane %v14018_v4, 1 }
 0x1c9   : > { %v1649_v25 = vpop.permute.xlu0 %1648  ;;  %v1750_v29 = vsel %vm1736_vm11, %v1717_v1, %v13844_v35  ;;  %v3313_v49 = vrot.slane %v14048_v13, 1  ;;  %v3317_v54 = vrot.slane %v14076_v45, 1  ;;  %v14127_v16 = vshrl.u32 %v14063_v41, 16 }
 0x1ca   : > { %v14066_v40 = vpop.permute.xlu1 %1954  ;;  %v14073_v32 = vsel %vm1901_vm1, %v1880_v26, %v1649_v25  ;;  %v1783_v24 = vsel %vm1769_vm12, %v1750_v29, %v13896_v37  ;;  %v3597_v38 = vrot.slane %v14099_v59, 1  ;;  %v3318_v57 = vrot.slane %v14051_v47, 2 }
 0x1cb   : > { %10101 = vmatprep.mubr.msk.bf16.mxu0 %vm2030_vm0, %v14073_v32  ;;  %2766 = vrot.lane.b32.xlu0 %v2765_v62, %s11721_s28  ;;  %v1816_v35 = vsel %vm1802_vm13, %v1783_v24, %v13940_v43  ;;  %v14131_v43 = vshll.u32 %v14096_v28, 16  ;;  %v3322_v7 = vrot.slane %v14109_v30, 1  ;;  %v14146_v50 = vshrl.u32 %v14096_v28, 16 }
 0x1cc   : > { %3046 = vrot.lane.b32.xlu1 %v3045_v21, %s11719_s16  ;;  %v1849_v37 = vsel %vm1835_vm14, %v1816_v35, %v13983_v52  ;;  %v3323_v52 = vrot.slane %v14080_v51, 2  ;;  %v3598_v27 = vor.u32 %v3597_v38, %v14127_v16  ;;  %v3309_v62 = vsel %vm687_vm2, %v3304_v42, %v3308_v55 }
 0x1cd   : > { %v14103_v14 = vpop.permute.xlu0 %894  ;;  %v1882_v36 = vsel %vm1868_vm15, %v1849_v37, %v1603_v2  ;;  %v3314_v2 = vsel %vm912_vm3, %v3312_v31, %v3313_v49  ;;  %v3602_v22 = vrot.slane %v14131_v43, 1  ;;  %v3319_v48 = vor.u32 %v3318_v57, %v3317_v54 }
 0x1ce   : > { %v14105_v15 = vpop.permute.xlu1 %1168  ;;  %v3324_v17 = vor.u32 %v3323_v52, %v3322_v7  ;;  %v3333_v12 = vrot.slane %v14076_v45, 2  ;;  %v3334_v34 = vrot.slane %v14051_v47, 3  ;;  %v3336_v8 = vrot.slane %v14109_v30, 2 }
 0x1cf   : > { %2769 = vrot.lane.b32.xlu0 %v9358_v18, %s11722_s29  ;;  %v3337_v18 = vrot.slane %v14080_v51, 3  ;;  %v3611_v1 = vrot.slane %v14127_v16, 1  ;;  %v3616_v29 = vrot.slane %v14146_v50, 1  ;;  %v3603_v24 = vsel %vm687_vm2, %v3598_v27, %v3602_v22 }
 0x1d0   : > { %3051 = vrot.lane.b32.xlu1 %v3050_v0, %s11720_s18  ;;  %v3612_v0 = vrot.slane %v14099_v59, 2  ;;  %v3607_v42 = vrot.slane %v14096_v28, 1  ;;  %v3325_v31 = vsel %vm993_vm5, %v3319_v48, %v3324_v17  ;;  %v3328_v49 = vrot.slane %v14018_v4, 2 }
 0x1d1   : > { %v1651_v58 = vpop.permute.xlu0 %1650  ;;  %v3329_v54 = vrot.slane %v14048_v13, 2  ;;  %v3335_v37 = vor.u32 %v3334_v34, %v3333_v12  ;;  %v3338_v38 = vor.u32 %v3337_v18, %v3336_v8  ;;  %v3342_v22 = vrot.slane %v14018_v4, 3 }
 0x1d2   : > { %v14134_v11 = vpop.permute.xlu1 %1959  ;;  %v14140_v21 = vsel %vm1901_vm1, %v1882_v36, %v1651_v58  ;;  %v3613_v36 = vor.u32 %v3612_v0, %v3611_v1  ;;  %v3343_v48 = vrot.slane %v14048_v13, 3  ;;  %v3622_v17 = vrot.slane %v14063_v41, 2 }
 0x1d3   : > { %10102 = vmatmul.mubr.msk.bf16.gmra.mxu0 %vm2030_vm0, %v14140_v21  ;;  %3060 = vrot.lane.b32.xlu0 %v3059_v6, %s11721_s28  ;;  %v3617_v6 = vrot.slane %v14131_v43, 2  ;;  %v3339_v27 = vsel %vm1251_vm6, %v3335_v37, %v3338_v38  ;;  %v3623_v12 = vrot.slane %v14096_v28, 2  ;;  %v3627_v34 = vrot.slane %v14127_v16, 2 }
 0x1d4   : > { %3063 = vrot.lane.b32.xlu1 %v9379_v61, %s11722_s29  ;;  %v3606_v61 = vrot.slane %v14063_v41, 1  ;;  %v3628_v8 = vrot.slane %v14099_v59, 3  ;;  %v3630_v18 = vrot.slane %v14146_v50, 2  ;;  %v3631_v1 = vrot.slane %v14131_v43, 3 }
 0x1d5   : > { %v14152_v26 = vpop.permute.xlu0 %896  ;;  %v3618_v58 = vor.u32 %v3617_v6, %v3616_v29  ;;  %v3347_v13 = vrot.slane %v14076_v45, 3  ;;  %v3348_v6 = vrot.slane %v14051_v47, 4  ;;  %v3344_v47 = vsel %vm1396_vm7, %v3342_v22, %v3343_v48  ;;  %v517_v22 = vld [vmem:[%s12324_s22 + $0x108] sm:$0xf] }
 0x1d6   : > { %v14154_v25 = vpop.permute.xlu1 %975  ;;  %v3608_v57 = vsel %vm912_vm3, %v3606_v61, %v3607_v42  ;;  %v3351_v61 = vrot.slane %v14080_v51, 4  ;;  %v3624_v42 = vsel %vm1170_vm4, %v3622_v17, %v3623_v12  ;;  %v3641_v51 = vrot.slane %v14127_v16, 3 }
 0x1d7   : > { %3310 = vrot.lane.b32.xlu0 %v3309_v62, %s11716_s25  ;;  %v3619_v62 = vsel %vm993_vm5, %v3613_v36, %v3618_v58  ;;  %v3349_v45 = vor.u32 %v3348_v6, %v3347_v13  ;;  %v3642_v38 = vrot.slane %v14099_v59, 4  ;;  %v3644_v36 = vrot.slane %v14146_v50, 3 }
 0x1d8   : > { %3315 = vrot.lane.b32.xlu1 %v3314_v2, %s11715_s12  ;;  %v3330_v2 = vsel %vm1170_vm4, %v3328_v49, %v3329_v54  ;;  %v3632_v49 = vor.u32 %v3631_v1, %v3630_v18  ;;  %v3645_v58 = vrot.slane %v14131_v43, 4  ;;  %v14233_v43 = vld [vmem:[%s12324_s22 + $0x110] sm:$0xf]  ;;  %v17781_v1 = vld [vmem:[#allocation115_spill] sm:$0xff] }
 0x1d9   : > { %v14170_v55 = vpop.permute.xlu0 %1249  ;;  %v3643_v50 = vor.u32 %v3642_v38, %v3641_v51  ;;  %v1702_v13 = vsel %vm1670_vm9, %v17781_v1, %v13981_v60 }
 0x1da   : > { %v14172_v35 = vpop.permute.xlu1 %1970  ;;  %v3646_v12 = vor.u32 %v3645_v58, %v3644_v36 }
 0x1db   : > { %3326 = vrot.lane.b32.xlu0 %v3325_v31, %s11718_s15  ;;  %v3629_v31 = vor.u32 %v3628_v8, %v3627_v34  ;;  %v9400_v8 = vcombine.low %v14000_v10, %v14027_v33  ;;  %v1735_v10 = vsel %vm1703_vm10, %v1702_v13, %v14036_v39  ;;  %v14265_v33 = vld [vmem:[%s12324_s22 + $0x118] sm:$0xf] }
 0x1dc   : > { %3604 = vrot.lane.b32.xlu1 %v3603_v24, %s11716_s25  ;;  %v3350_v24 = vrot.slane %v14109_v30, 3  ;;  %v3647_v60 = vsel %vm1477_vm8, %v3643_v50, %v3646_v12 }
 0x1dd   : > { %v14180_v7 = vpop.permute.xlu0 %977 }
 0x1de   : > { %v14182_v52 = vpop.permute.xlu1 %1152  ;;  %v3352_v30 = vor.u32 %v3351_v61, %v3350_v24 }
 0x1df   : > { %3331 = vrot.lane.b32.xlu0 %v3330_v2, %s11717_s14  ;;  %v3636_v2 = vrot.slane %v14063_v41, 3 }
 0x1e0   : > { %3609 = vrot.lane.b32.xlu1 %v3608_v57, %s11715_s12  ;;  %v3633_v57 = vsel %vm1251_vm6, %v3629_v31, %v3632_v49  ;;  %v3353_v59 = vsel %vm1477_vm8, %v3349_v45, %v3352_v30  ;;  %v520_v49 = vld [vmem:[%s12324_s22 + $0x114] sm:$0xf]  ;;  %v14275_v30 = vld [vmem:[%s12324_s22 + $0x11c] sm:$0xf] }
 0x1e1   : > { %v14197_v0 = vpop.permute.xlu0 %1394  ;;  %v14278_v51 = vcombine.low %v520_v49, %v14265_v33  ;;  %v14286_v58 = vcombine.low %v14275_v30, %v14275_v30 }
 0x1e2   : > { %v14199_v29 = vpop.permute.xlu1 %1975 }
 0x1e3   : > { %3340 = vrot.lane.b32.xlu0 %v3339_v27, %s11719_s16  ;;  %v3637_v27 = vrot.slane %v14096_v28, 3  ;;  %v14238_v28 = vcombine.low %v14233_v43, %v14233_v43  ;;  %v14303_v1 = vshll.u32 %v14286_v58, 16 }
 0x1e4   : > { %3620 = vrot.lane.b32.xlu1 %v3619_v62, %s11718_s15  ;;  %v14224_v62 = vld [vmem:[%s12324_s22 + $0x10c] sm:$0xf] }
 0x1e5   : > { %v14208_v54 = vpop.permute.xlu0 %1154  ;;  %v14230_v16 = vcombine.low %v517_v22, %v14224_v62  ;;  %v3638_v18 = vsel %vm1396_vm7, %v3636_v2, %v3637_v27  ;;  %v14259_v31 = vshll.u32 %v14238_v28, 16  ;;  %v14272_v45 = vshrl.u32 %v14238_v28, 16 }
 0x1e6   : > { %v14210_v37 = vpop.permute.xlu1 %1233  ;;  %v3901_v36 = vrot.slane %v14238_v28, 1  ;;  %v4190_v41 = vrot.slane %v14303_v1, 1 }
 0x1e7   : > { %3345 = vrot.lane.b32.xlu0 %v3344_v47, %s11720_s18  ;;  %v14241_v34 = vshll.u32 %v14230_v16, 16  ;;  %v14255_v61 = vshrl.u32 %v14230_v16, 16  ;;  %v9421_v47 = vcombine.low %v14042_v23, %v14070_v44  ;;  %v3900_v38 = vrot.slane %v14230_v16, 1 }
 0x1e8   : > { %3625 = vrot.lane.b32.xlu1 %v3624_v42, %s11717_s14  ;;  %v3910_v22 = vrot.slane %v14272_v45, 1  ;;  %v3911_v50 = vrot.slane %v14259_v31, 2 }
 0x1e9   : > { %v1476_v48 = vpop.permute.xlu0 %1475  ;;  %v3891_v42 = vrot.slane %v14241_v34, 1  ;;  %v3905_v2 = vrot.slane %v14255_v61, 1  ;;  %v3906_v27 = vrot.slane %v14241_v34, 2 }
 0x1ea   : > { %v14226_v17 = vpop.permute.xlu1 %1984 }
 0x1eb   : > { %3354 = vrot.lane.b32.xlu0 %v3353_v59, %s11721_s28  ;;  %v3892_v39 = vor.u32 %v3891_v42, %v14255_v61  ;;  %v1768_v59 = vsel %vm1736_vm11, %v1735_v10, %v14105_v15  ;;  %v3907_v12 = vor.u32 %v3906_v27, %v3905_v2  ;;  %v3902_v15 = vsel %vm912_vm3, %v3900_v38, %v3901_v36 }
 0x1ec   : > { %3634 = vrot.lane.b32.xlu1 %v3633_v57, %s11719_s16  ;;  %v3896_v57 = vrot.slane %v14259_v31, 1  ;;  %v1801_v13 = vsel %vm1769_vm12, %v1768_v59, %v14170_v55  ;;  %v3912_v42 = vor.u32 %v3911_v50, %v3910_v22  ;;  %v2004_v55 = vsel %vm1670_vm9, %v13265_v5, %v14066_v40 }
 0x1ed   : > { %v14250_v6 = vpop.permute.xlu0 %1235  ;;  %v1834_v49 = vsel %vm1802_vm13, %v1801_v13, %v14197_v0  ;;  %v2006_v38 = vsel %vm1703_vm10, %v2004_v55, %v14134_v11  ;;  %v4194_v22 = vrot.slane %v14278_v51, 1  ;;  %v4195_v5 = vrot.slane %v14286_v58, 1 }
 0x1ee   : > { %v14252_v24 = vpop.permute.xlu1 %1378  ;;  %v3897_v2 = vsel %vm687_vm2, %v3892_v39, %v3896_v57  ;;  %v3913_v36 = vsel %vm993_vm5, %v3907_v12, %v3912_v42  ;;  %v3916_v57 = vrot.slane %v14230_v16, 2  ;;  %v14333_v40 = vshrl.u32 %v14286_v58, 16 }
 0x1ef   : > { %3357 = vrot.lane.b32.xlu0 %v9400_v8, %s11722_s29  ;;  %v14297_v8 = vshrl.u32 %v14278_v51, 16  ;;  %v3917_v59 = vrot.slane %v14238_v28, 2  ;;  %v3921_v50 = vrot.slane %v14255_v61, 2  ;;  %v3922_v12 = vrot.slane %v14241_v34, 3 }
 0x1f0   : > { %3639 = vrot.lane.b32.xlu1 %v3638_v18, %s11720_s18  ;;  %v14300_v18 = vshll.u32 %v14278_v51, 16  ;;  %v2008_v13 = vsel %vm1736_vm11, %v2006_v38, %v14172_v35  ;;  %v3924_v42 = vrot.slane %v14272_v45, 2  ;;  %v4196_v55 = vsel %vm912_vm3, %v4194_v22, %v4195_v5 }
 0x1f1   : > { %v1621_v23 = vpop.permute.xlu0 %1620  ;;  %v2010_v35 = vsel %vm1769_vm12, %v2008_v13, %v14199_v29  ;;  %v4205_v38 = vrot.slane %v14303_v1, 2  ;;  %v1686_v22 = vsel %vm1670_vm9, %v13308_v56, %v14103_v14  ;;  %v4211_v13 = vrot.slane %v14286_v58, 2 }
 0x1f2   : > { %v1990_v44 = vpop.permute.xlu1 %1989  ;;  %v4185_v27 = vrot.slane %v14300_v18, 1  ;;  %v3935_v56 = vrot.slane %v14255_v61, 3  ;;  %v3936_v14 = vrot.slane %v14241_v34, 4  ;;  %v4216_v34 = vrot.slane %v14300_v18, 3 }
 0x1f3   : > { %3648 = vrot.lane.b32.xlu0 %v3647_v60, %s11721_s28  ;;  %v1867_v60 = vsel %vm1835_vm14, %v1834_v49, %v1476_v48  ;;  %v3925_v49 = vrot.slane %v14259_v31, 3 }
 0x1f4   : > { %3651 = vrot.lane.b32.xlu1 %v9421_v47, %s11722_s29  ;;  %v1900_v0 = vsel %vm1868_vm15, %v1867_v60, %v1621_v23  ;;  %v4186_v39 = vor.u32 %v4185_v27, %v14297_v8  ;;  %v4200_v27 = vrot.slane %v14300_v18, 2  ;;  %v4204_v60 = vrot.slane %v14333_v40, 1 }
 0x1f5   : > { %v14311_v10 = vpop.permute.xlu0 %1380 }
 0x1f6   : > { %v14313_v47 = vpop.permute.xlu1 %1459  ;;  %v4191_v23 = vsel %vm687_vm2, %v4186_v39, %v4190_v41  ;;  %v3923_v41 = vor.u32 %v3922_v12, %v3921_v50 }
 0x1f7   : > { %3898 = vrot.lane.b32.xlu0 %v3897_v2, %s11716_s25  ;;  %v4199_v2 = vrot.slane %v14297_v8, 1 }
 0x1f8   : > { %3903 = vrot.lane.b32.xlu1 %v3902_v15, %s11715_s12 }
 0x1f9   : > { %v1669_v11 = vpop.permute.xlu0 %1668  ;;  %v4201_v50 = vor.u32 %v4200_v27, %v4199_v2 }
 0x1fa   : > { %v1999_v48 = vpop.permute.xlu1 %1998  ;;  %v14342_v15 = vsel %vm1901_vm1, %v1900_v0, %v1669_v11  ;;  %v2012_v0 = vsel %vm1802_vm13, %v2010_v35, %v14226_v17  ;;  %v3918_v11 = vsel %vm1170_vm4, %v3916_v57, %v3917_v59  ;;  %v3930_v59 = vrot.slane %v14230_v16, 3 }
 0x1fb   : > { %10121 = vmatprep.mubr.msk.bf16.mxu1 %vm2030_vm0, %v14342_v15  ;;  %3914 = vrot.lane.b32.xlu0 %v3913_v36, %s11718_s15  ;;  %v2014_v12 = vsel %vm1835_vm14, %v2012_v0, %v1990_v44  ;;  %v4206_v36 = vor.u32 %v4205_v38, %v4204_v60  ;;  %v4210_v44 = vrot.slane %v14278_v51, 2  ;;  %v3939_v35 = vrot.slane %v14259_v31, 4 }
 0x1fc   : > { %4192 = vrot.lane.b32.xlu1 %v4191_v23, %s11716_s25  ;;  %v3926_v23 = vor.u32 %v3925_v49, %v3924_v42  ;;  %v2016_v5 = vsel %vm1868_vm15, %v2014_v12, %v1999_v48  ;;  %v3931_v49 = vrot.slane %v14238_v28, 3  ;;  %v3938_v48 = vrot.slane %v14272_v45, 3 }
 0x1fd   : > { %v14363_v29 = vpop.permute.xlu0 %880  ;;  %v4207_v57 = vsel %vm993_vm5, %v4201_v50, %v4206_v36  ;;  %v4212_v61 = vsel %vm1170_vm4, %v4210_v44, %v4211_v13  ;;  %v3937_v45 = vor.u32 %v3936_v14, %v3935_v56  ;;  %v4219_v60 = vrot.slane %v14303_v1, 3 }
 0x1fe   : > { %v14359_v39 = vpop.permute.xlu1 %1461  ;;  %v3927_v17 = vsel %vm1251_vm6, %v3923_v41, %v3926_v23  ;;  %v1719_v41 = vsel %vm1703_vm10, %v1686_v22, %v14154_v25  ;;  %v4218_v25 = vrot.slane %v14333_v40, 2  ;;  %v3940_v31 = vor.u32 %v3939_v35, %v3938_v48 }
 0x1ff   : > { %3919 = vrot.lane.b32.xlu0 %v3918_v11, %s11717_s14  ;;  %v1752_v28 = vsel %vm1736_vm11, %v1719_v41, %v14182_v52  ;;  %v3932_v0 = vsel %vm1396_vm7, %v3930_v59, %v3931_v49  ;;  %v1688_v23 = vsel %vm1670_vm9, %v13374_v3, %v14152_v26  ;;  %v4224_v3 = vrot.slane %v14278_v51, 3 }
 0x200   : > { %4197 = vrot.lane.b32.xlu1 %v4196_v55, %s11715_s12  ;;  %v4215_v55 = vrot.slane %v14297_v8, 2  ;;  %v1785_v52 = vsel %vm1769_vm12, %v1752_v28, %v14210_v37  ;;  %v4220_v36 = vor.u32 %v4219_v60, %v4218_v25  ;;  %v1721_v22 = vsel %vm1703_vm10, %v1688_v23, %v14180_v7  ;;  %v11256_v60 = vld [vmem:[%s17523_s1 + $0x40] sm:$0xff]  }
 0x201   : > { %v1605_v27 = vpop.permute.xlu0 %1604  ;;  %v1818_v50 = vsel %vm1802_vm13, %v1785_v52, %v14252_v24  ;;  %v3941_v37 = vsel %vm1477_vm8, %v3937_v45, %v3940_v31  ;;  %v4225_v26 = vrot.slane %v14286_v58, 3  ;;  %v4230_v7 = vrot.slane %v14300_v18, 4  ;;  %v11255_v31 = vld [vmem:[%s17523_s1 + $0x30] sm:$0xff]   ;;  %v11259_v52 = vld [vmem:[%s17523_s1 + $0x58] sm:$0x3f]   ;;  %v17786_v23 = vld [vmem:[#allocation95_spill] sm:$0xff] }
 0x202   : > { %v2002_v42 = vpop.permute.xlu1 %2001  ;;  %v4217_v11 = vor.u32 %v4216_v34, %v4215_v55  ;;  %v4232_v59 = vrot.slane %v14333_v40, 3  ;;  %v1754_v44 = vsel %vm1736_vm11, %v1721_v22, %v14208_v54  ;;  %v9442_v54 = vcombine.low %v14224_v62, %v14233_v43  ;;  %v17788_v22 = vld [vmem:[#allocation116_spill] sm:$0xff] }
 0x203   : > { %v14383_v2 = vsel %vm1901_vm1, %v2016_v5, %v2002_v42  ;;  %3928 = vrot.lane.b32.xlu0 %v3927_v17, %s11719_s16  ;;  %v1851_v5 = vsel %vm1835_vm14, %v1818_v50, %v14313_v47  ;;  %v4233_v47 = vrot.slane %v14303_v1, 4  ;;  %v1787_v49 = vsel %vm1769_vm12, %v1754_v44, %v14250_v6  ;;  %v17787_v50 = vld [vmem:[#allocation103_spill] sm:$0xff] }
 0x204   : > { %10122 = vmatmul.mubr.msk.bf16.gmra.mxu1 %vm2030_vm0, %v14383_v2  ;;  %4208 = vrot.lane.b32.xlu1 %v4207_v57, %s11718_s15  ;;  %v4221_v17 = vsel %vm1251_vm6, %v4217_v11, %v4220_v36  ;;  %v4229_v57 = vrot.slane %v14297_v8, 3  ;;  %v1884_v13 = vsel %vm1868_vm15, %v1851_v5, %v1605_v27  ;;  %v1820_v8 = vsel %vm1802_vm13, %v1787_v49, %v14311_v10  ;;  %v17782_v27 = vld [vmem:[#allocation112_spill] sm:$0xff]  ;;  %v17789_v5 = vld [vmem:[#allocation118_spill] sm:$0xff] }
 0x205   : > { %v962_v12 = vpop.permute.xlu0 %961  ;;  %v4226_v18 = vsel %vm1396_vm7, %v4224_v3, %v4225_v26  ;;  %v1853_v6 = vsel %vm1835_vm14, %v1820_v8, %v14359_v39  ;;  %v4234_v56 = vor.u32 %v4233_v47, %v4232_v59  ;;  %v1672_v10 = vsel %vm1670_vm9, %v13569_v9, %v14363_v29  ;;  %v17785_v11 = vld [vmem:[#allocation96_spill] sm:$0xff]  ;;  %v17791_v3 = vld [vmem:[#allocation107_spill] sm:$0xff]  ;;  %v17792_v26 = vld [vmem:[#allocation110_spill] sm:$0xff] }
 0x206   : > { %v1607_v38 = vpop.permute.xlu1 %1606  ;;  %v4231_v40 = vor.u32 %v4230_v7, %v4229_v57  ;;  %v9463_v62 = vcombine.low %v14265_v33, %v14275_v30  ;;  %v1705_v43 = vsel %vm1703_vm10, %v1672_v10, %v962_v12  ;;  %v3389_v36 = vand.u32 %v11259_v52, %v17787_v50  ;;  %v11269_v10 = vld [vmem:[%s17523_s1 + $0x78] sm:$0x3f]  }
 0x207   : > { %3933 = vrot.lane.b32.xlu0 %v3932_v0, %s11720_s18  ;;  %v1886_v14 = vsel %vm1868_vm15, %v1853_v6, %v1607_v38  ;;  %v17783_v38 = vld [vmem:[#allocation108_spill] sm:$0xff] }
 0x208   : > { %4213 = vrot.lane.b32.xlu1 %v4212_v61, %s11717_s14  ;;  %v4235_v29 = vsel %vm1477_vm8, %v4231_v40, %v4234_v56  ;;  %v11260_v61 = vld [vmem:[%s17523_s1 + $0x68] sm:$0x3f]   ;;  %v11266_v56 = vld [vmem:[%s17523_s1 + $0x60] sm:$0xff]   ;;  %s15428_s14 = smov 0  }
 0x209   : > { %v1653_v42 = vpop.permute.xlu0 %1652  ;;  %v17784_v0 = vld [vmem:[#allocation100_spill] sm:$0xff]  ;;  %v3683_v12 = vand.u32 %v11260_v61, %v17787_v50 }
 0x20a   : > { %v1139_v24 = vpop.permute.xlu1 %1138  ;;  %v14425_v58 = vsel %vm1901_vm1, %v1884_v13, %v1653_v42 }
 0x20b   : > { %10105 = vmatprep.mubr.msk.bf16.mxu0 %vm2030_vm0, %v14425_v58  ;;  %3942 = vrot.lane.b32.xlu0 %v3941_v37, %s11721_s28  ;;  %v1738_v39 = vsel %vm1736_vm11, %v1705_v43, %v1139_v24 }
 0x20c   : > { %4222 = vrot.lane.b32.xlu1 %v4221_v17, %s11719_s16  ;;  %v17790_v17 = vld [vmem:[#allocation105_spill] sm:$0xff] }
 0x20d   : > { %v1655_v48 = vpop.permute.xlu0 %1654 }
 0x20e   : > { %v1220_v1 = vpop.permute.xlu1 %1219  ;;  %v14443_v41 = vsel %vm1901_vm1, %v1886_v14, %v1655_v48  ;;  %v11270_v14 = vld [vmem:[%s17523_s1 + $0x88] sm:$0x3f]   ;;  %v11265_v48 = vld [vmem:[%s17523_s1 + $0x50] sm:$0xff]  }
 0x20f   : > { %10106 = vmatmul.mubr.msk.bf16.gmra.mxu0 %vm2030_vm0, %v14443_v41  ;;  %3945 = vrot.lane.b32.xlu0 %v9442_v54, %s11722_s29  ;;  %v1771_v35 = vsel %vm1769_vm12, %v1738_v39, %v1220_v1 }
 0x210   : > { %4227 = vrot.lane.b32.xlu1 %v4226_v18, %s11720_s18  ;;  %10165 = vmatprep.mubr.msk.bf16.mxu0 %vm2030_vm0, %v17782_v27 }
 0x211   : > { %v1365_v55 = vpop.permute.xlu0 %1364 }
 0x212   : > { %v1446_v9 = vpop.permute.xlu1 %1445  ;;  %v1804_v33 = vsel %vm1802_vm13, %v1771_v35, %v1365_v55 }
 0x213   : > { %4236 = vrot.lane.b32.xlu0 %v4235_v29, %s11721_s28  ;;  %v1837_v28 = vsel %vm1835_vm14, %v1804_v33, %v1446_v9 }
 0x214   : > { %4239 = vrot.lane.b32.xlu1 %v9463_v62, %s11722_s29  ;;  %v14579_v62 = vand.u32 %v11269_v10, %v17787_v50 }
 0x215   : > { %v1591_v34 = vpop.permute.xlu0 %1590 }
 0x216   : > { %v1639_v30 = vpop.permute.xlu1 %1638  ;;  %v1870_v25 = vsel %vm1868_vm15, %v1837_v28, %v1591_v34 }
 0x217   : > { %v1903_v45 = vsel %vm1901_vm1, %v1870_v25, %v1639_v30  ;;  %10166 = vmatmul.mubr.msk.bf16.vlgmr.msra.gmra.mxu0 %vm2030_vm0, %v13679_v63 }
 0x218   : > { %10129 = vmatprep.mubr.msk.bf16.mxu1 %vm2030_vm0, %v1903_v45  ;;  %10169 = vmatprep.mubr.msk.bf16.mxu0 %vm2030_vm0, %v17783_v38 }
 0x219   : > { %10130 = vmatmul.mubr.msk.bf16.vlgmr.msra.gmra.mxu1 %vm2030_vm0, %v17784_v0  ;;  %10234 = vmatpush3.bf16.msra.mxu0 %v17785_v11  ;;  %v2429_v37 = vpop.permute.xlu0 %2428 }
 0x21a   : > { %10198 = vmatpush3.bf16.msra.mxu1 %v17786_v23  ;;  %10133 = vmatprep.mubr.msk.bf16.mxu1 %vm2030_vm0, %v17782_v27  ;;  %v2478_v24 = vsel %vm1670_vm9, %v17792_v26, %v2429_v37  ;;  %v2434_v57 = vpop.permute.xlu1 %2433 }
 0x21b   : > { %10199 = vmatprep.subr.bf16.mxu1 %v11255_v31  ;;  %10235 = vmatprep.subr.bf16.mxu0 %v11256_v60  ;;  %v2480_v7 = vsel %vm1703_vm10, %v2478_v24, %v2434_v57 }
 0x21d   : > { %10236 = vmatpush3.bf16.msra.mxu0 %v11256_v60  ;;  %v2445_v59 = vpop.permute.xlu0 %2444 }
 0x21e   : > { %10200 = vmatpush3.bf16.msra.mxu1 %v11255_v31  ;;  %10305 = vmatprep.subr.bf16.mxu0 %v3683_v12  ;;  %v2482_v47 = vsel %vm1736_vm11, %v2480_v7, %v2445_v59  ;;  %v2450_v44 = vpop.permute.xlu1 %2449 }
 0x21f   : > { %10170 = vmatmul.mubr.msk.bf16.gmra.mxu0 %vm2030_vm0, %v14073_v32  ;;  %10269 = vmatprep.subr.bf16.mxu1 %v3389_v36  ;;  %v2484_v13 = vsel %vm1769_vm12, %v2482_v47, %v2450_v44  ;;  %v11272_v47 = vld [vmem:[%s17523_s1 + $0x80] sm:$0xff]   ;;  %v11271_v44 = vld [vmem:[%s17523_s1 + $0x70] sm:$0xff]  }
 0x220   : > { %10173 = vmatprep.mubr.msk.bf16.mxu0 %vm2030_vm0, %v14140_v21 }
 0x221   : > { %10134 = vmatmul.mubr.msk.bf16.gmra.mxu1 %vm2030_vm0, %v13679_v63  ;;  %v2459_v42 = vpop.permute.xlu0 %2458 }
 0x222   : > { %10137 = vmatprep.mubr.msk.bf16.mxu1 %vm2030_vm0, %v17783_v38  ;;  %v2486_v49 = vsel %vm1802_vm13, %v2484_v13, %v2459_v42  ;;  %v2464_v8 = vpop.permute.xlu1 %2463  ;;  %v14681_v42 = vpop.f32.mrf.mxu1 }
 0x223   : > { %v2488_v54 = vsel %vm1835_vm14, %v2486_v49, %v2464_v8  ;;  %v14689_v8 = vpop.f32.mrf.mxu0 }
 0x224   : > { %v14687_v49 = vpop.f32.mrf.mxu1 }
 0x225   : > { %v2473_v18 = vpop.permute.xlu0 %2472 }
 0x226   : > { %v2490_v6 = vsel %vm1868_vm15, %v2488_v54, %v2473_v18  ;;  %v2476_v1 = vpop.permute.xlu1 %2475  ;;  %v14695_v18 = vpop.f32.mrf.mxu1 }
 0x227   : > { %10174 = vmatmul.mubr.msk.bf16.gmra.mxu0 %vm2030_vm0, %v14425_v58  ;;  %v14545_v40 = vsel %vm1901_vm1, %v2490_v6, %v2476_v1  ;;  %v14697_v6 = vpop.f32.mrf.mxu0 }
 0x228   : > { %10177 = vmatprep.mubr.msk.bf16.mxu0 %vm2030_vm0, %v14443_v41 }
 0x229   : > { %10138 = vmatmul.mubr.msk.bf16.gmra.mxu1 %vm2030_vm0, %v14073_v32  ;;  %v2723_v43 = vpop.permute.xlu0 %2722 }
 0x22a   : > { %10141 = vmatprep.mubr.msk.bf16.mxu1 %vm2030_vm0, %v14140_v21  ;;  %v2728_v39 = vpop.permute.xlu1 %2727  ;;  %v2772_v33 = vsel %vm1670_vm9, %v13828_v19, %v2723_v43 }
 0x22b   : > { %v2774_v28 = vsel %vm1703_vm10, %v2772_v33, %v2728_v39 }
 0x22d   : > { %v2739_v27 = vpop.permute.xlu0 %2738 }
 0x22e   : > { %v3017_v9 = vpop.permute.xlu1 %3016  ;;  %v2776_v25 = vsel %vm1736_vm11, %v2774_v28, %v2739_v27  ;;  %v17793_v28 = vld [vmem:[#allocation97_spill] sm:$0xff] }
 0x22f   : > { %10178 = vmatmul.mubr.msk.bf16.gmra.mxu0 %vm2030_vm0, %v17788_v22  ;;  %v3066_v61 = vsel %vm1670_vm9, %v13859_v46, %v3017_v9 }
 0x230   : > { %10181 = vmatprep.mubr.msk.bf16.mxu0 %vm2030_vm0, %v17789_v5 }
 0x231   : > { %10142 = vmatmul.mubr.msk.bf16.gmra.mxu1 %vm2030_vm0, %v14425_v58  ;;  %v2744_v29 = vpop.permute.xlu0 %2743 }
 0x232   : > { %10145 = vmatprep.mubr.msk.bf16.mxu1 %vm2030_vm0, %v14443_v41  ;;  %v3022_v35 = vpop.permute.xlu1 %3021  ;;  %v2778_v19 = vsel %vm1769_vm12, %v2776_v25, %v2744_v29 }
 0x233   : > { %v3068_v31 = vsel %vm1703_vm10, %v3066_v61, %v3022_v35 }
 0x235   : > { %v2753_v55 = vpop.permute.xlu0 %2752 }
 0x236   : > { %v3033_v30 = vpop.permute.xlu1 %3032  ;;  %v2780_v52 = vsel %vm1802_vm13, %v2778_v19, %v2753_v55 }
 0x237   : > { %10182 = vmatmul.mubr.msk.bf16.gmra.mxu0 %vm2030_vm0, %v17790_v17 }
 0x238   : > { %10185 = vmatprep.mubr.msk.bf16.mxu0 %vm2030_vm0, %v17791_v3 }
 0x239   : > { %10146 = vmatmul.mubr.msk.bf16.gmra.mxu1 %vm2030_vm0, %v17788_v22  ;;  %v2758_v34 = vpop.permute.xlu0 %2757 }
 0x23a   : > { %10149 = vmatprep.mubr.msk.bf16.mxu1 %vm2030_vm0, %v17789_v5  ;;  %v3038_v45 = vpop.permute.xlu1 %3037  ;;  %v2782_v46 = vsel %vm1835_vm14, %v2780_v52, %v2758_v34 }
 0x23d   : > { %v2767_v60 = vpop.permute.xlu0 %2766 }
 0x23e   : > { %v3047_v0 = vpop.permute.xlu1 %3046 }
 0x23f   : > { %10186 = vmatmul.mubr.msk.bf16.gmra.mxu0 %vm2030_vm0, %v13966_v20 }
 0x240   : > { %10189 = vmatprep.mubr.msk.bf16.mxu0 %vm2030_vm0, %v14013_v53 }
 0x241   : > { %10150 = vmatmul.mubr.msk.bf16.gmra.mxu1 %vm2030_vm0, %v17790_v17  ;;  %v2770_v23 = vpop.permute.xlu0 %2769 }
 0x242   : > { %10153 = vmatprep.mubr.msk.bf16.mxu1 %vm2030_vm0, %v17791_v3 }
 0x245   : > { %v3061_v24 = vpop.permute.xlu0 %3060 }
 0x247   : > { %10190 = vmatmul.mubr.msk.bf16.gmra.mxu0 %vm2030_vm0, %v14342_v15 }
 0x248   : > { %10193 = vmatprep.mubr.msk.bf16.mxu0 %vm2030_vm0, %v14383_v2 }
 0x249   : > { %10154 = vmatmul.mubr.msk.bf16.gmra.mxu1 %vm2030_vm0, %v13966_v20 }
 0x24a   : > { %10157 = vmatprep.mubr.msk.bf16.mxu1 %vm2030_vm0, %v14013_v53 }
 0x24f   : > { %10194 = vmatmul.mubr.msk.bf16.gmra.mxu0 %vm2030_vm0, %v14545_v40 }
 0x250   : > { %10237 = vmatprep.mubr.msk.bf16.mxu0 %vm2030_vm0, %v17783_v38 }
 0x251   : > { %10158 = vmatmul.mubr.msk.bf16.gmra.mxu1 %vm2030_vm0, %v14342_v15 }
 0x252   : > { %10201 = vmatprep.mubr.msk.bf16.mxu1 %vm2030_vm0, %v13679_v63  ;;  %v14574_v63 = vand.u32 %v11270_v14, %v17787_v50  ;;  %v2784_v50 = vsel %vm1868_vm15, %v2782_v46, %v2767_v60  ;;  %v14703_v14 = vpop.f32.mrf.mxu1 }
 0x253   : > { %v14638_v37 = vsel %vm1901_vm1, %v2784_v50, %v2770_v23 }
 0x254   : > { %v14707_v10 = vpop.f32.mrf.mxu1 }
 0x256   : > { %v14721_v27 = vpop.f32.mrf.mxu1 }
 0x257   : > { %10238 = vmatmul.mubr.msk.bf16.vlgmr.msra.gmra.mxu0 %vm2030_vm0, %v14073_v32 }
 0x258   : > { %10241 = vmatprep.mubr.msk.bf16.mxu0 %vm2030_vm0, %v14140_v21  ;;  %10306 = vmatpush3.bf16.msra.mxu0 %v3683_v12  ;;  %v14726_v55 = vpop.f32.mrf.mxu1 }
 0x259   : > { %10202 = vmatmul.mubr.msk.bf16.vlgmr.msra.gmra.mxu1 %vm2030_vm0, %v17783_v38  ;;  %10307 = vmatprep.subr.bf16.mxu0 %v11266_v56  ;;  %v3070_v38 = vsel %vm1736_vm11, %v3068_v31, %v3033_v30 }
 0x25a   : > { %10270 = vmatpush3.bf16.msra.mxu1 %v3389_v36  ;;  %10205 = vmatprep.mubr.msk.bf16.mxu1 %vm2030_vm0, %v14073_v32  ;;  %v3072_v11 = vsel %vm1769_vm12, %v3070_v38, %v3038_v45  ;;  %v3052_v36 = vpop.permute.xlu1 %3051  ;;  %v14741_v25 = vpop.f32.mrf.mxu1 }
 0x25b   : > { %10271 = vmatprep.subr.bf16.mxu1 %v11265_v48  ;;  %v3074_v12 = vsel %vm1802_vm13, %v3072_v11, %v3047_v0 }
 0x25c   : > { %10308 = vmatpush3.bf16.msra.mxu0 %v11266_v56  ;;  %v3076_v26 = vsel %vm1835_vm14, %v3074_v12, %v3052_v36 }
 0x25d   : > { %10377 = vmatprep.subr.bf16.mxu0 %v14574_v63  ;;  %v3078_v57 = vsel %vm1868_vm15, %v3076_v26, %v3061_v24 }
 0x25e   : > { %10272 = vmatpush3.bf16.msra.mxu1 %v11265_v48  ;;  %v3064_v7 = vpop.permute.xlu1 %3063  ;;  %v14705_v48 = vpop.f32.mrf.mxu0 }
 0x25f   : > { %10242 = vmatmul.mubr.msk.bf16.gmra.mxu0 %vm2030_vm0, %v14425_v58  ;;  %10341 = vmatprep.subr.bf16.mxu1 %v14579_v62  ;;  %v14651_v59 = vsel %vm1901_vm1, %v3078_v57, %v3064_v7 }
 0x260   : > { %10245 = vmatprep.mubr.msk.bf16.mxu0 %vm2030_vm0, %v14443_v41 }
 0x261   : > { %10206 = vmatmul.mubr.msk.bf16.gmra.mxu1 %vm2030_vm0, %v14140_v21 }
 0x262   : > { %10209 = vmatprep.mubr.msk.bf16.mxu1 %vm2030_vm0, %v14425_v58  ;;  %v3316_v13 = vpop.permute.xlu1 %3315 }
 0x266   : > { %v3605_v54 = vpop.permute.xlu1 %3604 }
 0x267   : > { %10246 = vmatmul.mubr.msk.bf16.gmra.mxu0 %vm2030_vm0, %v17788_v22  ;;  %v3654_v34 = vsel %vm1670_vm9, %v17793_v28, %v3605_v54 }
 0x268   : > { %10249 = vmatprep.mubr.msk.bf16.mxu0 %vm2030_vm0, %v17789_v5 }
 0x269   : > { %10210 = vmatmul.mubr.msk.bf16.gmra.mxu1 %vm2030_vm0, %v14443_v41 }
 0x26a   : > { %10213 = vmatprep.mubr.msk.bf16.mxu1 %vm2030_vm0, %v17788_v22  ;;  %v3610_v56 = vpop.permute.xlu1 %3609 }
 0x26b   : > { %v3656_v19 = vsel %vm1703_vm10, %v3654_v34, %v3610_v56 }
 0x26e   : > { %v3621_v39 = vpop.permute.xlu1 %3620 }
 0x26f   : > { %10250 = vmatmul.mubr.msk.bf16.gmra.mxu0 %vm2030_vm0, %v17790_v17  ;;  %v3658_v46 = vsel %vm1736_vm11, %v3656_v19, %v3621_v39 }
 0x270   : > { %10253 = vmatprep.mubr.msk.bf16.mxu0 %vm2030_vm0, %v17791_v3 }
 0x271   : > { %10214 = vmatmul.mubr.msk.bf16.gmra.mxu1 %vm2030_vm0, %v17789_v5 }
 0x272   : > { %10217 = vmatprep.mubr.msk.bf16.mxu1 %vm2030_vm0, %v17790_v17  ;;  %v3626_v30 = vpop.permute.xlu1 %3625 }
 0x273   : > { %v3660_v12 = vsel %vm1769_vm12, %v3658_v46, %v3626_v30 }
 0x276   : > { %v3635_v38 = vpop.permute.xlu1 %3634 }
 0x277   : > { %10254 = vmatmul.mubr.msk.bf16.gmra.mxu0 %vm2030_vm0, %v13966_v20 }
 0x278   : > { %10257 = vmatprep.mubr.msk.bf16.mxu0 %vm2030_vm0, %v14013_v53 }
 0x279   : > { %10218 = vmatmul.mubr.msk.bf16.gmra.mxu1 %vm2030_vm0, %v17791_v3 }
 0x27a   : > { %10221 = vmatprep.mubr.msk.bf16.mxu1 %vm2030_vm0, %v13966_v20  ;;  %v3640_v24 = vpop.permute.xlu1 %3639 }
 0x27e   : > { %v3652_v56 = vpop.permute.xlu1 %3651 }
 0x27f   : > { %10258 = vmatmul.mubr.msk.bf16.gmra.mxu0 %vm2030_vm0, %v14342_v15 }
 0x280   : > { %10261 = vmatprep.mubr.msk.bf16.mxu0 %vm2030_vm0, %v14383_v2 }
 0x281   : > { %10222 = vmatmul.mubr.msk.bf16.gmra.mxu1 %vm2030_vm0, %v14013_v53 }
 0x282   : > { %10225 = vmatprep.mubr.msk.bf16.mxu1 %vm2030_vm0, %v14342_v15 }
 0x284   : > { %v14747_v60 = vpop.f32.mrf.mxu1 }
 0x286   : > { %v14757_v11 = vpop.f32.mrf.mxu1 }
 0x287   : > { %10262 = vmatmul.mubr.msk.bf16.gmra.mxu0 %vm2030_vm0, %v14545_v40 }
 0x288   : > { %10265 = vmatprep.mubr.msk.bf16.mxu0 %vm2030_vm0, %v14638_v37  ;;  %v14768_v57 = vpop.f32.mrf.mxu1 }
 0x289   : > { %10226 = vmatmul.mubr.msk.bf16.gmra.mxu1 %vm2030_vm0, %v14383_v2 }
 0x28a   : > { %10229 = vmatprep.mubr.msk.bf16.mxu1 %vm2030_vm0, %v14545_v40 }
 0x28f   : > { %10266 = vmatmul.mubr.msk.bf16.gmra.mxu0 %vm2030_vm0, %v14651_v59 }
 0x290   : > { %10309 = vmatprep.mubr.msk.bf16.mxu0 %vm2030_vm0, %v14140_v21 }
 0x291   : > { %10230 = vmatmul.mubr.msk.bf16.gmra.mxu1 %vm2030_vm0, %v14638_v37 }
 0x292   : > { %10273 = vmatprep.mubr.msk.bf16.mxu1 %vm2030_vm0, %v14073_v32  ;;  %v3311_v32 = vpop.permute.xlu0 %3310 }
 0x293   : > { %v3360_v43 = vsel %vm1670_vm9, %v14018_v4, %v3311_v32 }
 0x294   : > { %v3362_v29 = vsel %vm1703_vm10, %v3360_v43, %v3316_v13 }
 0x297   : > { %10310 = vmatmul.mubr.msk.bf16.vlgmr.msra.gmra.mxu0 %vm2030_vm0, %v14425_v58 }
 0x298   : > { %10313 = vmatprep.mubr.msk.bf16.mxu0 %vm2030_vm0, %v14443_v41  ;;  %10378 = vmatpush3.bf16.msra.mxu0 %v14574_v63 }
 0x299   : > { %10274 = vmatmul.mubr.msk.bf16.vlgmr.msra.gmra.mxu1 %vm2030_vm0, %v14140_v21  ;;  %10379 = vmatprep.subr.bf16.mxu0 %v11272_v47  ;;  %v3327_v21 = vpop.permute.xlu0 %3326 }
 0x29a   : > { %10342 = vmatpush3.bf16.msra.mxu1 %v14579_v62  ;;  %10277 = vmatprep.mubr.msk.bf16.mxu1 %vm2030_vm0, %v14425_v58  ;;  %v14713_v62 = vpop.f32.mrf.mxu0  ;;  %v3364_v4 = vsel %vm1736_vm11, %v3362_v29, %v3327_v21  ;;  %v14781_v21 = vpop.f32.mrf.mxu1 }
 0x29b   : > { %10343 = vmatprep.subr.bf16.mxu1 %v11271_v44 }
 0x29c   : > { %10380 = vmatpush3.bf16.msra.mxu0 %v11272_v47  ;;  %v14723_v9 = vpop.f32.mrf.mxu0  ;;  %v3662_v47 = vsel %vm1802_vm13, %v3660_v12, %v3635_v38 }
 0x29d   : > { %v3332_v1 = vpop.permute.xlu0 %3331  ;;  %v3664_v32 = vsel %vm1835_vm14, %v3662_v47, %v3640_v24 }
 0x29e   : > { %10344 = vmatpush3.bf16.msra.mxu1 %v11271_v44  ;;  %v14728_v33 = vpop.f32.mrf.mxu0  ;;  %v3366_v45 = vsel %vm1769_vm12, %v3364_v4, %v3332_v1 }
 0x29f   : > { %10314 = vmatmul.mubr.msk.bf16.gmra.mxu0 %vm2030_vm0, %v17788_v22 }
 0x2a0   : > { %10317 = vmatprep.mubr.msk.bf16.mxu0 %vm2030_vm0, %v17789_v5  ;;  %v14743_v61 = vpop.f32.mrf.mxu0 }
 0x2a1   : > { %10278 = vmatmul.mubr.msk.bf16.gmra.mxu1 %vm2030_vm0, %v14443_v41  ;;  %v3341_v63 = vpop.permute.xlu0 %3340 }
 0x2a2   : > { %10281 = vmatprep.mubr.msk.bf16.mxu1 %vm2030_vm0, %v17788_v22  ;;  %v3368_v52 = vsel %vm1802_vm13, %v3366_v45, %v3341_v63  ;;  %v14750_v0 = vpop.f32.mrf.mxu0 }
 0x2a4   : > { %v14759_v23 = vpop.f32.mrf.mxu0 }
 0x2a5   : > { %v3346_v35 = vpop.permute.xlu0 %3345 }
 0x2a6   : > { %v3370_v50 = vsel %vm1835_vm14, %v3368_v52, %v3346_v35  ;;  %v14770_v7 = vpop.f32.mrf.mxu0 }
 0x2a7   : > { %10318 = vmatmul.mubr.msk.bf16.gmra.mxu0 %vm2030_vm0, %v17790_v17 }
 0x2a8   : > { %10321 = vmatprep.mubr.msk.bf16.mxu0 %vm2030_vm0, %v17791_v3  ;;  %v14783_v54 = vpop.f32.mrf.mxu0 }
 0x2a9   : > { %10282 = vmatmul.mubr.msk.bf16.gmra.mxu1 %vm2030_vm0, %v17789_v5  ;;  %v3355_v31 = vpop.permute.xlu0 %3354 }
 0x2aa   : > { %10285 = vmatprep.mubr.msk.bf16.mxu1 %vm2030_vm0, %v17790_v17  ;;  %v3372_v26 = vsel %vm1868_vm15, %v3370_v50, %v3355_v31  ;;  %v14792_v43 = vpop.f32.mrf.mxu0 }
 0x2ad   : > { %v3358_v36 = vpop.permute.xlu0 %3357 }
 0x2ae   : > { %v14774_v44 = vsel %vm1901_vm1, %v3372_v26, %v3358_v36 }
 0x2af   : > { %10322 = vmatmul.mubr.msk.bf16.gmra.mxu0 %vm2030_vm0, %v13966_v20 }
 0x2b0   : > { %10325 = vmatprep.mubr.msk.bf16.mxu0 %vm2030_vm0, %v14013_v53 }
 0x2b1   : > { %10286 = vmatmul.mubr.msk.bf16.gmra.mxu1 %vm2030_vm0, %v17791_v3  ;;  %v3649_v13 = vpop.permute.xlu0 %3648 }
 0x2b2   : > { %10289 = vmatprep.mubr.msk.bf16.mxu1 %vm2030_vm0, %v13966_v20  ;;  %v3666_v1 = vsel %vm1868_vm15, %v3664_v32, %v3649_v13 }
 0x2b3   : > { %v14795_v39 = vsel %vm1901_vm1, %v3666_v1, %v3652_v56 }
 0x2b5   : > { %v3899_v47 = vpop.permute.xlu0 %3898 }
 0x2b7   : > { %10326 = vmatmul.mubr.msk.bf16.gmra.mxu0 %vm2030_vm0, %v14342_v15 }
 0x2b8   : > { %10329 = vmatprep.mubr.msk.bf16.mxu0 %vm2030_vm0, %v14383_v2 }
 0x2b9   : > { %10290 = vmatmul.mubr.msk.bf16.gmra.mxu1 %vm2030_vm0, %v14013_v53 }
 0x2ba   : > { %10293 = vmatprep.mubr.msk.bf16.mxu1 %vm2030_vm0, %v14342_v15 }
 0x2bf   : > { %10330 = vmatmul.mubr.msk.bf16.gmra.mxu0 %vm2030_vm0, %v14545_v40 }
 0x2c0   : > { %10333 = vmatprep.mubr.msk.bf16.mxu0 %vm2030_vm0, %v14638_v37 }
 0x2c1   : > { %10294 = vmatmul.mubr.msk.bf16.gmra.mxu1 %vm2030_vm0, %v14383_v2 }
 0x2c2   : > { %10297 = vmatprep.mubr.msk.bf16.mxu1 %vm2030_vm0, %v14545_v40 }
 0x2c4   : > { %v14790_v63 = vpop.f32.mrf.mxu1 }
 0x2c6   : > { %v14797_v29 = vpop.f32.mrf.mxu1 }
 0x2c7   : > { %10334 = vmatmul.mubr.msk.bf16.gmra.mxu0 %vm2030_vm0, %v14651_v59 }
 0x2c8   : > { %10337 = vmatprep.mubr.msk.bf16.mxu0 %vm2030_vm0, %v14774_v44  ;;  %v14811_v30 = vpop.f32.mrf.mxu1 }
 0x2c9   : > { %10298 = vmatmul.mubr.msk.bf16.gmra.mxu1 %vm2030_vm0, %v14638_v37 }
 0x2ca   : > { %10301 = vmatprep.mubr.msk.bf16.mxu1 %vm2030_vm0, %v14651_v59  ;;  %v14817_v45 = vpop.f32.mrf.mxu1 }
 0x2cf   : > { %v14799_v35 = vpop.f32.mrf.mxu0  ;;  %10338 = vmatmul.mubr.msk.bf16.gmra.mxu0 %vm2030_vm0, %v14795_v39 }
 0x2d0   : > { %10381 = vmatprep.mubr.msk.bf16.mxu0 %vm2030_vm0, %v14443_v41 }
 0x2d1   : > { %v14805_v4 = vpop.f32.mrf.mxu0  ;;  %10302 = vmatmul.mubr.msk.bf16.gmra.mxu1 %vm2030_vm0, %v14774_v44 }
 0x2d2   : > { %10345 = vmatprep.mubr.msk.bf16.mxu1 %vm2030_vm0, %v14425_v58 }
 0x2d3   : > { %v14813_v28 = vpop.f32.mrf.mxu0 }
 0x2d5   : > { %v14815_v34 = vpop.f32.mrf.mxu0 }
 0x2d7   : > { %v10167_v19 = vpop.f32.mrf.mxu0  ;;  %10382 = vmatmul.mubr.msk.bf16.vlgmr.msra.gmra.mxu0 %vm2030_vm0, %v17788_v22 }
 0x2d8   : > { %10385 = vmatprep.mubr.msk.bf16.mxu0 %vm2030_vm0, %v17789_v5 }
 0x2d9   : > { %v10131_v31 = vpop.f32.mrf.mxu1  ;;  %v2543_v52 = vpop.f32.mrf.mxu0  ;;  %10346 = vmatmul.mubr.msk.bf16.vlgmr.msra.gmra.mxu1 %vm2030_vm0, %v14443_v41 }
 0x2da   : > { %v2290_v58 = vadd.f32 %v10131_v31, %v14689_v8  ;;  %10349 = vmatprep.mubr.msk.bf16.mxu1 %vm2030_vm0, %v17788_v22  ;;  %v3904_v8 = vpop.permute.xlu1 %3903 }
 0x2db   : > { %v2281_v38 = vpop.f32.mrf.mxu1  ;;  %v10168_v46 = vpop.f32.mrf.mxu0 }
 0x2dc   : > { %v2282_v50 = vadd.f32 %v2281_v38, %v14697_v6  ;;  %v14829_v12 = vadd.f32 %v10167_v19, %v2290_v58  ;;  %v3915_v58 = vpop.permute.xlu0 %3914 }
 0x2dd   : > { %v10132_v36 = vpop.f32.mrf.mxu1  ;;  %v2546_v26 = vpop.f32.mrf.mxu0 }
 0x2de   : > { %v2293_v24 = vadd.f32 %v10132_v36, %v14705_v48  ;;  %v14832_v32 = vadd.f32 %v2543_v52, %v2282_v50 }
 0x2df   : > { %v2284_v13 = vpop.f32.mrf.mxu1  ;;  %v10171_v41 = vpop.f32.mrf.mxu0  ;;  %10386 = vmatmul.mubr.msk.bf16.gmra.mxu0 %vm2030_vm0, %v17790_v17 }
 0x2e0   : > { %v2285_v22 = vadd.f32 %v2284_v13, %v14713_v62  ;;  %10389 = vmatprep.mubr.msk.bf16.mxu0 %vm2030_vm0, %v17791_v3  ;;  %v14839_v6 = vadd.f32 %v10168_v46, %v2293_v24  ;;  %v4193_v24 = vpop.permute.xlu1 %4192 }
 0x2e1   : > { %v10135_v1 = vpop.f32.mrf.mxu1  ;;  %v2559_v56 = vpop.f32.mrf.mxu0  ;;  %10350 = vmatmul.mubr.msk.bf16.gmra.mxu1 %vm2030_vm0, %v17789_v5 }
 0x2e2   : > { %v2306_v48 = vadd.f32 %v10135_v1, %v14723_v9  ;;  %10353 = vmatprep.mubr.msk.bf16.mxu1 %vm2030_vm0, %v17790_v17  ;;  %v14846_v19 = vadd.f32 %v2546_v26, %v2285_v22  ;;  %v3920_v22 = vpop.permute.xlu0 %3919 }
 0x2e3   : > { %v2297_v31 = vpop.f32.mrf.mxu1  ;;  %v10172_v62 = vpop.f32.mrf.mxu0 }
 0x2e4   : > { %v2298_v52 = vadd.f32 %v2297_v31, %v14728_v33  ;;  %v14849_v38 = vadd.f32 %v10171_v41, %v2306_v48  ;;  %v4198_v31 = vpop.permute.xlu1 %4197 }
 0x2e5   : > { %v10136_v46 = vpop.f32.mrf.mxu1  ;;  %v2562_v50 = vpop.f32.mrf.mxu0 }
 0x2e6   : > { %v2309_v36 = vadd.f32 %v10136_v46, %v14743_v61  ;;  %v14852_v5 = vadd.f32 %v2559_v56, %v2298_v52 }
 0x2e7   : > { %v2300_v9 = vpop.f32.mrf.mxu1  ;;  %v10175_v13 = vpop.f32.mrf.mxu0  ;;  %10390 = vmatmul.mubr.msk.bf16.gmra.mxu0 %vm2030_vm0, %v13966_v20 }
 0x2e8   : > { %v2301_v17 = vadd.f32 %v2300_v9, %v14750_v0  ;;  %10393 = vmatprep.mubr.msk.bf16.mxu0 %vm2030_vm0, %v14013_v53  ;;  %v14859_v33 = vadd.f32 %v10172_v62, %v2309_v36 }
 0x2e9   : > { %v10139_v26 = vpop.f32.mrf.mxu1  ;;  %v2575_v41 = vpop.f32.mrf.mxu0  ;;  %10354 = vmatmul.mubr.msk.bf16.gmra.mxu1 %vm2030_vm0, %v17791_v3 }
 0x2ea   : > { %v2322_v61 = vadd.f32 %v10139_v26, %v14759_v23  ;;  %10357 = vmatprep.mubr.msk.bf16.mxu1 %vm2030_vm0, %v13966_v20  ;;  %v14866_v1 = vadd.f32 %v2562_v50, %v2301_v17  ;;  %v3929_v50 = vpop.permute.xlu0 %3928  ;;  %v4209_v26 = vpop.permute.xlu1 %4208 }
 0x2eb   : > { %v2313_v56 = vpop.f32.mrf.mxu1  ;;  %v10176_v0 = vpop.f32.mrf.mxu0 }
 0x2ec   : > { %v2314_v48 = vadd.f32 %v2313_v56, %v14770_v7  ;;  %v14869_v62 = vadd.f32 %v10175_v13, %v2322_v61 }
 0x2ed   : > { %v10140_v52 = vpop.f32.mrf.mxu1  ;;  %v2578_v46 = vpop.f32.mrf.mxu0 }
 0x2ee   : > { %v2325_v36 = vadd.f32 %v10140_v52, %v14783_v54  ;;  %v14872_v3 = vadd.f32 %v2575_v41, %v2314_v48  ;;  %v3948_v54 = vsel %vm1670_vm9, %v14230_v16, %v3899_v47 }
 0x2ef   : > { %v2316_v23 = vpop.f32.mrf.mxu1  ;;  %v10179_v9 = vpop.f32.mrf.mxu0  ;;  %10394 = vmatmul.mubr.msk.bf16.gmra.mxu0 %vm2030_vm0, %v14342_v15  ;;  %v3950_v52 = vsel %vm1703_vm10, %v3948_v54, %v3904_v8 }
 0x2f0   : > { %v2317_v20 = vadd.f32 %v2316_v23, %v14792_v43  ;;  %10397 = vmatprep.mubr.msk.bf16.mxu0 %vm2030_vm0, %v14383_v2  ;;  %v14879_v7 = vadd.f32 %v10176_v0, %v2325_v36  ;;  %v3934_v23 = vpop.permute.xlu0 %3933 }
 0x2f1   : > { %v10143_v13 = vpop.f32.mrf.mxu1  ;;  %v2591_v17 = vpop.f32.mrf.mxu0  ;;  %10358 = vmatmul.mubr.msk.bf16.gmra.mxu1 %vm2030_vm0, %v14013_v53 }
 0x2f2   : > { %v2338_v41 = vadd.f32 %v10143_v13, %v14799_v35  ;;  %10361 = vmatprep.mubr.msk.bf16.mxu1 %vm2030_vm0, %v14342_v15  ;;  %v14888_v43 = vadd.f32 %v2578_v46, %v2317_v20  ;;  %v3952_v15 = vsel %vm1736_vm11, %v3950_v52, %v3915_v58  ;;  %v4214_v46 = vpop.permute.xlu1 %4213 }
 0x2f3   : > { %v2329_v61 = vpop.f32.mrf.mxu1  ;;  %v10180_v56 = vpop.f32.mrf.mxu0 }
 0x2f4   : > { %v2330_v0 = vadd.f32 %v2329_v61, %v14805_v4  ;;  %v14891_v48 = vadd.f32 %v10179_v9, %v2338_v41 }
 0x2f5   : > { %v10144_v53 = vpop.f32.mrf.mxu1  ;;  %v2594_v36 = vpop.f32.mrf.mxu0 }
 0x2f6   : > { %v2341_v16 = vadd.f32 %v10144_v53, %v14813_v28  ;;  %v14895_v47 = vadd.f32 %v2591_v17, %v2330_v0  ;;  %v4242_v28 = vsel %vm1670_vm9, %v14278_v51, %v4193_v24  ;;  %v4223_v52 = vpop.permute.xlu1 %4222 }
 0x2f7   : > { %v2332_v35 = vpop.f32.mrf.mxu1  ;;  %v10183_v13 = vpop.f32.mrf.mxu0  ;;  %10398 = vmatmul.mubr.msk.bf16.gmra.mxu0 %vm2030_vm0, %v14545_v40  ;;  %v4244_v61 = vsel %vm1703_vm10, %v4242_v28, %v4198_v31 }
 0x2f8   : > { %v2333_v4 = vadd.f32 %v2332_v35, %v14815_v34  ;;  %10401 = vmatprep.mubr.msk.bf16.mxu0 %vm2030_vm0, %v14638_v37  ;;  %v14903_v8 = vadd.f32 %v10180_v56, %v2341_v16  ;;  %v3954_v34 = vsel %vm1769_vm12, %v3952_v15, %v3920_v22  ;;  %v3943_v56 = vpop.permute.xlu0 %3942  ;;  %v4246_v22 = vsel %vm1736_vm11, %v4244_v61, %v4209_v26 }
 0x2f9   : > { %v10147_v9 = vpop.f32.mrf.mxu1  ;;  %v2607_v20 = vpop.f32.mrf.mxu0  ;;  %10362 = vmatmul.mubr.msk.bf16.gmra.mxu1 %vm2030_vm0, %v14383_v2  ;;  %v4248_v26 = vsel %vm1769_vm12, %v4246_v22, %v4214_v46 }
 0x2fa   : > { %v2354_v17 = vadd.f32 %v10147_v9, %v14681_v42  ;;  %10365 = vmatprep.mubr.msk.bf16.mxu1 %vm2030_vm0, %v14545_v40  ;;  %v14912_v58 = vadd.f32 %v2594_v36, %v2333_v4  ;;  %v3956_v42 = vsel %vm1802_vm13, %v3954_v34, %v3929_v50 }
 0x2fb   : > { %v2345_v54 = vpop.f32.mrf.mxu1  ;;  %v10184_v41 = vpop.f32.mrf.mxu0  ;;  %v3958_v50 = vsel %vm1835_vm14, %v3956_v42, %v3934_v23 }
 0x2fc   : > { %v2346_v51 = vadd.f32 %v2345_v54, %v14687_v49  ;;  %v14917_v24 = vadd.f32 %v10183_v13, %v2354_v17  ;;  %v3946_v13 = vpop.permute.xlu0 %3945  ;;  %v3960_v9 = vsel %vm1868_vm15, %v3958_v50, %v3943_v56  ;;  %v4228_v23 = vpop.permute.xlu1 %4227 }
 0x2fd   : > { %v10148_v0 = vpop.f32.mrf.mxu1  ;;  %v2610_v2 = vpop.f32.mrf.mxu0 }
 0x2fe   : > { %v2357_v40 = vadd.f32 %v10148_v0, %v14695_v18  ;;  %v14921_v53 = vadd.f32 %v2607_v20, %v2346_v51 }
 0x2ff   : > { %v2348_v36 = vpop.f32.mrf.mxu1  ;;  %v10187_v16 = vpop.f32.mrf.mxu0  ;;  %10402 = vmatmul.mubr.msk.bf16.gmra.mxu0 %vm2030_vm0, %v14651_v59 }
 0x300   : > { %v2349_v49 = vadd.f32 %v2348_v36, %v14703_v14  ;;  %10405 = vmatprep.mubr.msk.bf16.mxu0 %vm2030_vm0, %v14774_v44  ;;  %v14929_v31 = vadd.f32 %v10184_v41, %v2357_v40  ;;  %v4240_v42 = vpop.permute.xlu1 %4239 }
 0x301   : > { %v10151_v35 = vpop.f32.mrf.mxu1  ;;  %v2623_v18 = vpop.f32.mrf.mxu0  ;;  %10366 = vmatmul.mubr.msk.bf16.gmra.mxu1 %vm2030_vm0, %v14638_v37  ;;  %v4250_v37 = vsel %vm1802_vm13, %v4248_v26, %v4223_v52 }
 0x302   : > { %v2370_v15 = vadd.f32 %v10151_v35, %v14707_v10  ;;  %10369 = vmatprep.mubr.msk.bf16.mxu1 %vm2030_vm0, %v14651_v59  ;;  %v14938_v14 = vadd.f32 %v2610_v2, %v2349_v49  ;;  %v3962_v59 = vsel %vm1901_vm1, %v3960_v9, %v3946_v13  ;;  %v4252_v56 = vsel %vm1835_vm14, %v4250_v37, %v4228_v23 }
 0x303   : > { %v2361_v4 = vpop.f32.mrf.mxu1  ;;  %v10188_v28 = vpop.f32.mrf.mxu0 }
 0x304   : > { %v2362_v20 = vadd.f32 %v2361_v4, %v14721_v27  ;;  %v14942_v17 = vadd.f32 %v10187_v16, %v2370_v15  ;;  %v4237_v27 = vpop.permute.xlu0 %4236 }
 0x305   : > { %v10152_v46 = vpop.f32.mrf.mxu1  ;;  %v2626_v34 = vpop.f32.mrf.mxu0  ;;  %v4254_v22 = vsel %vm1868_vm15, %v4252_v56, %v4237_v27 }
 0x306   : > { %v2373_v10 = vadd.f32 %v10152_v46, %v14726_v55  ;;  %v14946_v54 = vadd.f32 %v2623_v18, %v2362_v20 }
 0x307   : > { %v2364_v41 = vpop.f32.mrf.mxu1  ;;  %v10191_v61 = vpop.f32.mrf.mxu0  ;;  %10406 = vmatmul.mubr.msk.bf16.gmra.mxu0 %vm2030_vm0, %v14795_v39 }
 0x308   : > { %v2365_v51 = vadd.f32 %v2364_v41, %v14741_v25  ;;  %10409 = vmatprep.mubr.msk.bf16.mxu0 %vm2030_vm0, %v3962_v59  ;;  %v14954_v0 = vadd.f32 %v10188_v28, %v2373_v10 }
 0x309   : > { %v10155_v2 = vpop.f32.mrf.mxu1  ;;  %v2639_v55 = vpop.f32.mrf.mxu0  ;;  %10370 = vmatmul.mubr.msk.bf16.gmra.mxu1 %vm2030_vm0, %v14774_v44  ;;  %v4256_v44 = vsel %vm1901_vm1, %v4254_v22, %v4240_v42 }
 0x30a   : > { %v2386_v52 = vadd.f32 %v10155_v2, %v14747_v60  ;;  %10373 = vmatprep.mubr.msk.bf16.mxu1 %vm2030_vm0, %v14795_v39  ;;  %v14961_v40 = vadd.f32 %v2626_v34, %v2365_v51 }
 0x30b   : > { %v2377_v25 = vpop.f32.mrf.mxu1  ;;  %v10192_v36 = vpop.f32.mrf.mxu0 }
 0x30c   : > { %v2378_v16 = vadd.f32 %v2377_v25, %v14757_v11  ;;  %v14965_v49 = vadd.f32 %v10191_v61, %v2386_v52 }
 0x30d   : > { %v10156_v50 = vpop.f32.mrf.mxu1  ;;  %v2642_v35 = vpop.f32.mrf.mxu0 }
 0x30e   : > { %v2389_v18 = vadd.f32 %v10156_v50, %v14768_v57  ;;  %v14969_v60 = vadd.f32 %v2639_v55, %v2378_v16 }
 0x30f   : > { %v2380_v26 = vpop.f32.mrf.mxu1  ;;  %v10195_v39 = vpop.f32.mrf.mxu0  ;;  %10410 = vmatmul.mubr.msk.bf16.gmra.mxu0 %vm2030_vm0, %v4256_v44 }
 0x310   : > { %v2381_v13 = vadd.f32 %v2380_v26, %v14781_v21  ;;  %v14973_v15 = vadd.f32 %v10192_v36, %v2389_v18 }
 0x311   : > { %v10159_v4 = vpop.f32.mrf.mxu1  ;;  %v2655_v11 = vpop.f32.mrf.mxu0  ;;  %10374 = vmatmul.mubr.msk.bf16.gmra.mxu1 %vm2030_vm0, %v3962_v59 }
 0x312   : > { %v2402_v28 = vadd.f32 %v10159_v4, %v14790_v63  ;;  %v14977_v9 = vadd.f32 %v2642_v35, %v2381_v13 }
 0x313   : > { %v2393_v23 = vpop.f32.mrf.mxu1  ;;  %v10196_v57 = vpop.f32.mrf.mxu0 }
 0x314   : > { %v2394_v20 = vadd.f32 %v2393_v23, %v14797_v29  ;;  %v14980_v37 = vadd.f32 %v10195_v39, %v2402_v28 }
 0x315   : > { %v10160_v46 = vpop.f32.mrf.mxu1  ;;  %v2658_v34 = vpop.f32.mrf.mxu0 }
 0x316   : > { %v2405_v21 = vadd.f32 %v10160_v46, %v14811_v30  ;;  %v14983_v10 = vadd.f32 %v2655_v11, %v2394_v20 }
 0x317   : > { %v2396_v41 = vpop.f32.mrf.mxu1  ;;  %v10239_v61 = vpop.f32.mrf.mxu0 }
 0x318   : > { %v2397_v59 = vadd.f32 %v2396_v41, %v14817_v45  ;;  %v14986_v56 = vadd.f32 %v10196_v57, %v2405_v21 }
 0x319   : > { %v10203_v63 = vpop.f32.mrf.mxu1  ;;  %v3131_v27 = vpop.f32.mrf.mxu0 }
 0x31a   : > { %v2966_v51 = vadd.f32 %v10203_v63, %v14829_v12  ;;  %v14989_v2 = vadd.f32 %v2658_v34, %v2397_v59 }
 0x31b   : > { %v2837_v29 = vpop.f32.mrf.mxu1  ;;  %v10240_v55 = vpop.f32.mrf.mxu0 }
 0x31c   : > { %v2964_v42 = vadd.f32 %v2837_v29, %v14832_v32  ;;  %v14992_v52 = vadd.f32 %v10239_v61, %v2966_v51 }
 0x31d   : > { %v10204_v30 = vpop.f32.mrf.mxu1  ;;  %v3134_v22 = vpop.f32.mrf.mxu0 }
 0x31e   : > { %v2967_v25 = vadd.f32 %v10204_v30, %v14839_v6  ;;  %v14995_v36 = vadd.f32 %v3131_v27, %v2964_v42 }
 0x31f   : > { %v2840_v45 = vpop.f32.mrf.mxu1  ;;  %v10243_v16 = vpop.f32.mrf.mxu0 }
 0x320   : > { %v2965_v50 = vadd.f32 %v2840_v45, %v14846_v19  ;;  %v14998_v35 = vadd.f32 %v10240_v55, %v2967_v25 }
 0x321   : > { %v10207_v12 = vpop.f32.mrf.mxu1  ;;  %v3147_v44 = vpop.f32.mrf.mxu0 }
 0x322   : > { %v2970_v18 = vadd.f32 %v10207_v12, %v14849_v38  ;;  %v15001_v26 = vadd.f32 %v3134_v22, %v2965_v50 }
 0x323   : > { %v2853_v32 = vpop.f32.mrf.mxu1  ;;  %v10244_v39 = vpop.f32.mrf.mxu0 }
 0x324   : > { %v2968_v13 = vadd.f32 %v2853_v32, %v14852_v5  ;;  %v15004_v4 = vadd.f32 %v10243_v16, %v2970_v18 }
 0x325   : > { %v10208_v6 = vpop.f32.mrf.mxu1  ;;  %v3150_v11 = vpop.f32.mrf.mxu0 }
 0x326   : > { %v2971_v28 = vadd.f32 %v10208_v6, %v14859_v33  ;;  %v15007_v23 = vadd.f32 %v3147_v44, %v2968_v13 }
 0x327   : > { %v2856_v19 = vpop.f32.mrf.mxu1  ;;  %v10247_v57 = vpop.f32.mrf.mxu0 }
 0x328   : > { %v2969_v20 = vadd.f32 %v2856_v19, %v14866_v1  ;;  %v15010_v46 = vadd.f32 %v10244_v39, %v2971_v28 }
 0x329   : > { %v10211_v38 = vpop.f32.mrf.mxu1  ;;  %v3163_v34 = vpop.f32.mrf.mxu0 }
 0x32a   : > { %v2974_v21 = vadd.f32 %v10211_v38, %v14869_v62  ;;  %v15013_v41 = vadd.f32 %v3150_v11, %v2969_v20 }
 0x32b   : > { %v2869_v5 = vpop.f32.mrf.mxu1  ;;  %v10248_v61 = vpop.f32.mrf.mxu0 }
 0x32c   : > { %v2972_v59 = vadd.f32 %v2869_v5, %v14872_v3  ;;  %v15016_v63 = vadd.f32 %v10247_v57, %v2974_v21 }
 0x32d   : > { %v10212_v33 = vpop.f32.mrf.mxu1  ;;  %v3166_v27 = vpop.f32.mrf.mxu0 }
 0x32e   : > { %v2975_v51 = vadd.f32 %v10212_v33, %v14879_v7  ;;  %v15019_v29 = vadd.f32 %v3163_v34, %v2972_v59 }
 0x32f   : > { %v2872_v1 = vpop.f32.mrf.mxu1  ;;  %v10251_v55 = vpop.f32.mrf.mxu0 }
 0x330   : > { %v2973_v42 = vadd.f32 %v2872_v1, %v14888_v43  ;;  %v15022_v30 = vadd.f32 %v10248_v61, %v2975_v51 }
 0x331   : > { %v10215_v62 = vpop.f32.mrf.mxu1  ;;  %v3179_v22 = vpop.f32.mrf.mxu0 }
 0x332   : > { %v2978_v25 = vadd.f32 %v10215_v62, %v14891_v48  ;;  %v15025_v45 = vadd.f32 %v3166_v27, %v2973_v42 }
 0x333   : > { %v2885_v3 = vpop.f32.mrf.mxu1  ;;  %v10252_v16 = vpop.f32.mrf.mxu0 }
 0x334   : > { %v2976_v50 = vadd.f32 %v2885_v3, %v14895_v47  ;;  %v15028_v12 = vadd.f32 %v10251_v55, %v2978_v25 }
 0x335   : > { %v10216_v7 = vpop.f32.mrf.mxu1  ;;  %v3182_v44 = vpop.f32.mrf.mxu0 }
 0x336   : > { %v2979_v18 = vadd.f32 %v10216_v7, %v14903_v8  ;;  %v15031_v32 = vadd.f32 %v3179_v22, %v2976_v50 }
 0x337   : > { %v2888_v43 = vpop.f32.mrf.mxu1  ;;  %v10255_v39 = vpop.f32.mrf.mxu0 }
 0x338   : > { %v2977_v13 = vadd.f32 %v2888_v43, %v14912_v58  ;;  %v15034_v6 = vadd.f32 %v10252_v16, %v2979_v18 }
 0x339   : > { %v10219_v48 = vpop.f32.mrf.mxu1  ;;  %v3195_v11 = vpop.f32.mrf.mxu0 }
 0x33a   : > { %v2982_v28 = vadd.f32 %v10219_v48, %v14917_v24  ;;  %v15037_v19 = vadd.f32 %v3182_v44, %v2977_v13 }
 0x33b   : > { %v2901_v47 = vpop.f32.mrf.mxu1  ;;  %v10256_v57 = vpop.f32.mrf.mxu0 }
 0x33c   : > { %v2980_v20 = vadd.f32 %v2901_v47, %v14921_v53  ;;  %v15040_v38 = vadd.f32 %v10255_v39, %v2982_v28 }
 0x33d   : > { %v10220_v8 = vpop.f32.mrf.mxu1  ;;  %v3198_v34 = vpop.f32.mrf.mxu0 }
 0x33e   : > { %v2983_v21 = vadd.f32 %v10220_v8, %v14929_v31  ;;  %v15043_v5 = vadd.f32 %v3195_v11, %v2980_v20 }
 0x33f   : > { %v2904_v58 = vpop.f32.mrf.mxu1  ;;  %v10259_v61 = vpop.f32.mrf.mxu0 }
 0x340   : > { %v2981_v59 = vadd.f32 %v2904_v58, %v14938_v14  ;;  %v15046_v33 = vadd.f32 %v10256_v57, %v2983_v21 }
 0x341   : > { %v10223_v24 = vpop.f32.mrf.mxu1  ;;  %v3211_v27 = vpop.f32.mrf.mxu0 }
 0x342   : > { %v2986_v51 = vadd.f32 %v10223_v24, %v14942_v17  ;;  %v15049_v1 = vadd.f32 %v3198_v34, %v2981_v59 }
 0x343   : > { %v2917_v53 = vpop.f32.mrf.mxu1  ;;  %v10260_v55 = vpop.f32.mrf.mxu0 }
 0x344   : > { %v2984_v42 = vadd.f32 %v2917_v53, %v14946_v54  ;;  %v15052_v62 = vadd.f32 %v10259_v61, %v2986_v51 }
 0x345   : > { %v10224_v31 = vpop.f32.mrf.mxu1  ;;  %v3214_v22 = vpop.f32.mrf.mxu0 }
 0x346   : > { %v2987_v25 = vadd.f32 %v10224_v31, %v14954_v0  ;;  %v15055_v3 = vadd.f32 %v3211_v27, %v2984_v42 }
 0x347   : > { %v2920_v14 = vpop.f32.mrf.mxu1  ;;  %v10263_v16 = vpop.f32.mrf.mxu0 }
 0x348   : > { %v2985_v50 = vadd.f32 %v2920_v14, %v14961_v40  ;;  %v15058_v7 = vadd.f32 %v10260_v55, %v2987_v25 }
 0x349   : > { %v10227_v17 = vpop.f32.mrf.mxu1  ;;  %v3227_v44 = vpop.f32.mrf.mxu0 }
 0x34a   : > { %v2990_v18 = vadd.f32 %v10227_v17, %v14965_v49  ;;  %v15061_v43 = vadd.f32 %v3214_v22, %v2985_v50 }
 0x34b   : > { %v2933_v54 = vpop.f32.mrf.mxu1  ;;  %v10264_v39 = vpop.f32.mrf.mxu0 }
 0x34c   : > { %v2988_v13 = vadd.f32 %v2933_v54, %v14969_v60  ;;  %v15064_v48 = vadd.f32 %v10263_v16, %v2990_v18 }
 0x34d   : > { %v10228_v0 = vpop.f32.mrf.mxu1  ;;  %v3230_v11 = vpop.f32.mrf.mxu0 }
 0x34e   : > { %v2991_v28 = vadd.f32 %v10228_v0, %v14973_v15  ;;  %v15067_v47 = vadd.f32 %v3227_v44, %v2988_v13 }
 0x34f   : > { %v2936_v40 = vpop.f32.mrf.mxu1  ;;  %v10267_v57 = vpop.f32.mrf.mxu0 }
 0x350   : > { %v2989_v20 = vadd.f32 %v2936_v40, %v14977_v9  ;;  %v15070_v8 = vadd.f32 %v10264_v39, %v2991_v28 }
 0x351   : > { %v10231_v49 = vpop.f32.mrf.mxu1  ;;  %v3243_v34 = vpop.f32.mrf.mxu0 }
 0x352   : > { %v2994_v21 = vadd.f32 %v10231_v49, %v14980_v37  ;;  %v15073_v58 = vadd.f32 %v3230_v11, %v2989_v20 }
 0x353   : > { %v2949_v60 = vpop.f32.mrf.mxu1  ;;  %v10268_v61 = vpop.f32.mrf.mxu0 }
 0x354   : > { %v2992_v59 = vadd.f32 %v2949_v60, %v14983_v10  ;;  %v15076_v24 = vadd.f32 %v10267_v57, %v2994_v21 }
 0x355   : > { %v10232_v15 = vpop.f32.mrf.mxu1  ;;  %v3246_v27 = vpop.f32.mrf.mxu0 }
 0x356   : > { %v2995_v51 = vadd.f32 %v10232_v15, %v14986_v56  ;;  %v15079_v53 = vadd.f32 %v3243_v34, %v2992_v59 }
 0x357   : > { %v2952_v9 = vpop.f32.mrf.mxu1  ;;  %v10311_v55 = vpop.f32.mrf.mxu0 }
 0x358   : > { %v2993_v42 = vadd.f32 %v2952_v9, %v14989_v2  ;;  %v15082_v31 = vadd.f32 %v10268_v61, %v2995_v51 }
 0x359   : > { %v10275_v37 = vpop.f32.mrf.mxu1  ;;  %v3719_v22 = vpop.f32.mrf.mxu0 }
 0x35a   : > { %v3554_v25 = vadd.f32 %v10275_v37, %v14992_v52  ;;  %v15085_v14 = vadd.f32 %v3246_v27, %v2993_v42 }
 0x35b   : > { %v3425_v10 = vpop.f32.mrf.mxu1  ;;  %v10312_v16 = vpop.f32.mrf.mxu0 }
 0x35c   : > { %v3552_v50 = vadd.f32 %v3425_v10, %v14995_v36  ;;  %v15088_v17 = vadd.f32 %v10311_v55, %v3554_v25 }
 0x35d   : > { %v10276_v56 = vpop.f32.mrf.mxu1  ;;  %v3722_v44 = vpop.f32.mrf.mxu0 }
 0x35e   : > { %v3555_v18 = vadd.f32 %v10276_v56, %v14998_v35  ;;  %v15091_v54 = vadd.f32 %v3719_v22, %v3552_v50 }
 0x35f   : > { %v3428_v2 = vpop.f32.mrf.mxu1  ;;  %v10315_v39 = vpop.f32.mrf.mxu0 }
 0x360   : > { %v3553_v13 = vadd.f32 %v3428_v2, %v15001_v26  ;;  %v15094_v0 = vadd.f32 %v10312_v16, %v3555_v18 }
 0x361   : > { %v10279_v52 = vpop.f32.mrf.mxu1  ;;  %v3735_v11 = vpop.f32.mrf.mxu0 }
 0x362   : > { %v3558_v28 = vadd.f32 %v10279_v52, %v15004_v4  ;;  %v15097_v40 = vadd.f32 %v3722_v44, %v3553_v13 }
 0x363   : > { %v3441_v36 = vpop.f32.mrf.mxu1  ;;  %v10316_v57 = vpop.f32.mrf.mxu0 }
 0x364   : > { %v3556_v20 = vadd.f32 %v3441_v36, %v15007_v23  ;;  %v15100_v49 = vadd.f32 %v10315_v39, %v3558_v28 }
 0x365   : > { %v10280_v35 = vpop.f32.mrf.mxu1  ;;  %v3738_v34 = vpop.f32.mrf.mxu0 }
 0x366   : > { %v3559_v21 = vadd.f32 %v10280_v35, %v15010_v46  ;;  %v15103_v60 = vadd.f32 %v3735_v11, %v3556_v20 }
 0x367   : > { %v3444_v26 = vpop.f32.mrf.mxu1  ;;  %v10319_v61 = vpop.f32.mrf.mxu0 }
 0x368   : > { %v3557_v59 = vadd.f32 %v3444_v26, %v15013_v41  ;;  %v15106_v15 = vadd.f32 %v10316_v57, %v3559_v21 }
 0x369   : > { %v10283_v4 = vpop.f32.mrf.mxu1  ;;  %v3751_v27 = vpop.f32.mrf.mxu0 }
 0x36a   : > { %v3562_v51 = vadd.f32 %v10283_v4, %v15016_v63  ;;  %v15109_v9 = vadd.f32 %v3738_v34, %v3557_v59 }
 0x36b   : > { %v3457_v23 = vpop.f32.mrf.mxu1  ;;  %v10320_v55 = vpop.f32.mrf.mxu0 }
 0x36c   : > { %v3560_v42 = vadd.f32 %v3457_v23, %v15019_v29  ;;  %v15112_v37 = vadd.f32 %v10319_v61, %v3562_v51 }
 0x36d   : > { %v10284_v46 = vpop.f32.mrf.mxu1  ;;  %v3754_v22 = vpop.f32.mrf.mxu0 }
 0x36e   : > { %v3563_v25 = vadd.f32 %v10284_v46, %v15022_v30  ;;  %v15115_v10 = vadd.f32 %v3751_v27, %v3560_v42 }
 0x36f   : > { %v3460_v41 = vpop.f32.mrf.mxu1  ;;  %v10323_v16 = vpop.f32.mrf.mxu0 }
 0x370   : > { %v3561_v50 = vadd.f32 %v3460_v41, %v15025_v45  ;;  %v15118_v56 = vadd.f32 %v10320_v55, %v3563_v25 }
 0x371   : > { %v10287_v63 = vpop.f32.mrf.mxu1  ;;  %v3767_v44 = vpop.f32.mrf.mxu0 }
 0x372   : > { %v3566_v18 = vadd.f32 %v10287_v63, %v15028_v12  ;;  %v15121_v2 = vadd.f32 %v3754_v22, %v3561_v50 }
 0x373   : > { %v3473_v29 = vpop.f32.mrf.mxu1  ;;  %v10324_v39 = vpop.f32.mrf.mxu0 }
 0x374   : > { %v3564_v13 = vadd.f32 %v3473_v29, %v15031_v32  ;;  %v15124_v52 = vadd.f32 %v10323_v16, %v3566_v18 }
 0x375   : > { %v10288_v30 = vpop.f32.mrf.mxu1  ;;  %v3770_v11 = vpop.f32.mrf.mxu0 }
 0x376   : > { %v3567_v28 = vadd.f32 %v10288_v30, %v15034_v6  ;;  %v15127_v36 = vadd.f32 %v3767_v44, %v3564_v13 }
 0x377   : > { %v3476_v45 = vpop.f32.mrf.mxu1  ;;  %v10327_v57 = vpop.f32.mrf.mxu0 }
 0x378   : > { %v3565_v20 = vadd.f32 %v3476_v45, %v15037_v19  ;;  %v15130_v35 = vadd.f32 %v10324_v39, %v3567_v28 }
 0x379   : > { %v10291_v12 = vpop.f32.mrf.mxu1  ;;  %v3783_v34 = vpop.f32.mrf.mxu0 }
 0x37a   : > { %v3570_v21 = vadd.f32 %v10291_v12, %v15040_v38  ;;  %v15133_v26 = vadd.f32 %v3770_v11, %v3565_v20 }
 0x37b   : > { %v3489_v32 = vpop.f32.mrf.mxu1  ;;  %v10328_v61 = vpop.f32.mrf.mxu0 }
 0x37c   : > { %v3568_v59 = vadd.f32 %v3489_v32, %v15043_v5  ;;  %v15136_v4 = vadd.f32 %v10327_v57, %v3570_v21 }
 0x37d   : > { %v10292_v6 = vpop.f32.mrf.mxu1  ;;  %v3786_v27 = vpop.f32.mrf.mxu0 }
 0x37e   : > { %v3571_v51 = vadd.f32 %v10292_v6, %v15046_v33  ;;  %v15139_v23 = vadd.f32 %v3783_v34, %v3568_v59 }
 0x37f   : > { %v3492_v19 = vpop.f32.mrf.mxu1  ;;  %v10331_v55 = vpop.f32.mrf.mxu0 }
 0x380   : > { %v3569_v42 = vadd.f32 %v3492_v19, %v15049_v1  ;;  %v15142_v46 = vadd.f32 %v10328_v61, %v3571_v51 }
 0x381   : > { %v10295_v38 = vpop.f32.mrf.mxu1  ;;  %v3799_v22 = vpop.f32.mrf.mxu0 }
 0x382   : > { %v3574_v25 = vadd.f32 %v10295_v38, %v15052_v62  ;;  %v15145_v41 = vadd.f32 %v3786_v27, %v3569_v42 }
 0x383   : > { %v3505_v5 = vpop.f32.mrf.mxu1  ;;  %v10332_v16 = vpop.f32.mrf.mxu0 }
 0x384   : > { %v3572_v50 = vadd.f32 %v3505_v5, %v15055_v3  ;;  %v15148_v63 = vadd.f32 %v10331_v55, %v3574_v25 }
 0x385   : > { %v10296_v33 = vpop.f32.mrf.mxu1  ;;  %v3802_v44 = vpop.f32.mrf.mxu0 }
 0x386   : > { %v3575_v18 = vadd.f32 %v10296_v33, %v15058_v7  ;;  %v15151_v29 = vadd.f32 %v3799_v22, %v3572_v50  ;;  %v15185_v33 = vld [vmem:[#allocation3] ss:$0 sm:$0xff] }
 0x387   : > { %v3508_v1 = vpop.f32.mrf.mxu1  ;;  %v10335_v39 = vpop.f32.mrf.mxu0 }
 0x388   : > { %v3573_v13 = vadd.f32 %v3508_v1, %v15061_v43  ;;  %v15154_v30 = vadd.f32 %v10332_v16, %v3575_v18 }
 0x389   : > { %v10299_v62 = vpop.f32.mrf.mxu1  ;;  %v3815_v11 = vpop.f32.mrf.mxu0 }
 0x38a   : > { %v3578_v28 = vadd.f32 %v10299_v62, %v15064_v48  ;;  %v15157_v45 = vadd.f32 %v3802_v44, %v3573_v13 }
 0x38b   : > { %v3521_v3 = vpop.f32.mrf.mxu1  ;;  %v10336_v57 = vpop.f32.mrf.mxu0 }
 0x38c   : > { %v3576_v20 = vadd.f32 %v3521_v3, %v15067_v47  ;;  %v15160_v12 = vadd.f32 %v10335_v39, %v3578_v28 }
 0x38d   : > { %v10300_v7 = vpop.f32.mrf.mxu1  ;;  %v3818_v34 = vpop.f32.mrf.mxu0 }
 0x38e   : > { %v3579_v21 = vadd.f32 %v10300_v7, %v15070_v8  ;;  %v15163_v32 = vadd.f32 %v3815_v11, %v3576_v20 }
 0x38f   : > { %v3524_v43 = vpop.f32.mrf.mxu1  ;;  %v10339_v61 = vpop.f32.mrf.mxu0 }
 0x390   : > { %v3577_v59 = vadd.f32 %v3524_v43, %v15073_v58  ;;  %v15166_v6 = vadd.f32 %v10336_v57, %v3579_v21 }
 0x391   : > { %v10303_v48 = vpop.f32.mrf.mxu1  ;;  %v3831_v27 = vpop.f32.mrf.mxu0 }
 0x392   : > { %v3582_v51 = vadd.f32 %v10303_v48, %v15076_v24  ;;  %v15169_v19 = vadd.f32 %v3818_v34, %v3577_v59 }
 0x393   : > { %v3537_v47 = vpop.f32.mrf.mxu1  ;;  %v15171_v55 = vpop.f32.mrf.mxu0 }
 0x394   : > { %v3580_v42 = vadd.f32 %v3537_v47, %v15079_v53  ;;  %v15174_v8 = vadd.f32 %v10339_v61, %v3582_v51 }
 0x395   : > { %v15176_v38 = vpop.f32.mrf.mxu1  ;;  %v15178_v22 = vpop.f32.mrf.mxu0 }
 0x396   : > { %v15180_v58 = vadd.f32 %v3831_v27, %v3580_v42 }
 0x397   : > { %v15182_v25 = vpop.f32.mrf.mxu1  ;;  %v10383_v5 = vpop.f32.mrf.mxu0 }
 0x399   : > { %v10347_v16 = vpop.f32.mrf.mxu1  ;;  %v4307_v24 = vpop.f32.mrf.mxu0 }
 0x39a   : > { %v4142_v50 = vadd.f32 %v10347_v16, %v15088_v17 }
 0x39b   : > { %v4013_v44 = vpop.f32.mrf.mxu1  ;;  %v10384_v18 = vpop.f32.mrf.mxu0 }
 0x39c   : > { %v4436_v53 = vadd.f32 %v10383_v5, %v4142_v50  ;;  %v4140_v1 = vadd.f32 %v4013_v44, %v15091_v54 }
 0x39d   : > { %v10348_v39 = vpop.f32.mrf.mxu1  ;;  %v4310_v13 = vpop.f32.mrf.mxu0 }
 0x39e   : > { %v15189_v62 = vadd.f32 %v15185_v33, %v4436_v53  ;;  %v4434_v11 = vadd.f32 %v4307_v24, %v4140_v1  ;;  %v4143_v28 = vadd.f32 %v10348_v39, %v15094_v0 }
 0x39f   : > { %v4016_v3 = vpop.f32.mrf.mxu1  ;;  %v10387_v57 = vpop.f32.mrf.mxu0 }
 0x3a0   : > { %v15194_v17 = vadd.f32 %v15185_v33, %v4434_v11  ;;  %v4437_v7 = vadd.f32 %v10384_v18, %v4143_v28  ;;  %v4141_v34 = vadd.f32 %v4016_v3, %v15097_v40 }
 0x3a1   : > { %v10351_v21 = vpop.f32.mrf.mxu1  ;;  %v4323_v54 = vpop.f32.mrf.mxu0 }
 0x3a2   : > { %v15199_v61 = vadd.f32 %v15185_v33, %v4437_v7  ;;  %v4435_v59 = vadd.f32 %v4310_v13, %v4141_v34  ;;  %v4146_v0 = vadd.f32 %v10351_v21, %v15100_v49 }
 0x3a3   : > { %v4029_v48 = vpop.f32.mrf.mxu1  ;;  %v10388_v27 = vpop.f32.mrf.mxu0 }
 0x3a4   : > { %v15204_v47 = vadd.f32 %v15185_v33, %v4435_v59  ;;  %v4440_v42 = vadd.f32 %v10387_v57, %v4146_v0  ;;  %v4144_v40 = vadd.f32 %v4029_v48, %v15103_v60 }
 0x3a5   : > { %v10352_v5 = vpop.f32.mrf.mxu1  ;;  %v4326_v16 = vpop.f32.mrf.mxu0 }
 0x3a6   : > { %v15209_v50 = vadd.f32 %v15185_v33, %v4440_v42  ;;  %v4438_v44 = vadd.f32 %v4323_v54, %v4144_v40  ;;  %v4147_v49 = vadd.f32 %v10352_v5, %v15106_v15 }
 0x3a7   : > { %v4032_v18 = vpop.f32.mrf.mxu1  ;;  %v10391_v53 = vpop.f32.mrf.mxu0 }
 0x3a8   : > { %v15214_v39 = vadd.f32 %v15185_v33, %v4438_v44  ;;  %v4441_v13 = vadd.f32 %v10388_v27, %v4147_v49  ;;  %v4145_v60 = vadd.f32 %v4032_v18, %v15109_v9 }
 0x3a9   : > { %v10355_v11 = vpop.f32.mrf.mxu1  ;;  %v4339_v28 = vpop.f32.mrf.mxu0 }
 0x3aa   : > { %v15219_v57 = vadd.f32 %v15185_v33, %v4441_v13  ;;  %v4439_v7 = vadd.f32 %v4326_v16, %v4145_v60  ;;  %v4150_v15 = vadd.f32 %v10355_v11, %v15112_v37 }
 0x3ab   : > { %v4045_v34 = vpop.f32.mrf.mxu1  ;;  %v10392_v21 = vpop.f32.mrf.mxu0 }
 0x3ac   : > { %v15224_v59 = vadd.f32 %v15185_v33, %v4439_v7  ;;  %v4444_v0 = vadd.f32 %v10391_v53, %v4150_v15  ;;  %v4148_v9 = vadd.f32 %v4045_v34, %v15115_v10 }
 0x3ad   : > { %v10356_v48 = vpop.f32.mrf.mxu1  ;;  %v4342_v27 = vpop.f32.mrf.mxu0 }
 0x3ae   : > { %v15229_v40 = vadd.f32 %v15185_v33, %v4444_v0  ;;  %v4442_v5 = vadd.f32 %v4339_v28, %v4148_v9  ;;  %v4151_v37 = vadd.f32 %v10356_v48, %v15118_v56 }
 0x3af   : > { %v4048_v16 = vpop.f32.mrf.mxu1  ;;  %v10395_v44 = vpop.f32.mrf.mxu0 }
 0x3b0   : > { %v15234_v18 = vadd.f32 %v15185_v33, %v4442_v5  ;;  %v4445_v53 = vadd.f32 %v10392_v21, %v4151_v37  ;;  %v4149_v10 = vadd.f32 %v4048_v16, %v15121_v2 }
 0x3b1   : > { %v10359_v13 = vpop.f32.mrf.mxu1  ;;  %v4355_v60 = vpop.f32.mrf.mxu0 }
 0x3b2   : > { %v15239_v7 = vadd.f32 %v15185_v33, %v4445_v53  ;;  %v4443_v28 = vadd.f32 %v4342_v27, %v4149_v10  ;;  %v4154_v56 = vadd.f32 %v10359_v13, %v15124_v52 }
 0x3b3   : > { %v4061_v15 = vpop.f32.mrf.mxu1  ;;  %v10396_v34 = vpop.f32.mrf.mxu0 }
 0x3b4   : > { %v15244_v9 = vadd.f32 %v15185_v33, %v4443_v28  ;;  %v4448_v21 = vadd.f32 %v10395_v44, %v4154_v56  ;;  %v4152_v2 = vadd.f32 %v4061_v15, %v15127_v36 }
 0x3b5   : > { %v10360_v48 = vpop.f32.mrf.mxu1  ;;  %v4358_v5 = vpop.f32.mrf.mxu0 }
 0x3b6   : > { %v15249_v16 = vadd.f32 %v15185_v33, %v4448_v21  ;;  %v4446_v27 = vadd.f32 %v4355_v60, %v4152_v2  ;;  %v4155_v52 = vadd.f32 %v10360_v48, %v15130_v35 }
 0x3b7   : > { %v4064_v53 = vpop.f32.mrf.mxu1  ;;  %v10399_v10 = vpop.f32.mrf.mxu0 }
 0x3b8   : > { %v4519_v13 = vmax.f32 %v15249_v16, 0.0   ;;  %v15254_v28 = vadd.f32 %v15185_v33, %v4446_v27  ;;  %v4449_v44 = vadd.f32 %v10396_v34, %v4155_v52  ;;  %v4153_v36 = vadd.f32 %v4064_v53, %v15133_v26 }
 0x3b9   : > { %v10363_v56 = vpop.f32.mrf.mxu1  ;;  %v4371_v15 = vpop.f32.mrf.mxu0  ;;  %v17798_v16 = vmax.f32 %v15244_v9, 0.0   ;;  %v17803_v9 = vmax.f32 %v15214_v39, 0.0  }
 0x3ba   : > { %v15259_v21 = vadd.f32 %v15185_v33, %v4449_v44  ;;  %v4447_v60 = vadd.f32 %v4358_v5, %v4153_v36  ;;  %v4158_v35 = vadd.f32 %v10363_v56, %v15136_v4 }
 0x3bb   : > { %v4077_v2 = vpop.f32.mrf.mxu1  ;;  %v10400_v48 = vpop.f32.mrf.mxu0 }
 0x3bc   : > { %v4520_v24 = vmax.f32 %v15259_v21, 0.0   ;;  %v15264_v27 = vadd.f32 %v15185_v33, %v4447_v60  ;;  %v4452_v34 = vadd.f32 %v10399_v10, %v4158_v35  ;;  %v4156_v26 = vadd.f32 %v4077_v2, %v15139_v23 }
 0x3bd   : > { %v10364_v52 = vpop.f32.mrf.mxu1  ;;  %v4374_v53 = vpop.f32.mrf.mxu0  ;;  %v17797_v21 = vmax.f32 %v15229_v40, 0.0   ;;  %v17802_v40 = vmax.f32 %v15224_v59, 0.0   ;;  %v17807_v59 = vmax.f32 %v15194_v17, 0.0  }
 0x3be   : > { %v15269_v44 = vadd.f32 %v15185_v33, %v4452_v34  ;;  %v4450_v5 = vadd.f32 %v4371_v15, %v4156_v26  ;;  %v4159_v4 = vadd.f32 %v10364_v52, %v15142_v46 }
 0x3bf   : > { %v4080_v36 = vpop.f32.mrf.mxu1  ;;  %v10403_v56 = vpop.f32.mrf.mxu0 }
 0x3c0   : > { %v4523_v51 = vmax.f32 %v15269_v44, 0.0   ;;  %v15274_v60 = vadd.f32 %v15185_v33, %v4450_v5  ;;  %v4453_v10 = vadd.f32 %v10400_v48, %v4159_v4  ;;  %v4157_v23 = vadd.f32 %v4080_v36, %v15145_v41 }
 0x3c1   : > { %v10367_v35 = vpop.f32.mrf.mxu1  ;;  %v4387_v2 = vpop.f32.mrf.mxu0  ;;  %v17795_v44 = vmax.f32 %v15254_v28, 0.0   ;;  %v17800_v28 = vmax.f32 %v15219_v57, 0.0   ;;  %v17805_v57 = vmax.f32 %v15189_v62, 0.0  }
 0x3c2   : > { %v4521_v3 = vmax.f32 %v15274_v60, 0.0   ;;  %v15279_v34 = vadd.f32 %v15185_v33, %v4453_v10  ;;  %v4451_v15 = vadd.f32 %v4374_v53, %v4157_v23  ;;  %v4162_v46 = vadd.f32 %v10367_v35, %v15148_v63 }
 0x3c3   : > { %v4093_v26 = vpop.f32.mrf.mxu1  ;;  %v10404_v52 = vpop.f32.mrf.mxu0  ;;  %v17796_v60 = vmax.f32 %v15239_v7, 0.0   ;;  %v17801_v7 = vmax.f32 %v15209_v50, 0.0   ;;  %v17806_v50 = vmax.f32 %v15204_v47, 0.0  }
 0x3c4   : > { %v4524_v42 = vmax.f32 %v15279_v34, 0.0   ;;  %v15284_v5 = vadd.f32 %v15185_v33, %v4451_v15  ;;  %v4456_v48 = vadd.f32 %v10403_v56, %v4162_v46  ;;  %v4160_v41 = vadd.f32 %v4093_v26, %v15151_v29 }
 0x3c5   : > { %v10368_v4 = vpop.f32.mrf.mxu1  ;;  %v4390_v36 = vpop.f32.mrf.mxu0 }
 0x3c6   : > { %v4522_v1 = vmax.f32 %v15284_v5, 0.0   ;;  %v15289_v10 = vadd.f32 %v15185_v33, %v4456_v48  ;;  %v4454_v53 = vadd.f32 %v4387_v2, %v4160_v41  ;;  %v4163_v63 = vadd.f32 %v10368_v4, %v15154_v30 }
 0x3c7   : > { %v4096_v23 = vpop.f32.mrf.mxu1  ;;  %v10407_v35 = vpop.f32.mrf.mxu0 }
 0x3c8   : > { %v4527_v54 = vmax.f32 %v15289_v10, 0.0   ;;  %v15294_v15 = vadd.f32 %v15185_v33, %v4454_v53  ;;  %v4457_v56 = vadd.f32 %v10404_v52, %v4163_v63  ;;  %v4161_v29 = vadd.f32 %v4096_v23, %v15157_v45 }
 0x3c9   : > { %v10371_v46 = vpop.f32.mrf.mxu1  ;;  %v4403_v26 = vpop.f32.mrf.mxu0 }
 0x3ca   : > { %v4525_v11 = vmax.f32 %v15294_v15, 0.0   ;;  %v4496_v48 = vadd.f32 %v15185_v33, %v4457_v56  ;;  %v4455_v37 = vadd.f32 %v4390_v36, %v4161_v29  ;;  %v4166_v2 = vadd.f32 %v10371_v46, %v15160_v12 }
 0x3cb   : > { %v4109_v30 = vpop.f32.mrf.mxu1  ;;  %v10408_v41 = vpop.f32.mrf.mxu0  ;;  %v3583_v36 = vadd.f32 %v15176_v38, %v15082_v31 }
 0x3cc   : > { %v4528_v4 = vmax.f32 %v4496_v48, 0.0   ;;  %v4494_v49 = vadd.f32 %v15185_v33, %v4455_v37  ;;  %v4460_v0 = vadd.f32 %v10407_v35, %v4166_v2  ;;  %v4164_v53 = vadd.f32 %v4109_v30, %v15163_v32 }
 0x3cd   : > { %v10372_v52 = vpop.f32.mrf.mxu1  ;;  %v4406_v63 = vpop.f32.mrf.mxu0  ;;  %v3581_v32 = vadd.f32 %v15182_v25, %v15085_v14  ;;  %v3877_v38 = vadd.f32 %v15171_v55, %v3583_v36 }
 0x3ce   : > { %v4526_v45 = vmax.f32 %v4494_v49, 0.0   ;;  %v4499_v23 = vadd.f32 %v15185_v33, %v4460_v0  ;;  %v4458_v43 = vadd.f32 %v4403_v26, %v4164_v53  ;;  %v4167_v20 = vadd.f32 %v10372_v52, %v15166_v6 }
 0x3cf   : > { %v4112_v12 = vpop.f32.mrf.mxu1  ;;  %v10411_v56 = vpop.f32.mrf.mxu0  ;;  %v3875_v14 = vadd.f32 %v15178_v22, %v3581_v32 }
 0x3d0   : > { %v4531_v29 = vmax.f32 %v4499_v23, 0.0   ;;  %v4497_v46 = vadd.f32 %v15185_v33, %v4458_v43  ;;  %v4461_v37 = vadd.f32 %v10408_v41, %v4167_v20  ;;  %v4165_v35 = vadd.f32 %v4112_v12, %v15169_v19 }
 0x3d1   : > { %v10375_v49 = vpop.f32.mrf.mxu1  ;;  %v4419_v48 = vpop.f32.mrf.mxu0 }
 0x3d2   : > { %v4529_v0 = vmax.f32 %v4497_v46, 0.0   ;;  %v4500_v26 = vadd.f32 %v15185_v33, %v4461_v37  ;;  %v4459_v6 = vadd.f32 %v4406_v63, %v4165_v35  ;;  %v4170_v2 = vadd.f32 %v10375_v49, %v15174_v8 }
 0x3d3   : > { %v4125_v31 = vpop.f32.mrf.mxu1  ;;  %v10412_v41 = vpop.f32.mrf.mxu0 }
 0x3d4   : > { %v4532_v30 = vmax.f32 %v4500_v26, 0.0   ;;  %v4498_v43 = vadd.f32 %v15185_v33, %v4459_v6  ;;  %v4464_v20 = vadd.f32 %v10411_v56, %v4170_v2  ;;  %v4168_v19 = vadd.f32 %v4125_v31, %v15180_v58 }
 0x3d5   : > { %v10376_v53 = vpop.f32.mrf.mxu1  ;;  %v4422_v37 = vpop.f32.mrf.mxu0 }
 0x3d6   : > { %v4530_v25 = vmax.f32 %v4498_v43, 0.0   ;;  %v4503_v52 = vadd.f32 %v15185_v33, %v4464_v20  ;;  %v4462_v23 = vadd.f32 %v4419_v48, %v4168_v19  ;;  %v4171_v63 = vadd.f32 %v10376_v53, %v3877_v38 }
 0x3d7   : > { %v4128_v12 = vpop.f32.mrf.mxu1 }
 0x3d8   : > { %v4535_v8 = vmax.f32 %v4503_v52, 0.0   ;;  %v4501_v46 = vadd.f32 %v15185_v33, %v4462_v23  ;;  %v4465_v55 = vadd.f32 %v10412_v41, %v4171_v63  ;;  %v4169_v36 = vadd.f32 %v4128_v12, %v3875_v14 }
 0x3da   : > { %v4533_v35 = vmax.f32 %v4501_v46, 0.0   ;;  %v4504_v56 = vadd.f32 %v15185_v33, %v4465_v55  ;;  %v4463_v58 = vadd.f32 %v4422_v37, %v4169_v36 }
 0x3dc   : > { %v4536_v49 = vmax.f32 %v4504_v56, 0.0   ;;  %v4502_v26 = vadd.f32 %v15185_v33, %v4463_v58  ;;  %v17794_v33 = vmax.f32 %v15264_v27, 0.0   ;;  %v17799_v27 = vmax.f32 %v15234_v18, 0.0  }
 0x3dd   : > { %v17804_v18 = vmax.f32 %v15199_v61, 0.0  }
 0x3de   : > { %v4534_v22 = vmax.f32 %v4502_v26, 0.0  }
 0x3df LB: >> { %17808 = vst [vmem:[#allocation121_spill] sm:$0xff] %v11579_v49  ;;  %17809 = vst [vmem:[#allocation122_spill] sm:$0xff] %v11583_v8  ;;  %vm17840_vm0 = vcmask 261120   ;;  %s11724_s15 = smov 64   ;;  %s11725_s16 = smov 32   ;;  %s11707_s14 = sphi %s15428_s14, %s18155_s14   ;;  %v11703_v59 = vphi %v17807_v59, %v18154_v59   ;;  %v11699_v50 = vphi %v17806_v50, %v18153_v50   ;;  %v11695_v57 = vphi %v17805_v57, %v18152_v57   ;;  %v11691_v18 = vphi %v17804_v18, %v18151_v18   ;;  %v11687_v9 = vphi %v17803_v9, %v18150_v9   ;;  %v11683_v40 = vphi %v17802_v40, %v18149_v40   ;;  %v11679_v7 = vphi %v17801_v7, %v18148_v7   ;;  %v11675_v28 = vphi %v17800_v28, %v18147_v28   ;;  %v11671_v27 = vphi %v17799_v27, %v18146_v27   ;;  %v11667_v16 = vphi %v17798_v16, %v18145_v16   ;;  %v11663_v21 = vphi %v17797_v21, %v18144_v21   ;;  %v11659_v60 = vphi %v17796_v60, %v18143_v60   ;;  %v11655_v44 = vphi %v17795_v44, %v18142_v44   ;;  %v11651_v33 = vphi %v17794_v33, %v18141_v33   ;;  %v11647_v13 = vphi %v4519_v13, %v18140_v13   ;;  %v11643_v24 = vphi %v4520_v24, %v18139_v24   ;;  %v11639_v3 = vphi %v4521_v3, %v18138_v3   ;;  %v11635_v1 = vphi %v4522_v1, %v18137_v1   ;;  %v11631_v51 = vphi %v4523_v51, %v18136_v51   ;;  %v11627_v42 = vphi %v4524_v42, %v18135_v42   ;;  %v11623_v11 = vphi %v4525_v11, %v18134_v11   ;;  %v11619_v45 = vphi %v4526_v45, %v18133_v45   ;;  %v11615_v54 = vphi %v4527_v54, %v18132_v54   ;;  %v11611_v4 = vphi %v4528_v4, %v18131_v4   ;;  %v11607_v0 = vphi %v4529_v0, %v18130_v0   ;;  %v11603_v25 = vphi %v4530_v25, %v18129_v25   ;;  %v11599_v29 = vphi %v4531_v29, %v18128_v29   ;;  %v11595_v30 = vphi %v4532_v30, %v18127_v30   ;;  %v11591_v35 = vphi %v4533_v35, %v18126_v35   ;;  %v11587_v22 = vphi %v4534_v22, %v18125_v22   ;;  %v11583_v8 = vphi %v4535_v8, %v18124_v8   ;;  %v11579_v49 = vphi %v4536_v49, %v18123_v49  }
 0x3e0   : >> { %17810 = vst [vmem:[#allocation123_spill] sm:$0xff] %v11587_v22  ;;  %17811 = vst [vmem:[#allocation124_spill] sm:$0xff] %v11591_v35  ;;  %s4678_s18 = sadd.s32 1, %s11707_s14  }
 0x3e1   : >> { %17812 = vst [vmem:[#allocation125_spill] sm:$0xff] %v11595_v30  ;;  %17813 = vst [vmem:[#allocation126_spill] sm:$0xff] %v11599_v29  ;;  %p16833_p2 = scmp.ge.s32.totalorder %s4678_s18, 4   ;;  %s18155_s14 = smov %s4678_s18 }
 0x3e2   : >> { %17814 = vst [vmem:[#allocation127_spill] sm:$0xff] %v11603_v25  ;;  %17815 = vst [vmem:[#allocation128_spill] sm:$0xff] %v11607_v0  ;;  %s11729_s23 = smov (%p16833_p2), 64   ;;  %s11730_s25 = smov (%p16833_p2), 32  }
 0x3e3   : >> { %17816 = vst [vmem:[#allocation129_spill] sm:$0xff] %v11611_v4  ;;  %17817 = vst [vmem:[#allocation130_spill] sm:$0xff] %v11615_v54 }
 0x3e4   : >> { %17818 = vst [vmem:[#allocation131_spill] sm:$0xff] %v11619_v45  ;;  %17819 = vst [vmem:[#allocation132_spill] sm:$0xff] %v11623_v11 }
 0x3e5   : >> { %17820 = vst [vmem:[#allocation133_spill] sm:$0xff] %v11627_v42  ;;  %17821 = vst [vmem:[#allocation134_spill] sm:$0xff] %v11631_v51 }
 0x3e6   : >> { %17822 = vst [vmem:[#allocation135_spill] sm:$0xff] %v11635_v1  ;;  %17823 = vst [vmem:[#allocation136_spill] sm:$0xff] %v11639_v3 }
 0x3e7   : >> { %17824 = vst [vmem:[#allocation137_spill] sm:$0xff] %v11643_v24  ;;  %17825 = vst [vmem:[#allocation138_spill] sm:$0xff] %v11647_v13 }
 0x3e8   : >> { %17826 = vst [vmem:[#allocation139_spill] sm:$0xff] %v11651_v33  ;;  %17827 = vst [vmem:[#allocation140_spill] sm:$0xff] %v11655_v44 }
 0x3e9   : >> { %17828 = vst [vmem:[#allocation141_spill] sm:$0xff] %v11659_v60  ;;  %17829 = vst [vmem:[#allocation142_spill] sm:$0xff] %v11663_v21 }
 0x3ea   : >> { %17830 = vst [vmem:[#allocation143_spill] sm:$0xff] %v11667_v16  ;;  %17831 = vst [vmem:[#allocation144_spill] sm:$0xff] %v11671_v27 }
 0x3eb   : >> { %17832 = vst [vmem:[#allocation145_spill] sm:$0xff] %v11675_v28  ;;  %17833 = vst [vmem:[#allocation146_spill] sm:$0xff] %v11679_v7 }
 0x3ec   : >> { %17834 = vst [vmem:[#allocation147_spill] sm:$0xff] %v11683_v40  ;;  %17835 = vst [vmem:[#allocation148_spill] sm:$0xff] %v11687_v9 }
 0x3ed   : >> { %17836 = vst [vmem:[#allocation149_spill] sm:$0xff] %v11691_v18  ;;  %17837 = vst [vmem:[#allocation150_spill] sm:$0xff] %v11695_v57 }
 0x3ee   : >> { %17838 = vst [vmem:[#allocation151_spill] sm:$0xff] %v11699_v50  ;;  %17839 = vst [vmem:[#allocation152_spill] sm:$0xff] %v11703_v59 }
 0x3ef   : >> { %4712 = vst.msk [vmem:[#allocation2 + $0x19] sm:$0xff] %vm17840_vm0, %v11703_v59  ;;  %vm17841_vm4 = vmmov %vm17840_vm0 }
 0x3f0   : >> { %4713 = vst.msk [vmem:[#allocation2 + $0x21] sm:$0xff] %vm17841_vm4, %v11699_v50  ;;  %vm17842_vm5 = vmmov %vm17840_vm0 }
 0x3f1   : >> { %4714 = vst.msk [vmem:[#allocation2 + $0x31] sm:$0xff] %vm17842_vm5, %v11695_v57  ;;  %vm17843_vm6 = vmmov %vm17840_vm0 }
 0x3f2   : >> { %4715 = vst.msk [vmem:[#allocation2 + $0x39] sm:$0xff] %vm17843_vm6, %v11691_v18  ;;  %vm17844_vm7 = vmmov %vm17840_vm0 }
 0x3f3   : >> { %4718 = vst.msk [vmem:[#allocation2 + $0x61] sm:$0xff] %vm17844_vm7, %v11679_v7  ;;  %vm17845_vm8 = vmmov %vm17840_vm0 }
 0x3f4   : >> { %4719 = vst.msk [vmem:[#allocation2 + $0x69] sm:$0xff] %vm17845_vm8, %v11675_v28  ;;  %vm17846_vm9 = vmmov %vm17840_vm0 }
 0x3f5   : >> { %4716 = vst.msk [vmem:[#allocation2 + $0x49] sm:$0xff] %vm17846_vm9, %v11687_v9  ;;  %vm17847_vm10 = vmmov %vm17840_vm0 }
 0x3f6   : >> { %4717 = vst.msk [vmem:[#allocation2 + $0x51] sm:$0xff] %vm17847_vm10, %v11683_v40  ;;  %vm17848_vm11 = vmmov %vm17840_vm0  ;;  %v4747_v62 = vld [vmem:[#allocation2 + $0x18] sm:$0xff] }
 0x3f7   : >> { %4722 = vst.msk [vmem:[#allocation2 + $0x91] sm:$0xff] %vm17848_vm11, %v11663_v21  ;;  %vm17849_vm12 = vmmov %vm17840_vm0  ;;  %v4748_v17 = vld [vmem:[#allocation2 + $0x20] sm:$0xff]  ;;  %v4749_v61 = vld [vmem:[#allocation2 + $0x28] sm:$0x3] }
 0x3f8   : >> { %4723 = vst.msk [vmem:[#allocation2 + $0x99] sm:$0xff] %vm17849_vm12, %v11659_v60  ;;  %vm17850_vm13 = vmmov %vm17840_vm0  ;;  %v15561_v47 = vpack.c.bf16 %v4748_v17, %v4747_v62  ;;  %v4801_v39 = vpack.c.bf16 %v4749_v61, %v4749_v61  ;;  %v4750_v34 = vld [vmem:[#allocation2 + $0x30] sm:$0xff] }
 0x3f9   : >> { %4720 = vst.msk [vmem:[#allocation2 + $0x79] sm:$0xff] %vm17850_vm13, %v11671_v27  ;;  %vm17851_vm14 = vmmov %vm17840_vm0  ;;  %v4751_v5 = vld [vmem:[#allocation2 + $0x38] sm:$0xff]  ;;  %v4752_v10 = vld [vmem:[#allocation2 + $0x40] sm:$0x3] }
 0x3fa   : >> { %4721 = vst.msk [vmem:[#allocation2 + $0x81] sm:$0xff] %vm17851_vm14, %v11667_v16  ;;  %vm17852_vm15 = vmmov %vm17840_vm0  ;;  %v15571_v15 = vpack.c.bf16 %v4751_v5, %v4750_v34  ;;  %v4803_v32 = vpack.c.bf16 %v4752_v10, %v4752_v10  ;;  %v4756_v48 = vld [vmem:[#allocation2 + $0x60] sm:$0xff]  ;;  %v5093_v2 = vrot.slane %v15561_v47, 1  ;;  %v5094_v31 = vrot.slane %v4801_v39, 1 }
 0x3fb   : >> { %4726 = vst.msk [vmem:[#allocation2 + $0xc1] sm:$0xff] %vm17852_vm15, %v11647_v13  ;;  %vm17853_vm1 = vmmov %vm17840_vm0  ;;  %v4757_v6 = vld [vmem:[#allocation2 + $0x68] sm:$0xff]  ;;  %v4847_v38 = vshrl.u32 %v15561_v47, 16  ;;  %v4849_v43 = vshll.u32 %v15561_v47, 16  ;;  %v4758_v20 = vld [vmem:[#allocation2 + $0x70] sm:$0x3] }
 0x3fc   : >> { %4727 = vst.msk [vmem:[#allocation2 + $0xc9] sm:$0xff] %vm17853_vm1, %v11643_v24  ;;  %vm17854_vm4 = vmmov %vm17840_vm0  ;;  %v4854_v19 = vshll.u32 %v4801_v39, 16  ;;  %v5096_v41 = vrot.slane %v15571_v15, 1  ;;  %v5097_v53 = vrot.slane %v4803_v32, 1  ;;  %v4859_v14 = vshrl.u32 %v15571_v15, 16  ;;  %v4753_v52 = vld [vmem:[#allocation2 + $0x48] sm:$0xff] }
 0x3fd   : >> { %4724 = vst.msk [vmem:[#allocation2 + $0xa9] sm:$0xff] %vm17840_vm0, %v11655_v44  ;;  %vm17855_vm5 = vmmov %vm17840_vm0  ;;  %v4754_v23 = vld [vmem:[#allocation2 + $0x50] sm:$0xff]  ;;  %v5095_v63 = vsel %vm912_vm3, %v5093_v2, %v5094_v31  ;;  %v4851_v12 = vrot.slane %v4849_v43, 1  ;;  %v4861_v46 = vshll.u32 %v15571_v15, 16  ;;  %v4866_v55 = vshll.u32 %v4803_v32, 16 }
 0x3fe   : >> { %4725 = vst.msk [vmem:[#allocation2 + $0xb1] sm:$0xff] %vm17854_vm4, %v11651_v33  ;;  %vm17856_vm6 = vmmov %vm17840_vm0  ;;  %v4755_v36 = vld [vmem:[#allocation2 + $0x58] sm:$0x3]  ;;  %5140 = vrot.lane.b32.xlu1 %v5095_v63, %s11724_s15  ;;  %v4856_v37 = vrot.slane %v4854_v19, 1  ;;  %v5098_v56 = vsel %vm912_vm3, %v5096_v41, %v5097_v53  ;;  %v15586_v58 = vpack.c.bf16 %v4757_v6, %v4756_v48  ;;  %v4807_v26 = vpack.c.bf16 %v4758_v20, %v4758_v20  ;;  %v4762_v6 = vld [vmem:[#allocation2 + $0x90] sm:$0xff] }
 0x3ff   : >> { %4730 = vst.msk [vmem:[#allocation2 + $0xf1] sm:$0xff] %vm17855_vm5, %v11631_v51  ;;  %vm17857_vm7 = vmmov %vm17840_vm0  ;;  %v4852_v62 = vor.u32 %v4851_v12, %v4847_v38  ;;  %v4863_v17 = vrot.slane %v4861_v46, 1  ;;  %v4868_v61 = vrot.slane %v4866_v55, 1  ;;  %v15588_v39 = vpack.c.bf16 %v4754_v23, %v4753_v52  ;;  %v4763_v20 = vld [vmem:[#allocation2 + $0x98] sm:$0xff]  ;;  %v4764_v52 = vld [vmem:[#allocation2 + $0xa0] sm:$0x3] }
 0x400   : >> { %4731 = vst.msk [vmem:[#allocation2 + $0xf9] sm:$0xff] %vm17856_vm6, %v11627_v42  ;;  %vm17858_vm8 = vmmov %vm17840_vm0  ;;  %v4883_v34 = vshrl.u32 %v15586_v58, 16  ;;  %v4885_v5 = vshll.u32 %v15586_v58, 16  ;;  %v4890_v10 = vshll.u32 %v4807_v26, 16  ;;  %v4805_v32 = vpack.c.bf16 %v4755_v36, %v4755_v36  ;;  %v4759_v38 = vld [vmem:[#allocation2 + $0x78] sm:$0xff] }
 0x401   : >> { %4728 = vst.msk [vmem:[#allocation2 + $0xd9] sm:$0xff] %vm17857_vm7, %v11639_v3  ;;  %vm17859_vm9 = vmmov %vm17840_vm0  ;;  %v4857_v2 = vsel %vm687_vm2, %v4852_v62, %v4856_v37  ;;  %v4864_v31 = vor.u32 %v4863_v17, %v4859_v14  ;;  %v4871_v43 = vshrl.u32 %v15588_v39, 16  ;;  %v4873_v48 = vshll.u32 %v15588_v39, 16  ;;  %v4760_v23 = vld [vmem:[#allocation2 + $0x80] sm:$0xff]  ;;  %v4761_v62 = vld [vmem:[#allocation2 + $0x88] sm:$0x3] }
 0x402   : >> { %4729 = vst.msk [vmem:[#allocation2 + $0xe1] sm:$0xff] %vm17858_vm8, %v11635_v1  ;;  %vm17860_vm10 = vmmov %vm17840_vm0  ;;  %5028 = vrot.lane.b32.xlu0 %v4857_v2, %s11725_s16  ;;  %5142 = vrot.lane.b32.xlu1 %v5098_v56, %s11724_s15  ;;  %v4887_v19 = vrot.slane %v4885_v5, 1  ;;  %v4892_v41 = vrot.slane %v4890_v10, 1  ;;  %v4878_v53 = vshll.u32 %v4805_v32, 16  ;;  %v5102_v12 = vrot.slane %v15586_v58, 1 }
 0x403   : >> { %4734 = vst.msk [vmem:[#allocation2 + $0x121] sm:$0xff] %vm17859_vm9, %v11615_v54  ;;  %v4869_v63 = vsel %vm687_vm2, %v4864_v31, %v4868_v61  ;;  %v4875_v14 = vrot.slane %v4873_v48, 1  ;;  %v5103_v36 = vrot.slane %v4807_v26, 1  ;;  %v15599_v37 = vpack.c.bf16 %v4763_v20, %v4762_v6  ;;  %v4768_v48 = vld [vmem:[#allocation2 + $0xc0] sm:$0xff]  ;;  %v4769_v6 = vld [vmem:[#allocation2 + $0xc8] sm:$0xff]  ;;  %vm17861_vm11 = vmmov %vm17840_vm0 }
 0x404   : >> { %4735 = vst.msk [vmem:[#allocation2 + $0x129] sm:$0xff] %vm17860_vm10, %v11611_v4  ;;  %v4888_v46 = vor.u32 %v4887_v19, %v4883_v34  ;;  %v4880_v55 = vrot.slane %v4878_v53, 1  ;;  %v4811_v2 = vpack.c.bf16 %v4764_v52, %v4764_v52  ;;  %v15601_v4 = vpack.c.bf16 %v4760_v23, %v4759_v38  ;;  %v4770_v20 = vld [vmem:[#allocation2 + $0xd0] sm:$0x3]  ;;  %v4765_v52 = vld [vmem:[#allocation2 + $0xa8] sm:$0xff]  ;;  %vm17862_vm12 = vmmov %vm17840_vm0 }
 0x405   : >> { %v4876_v17 = vor.u32 %v4875_v14, %v4871_v43  ;;  %v5099_v5 = vrot.slane %v15588_v39, 1  ;;  %v4907_v61 = vshrl.u32 %v15599_v37, 16  ;;  %v4909_v10 = vshll.u32 %v15599_v37, 16  ;;  %v4766_v23 = vld [vmem:[#allocation2 + $0xb0] sm:$0xff]  ;;  %4733 = vst.msk [vmem:[#allocation2 + $0x111] sm:$0xff] %vm17861_vm11, %v11619_v45  ;;  %vm17863_vm13 = vmmov %vm17840_vm0 }
 0x406   : >> { %5030 = vrot.lane.b32.xlu0 %v4869_v63, %s11725_s16  ;;  %v4893_v56 = vsel %vm687_vm2, %v4888_v46, %v4892_v41  ;;  %v5100_v34 = vrot.slane %v4805_v32, 1  ;;  %v4914_v31 = vshll.u32 %v4811_v2, 16  ;;  %v15610_v43 = vpack.c.bf16 %v4761_v62, %v4761_v62  ;;  %4732 = vst.msk [vmem:[#allocation2 + $0x109] sm:$0xff] %vm17862_vm12, %v11623_v11  ;;  %vm17864_vm14 = vmmov %vm17840_vm0 }
 0x407   : >> { %5034 = vrot.lane.b32.xlu1 %v4893_v56, %s11725_s16  ;;  %v4881_v26 = vsel %vm687_vm2, %v4876_v17, %v4880_v55  ;;  %v5104_v38 = vsel %vm912_vm3, %v5102_v12, %v5103_v36  ;;  %v4911_v19 = vrot.slane %v4909_v10, 1  ;;  %v4895_v41 = vshrl.u32 %v15601_v4, 16  ;;  %v4767_v12 = vld [vmem:[#allocation2 + $0xb8] sm:$0x3]  ;;  %4738 = vst.msk [vmem:[#allocation2 + $0x151] sm:$0xff] %vm17863_vm13, %v11599_v29  ;;  %vm17865_vm15 = vmmov %vm17840_vm0 }
 0x408   : >> { %v4897_v53 = vshll.u32 %v15601_v4, 16  ;;  %v4916_v63 = vrot.slane %v4914_v31, 1  ;;  %v4902_v14 = vshll.u32 %v15610_v43, 16  ;;  %v5108_v32 = vrot.slane %v15599_v37, 1  ;;  %4739 = vst.msk [vmem:[#allocation2 + $0x159] sm:$0xff] %vm17864_vm14, %v11595_v30  ;;  %vm17866_vm1 = vmmov %vm17840_vm0 }
 0x409   : >> { %v4912_v46 = vor.u32 %v4911_v19, %v4907_v61  ;;  %v5109_v62 = vrot.slane %v4811_v2, 1  ;;  %v15618_v17 = vpack.c.bf16 %v4769_v6, %v4768_v48  ;;  %v5101_v36 = vsel %vm912_vm3, %v5099_v5, %v5100_v34  ;;  %v4775_v19 = vld [vmem:[#allocation2 + $0xf8] sm:$0xff]  ;;  %4737 = vst.msk [vmem:[#allocation2 + $0x141] sm:$0xff] %vm17865_vm15, %v11603_v25  ;;  %vm17867_vm4 = vmmov %vm17840_vm0 }
 0x40a   : >> { %5032 = vrot.lane.b32.xlu0 %v4881_v26, %s11725_s16  ;;  %v4899_v55 = vrot.slane %v4897_v53, 1  ;;  %v4904_v56 = vrot.slane %v4902_v14, 1  ;;  %v4815_v10 = vpack.c.bf16 %v4770_v20, %v4770_v20  ;;  %v15622_v54 = vpack.c.bf16 %v4766_v23, %v4765_v52  ;;  %v4771_v5 = vld [vmem:[#allocation2 + $0xd8] sm:$0xff]  ;;  %v4776_v52 = vld [vmem:[#allocation2 + $0x100] sm:$0x3]  ;;  %4736 = vst.msk [vmem:[#allocation2 + $0x139] sm:$0xff] %vm17866_vm1, %v11607_v0  ;;  %vm17872_vm5 = vmmov %vm17840_vm0 }
 0x40b   : >> { %5146 = vrot.lane.b32.xlu1 %v5104_v38, %s11724_s15  ;;  %v4917_v31 = vsel %vm687_vm2, %v4912_v46, %v4916_v63  ;;  %v4931_v51 = vshrl.u32 %v15618_v17, 16  ;;  %v4933_v61 = vshll.u32 %v15618_v17, 16  ;;  %v5105_v2 = vrot.slane %v15601_v4, 1  ;;  %v4774_v38 = vld [vmem:[#allocation2 + $0xf0] sm:$0xff]  ;;  %v4772_v23 = vld [vmem:[#allocation2 + $0xe0] sm:$0xff]  ;;  %4740 = vst.msk [vmem:[#allocation2 + $0x169] sm:$0xff] %vm17840_vm0, %v11591_v35  ;;  %vm17873_vm6 = vmmov %vm17840_vm0 }
 0x40c   : >> { %v4900_v42 = vor.u32 %v4899_v55, %v4895_v41  ;;  %v4938_v26 = vshll.u32 %v4815_v10, 16  ;;  %v4813_v48 = vpack.c.bf16 %v4767_v12, %v4767_v12  ;;  %v4921_v6 = vshll.u32 %v15622_v54, 16  ;;  %4741 = vst.msk [vmem:[#allocation2 + $0x171] sm:$0xff] %vm17867_vm4, %v11587_v22  ;;  %vm17896_vm9 = vmmov %vm17840_vm0 }
 0x40d   : >> { %v5110_v34 = vsel %vm912_vm3, %v5108_v32, %v5109_v62  ;;  %v5106_v20 = vrot.slane %v15610_v43, 1  ;;  %v4935_v41 = vrot.slane %v4933_v61, 1  ;;  %v4919_v53 = vshrl.u32 %v15622_v54, 16  ;;  %v4773_v32 = vld [vmem:[#allocation2 + $0xe8] sm:$0x3]  ;;  %4742 = vst.msk [vmem:[#allocation2 + $0x181] sm:$0xff] %vm17872_vm5, %v11583_v8  ;;  %vm17897_vm10 = vmmov %vm17840_vm0 }
 0x40e   : >> { %5144 = vrot.lane.b32.xlu0 %v5101_v36, %s11724_s15  ;;  %v4905_v63 = vsel %vm687_vm2, %v4900_v42, %v4904_v56  ;;  %v4940_v14 = vrot.slane %v4938_v26, 1  ;;  %v4923_v46 = vrot.slane %v4921_v6, 1  ;;  %v4926_v55 = vshll.u32 %v4813_v48, 16  ;;  %v4780_v6 = vld [vmem:[#allocation2 + $0x120] sm:$0xff]  ;;  %4743 = vst.msk [vmem:[#allocation2 + $0x189] sm:$0xff] %vm17873_vm6, %v11579_v49  ;;  %vm17902_vm11 = vmmov %vm17840_vm0 }
 0x40f   : >> { %5038 = vrot.lane.b32.xlu1 %v4917_v31, %s11725_s16  ;;  %v4936_v12 = vor.u32 %v4935_v41, %v4931_v51  ;;  %v5114_v1 = vrot.slane %v15618_v17, 1  ;;  %v5115_v36 = vrot.slane %v4815_v10, 1  ;;  %v15636_v3 = vpack.c.bf16 %v4775_v19, %v4774_v38  ;;  %v4781_v38 = vld [vmem:[#allocation2 + $0x128] sm:$0xff]  ;;  %vm17903_vm12 = vmmov %vm17840_vm0 }
 0x410   : >> { %v5111_v43 = vrot.slane %v15622_v54, 1  ;;  %v5112_v62 = vrot.slane %v4813_v48, 1  ;;  %v4819_v61 = vpack.c.bf16 %v4776_v52, %v4776_v52  ;;  %v15639_v24 = vpack.c.bf16 %v4772_v23, %v4771_v5  ;;  %v4782_v52 = vld [vmem:[#allocation2 + $0x130] sm:$0x3]  ;;  %vm17908_vm13 = vmmov %vm17840_vm0 }
 0x411   : >> { %v4924_v31 = vor.u32 %v4923_v46, %v4919_v53  ;;  %v4928_v42 = vrot.slane %v4926_v55, 1  ;;  %v4957_v56 = vshll.u32 %v15636_v3, 16  ;;  %v5107_v51 = vsel %vm912_vm3, %v5105_v2, %v5106_v20  ;;  %vm17909_vm14 = vmmov %vm17840_vm0 }
 0x412   : >> { %5036 = vrot.lane.b32.xlu0 %v4905_v63, %s11725_s16  ;;  %v4941_v10 = vsel %vm687_vm2, %v4936_v12, %v4940_v14  ;;  %v4817_v26 = vpack.c.bf16 %v4773_v32, %v4773_v32  ;;  %v4955_v48 = vshrl.u32 %v15636_v3, 16  ;;  %v4962_v5 = vshll.u32 %v4819_v61, 16  ;;  %vm17912_vm15 = vmmov %vm17840_vm0 }
 0x413   : >> { %5150 = vrot.lane.b32.xlu1 %v5110_v34, %s11724_s15  ;;  %v4959_v19 = vrot.slane %v4957_v56, 1  ;;  %v4945_v41 = vshll.u32 %v15639_v24, 16  ;;  %v5116_v53 = vsel %vm912_vm3, %v5114_v1, %v5115_v36  ;;  %v5113_v23 = vsel %vm912_vm3, %v5111_v43, %v5112_v62  ;;  %v4791_v49 = vld [vmem:[#allocation2 + $0x178] sm:$0x3]  ;;  %vm17913_vm1 = vmmov %vm17840_vm0 }
 0x414   : >> { %v4950_v63 = vshll.u32 %v4817_v26, 16  ;;  %v4929_v2 = vsel %vm687_vm2, %v4924_v31, %v4928_v42  ;;  %v4943_v34 = vshrl.u32 %v15639_v24, 16  ;;  %v15653_v14 = vpack.c.bf16 %v4781_v38, %v4780_v6  ;;  %vm17914_vm4 = vmmov %vm17840_vm0 }
 0x415   : >> { %v4947_v20 = vrot.slane %v4945_v41, 1  ;;  %v5120_v46 = vrot.slane %v15636_v3, 1  ;;  %v5121_v55 = vrot.slane %v4819_v61, 1  ;;  %v15657_v12 = vpack.c.bf16 %v4782_v52, %v4782_v52  ;;  %v17870_v52 = vld [vmem:[#allocation35_spill] sm:$0xff]  ;;  %v4794_v0 = vld [vmem:[#allocation2 + $0x190] sm:$0x3]  ;;  %vm17915_vm5 = vmmov %vm17840_vm0 }
 0x416   : >> { %5148 = vrot.lane.b32.xlu0 %v5107_v51, %s11724_s15  ;;  %v4960_v1 = vor.u32 %v4959_v19, %v4955_v48  ;;  %v4964_v36 = vrot.slane %v4962_v5, 1  ;;  %v5117_v32 = vrot.slane %v15639_v24, 1  ;;  %v4981_v43 = vshll.u32 %v15653_v14, 16  ;;  %v17868_v19 = vld [vmem:[#allocation37_spill] sm:$0xff]  ;;  %v17869_v5 = vld [vmem:[#allocation36_spill] sm:$0xff]  ;;  %vm17916_vm6 = vmmov %vm17840_vm0 }
 0x417   : >> { %5042 = vrot.lane.b32.xlu1 %v4941_v10, %s11725_s16  ;;  %v4952_v62 = vrot.slane %v4950_v63, 1  ;;  %v5118_v31 = vrot.slane %v4817_v26, 1  ;;  %v4948_v42 = vor.u32 %v4947_v20, %v4943_v34  ;;  %v4979_v56 = vshrl.u32 %v15653_v14, 16  ;;  %v4779_v63 = vld [vmem:[#allocation2 + $0x118] sm:$0x3]  ;;  %v4778_v34 = vld [vmem:[#allocation2 + $0x110] sm:$0xff] }
 0x418   : >> { %v4986_v51 = vshll.u32 %v15657_v12, 16  ;;  %v4983_v61 = vrot.slane %v4981_v43, 1  ;;  %v4965_v10 = vsel %vm687_vm2, %v4960_v1, %v4964_v36  ;;  %v5122_v26 = vsel %vm912_vm3, %v5120_v46, %v5121_v55 }
 0x419   : >> { %v4953_v6 = vsel %vm687_vm2, %v4948_v42, %v4952_v62  ;;  %v9488_v41 = vcombine.low %v17869_v5, %v17868_v19  ;;  %v4821_v20 = vpack.c.bf16 %v4779_v63, %v4779_v63  ;;  %v5119_v46 = vsel %vm912_vm3, %v5117_v32, %v5118_v31  ;;  %v4786_v42 = vld [vmem:[#allocation2 + $0x150] sm:$0xff]  ;;  %v4785_v19 = vld [vmem:[#allocation2 + $0x148] sm:$0x3]  ;;  %v4783_v5 = vld [vmem:[#allocation2 + $0x138] sm:$0xff] }
 0x41a   : >> { %5040 = vrot.lane.b32.xlu0 %v4929_v2, %s11725_s16  ;;  %v4984_v38 = vor.u32 %v4983_v61, %v4979_v56  ;;  %v4988_v48 = vrot.slane %v4986_v51, 1  ;;  %v4777_v2 = vld [vmem:[#allocation2 + $0x108] sm:$0xff]  ;;  %v5126_v1 = vrot.slane %v15653_v14, 1  ;;  %v5127_v62 = vrot.slane %v15657_v12, 1  ;;  %v4787_v56 = vld [vmem:[#allocation2 + $0x158] sm:$0xff] }
 0x41b   : >> { %5154 = vrot.lane.b32.xlu1 %v5116_v53, %s11724_s15  ;;  %v17871_v53 = vld [vmem:[#allocation34_spill] sm:$0xff]  ;;  %10413 = vmatprep.subr.bf16.mxu0 %v9488_v41  ;;  %v15697_v55 = vpack.c.bf16 %v4778_v34, %v4777_v2  ;;  %v4974_v43 = vshll.u32 %v4821_v20, 16  ;;  %v17874_v61 = vld [vmem:[#allocation33_spill] sm:$0xff]  ;;  %v15706_v31 = vpack.c.bf16 %v4787_v56, %v4786_v42  ;;  %vm5202_vm7 = vcmask 523264  }
 0x41c   : >> { %10414 = vmatpush3.bf16.msra.mxu0 %v9488_v41  ;;  %v4989_v36 = vsel %vm687_vm2, %v4984_v38, %v4988_v48  ;;  %v4788_v51 = vld [vmem:[#allocation2 + $0x160] sm:$0x3]  ;;  %v5124_v48 = vrot.slane %v4821_v20, 1  ;;  %v5128_v42 = vsel %vm912_vm3, %v5126_v1, %v5127_v62  ;;  %v17876_v20 = vld [vmem:[#allocation31_spill] sm:$0xff]  ;;  %vm5296_vm8 = vcmask 785408  }
 0x41d   : >> { %v4969_v32 = vshll.u32 %v15697_v55, 16  ;;  %v5123_v38 = vrot.slane %v15697_v55, 1  ;;  %v4827_v12 = vpack.c.bf16 %v4788_v51, %v4788_v51  ;;  %v4784_v41 = vld [vmem:[#allocation2 + $0x140] sm:$0xff]  ;;  %v4976_v63 = vrot.slane %v4974_v43, 1  ;;  %v4790_v43 = vld [vmem:[#allocation2 + $0x170] sm:$0xff]  ;;  %v4793_v62 = vld [vmem:[#allocation2 + $0x188] sm:$0xff] }
 0x41e   : >> { %5152 = vrot.lane.b32.xlu0 %v5113_v23, %s11724_s15  ;;  %v9487_v23 = vcombine.low %v17871_v53, %v17870_v52  ;;  %v15710_v52 = vpack.c.bf16 %v4785_v19, %v4785_v19  ;;  %v5003_v2 = vshrl.u32 %v15706_v31, 16  ;;  %v5005_v34 = vshll.u32 %v15706_v31, 16  ;;  %v17877_v51 = vld [vmem:[#allocation30_spill] sm:$0xff] }
 0x41f   : >> { %5046 = vrot.lane.b32.xlu1 %v4965_v10, %s11725_s16  ;;  %v17875_v10 = vld [vmem:[#allocation32_spill] sm:$0xff]  ;;  %v4971_v53 = vrot.slane %v4969_v32, 1  ;;  %v15716_v56 = vpack.c.bf16 %v4784_v41, %v4783_v5  ;;  %v4792_v1 = vld [vmem:[#allocation2 + $0x180] sm:$0xff]  ;;  %v17878_v5 = vld [vmem:[#allocation29_spill] sm:$0xff]  ;;  %v5133_v29 = vrot.slane %v4827_v12, 1 }
 0x420   : >> { %10415 = vmatprep.subr.bf16.mxu0 %v9487_v23  ;;  %v5007_v19 = vrot.slane %v5005_v34, 1  ;;  %v4789_v32 = vld [vmem:[#allocation2 + $0x168] sm:$0xff]  ;;  %v4744_v34 = vld [vmem:[#allocation2] sm:$0xff] }
 0x421   : >> { %10416 = vmatpush3.bf16.msra.mxu0 %v9487_v23  ;;  %v4991_v22 = vshrl.u32 %v15716_v56, 16  ;;  %v4993_v23 = vshll.u32 %v15716_v56, 16  ;;  %v17879_v41 = vld [vmem:[#allocation28_spill] sm:$0xff]  ;;  %v15730_v25 = vpack.c.bf16 %v4790_v43, %v4789_v32  ;;  %v17880_v32 = vld [vmem:[#allocation27_spill] sm:$0xff] }
 0x422   : >> { %5044 = vrot.lane.b32.xlu0 %v4953_v6, %s11725_s16  ;;  %v9486_v6 = vcombine.low %v17875_v10, %v17874_v61  ;;  %v9485_v61 = vcombine.low %v17877_v51, %v17876_v20  ;;  %v9484_v35 = vcombine.low %v17879_v41, %v17878_v5  ;;  %v4745_v20 = vld [vmem:[#allocation2 + $0x8] sm:$0xff]  ;;  %v5132_v51 = vrot.slane %v15706_v31, 1  ;;  %v4795_v41 = vld [vmem:[#allocation2 + $0x198] sm:$0xff] }
 0x423   : >> { %5158 = vrot.lane.b32.xlu1 %v5122_v26, %s11724_s15  ;;  %v4967_v26 = vshrl.u32 %v15697_v55, 16  ;;  %v15733_v5 = vpack.c.bf16 %v4793_v62, %v4792_v1  ;;  %v5135_v43 = vrot.slane %v15730_v25, 1 }
 0x424   : >> { %10417 = vmatprep.subr.bf16.mxu0 %v9486_v6 }
 0x425   : >> { %v4972_v10 = vor.u32 %v4971_v53, %v4967_v26  ;;  %v5125_v26 = vsel %vm912_vm3, %v5123_v38, %v5124_v48  ;;  %v5008_v53 = vor.u32 %v5007_v19, %v5003_v2  ;;  %10418 = vmatpush3.bf16.msra.mxu0 %v9486_v6  ;;  %v5017_v48 = vshll.u32 %v15730_v25, 16  ;;  %v4746_v19 = vld [vmem:[#allocation2 + $0x10] sm:$0x3] }
 0x426   : >> { %5156 = vrot.lane.b32.xlu0 %v5119_v46, %s11724_s15  ;;  %v5010_v46 = vshll.u32 %v4827_v12, 16  ;;  %10419 = vmatprep.subr.bf16.mxu0 %v9485_v61  ;;  %v15736_v6 = vpack.c.bf16 %v4745_v20, %v4744_v34  ;;  %v5130_v12 = vrot.slane %v15710_v52, 1  ;;  %v4831_v2 = vpack.c.bf16 %v4794_v0, %v4794_v0 }
 0x427   : >> { %5050 = vrot.lane.b32.xlu1 %v4989_v36, %s11725_s16  ;;  %v4998_v36 = vshll.u32 %v15710_v52, 16  ;;  %v4977_v30 = vsel %vm687_vm2, %v4972_v10, %v4976_v63  ;;  %v5019_v62 = vrot.slane %v5017_v48, 1  ;;  %v5238_v0 = vshll.u32 %v15733_v5, 16 }
 0x428   : >> { %v5012_v8 = vrot.slane %v5010_v46, 1  ;;  %v4995_v46 = vrot.slane %v4993_v23, 1  ;;  %v5243_v34 = vshll.u32 %v4831_v2, 16  ;;  %v4837_v20 = vshll.u32 %v15736_v6, 16 }
 0x429   : >> { %v5000_v10 = vrot.slane %v4998_v36, 1  ;;  %10420 = vmatpush3.bf16.msra.mxu0 %v9485_v61  ;;  %v4799_v61 = vpack.c.bf16 %v4746_v19, %v4746_v19 }
 0x42a   : >> { %5048 = vrot.lane.b32.xlu0 %v4977_v30, %s11725_s16  ;;  %v5013_v63 = vsel %vm687_vm2, %v5008_v53, %v5012_v8  ;;  %v4996_v38 = vor.u32 %v4995_v46, %v4991_v22  ;;  %v5129_v30 = vrot.slane %v15716_v56, 1  ;;  %v17881_v8 = vld [vmem:[#allocation26_spill] sm:$0xff]  ;;  %v5015_v22 = vshrl.u32 %v15730_v25, 16  ;;  %10421 = vmatprep.subr.bf16.mxu0 %v9484_v35 }
 0x42b   : >> { %5162 = vrot.lane.b32.xlu1 %v5128_v42, %s11724_s15  ;;  %v4829_v42 = vpack.c.bf16 %v4791_v49, %v4791_v49  ;;  %v9483_v36 = vcombine.low %v17881_v8, %v17880_v32  ;;  %v5134_v49 = vsel %vm912_vm3, %v5132_v51, %v5133_v29  ;;  %v4796_v53 = vld [vmem:[#allocation2 + $0x1a0] sm:$0xff]  ;;  %v5236_v29 = vshrl.u32 %v15733_v5, 16  ;;  %v4797_v32 = vld [vmem:[#allocation2 + $0x1a8] sm:$0x3]  ;;  %v17884_v8 = vld [vmem:[#allocation25_spill] sm:$0xff] }
 0x42c   : >> { %v5001_v1 = vsel %vm687_vm2, %v4996_v38, %v5000_v10  ;;  %v5251_v51 = vrot.slane %v15733_v5, 1  ;;  %v17882_v10 = vld [vmem:[#allocation49_spill] sm:$0xff]  ;;  %v5020_v48 = vor.u32 %v5019_v62, %v5015_v22  ;;  %v15760_v19 = vpack.c.bf16 %v4796_v53, %v4795_v41 }
 0x42d   : >> { %v5136_v23 = vrot.slane %v4829_v42, 1  ;;  %v5022_v52 = vshll.u32 %v4829_v42, 16  ;;  %10422 = vmatpush3.bf16.msra.mxu0 %v9484_v35  ;;  %v17883_v42 = vld [vmem:[#allocation48_spill] sm:$0xff]  ;;  %v5245_v22 = vrot.slane %v5243_v34, 1 }
 0x42e   : >> { %5160 = vrot.lane.b32.xlu0 %v5125_v26, %s11724_s15  ;;  %v5131_v26 = vsel %vm912_vm3, %v5129_v30, %v5130_v12  ;;  %10423 = vmatprep.subr.bf16.mxu0 %v9483_v36  ;;  %v15758_v38 = vcombine.low %v17883_v42, %v17882_v10  ;;  %v5240_v12 = vrot.slane %v5238_v0, 1  ;;  %v17885_v35 = vld [vmem:[#allocation24_spill] sm:$0xff]  ;;  %v17887_v10 = vld [vmem:[#allocation22_spill] sm:$0xff]  ;;  %v5091_v0 = vrot.slane %v4799_v61, 1 }
 0x42f   : >> { %5054 = vrot.lane.b32.xlu1 %v5013_v63, %s11725_s16  ;;  %v5137_v46 = vsel %vm912_vm3, %v5135_v43, %v5136_v23  ;;  %v5252_v63 = vrot.slane %v4831_v2, 1  ;;  %v5024_v30 = vrot.slane %v5022_v52, 1  ;;  %v4835_v43 = vshrl.u32 %v15736_v6, 16  ;;  %v17889_v34 = vld [vmem:[#allocation20_spill] sm:$0xff] }
 0x430   : >> { %v4842_v23 = vshll.u32 %v4799_v61, 16  ;;  %v5090_v2 = vrot.slane %v15736_v6, 1  ;;  %v4839_v52 = vrot.slane %v4837_v20, 1  ;;  %v5241_v53 = vor.u32 %v5240_v12, %v5236_v29 }
 0x431   : >> { %10424 = vmatpush3.bf16.msra.mxu0 %v9483_v36  ;;  %v5253_v62 = vsel %vm912_vm3, %v5251_v51, %v5252_v63  ;;  %v5025_v41 = vsel %vm687_vm2, %v5020_v48, %v5024_v30  ;;  %v5705_v51 = vrot.slane %v15760_v19, 1  ;;  %v5690_v48 = vshrl.u32 %v15760_v19, 16 }
 0x432   : >> { %5052 = vrot.lane.b32.xlu0 %v5001_v1, %s11725_s16  ;;  %v17886_v1 = vld [vmem:[#allocation23_spill] sm:$0xff]  ;;  %10501 = vmatprep.subr.bf16.mxu0 %v15758_v38  ;;  %v4844_v36 = vrot.slane %v4842_v23, 1  ;;  %v4840_v61 = vor.u32 %v4839_v52, %v4835_v43  ;;  %v5092_v20 = vsel %vm912_vm3, %v5090_v2, %v5091_v0  ;;  %v5246_v63 = vsel %vm687_vm2, %v5241_v53, %v5245_v22  ;;  %v17892_v22 = vld [vmem:[#allocation17_spill] sm:$0xff] }
 0x433   : >> { %5166 = vrot.lane.b32.xlu1 %v5134_v49, %s11724_s15  ;;  %v9510_v49 = vcombine.low %v17885_v35, %v17884_v8  ;;  %v9509_v42 = vcombine.low %v17887_v10, %v17886_v1  ;;  %v5692_v8 = vshll.u32 %v15760_v19, 16  ;;  %v17894_v0 = vld [vmem:[#allocation15_spill] sm:$0xff] }
 0x434   : >> { %v4845_v2 = vsel %vm687_vm2, %v4840_v61, %v4844_v36 }
 0x435   : >> { %10457 = vmatprep.subr.bf16.mxu1 %v9510_v49  ;;  %v5694_v30 = vrot.slane %v5692_v8, 1 }
 0x436   : >> { %5164 = vrot.lane.b32.xlu0 %v5131_v26, %s11724_s15  ;;  %10458 = vmatpush3.bf16.msra.mxu1 %v9510_v49  ;;  %v17888_v26 = vld [vmem:[#allocation21_spill] sm:$0xff]  ;;  %v17891_v49 = vld [vmem:[#allocation18_spill] sm:$0xff] }
 0x437   : >> { %5168 = vrot.lane.b32.xlu1 %v5137_v46, %s11724_s15  ;;  %v4833_v46 = vpack.c.bf16 %v4797_v32, %v4797_v32  ;;  %10459 = vmatprep.subr.bf16.mxu1 %v9509_v42  ;;  %v9508_v35 = vcombine.low %v17889_v34, %v17888_v26  ;;  %v17890_v32 = vld [vmem:[#allocation19_spill] sm:$0xff]  ;;  %v5695_v1 = vor.u32 %v5694_v30, %v5690_v48 }
 0x438   : >> { %v9507_v23 = vcombine.low %v17891_v49, %v17890_v32  ;;  %v17901_v32 = vld [vmem:[#allocation44_spill] sm:$0xff] }
 0x439   : >> { %v5706_v29 = vrot.slane %v4833_v46, 1  ;;  %v5697_v12 = vshll.u32 %v4833_v46, 16 }
 0x43a   : >> { %5056 = vrot.lane.b32.xlu0 %v5025_v41, %s11725_s16  ;;  %10460 = vmatpush3.bf16.msra.mxu1 %v9509_v42  ;;  %v17893_v42 = vld [vmem:[#allocation16_spill] sm:$0xff]  ;;  %v17895_v41 = vld [vmem:[#allocation14_spill] sm:$0xff] }
 0x43b   : >> { %5254 = vrot.lane.b32.xlu1 %v5253_v62, %s11724_s15  ;;  %10461 = vmatprep.subr.bf16.mxu1 %v9508_v35  ;;  %v5707_v43 = vsel %vm912_vm3, %v5705_v51, %v5706_v29  ;;  %v5699_v10 = vrot.slane %v5697_v12, 1  ;;  %v9506_v62 = vcombine.low %v17893_v42, %v17892_v22  ;;  %v9505_v53 = vcombine.low %v17895_v41, %v17894_v0  ;;  %v17898_v51 = vld [vmem:[#allocation47_spill] sm:$0xff]  ;;  %v17899_v29 = vld [vmem:[#allocation46_spill] sm:$0xff]  ;;  %v17900_v12 = vld [vmem:[#allocation45_spill] sm:$0xff] }
 0x43c   : >> { %v9530_v49 = vcombine.low %v17901_v32, %v17900_v12 }
 0x43d   : >> { %v5700_v52 = vsel %vm687_vm2, %v5695_v1, %v5699_v10  ;;  %v17904_v10 = vld [vmem:[#allocation43_spill] sm:$0xff] }
 0x43e   : >> { %5247 = vrot.lane.b32.xlu0 %v5246_v63, %s11725_s16  ;;  %10462 = vmatpush3.bf16.msra.mxu1 %v9508_v35  ;;  %v9531_v63 = vcombine.low %v17899_v29, %v17898_v51 }
 0x43f   : >> { %5138 = vrot.lane.b32.xlu1 %v5092_v20, %s11724_s15  ;;  %10463 = vmatprep.subr.bf16.mxu1 %v9507_v23 }
 0x442   : >> { %5026 = vrot.lane.b32.xlu0 %v4845_v2, %s11725_s16  ;;  %10464 = vmatpush3.bf16.msra.mxu1 %v9507_v23 }
 0x443   : >> { %5708 = vrot.lane.b32.xlu1 %v5707_v43, %s11724_s15  ;;  %10465 = vmatprep.subr.bf16.mxu1 %v9506_v62 }
 0x446   : >> { %5701 = vrot.lane.b32.xlu0 %v5700_v52, %s11725_s16  ;;  %10466 = vmatpush3.bf16.msra.mxu1 %v9506_v62  ;;  %v17906_v62 = vld [vmem:[#allocation41_spill] sm:$0xff]  ;;  %v17907_v52 = vld [vmem:[#allocation40_spill] sm:$0xff] }
 0x447   : >> { %10467 = vmatprep.subr.bf16.mxu1 %v9505_v53  ;;  %v9528_v0 = vcombine.low %v17907_v52, %v17906_v62 }
 0x44a   : >> { %10468 = vmatpush3.bf16.msra.mxu1 %v9505_v53 }
 0x470   : >> { %v5141_v46 = vpop.permute.xlu1 %5140 }
 0x474   : >> { %v5029_v8 = vpop.permute.xlu0 %5028  ;;  %v5143_v36 = vpop.permute.xlu1 %5142 }
 0x475   : >> { %v5173_v26 = vsel %vm17896_vm9, %v15561_v47, %v5029_v8  ;;  %vm17917_vm9 = vmmov %vm17840_vm0 }
 0x476   : >> { %v15799_v34 = vsel %vm5202_vm7, %v5173_v26, %v5141_v46  ;;  %v17910_v26 = vld [vmem:[#allocation39_spill] sm:$0xff] }
 0x477   : >> { %10425 = vmatprep.mubr.msk.bf16.mxu0 %vm5296_vm8, %v15799_v34 }
 0x478   : >> { %v5031_v35 = vpop.permute.xlu0 %5030 }
 0x479   : >> { %v5175_v61 = vsel %vm17897_vm10, %v15571_v15, %v5031_v35  ;;  %v5035_v20 = vpop.permute.xlu1 %5034  ;;  %v17911_v35 = vld [vmem:[#allocation38_spill] sm:$0xff]  ;;  %vm17918_vm10 = vmmov %vm17840_vm0 }
 0x47a   : >> { %v15808_v48 = vsel %vm5202_vm7, %v5175_v61, %v5143_v36  ;;  %v5179_v15 = vsel %vm17902_vm11, %v15586_v58, %v5035_v20  ;;  %v9527_v61 = vcombine.low %v17911_v35, %v17910_v26  ;;  %vm17919_vm11 = vmmov %vm17840_vm0 }
 0x47b   : >> { %10426 = vmatmul.mubr.msk.bf16.vlgmr.msra.gmra.mxu0 %vm5296_vm8, %v15808_v48 }
 0x47c   : >> { %v5033_v47 = vpop.permute.xlu0 %5032  ;;  %10502 = vmatpush3.bf16.msra.mxu0 %v15758_v38  ;;  %v17905_v38 = vld [vmem:[#allocation42_spill] sm:$0xff] }
 0x47d   : >> { %v5147_v30 = vpop.permute.xlu1 %5146  ;;  %10503 = vmatprep.subr.bf16.mxu0 %v9531_v63  ;;  %v5177_v23 = vsel %vm17903_vm12, %v15588_v39, %v5033_v47  ;;  %v9529_v22 = vcombine.low %v17905_v38, %v17904_v10  ;;  %vm17920_vm12 = vmmov %vm17840_vm0 }
 0x47e   : >> { %v15825_v42 = vsel %vm5202_vm7, %v5179_v15, %v5147_v30 }
 0x480   : >> { %v5145_v43 = vpop.permute.xlu0 %5144  ;;  %10504 = vmatpush3.bf16.msra.mxu0 %v9531_v63 }
 0x481   : >> { %v15820_v2 = vsel %vm5202_vm7, %v5177_v23, %v5145_v43  ;;  %v5039_v1 = vpop.permute.xlu1 %5038  ;;  %10505 = vmatprep.subr.bf16.mxu0 %v9530_v49 }
 0x482   : >> { %10429 = vmatprep.mubr.msk.bf16.mxu0 %vm5296_vm8, %v15820_v2  ;;  %v5183_v41 = vsel %vm17908_vm13, %v15599_v37, %v5039_v1  ;;  %vm17921_vm13 = vmmov %vm17840_vm0 }
 0x483   : >> { %10430 = vmatmul.mubr.msk.bf16.gmra.mxu0 %vm5296_vm8, %v15825_v42 }
 0x484   : >> { %v5037_v58 = vpop.permute.xlu0 %5036  ;;  %10506 = vmatpush3.bf16.msra.mxu0 %v9530_v49 }
 0x485   : >> { %v5151_v39 = vpop.permute.xlu1 %5150  ;;  %10507 = vmatprep.subr.bf16.mxu0 %v9529_v22  ;;  %v5181_v53 = vsel %vm17909_vm14, %v15601_v4, %v5037_v58  ;;  %vm17922_vm14 = vmmov %vm17840_vm0 }
 0x486   : >> { %v15843_v20 = vsel %vm5202_vm7, %v5183_v41, %v5151_v39 }
 0x488   : >> { %v5149_v46 = vpop.permute.xlu0 %5148  ;;  %10508 = vmatpush3.bf16.msra.mxu0 %v9529_v22 }
 0x489   : >> { %v15838_v8 = vsel %vm5202_vm7, %v5181_v53, %v5149_v46  ;;  %v5043_v36 = vpop.permute.xlu1 %5042  ;;  %10509 = vmatprep.subr.bf16.mxu0 %v9528_v0 }
 0x48a   : >> { %10433 = vmatprep.mubr.msk.bf16.mxu0 %vm5296_vm8, %v15838_v8  ;;  %v5187_v51 = vsel %vm17912_vm15, %v15618_v17, %v5043_v36  ;;  %vm17934_vm15 = vmmov %vm17840_vm0 }
 0x48b   : >> { %10434 = vmatmul.mubr.msk.bf16.gmra.mxu0 %vm5296_vm8, %v15843_v20 }
 0x48c   : >> { %v5041_v4 = vpop.permute.xlu0 %5040  ;;  %10510 = vmatpush3.bf16.msra.mxu0 %v9528_v0 }
 0x48d   : >> { %v5155_v37 = vpop.permute.xlu1 %5154  ;;  %10511 = vmatprep.subr.bf16.mxu0 %v9527_v61  ;;  %v5185_v29 = vsel %vm17913_vm1, %v15622_v54, %v5041_v4  ;;  %vm17935_vm1 = vmmov %vm17840_vm0 }
 0x48e   : >> { %v5220_v12 = vsel %vm5202_vm7, %v5187_v51, %v5155_v37 }
 0x490   : >> { %v5153_v63 = vpop.permute.xlu0 %5152  ;;  %10512 = vmatpush3.bf16.msra.mxu0 %v9527_v61 }
 0x491   : >> { %v5218_v47 = vsel %vm5202_vm7, %v5185_v29, %v5153_v63  ;;  %v5047_v30 = vpop.permute.xlu1 %5046 }
 0x492   : >> { %10437 = vmatprep.mubr.msk.bf16.mxu0 %vm5296_vm8, %v5218_v47  ;;  %v5191_v15 = vsel %vm17840_vm0, %v15636_v3, %v5047_v30 }
 0x493   : >> { %10438 = vmatmul.mubr.msk.bf16.gmra.mxu0 %vm5296_vm8, %v5220_v12 }
 0x494   : >> { %v5045_v32 = vpop.permute.xlu0 %5044 }
 0x495   : >> { %v5159_v49 = vpop.permute.xlu1 %5158  ;;  %v5189_v17 = vsel %vm17914_vm4, %v15639_v24, %v5045_v32  ;;  %vm17936_vm4 = vmmov %vm17840_vm0 }
 0x496   : >> { %v5224_v1 = vsel %vm5202_vm7, %v5191_v15, %v5159_v49 }
 0x498   : >> { %v5157_v54 = vpop.permute.xlu0 %5156 }
 0x499   : >> { %v5222_v23 = vsel %vm5202_vm7, %v5189_v17, %v5157_v54  ;;  %v5051_v43 = vpop.permute.xlu1 %5050 }
 0x49a   : >> { %10441 = vmatprep.mubr.msk.bf16.mxu0 %vm5296_vm8, %v5222_v23  ;;  %v5195_v22 = vsel %vm17915_vm5, %v15653_v14, %v5051_v43  ;;  %vm17937_vm5 = vmmov %vm17840_vm0 }
 0x49b   : >> { %10442 = vmatmul.mubr.msk.bf16.gmra.mxu0 %vm5296_vm8, %v5224_v1 }
 0x49c   : >> { %v5049_v38 = vpop.permute.xlu0 %5048 }
 0x49d   : >> { %v5163_v10 = vpop.permute.xlu1 %5162  ;;  %v5193_v3 = vsel %vm17916_vm6, %v15697_v55, %v5049_v38  ;;  %vm17940_vm6 = vmmov %vm17840_vm0 }
 0x49e   : >> { %v5228_v62 = vsel %vm5202_vm7, %v5195_v22, %v5163_v10 }
 0x4a0   : >> { %v5161_v24 = vpop.permute.xlu0 %5160 }
 0x4a1   : >> { %v5055_v58 = vpop.permute.xlu1 %5054  ;;  %v5226_v39 = vsel %vm5202_vm7, %v5193_v3, %v5161_v24 }
 0x4a2   : >> { %10445 = vmatprep.mubr.msk.bf16.mxu0 %vm5296_vm8, %v5226_v39  ;;  %v5199_v41 = vsel %vm17917_vm9, %v15706_v31, %v5055_v58  ;;  %vm17941_vm9 = vmmov %vm17840_vm0 }
 0x4a3   : >> { %10446 = vmatmul.mubr.msk.bf16.gmra.mxu0 %vm5296_vm8, %v5228_v62 }
 0x4a4   : >> { %v5053_v0 = vpop.permute.xlu0 %5052 }
 0x4a5   : >> { %v5167_v52 = vpop.permute.xlu1 %5166  ;;  %v5197_v14 = vsel %vm17918_vm10, %v15716_v56, %v5053_v0  ;;  %v17925_v0 = vld [vmem:[#allocation71_spill] sm:$0xff]  ;;  %vm17944_vm10 = vmmov %vm17840_vm0 }
 0x4a6   : >> { %v5232_v36 = vsel %vm5202_vm7, %v5199_v41, %v5167_v52  ;;  %v17926_v41 = vld [vmem:[#allocation70_spill] sm:$0xff] }
 0x4a8   : >> { %v5165_v46 = vpop.permute.xlu0 %5164 }
 0x4a9   : >> { %v5169_v53 = vpop.permute.xlu1 %5168  ;;  %v5230_v55 = vsel %vm5202_vm7, %v5197_v14, %v5165_v46 }
 0x4aa   : >> { %10449 = vmatprep.mubr.msk.bf16.mxu0 %vm5296_vm8, %v5230_v55 }
 0x4ab   : >> { %10450 = vmatmul.mubr.msk.bf16.gmra.mxu0 %vm5296_vm8, %v5232_v36 }
 0x4ac   : >> { %v5057_v26 = vpop.permute.xlu0 %5056 }
 0x4ad   : >> { %v5201_v35 = vsel %vm17919_vm11, %v15730_v25, %v5057_v26  ;;  %v5255_v61 = vpop.permute.xlu1 %5254  ;;  %vm17945_vm11 = vmmov %vm17840_vm0 }
 0x4ae   : >> { %v5234_v31 = vsel %vm5202_vm7, %v5201_v35, %v5169_v53  ;;  %v9553_v53 = vcombine.low %v17926_v41, %v17925_v0  ;;  %v17932_v0 = vld [vmem:[#allocation86_spill] sm:$0xff] }
 0x4af   : >> { %10453 = vmatprep.mubr.msk.bf16.mxu0 %vm5296_vm8, %v5234_v31  ;;  %v17933_v41 = vmov %v17932_v0 }
 0x4b0   : >> { %v5248_v4 = vpop.permute.xlu0 %5247 }
 0x4b1   : >> { %v5257_v56 = vsel %vm17920_vm12, %v15733_v5, %v5248_v4  ;;  %v5139_v51 = vpop.permute.xlu1 %5138  ;;  %v17930_v4 = vld [vmem:[#allocation66_spill] sm:$0xff]  ;;  %vm17946_vm12 = vmmov %vm17840_vm0 }
 0x4b2   : >> { %v5259_v37 = vsel %vm5202_vm7, %v5257_v56, %v5255_v61 }
 0x4b3   : >> { %10454 = vmatmul.mubr.msk.bf16.gmra.mxu0 %vm5296_vm8, %v5259_v37 }
 0x4b4   : >> { %10513 = vmatprep.mubr.msk.bf16.mxu0 %vm5296_vm8, %v15808_v48  ;;  %v5027_v29 = vpop.permute.xlu0 %5026 }
 0x4b5   : >> { %v5171_v25 = vsel %vm17921_vm13, %v15736_v6, %v5027_v29  ;;  %vm17947_vm13 = vmmov %vm17840_vm0 }
 0x4b6   : >> { %v5204_v63 = vsel %vm5202_vm7, %v5171_v25, %v5139_v51 }
 0x4b7   : >> { %10469 = vmatprep.mubr.msk.bf16.mxu1 %vm5296_vm8, %v5204_v63 }
 0x4b8   : >> { %10470 = vmatmul.mubr.msk.bf16.vlgmr.msra.gmra.mxu1 %vm5296_vm8, %v15799_v34  ;;  %v5702_v5 = vpop.permute.xlu0 %5701  ;;  %v5709_v34 = vpop.permute.xlu1 %5708 }
 0x4b9   : >> { %10473 = vmatprep.mubr.msk.bf16.mxu1 %vm5296_vm8, %v15808_v48  ;;  %v5711_v6 = vsel %vm17922_vm14, %v15760_v19, %v5702_v5  ;;  %vm17948_vm14 = vmmov %vm17840_vm0 }
 0x4ba   : >> { %v5713_v48 = vsel %vm5202_vm7, %v5711_v6, %v5709_v34 }
 0x4bb   : >> { %10514 = vmatmul.mubr.msk.bf16.vlgmr.msra.gmra.mxu0 %vm5296_vm8, %v15820_v2 }
 0x4bc   : >> { %10517 = vmatprep.mubr.msk.bf16.mxu0 %vm5296_vm8, %v15825_v42 }
 0x4c0   : >> { %10474 = vmatmul.mubr.msk.bf16.gmra.mxu1 %vm5296_vm8, %v15820_v2 }
 0x4c1   : >> { %10477 = vmatprep.mubr.msk.bf16.mxu1 %vm5296_vm8, %v15825_v42 }
 0x4c3   : >> { %10518 = vmatmul.mubr.msk.bf16.gmra.mxu0 %vm5296_vm8, %v15838_v8 }
 0x4c4   : >> { %10521 = vmatprep.mubr.msk.bf16.mxu0 %vm5296_vm8, %v15843_v20 }
 0x4c8   : >> { %10478 = vmatmul.mubr.msk.bf16.gmra.mxu1 %vm5296_vm8, %v15838_v8 }
 0x4c9   : >> { %10481 = vmatprep.mubr.msk.bf16.mxu1 %vm5296_vm8, %v15843_v20 }
 0x4cb   : >> { %10522 = vmatmul.mubr.msk.bf16.gmra.mxu0 %vm5296_vm8, %v5218_v47 }
 0x4cc   : >> { %10525 = vmatprep.mubr.msk.bf16.mxu0 %vm5296_vm8, %v5220_v12 }
 0x4d0   : >> { %10482 = vmatmul.mubr.msk.bf16.gmra.mxu1 %vm5296_vm8, %v5218_v47 }
 0x4d1   : >> { %10485 = vmatprep.mubr.msk.bf16.mxu1 %vm5296_vm8, %v5220_v12 }
 0x4d3   : >> { %10526 = vmatmul.mubr.msk.bf16.gmra.mxu0 %vm5296_vm8, %v5222_v23 }
 0x4d4   : >> { %10529 = vmatprep.mubr.msk.bf16.mxu0 %vm5296_vm8, %v5224_v1 }
 0x4d8   : >> { %10486 = vmatmul.mubr.msk.bf16.gmra.mxu1 %vm5296_vm8, %v5222_v23 }
 0x4d9   : >> { %10489 = vmatprep.mubr.msk.bf16.mxu1 %vm5296_vm8, %v5224_v1 }
 0x4db   : >> { %10530 = vmatmul.mubr.msk.bf16.gmra.mxu0 %vm5296_vm8, %v5226_v39 }
 0x4dc   : >> { %10533 = vmatprep.mubr.msk.bf16.mxu0 %vm5296_vm8, %v5228_v62 }
 0x4e0   : >> { %10490 = vmatmul.mubr.msk.bf16.gmra.mxu1 %vm5296_vm8, %v5226_v39  ;;  %v17923_v39 = vld [vmem:[#allocation73_spill] sm:$0xff] }
 0x4e1   : >> { %10493 = vmatprep.mubr.msk.bf16.mxu1 %vm5296_vm8, %v5228_v62  ;;  %v17924_v62 = vld [vmem:[#allocation72_spill] sm:$0xff] }
 0x4e2   : >> { %v9554_v52 = vcombine.low %v17924_v62, %v17923_v39 }
 0x4e3   : >> { %10534 = vmatmul.mubr.msk.bf16.gmra.mxu0 %vm5296_vm8, %v5230_v55 }
 0x4e4   : >> { %10537 = vmatprep.mubr.msk.bf16.mxu0 %vm5296_vm8, %v5232_v36  ;;  %10545 = vmatprep.subr.bf16.mxu1 %v9554_v52 }
 0x4e5   : >> { %10546 = vmatpush3.bf16.msra.mxu1 %v9554_v52 }
 0x4e6   : >> { %10547 = vmatprep.subr.bf16.mxu1 %v9553_v53 }
 0x4e8   : >> { %10494 = vmatmul.mubr.msk.bf16.gmra.mxu1 %vm5296_vm8, %v5230_v55  ;;  %v17927_v55 = vld [vmem:[#allocation69_spill] sm:$0xff] }
 0x4e9   : >> { %10497 = vmatprep.mubr.msk.bf16.mxu1 %vm5296_vm8, %v5232_v36  ;;  %v17928_v36 = vld [vmem:[#allocation68_spill] sm:$0xff]  ;;  %10548 = vmatpush3.bf16.msra.mxu1 %v9553_v53 }
 0x4ea   : >> { %v9552_v26 = vcombine.low %v17928_v36, %v17927_v55 }
 0x4eb   : >> { %10538 = vmatmul.mubr.msk.bf16.gmra.mxu0 %vm5296_vm8, %v5234_v31 }
 0x4ec   : >> { %10541 = vmatprep.mubr.msk.bf16.mxu0 %vm5296_vm8, %v5259_v37  ;;  %10549 = vmatprep.subr.bf16.mxu1 %v9552_v26  ;;  %v5945_v37 = vlaneseq }
 0x4ed   : >> { %10550 = vmatpush3.bf16.msra.mxu1 %v9552_v26 }
 0x4ee   : >> { %v15992_v25 = vshrl.u32 %v5945_v37, 7 }
 0x4f0   : >> { %10498 = vmatmul.mubr.msk.bf16.gmra.mxu1 %vm5296_vm8, %v5234_v31  ;;  %v17929_v31 = vld [vmem:[#allocation67_spill] sm:$0xff]  ;;  %17931 = vst [vmem:[#allocation153_spill] sm:$0xff] %v15992_v25  ;;  %v17600_v6 = vsub.s32 0, %v15992_v25 }
 0x4f1   : >> { %v9551_v56 = vcombine.low %v17930_v4, %v17929_v31 }
 0x4f2   : >> { %v16006_v53 = vrot.slane %v17932_v0, %v17600_v6 }
 0x4f3   : >> { %10542 = vmatmul.mubr.msk.bf16.gmra.mxu0 %vm5296_vm8, %v5713_v48  ;;  %10551 = vmatprep.subr.bf16.mxu1 %v9551_v56 }
 0x4f4   : >> { %10552 = vmatpush3.bf16.msra.mxu1 %v9551_v56 }
 0x53b   : >> { %v10427_v2 = vpop.f32.mrf.mxu0 }
 0x53d   : >> { %v5363_v42 = vpop.f32.mrf.mxu0 }
 0x53f   : >> { %v10428_v8 = vpop.f32.mrf.mxu0 }
 0x541   : >> { %v5366_v20 = vpop.f32.mrf.mxu0 }
 0x543   : >> { %v10431_v47 = vpop.f32.mrf.mxu0 }
 0x545   : >> { %v15938_v30 = vpop.f32.mrf.mxu0 }
 0x547   : >> { %v15940_v12 = vpop.f32.mrf.mxu0 }
 0x549   : >> { %v15942_v32 = vpop.f32.mrf.mxu0 }
 0x54b   : >> { %v15944_v49 = vpop.f32.mrf.mxu0 }
 0x54d   : >> { %v15946_v19 = vpop.f32.mrf.mxu0 }
 0x54f   : >> { %v15948_v15 = vpop.f32.mrf.mxu0 }
 0x551   : >> { %v15950_v17 = vpop.f32.mrf.mxu0 }
 0x553   : >> { %v15952_v54 = vpop.f32.mrf.mxu0 }
 0x555   : >> { %v15954_v23 = vpop.f32.mrf.mxu0 }
 0x557   : >> { %v15956_v43 = vpop.f32.mrf.mxu0 }
 0x559   : >> { %v15958_v1 = vpop.f32.mrf.mxu0 }
 0x55b   : >> { %v15960_v10 = vpop.f32.mrf.mxu0 }
 0x55d   : >> { %v15962_v38 = vpop.f32.mrf.mxu0 }
 0x55f   : >> { %v15964_v22 = vpop.f32.mrf.mxu0 }
 0x561   : >> { %v15966_v58 = vpop.f32.mrf.mxu0 }
 0x563   : >> { %v15968_v3 = vpop.f32.mrf.mxu0 }
 0x565   : >> { %v15970_v24 = vpop.f32.mrf.mxu0 }
 0x567   : >> { %v15976_v14 = vpop.f32.mrf.mxu0 }
 0x569   : >> { %v15978_v46 = vpop.f32.mrf.mxu0 }
 0x56b   : >> { %v15982_v35 = vpop.f32.mrf.mxu0 }
 0x56d   : >> { %v15984_v61 = vpop.f32.mrf.mxu0 }
 0x56f   : >> { %v15988_v51 = vpop.f32.mrf.mxu0 }
 0x571   : >> { %v15990_v29 = vpop.f32.mrf.mxu0 }
 0x573   : >> { %v15994_v63 = vpop.f32.mrf.mxu0 }
 0x575   : >> { %v15996_v5 = vpop.f32.mrf.mxu0 }
 0x577   : >> { %v15999_v34 = vpop.f32.mrf.mxu0 }
 0x578   : >> { %v10471_v48 = vpop.f32.mrf.mxu1 }
 0x579   : >> { %v5571_v39 = vadd.f32 %v10471_v48, %v10427_v2  ;;  %v16001_v62 = vpop.f32.mrf.mxu0 }
 0x57a   : >> { %v5562_v52 = vpop.f32.mrf.mxu1 }
 0x57b   : >> { %v5563_v55 = vadd.f32 %v5562_v52, %v5363_v42  ;;  %v10515_v36 = vpop.f32.mrf.mxu0 }
 0x57c   : >> { %v5915_v26 = vadd.f32 %v10515_v36, %v5571_v39  ;;  %v10472_v31 = vpop.f32.mrf.mxu1 }
 0x57d   : >> { %v5574_v4 = vadd.f32 %v10472_v31, %v10428_v8  ;;  %v5786_v56 = vpop.f32.mrf.mxu0 }
 0x57e   : >> { %v5951_v37 = vadd.f32 %v16006_v53, %v5915_v26  ;;  %v5913_v45 = vadd.f32 %v5786_v56, %v5563_v55  ;;  %v5565_v11 = vpop.f32.mrf.mxu1 }
 0x57f   : >> { %v5566_v13 = vadd.f32 %v5565_v11, %v5366_v20  ;;  %v10516_v2 = vpop.f32.mrf.mxu0 }
 0x580   : >> { %v5983_v48 = vmax.f32 %v5951_v37, 0.0  ;;  %v5949_v33 = vadd.f32 %v16006_v53, %v5913_v45  ;;  %v5916_v44 = vadd.f32 %v10516_v2, %v5574_v4  ;;  %v10475_v60 = vpop.f32.mrf.mxu1 }
 0x581   : >> { %v5587_v21 = vadd.f32 %v10475_v60, %v10431_v47  ;;  %v5789_v0 = vpop.f32.mrf.mxu0 }
 0x582   : >> { %6015 = vst.msk [vmem:[#allocation2 + $0x31] sm:$0xff] %vm17934_vm15, %v5983_v48  ;;  %v5981_v42 = vmax.f32 %v5949_v33, 0.0  ;;  %v5952_v39 = vadd.f32 %v16006_v53, %v5916_v44  ;;  %v5914_v8 = vadd.f32 %v5789_v0, %v5566_v13  ;;  %v5578_v52 = vpop.f32.mrf.mxu1  ;;  %vm17949_vm15 = vmmov %vm17840_vm0 }
 0x583   : >> { %v5579_v36 = vadd.f32 %v5578_v52, %v15938_v30  ;;  %v10519_v55 = vpop.f32.mrf.mxu0 }
 0x584   : >> { %6013 = vst.msk [vmem:[#allocation2 + $0x19] sm:$0xff] %vm17935_vm1, %v5981_v42  ;;  %v5984_v11 = vmax.f32 %v5952_v39, 0.0  ;;  %v5950_v20 = vadd.f32 %v16006_v53, %v5914_v8  ;;  %v5919_v45 = vadd.f32 %v10519_v55, %v5587_v21  ;;  %v10476_v26 = vpop.f32.mrf.mxu1  ;;  %v17939_v55 = vld [vmem:[#allocation64_spill] sm:$0xff]  ;;  %vm17950_vm1 = vmmov %vm17840_vm0 }
 0x585   : >> { %v5590_v60 = vadd.f32 %v10476_v26, %v15940_v12  ;;  %v5802_v47 = vpop.f32.mrf.mxu0 }
 0x586   : >> { %6016 = vst.msk [vmem:[#allocation2 + $0x39] sm:$0xff] %vm17840_vm0, %v5984_v11  ;;  %v5982_v33 = vmax.f32 %v5950_v20, 0.0  ;;  %v5955_v44 = vadd.f32 %v16006_v53, %v5919_v45  ;;  %v5917_v13 = vadd.f32 %v5802_v47, %v5579_v36  ;;  %v5581_v31 = vpop.f32.mrf.mxu1  ;;  %v17938_v36 = vld [vmem:[#allocation65_spill] sm:$0xff] }
 0x587   : >> { %v5582_v30 = vadd.f32 %v5581_v31, %v15942_v32  ;;  %v10520_v4 = vpop.f32.mrf.mxu0  ;;  %v9550_v11 = vcombine.low %v17939_v55, %v17938_v36 }
 0x588   : >> { %6014 = vst.msk [vmem:[#allocation2 + $0x21] sm:$0xff] %vm17936_vm4, %v5982_v33  ;;  %v5987_v56 = vmax.f32 %v5955_v44, 0.0  ;;  %v5953_v37 = vadd.f32 %v16006_v53, %v5917_v13  ;;  %v5920_v21 = vadd.f32 %v10520_v4, %v5590_v60  ;;  %v10479_v2 = vpop.f32.mrf.mxu1  ;;  %vm17951_vm4 = vmmov %vm17840_vm0 }
 0x589   : >> { %v5603_v12 = vadd.f32 %v10479_v2, %v15944_v49  ;;  %v5805_v48 = vpop.f32.mrf.mxu0  ;;  %v6051_v33 = vld [vmem:[#allocation2 + $0x30] sm:$0xff]  ;;  %10553 = vmatprep.subr.bf16.mxu1 %v9550_v11 }
 0x58a   : >> { %6019 = vst.msk [vmem:[#allocation2 + $0x61] sm:$0xff] %vm17937_vm5, %v5987_v56  ;;  %v5985_v0 = vmax.f32 %v5953_v37, 0.0  ;;  %v5956_v42 = vadd.f32 %v16006_v53, %v5920_v21  ;;  %v5918_v39 = vadd.f32 %v5805_v48, %v5582_v30  ;;  %v5594_v8 = vpop.f32.mrf.mxu1  ;;  %10554 = vmatpush3.bf16.msra.mxu1 %v9550_v11  ;;  %v17942_v48 = vld [vmem:[#allocation63_spill] sm:$0xff]  ;;  %vm17952_vm5 = vmmov %vm17840_vm0 }
 0x58b   : >> { %v5595_v32 = vadd.f32 %v5594_v8, %v15946_v19  ;;  %v10523_v52 = vpop.f32.mrf.mxu0  ;;  %v6048_v55 = vld [vmem:[#allocation2 + $0x18] sm:$0xff] }
 0x58c   : >> { %6017 = vst.msk [vmem:[#allocation2 + $0x49] sm:$0xff] %vm17940_vm6, %v5985_v0  ;;  %v5988_v20 = vmax.f32 %v5956_v42, 0.0  ;;  %v5954_v45 = vadd.f32 %v16006_v53, %v5918_v39  ;;  %v5923_v49 = vadd.f32 %v10523_v52, %v5603_v12  ;;  %v10480_v26 = vpop.f32.mrf.mxu1  ;;  %v17943_v0 = vld [vmem:[#allocation62_spill] sm:$0xff]  ;;  %vm17953_vm6 = vmmov %vm17840_vm0 }
 0x58d   : >> { %v5606_v60 = vadd.f32 %v10480_v26, %v15948_v15  ;;  %v5818_v47 = vpop.f32.mrf.mxu0  ;;  %v6052_v44 = vld [vmem:[#allocation2 + $0x38] sm:$0xff]  ;;  %v6053_v13 = vld [vmem:[#allocation2 + $0x40] sm:$0x3]  ;;  %v9549_v42 = vcombine.low %v17943_v0, %v17942_v48 }
 0x58e   : >> { %6020 = vst.msk [vmem:[#allocation2 + $0x69] sm:$0xff] %vm17941_vm9, %v5988_v20  ;;  %v5986_v19 = vmax.f32 %v5954_v45, 0.0  ;;  %v5959_v31 = vadd.f32 %v16006_v53, %v5923_v49  ;;  %v5921_v30 = vadd.f32 %v5818_v47, %v5595_v32  ;;  %v5597_v4 = vpop.f32.mrf.mxu1  ;;  %v16032_v56 = vpack.c.bf16 %v6052_v44, %v6051_v33  ;;  %vm17954_vm9 = vmmov %vm17840_vm0 }
 0x58f   : >> { %v5598_v37 = vadd.f32 %v5597_v4, %v15950_v17  ;;  %v10524_v21 = vpop.f32.mrf.mxu0  ;;  %v16035_v2 = vpack.c.bf16 %v6053_v13, %v6053_v13  ;;  %v6049_v15 = vld [vmem:[#allocation2 + $0x20] sm:$0xff]  ;;  %v6050_v12 = vld [vmem:[#allocation2 + $0x28] sm:$0x3]  ;;  %10555 = vmatprep.subr.bf16.mxu1 %v9549_v42 }
 0x590   : >> { %6018 = vst.msk [vmem:[#allocation2 + $0x51] sm:$0xff] %vm17944_vm10, %v5986_v19  ;;  %v5991_v39 = vmax.f32 %v5959_v31, 0.0  ;;  %v5957_v8 = vadd.f32 %v16006_v53, %v5921_v30  ;;  %v5924_v32 = vadd.f32 %v10524_v21, %v5606_v60  ;;  %v10483_v52 = vpop.f32.mrf.mxu1  ;;  %v6160_v36 = vshrl.u32 %v16032_v56, 16  ;;  %10556 = vmatpush3.bf16.msra.mxu1 %v9549_v42  ;;  %vm17955_vm10 = vmmov %vm17840_vm0 }
 0x591   : >> { %v5619_v17 = vadd.f32 %v10483_v52, %v15952_v54  ;;  %v5821_v11 = vpop.f32.mrf.mxu0  ;;  %v6162_v20 = vshll.u32 %v16032_v56, 16  ;;  %v6167_v45 = vshll.u32 %v16035_v2, 16  ;;  %v16045_v49 = vpack.c.bf16 %v6049_v15, %v6048_v55 }
 0x592   : >> { %6023 = vst.msk [vmem:[#allocation2 + $0x91] sm:$0xff] %vm17945_vm11, %v5991_v39  ;;  %v5989_v26 = vmax.f32 %v5957_v8, 0.0  ;;  %v5960_v47 = vadd.f32 %v16006_v53, %v5924_v32  ;;  %v5922_v60 = vadd.f32 %v5821_v11, %v5598_v37  ;;  %v5610_v33 = vpop.f32.mrf.mxu1  ;;  %v6102_v44 = vpack.c.bf16 %v6050_v12, %v6050_v12  ;;  %vm17956_vm11 = vmmov %vm17840_vm0 }
 0x593   : >> { %v5611_v13 = vadd.f32 %v5610_v33, %v15954_v23  ;;  %v10527_v54 = vpop.f32.mrf.mxu0  ;;  %v6164_v19 = vrot.slane %v6162_v20, 1  ;;  %v6169_v31 = vrot.slane %v6167_v45, 1  ;;  %v6148_v30 = vshrl.u32 %v16045_v49, 16 }
 0x594   : >> { %6021 = vst.msk [vmem:[#allocation2 + $0x79] sm:$0xff] %vm17946_vm12, %v5989_v26  ;;  %v5992_v4 = vmax.f32 %v5960_v47, 0.0  ;;  %v5958_v21 = vadd.f32 %v16006_v53, %v5922_v60  ;;  %v5927_v15 = vadd.f32 %v10527_v54, %v5619_v17  ;;  %v10484_v48 = vpop.f32.mrf.mxu1  ;;  %v6150_v0 = vshll.u32 %v16045_v49, 16  ;;  %vm17957_vm12 = vmmov %vm17840_vm0 }
 0x595   : >> { %v5622_v37 = vadd.f32 %v10484_v48, %v15956_v43  ;;  %v5834_v12 = vpop.f32.mrf.mxu0  ;;  %v6165_v42 = vor.u32 %v6164_v19, %v6160_v36  ;;  %v6155_v39 = vshll.u32 %v6102_v44, 16  ;;  %v6397_v23 = vrot.slane %v16032_v56, 1  ;;  %v6058_v54 = vld [vmem:[#allocation2 + $0x68] sm:$0xff]  ;;  %v6059_v19 = vld [vmem:[#allocation2 + $0x70] sm:$0x3] }
 0x596   : >> { %6024 = vst.msk [vmem:[#allocation2 + $0x99] sm:$0xff] %vm17947_vm13, %v5992_v4  ;;  %v5990_v8 = vmax.f32 %v5958_v21, 0.0  ;;  %v5963_v32 = vadd.f32 %v16006_v53, %v5927_v15  ;;  %v5925_v52 = vadd.f32 %v5834_v12, %v5611_v13  ;;  %v5613_v55 = vpop.f32.mrf.mxu1  ;;  %v6152_v11 = vrot.slane %v6150_v0, 1  ;;  %vm17958_vm13 = vmmov %vm17840_vm0 }
 0x597   : >> { %v5614_v17 = vadd.f32 %v5613_v55, %v15958_v1  ;;  %v10528_v20 = vpop.f32.mrf.mxu0  ;;  %v6170_v45 = vsel %vm687_vm2, %v6165_v42, %v6169_v31  ;;  %v6157_v26 = vrot.slane %v6155_v39, 1  ;;  %v6398_v43 = vrot.slane %v16035_v2, 1  ;;  %v6055_v15 = vld [vmem:[#allocation2 + $0x50] sm:$0xff]  ;;  %v6057_v42 = vld [vmem:[#allocation2 + $0x60] sm:$0xff] }
 0x598   : >> { %6022 = vst.msk [vmem:[#allocation2 + $0x81] sm:$0xff] %vm17948_vm14, %v5990_v8  ;;  %v5995_v36 = vmax.f32 %v5963_v32, 0.0  ;;  %v5961_v47 = vadd.f32 %v16006_v53, %v5925_v52  ;;  %v5928_v60 = vadd.f32 %v10528_v20, %v5622_v37  ;;  %6331 = vrot.lane.b32.xlu1 %v6170_v45, %s11725_s16  ;;  %v10487_v33 = vpop.f32.mrf.mxu1  ;;  %v6153_v13 = vor.u32 %v6152_v11, %v6148_v30  ;;  %v6054_v32 = vld [vmem:[#allocation2 + $0x48] sm:$0xff]  ;;  %v6056_v52 = vld [vmem:[#allocation2 + $0x58] sm:$0x3]  ;;  %vm17959_vm14 = vmmov %vm17840_vm0 }
 0x599   : >> { %v5635_v1 = vadd.f32 %v10487_v33, %v15960_v10  ;;  %v5837_v4 = vpop.f32.mrf.mxu0  ;;  %v6399_v31 = vsel %vm912_vm3, %v6397_v23, %v6398_v43  ;;  %v6394_v21 = vrot.slane %v16045_v49, 1  ;;  %v6395_v2 = vrot.slane %v6102_v44, 1 }
 0x59a   : >> { %6027 = vst.msk [vmem:[#allocation2 + $0xc1] sm:$0xff] %vm17949_vm15, %v5995_v36  ;;  %v5993_v48 = vmax.f32 %v5961_v47, 0.0  ;;  %v5964_v0 = vadd.f32 %v16006_v53, %v5928_v60  ;;  %v5926_v37 = vadd.f32 %v5837_v4, %v5614_v17  ;;  %v6158_v12 = vsel %vm687_vm2, %v6153_v13, %v6157_v26  ;;  %v5626_v30 = vpop.f32.mrf.mxu1  ;;  %vm17960_vm15 = vmmov %vm17840_vm0 }
 0x59b   : >> { %6329 = vrot.lane.b32.xlu0 %v6158_v12, %s11725_s16  ;;  %v5627_v10 = vadd.f32 %v5626_v30, %v15962_v38  ;;  %v10531_v39 = vpop.f32.mrf.mxu0  ;;  %v6396_v23 = vsel %vm912_vm3, %v6394_v21, %v6395_v2  ;;  %v16073_v8 = vpack.c.bf16 %v6058_v54, %v6057_v42  ;;  %v6108_v44 = vpack.c.bf16 %v6059_v19, %v6059_v19 }
 0x59c   : >> { %6025 = vst.msk [vmem:[#allocation2 + $0xa9] sm:$0xff] %vm17950_vm1, %v5993_v48  ;;  %v5996_v55 = vmax.f32 %v5964_v0, 0.0  ;;  %v5962_v11 = vadd.f32 %v16006_v53, %v5926_v37  ;;  %v5931_v17 = vadd.f32 %v10531_v39, %v5635_v1  ;;  %6443 = vrot.lane.b32.xlu1 %v6399_v31, %s11724_s15  ;;  %v10488_v20 = vpop.f32.mrf.mxu1  ;;  %v16078_v45 = vpack.c.bf16 %v6055_v15, %v6054_v32  ;;  %vm17961_vm1 = vmmov %vm17840_vm0 }
 0x59d   : >> { %v5638_v38 = vadd.f32 %v10488_v20, %v15964_v22  ;;  %v5850_v26 = vpop.f32.mrf.mxu0  ;;  %v6184_v43 = vshrl.u32 %v16073_v8, 16  ;;  %v6186_v36 = vshll.u32 %v16073_v8, 16  ;;  %v6191_v47 = vshll.u32 %v6108_v44, 16 }
 0x59e   : >> { %6028 = vst.msk [vmem:[#allocation2 + $0xc9] sm:$0xff] %vm17840_vm0, %v5996_v55  ;;  %v5994_v60 = vmax.f32 %v5962_v11, 0.0  ;;  %v5967_v33 = vadd.f32 %v16006_v53, %v5931_v17  ;;  %v5929_v13 = vadd.f32 %v5850_v26, %v5627_v10  ;;  %v5629_v54 = vpop.f32.mrf.mxu1  ;;  %v6106_v19 = vpack.c.bf16 %v6056_v52, %v6056_v52 }
 0x59f   : >> { %6441 = vrot.lane.b32.xlu0 %v6396_v23, %s11724_s15  ;;  %v5630_v1 = vadd.f32 %v5629_v54, %v15966_v58  ;;  %v10532_v4 = vpop.f32.mrf.mxu0  ;;  %v6188_v22 = vrot.slane %v6186_v36, 1  ;;  %v6193_v31 = vrot.slane %v6191_v47, 1  ;;  %v6172_v21 = vshrl.u32 %v16078_v45, 16 }
 0x5a0   : >> { %6026 = vst.msk [vmem:[#allocation2 + $0xb1] sm:$0xff] %vm17951_vm4, %v5994_v60  ;;  %v5999_v2 = vmax.f32 %v5967_v33, 0.0  ;;  %v5965_v15 = vadd.f32 %v16006_v53, %v5929_v13  ;;  %v5932_v48 = vadd.f32 %v10532_v4, %v5638_v38  ;;  %v10491_v0 = vpop.f32.mrf.mxu1  ;;  %v6174_v37 = vshll.u32 %v16078_v45, 16  ;;  %v6064_v33 = vld [vmem:[#allocation2 + $0x98] sm:$0xff]  ;;  %v6065_v13 = vld [vmem:[#allocation2 + $0xa0] sm:$0x3]  ;;  %vm17962_vm4 = vmmov %vm17840_vm0 }
 0x5a1   : >> { %v6189_v12 = vor.u32 %v6188_v22, %v6184_v43  ;;  %v5651_v30 = vadd.f32 %v10491_v0, %v15968_v3  ;;  %v5853_v42 = vpop.f32.mrf.mxu0  ;;  %v6179_v10 = vshll.u32 %v6106_v19, 16  ;;  %v6403_v58 = vrot.slane %v16073_v8, 1  ;;  %v6061_v22 = vld [vmem:[#allocation2 + $0x80] sm:$0xff]  ;;  %v6063_v0 = vld [vmem:[#allocation2 + $0x90] sm:$0xff] }
 0x5a2   : >> { %6031 = vst.msk [vmem:[#allocation2 + $0xf1] sm:$0xff] %vm17952_vm5, %v5999_v2  ;;  %v5997_v39 = vmax.f32 %v5965_v15, 0.0  ;;  %v5968_v23 = vadd.f32 %v16006_v53, %v5932_v48  ;;  %v5930_v32 = vadd.f32 %v5853_v42, %v5630_v1  ;;  %v6176_v52 = vrot.slane %v6174_v37, 1  ;;  %v5642_v55 = vpop.f32.mrf.mxu1  ;;  %v6060_v42 = vld [vmem:[#allocation2 + $0x78] sm:$0xff]  ;;  %vm17963_vm5 = vmmov %vm17840_vm0 }
 0x5a3   : >> { %v6194_v11 = vsel %vm687_vm2, %v6189_v12, %v6193_v31  ;;  %v6181_v17 = vrot.slane %v6179_v10, 1  ;;  %v5643_v20 = vadd.f32 %v5642_v55, %v15970_v24  ;;  %v10535_v38 = vpop.f32.mrf.mxu0  ;;  %v6404_v26 = vrot.slane %v6108_v44, 1  ;;  %v6062_v10 = vld [vmem:[#allocation2 + $0x88] sm:$0x3] }
 0x5a4   : >> { %6029 = vst.msk [vmem:[#allocation2 + $0xd9] sm:$0xff] %vm17953_vm6, %v5997_v39  ;;  %v6000_v3 = vmax.f32 %v5968_v23, 0.0  ;;  %6335 = vrot.lane.b32.xlu1 %v6194_v11, %s11725_s16  ;;  %v5966_v43 = vadd.f32 %v16006_v53, %v5930_v32  ;;  %v6177_v36 = vor.u32 %v6176_v52, %v6172_v21  ;;  %v5935_v47 = vadd.f32 %v10535_v38, %v5651_v30  ;;  %v10492_v60 = vpop.f32.mrf.mxu1  ;;  %vm17964_vm6 = vmmov %vm17840_vm0 }
 0x5a5   : >> { %v6405_v54 = vsel %vm912_vm3, %v6403_v58, %v6404_v26  ;;  %v5654_v1 = vadd.f32 %v10492_v60, %v15976_v14  ;;  %v5866_v4 = vpop.f32.mrf.mxu0  ;;  %v6400_v24 = vrot.slane %v16078_v45, 1  ;;  %v6401_v44 = vrot.slane %v6106_v19, 1 }
 0x5a6   : >> { %6032 = vst.msk [vmem:[#allocation2 + $0xf9] sm:$0xff] %vm17954_vm9, %v6000_v3  ;;  %v5998_v31 = vmax.f32 %v5966_v43, 0.0  ;;  %v6182_v2 = vsel %vm687_vm2, %v6177_v36, %v6181_v17  ;;  %v5971_v21 = vadd.f32 %v16006_v53, %v5935_v47  ;;  %v5933_v15 = vadd.f32 %v5866_v4, %v5643_v20  ;;  %v5645_v48 = vpop.f32.mrf.mxu1  ;;  %vm17965_vm9 = vmmov %vm17840_vm0 }
 0x5a7   : >> { %6333 = vrot.lane.b32.xlu0 %v6182_v2, %s11725_s16  ;;  %v6402_v37 = vsel %vm912_vm3, %v6400_v24, %v6401_v44  ;;  %v5646_v14 = vadd.f32 %v5645_v48, %v15978_v46  ;;  %v10536_v12 = vpop.f32.mrf.mxu0  ;;  %v16109_v30 = vpack.c.bf16 %v6064_v33, %v6063_v0  ;;  %v16111_v19 = vpack.c.bf16 %v6065_v13, %v6065_v13 }
 0x5a8   : >> { %6030 = vst.msk [vmem:[#allocation2 + $0xe1] sm:$0xff] %vm17955_vm10, %v5998_v31  ;;  %v6003_v58 = vmax.f32 %v5971_v21, 0.0  ;;  %6447 = vrot.lane.b32.xlu1 %v6405_v54, %s11724_s15  ;;  %v5969_v39 = vadd.f32 %v16006_v53, %v5933_v15  ;;  %v5936_v23 = vadd.f32 %v10536_v12, %v5654_v1  ;;  %v10495_v32 = vpop.f32.mrf.mxu1  ;;  %v16116_v52 = vpack.c.bf16 %v6061_v22, %v6060_v42  ;;  %vm17966_vm10 = vmmov %vm17840_vm0 }
 0x5a9   : >> { %v6208_v46 = vshrl.u32 %v16109_v30, 16  ;;  %v6210_v55 = vshll.u32 %v16109_v30, 16  ;;  %v6215_v11 = vshll.u32 %v16111_v19, 16  ;;  %v5667_v17 = vadd.f32 %v10495_v32, %v15982_v35  ;;  %v5869_v20 = vpop.f32.mrf.mxu0  ;;  %v6071_v32 = vld [vmem:[#allocation2 + $0xd0] sm:$0x3] }
 0x5aa   : >> { %6035 = vst.msk [vmem:[#allocation2 + $0x121] sm:$0xff] %vm17956_vm11, %v6003_v58  ;;  %v6001_v38 = vmax.f32 %v5969_v39, 0.0  ;;  %v5972_v26 = vadd.f32 %v16006_v53, %v5936_v23  ;;  %v5934_v3 = vadd.f32 %v5869_v20, %v5646_v14  ;;  %v6110_v43 = vpack.c.bf16 %v6062_v10, %v6062_v10  ;;  %v5658_v36 = vpop.f32.mrf.mxu1  ;;  %v6070_v23 = vld [vmem:[#allocation2 + $0xc8] sm:$0xff]  ;;  %vm17981_vm11 = vmmov %vm17840_vm0 }
 0x5ab   : >> { %6445 = vrot.lane.b32.xlu0 %v6402_v37, %s11724_s15  ;;  %v6212_v47 = vrot.slane %v6210_v55, 1  ;;  %v6217_v60 = vrot.slane %v6215_v11, 1  ;;  %v6196_v33 = vshrl.u32 %v16116_v52, 16  ;;  %v6198_v13 = vshll.u32 %v16116_v52, 16  ;;  %v10539_v54 = vpop.f32.mrf.mxu0  ;;  %v6067_v11 = vld [vmem:[#allocation2 + $0xb0] sm:$0xff] }
 0x5ac   : >> { %6033 = vst.msk [vmem:[#allocation2 + $0x109] sm:$0xff] %vm17957_vm12, %v6001_v38  ;;  %v6004_v35 = vmax.f32 %v5972_v26, 0.0  ;;  %v5970_v1 = vadd.f32 %v16006_v53, %v5934_v3  ;;  %v6203_v4 = vshll.u32 %v6110_v43, 16  ;;  %v5659_v24 = vadd.f32 %v5658_v36, %v15984_v61  ;;  %v10496_v44 = vpop.f32.mrf.mxu1  ;;  %v6069_v3 = vld [vmem:[#allocation2 + $0xc0] sm:$0xff]  ;;  %vm17982_vm12 = vmmov %vm17840_vm0 }
 0x5ad   : >> { %v6213_v22 = vor.u32 %v6212_v47, %v6208_v46  ;;  %v6200_v31 = vrot.slane %v6198_v13, 1  ;;  %v5939_v2 = vadd.f32 %v10539_v54, %v5667_v17  ;;  %v6409_v21 = vrot.slane %v16109_v30, 1  ;;  %v5882_v15 = vpop.f32.mrf.mxu0  ;;  %v6068_v47 = vld [vmem:[#allocation2 + $0xb8] sm:$0x3]  ;;  %v6066_v13 = vld [vmem:[#allocation2 + $0xa8] sm:$0xff] }
 0x5ae   : >> { %6036 = vst.msk [vmem:[#allocation2 + $0x129] sm:$0xff] %vm17958_vm13, %v6004_v35  ;;  %v6002_v48 = vmax.f32 %v5970_v1, 0.0  ;;  %v6205_v0 = vrot.slane %v6203_v4, 1  ;;  %v6410_v37 = vrot.slane %v16111_v19, 1  ;;  %v5670_v14 = vadd.f32 %v10496_v44, %v15988_v51  ;;  %v5661_v12 = vpop.f32.mrf.mxu1  ;;  %vm17989_vm13 = vmmov %vm17840_vm0 }
 0x5af   : >> { %v6218_v42 = vsel %vm687_vm2, %v6213_v22, %v6217_v60  ;;  %v6201_v10 = vor.u32 %v6200_v31, %v6196_v33  ;;  %v5975_v61 = vadd.f32 %v16006_v53, %v5939_v2  ;;  %v5937_v58 = vadd.f32 %v5882_v15, %v5659_v24  ;;  %v10540_v39 = vpop.f32.mrf.mxu0 }
 0x5b0   : >> { %6339 = vrot.lane.b32.xlu1 %v6218_v42, %s11725_s16  ;;  %6034 = vst.msk [vmem:[#allocation2 + $0x111] sm:$0xff] %vm17959_vm14, %v6002_v48  ;;  %v6406_v46 = vrot.slane %v16116_v52, 1  ;;  %v6407_v55 = vrot.slane %v6110_v43, 1  ;;  %v5662_v19 = vadd.f32 %v5661_v12, %v15990_v29  ;;  %v10499_v51 = vpop.f32.mrf.mxu1  ;;  %v5940_v26 = vadd.f32 %v10540_v39, %v5670_v14  ;;  %vm17990_vm14 = vmmov %vm17840_vm0 }
 0x5b1   : >> { %v6206_v17 = vsel %vm687_vm2, %v6201_v10, %v6205_v0  ;;  %v6007_v20 = vmax.f32 %v5975_v61, 0.0  ;;  %v5973_v38 = vadd.f32 %v16006_v53, %v5937_v58  ;;  %v5885_v36 = vpop.f32.mrf.mxu0  ;;  %v6411_v60 = vsel %vm912_vm3, %v6409_v21, %v6410_v37 }
 0x5b2   : >> { %6337 = vrot.lane.b32.xlu0 %v6206_v17, %s11725_s16  ;;  %v6408_v33 = vsel %vm912_vm3, %v6406_v46, %v6407_v55  ;;  %v16145_v43 = vpack.c.bf16 %v6070_v23, %v6069_v3  ;;  %v6116_v29 = vpack.c.bf16 %v6071_v32, %v6071_v32  ;;  %v5674_v54 = vpop.f32.mrf.mxu1  ;;  %v5976_v1 = vadd.f32 %v16006_v53, %v5940_v26  ;;  %v6076_v17 = vld [vmem:[#allocation2 + $0xf8] sm:$0xff] }
 0x5b3   : >> { %6039 = vst.msk [vmem:[#allocation2 + $0x151] sm:$0xff] %vm17960_vm15, %v6007_v20  ;;  %v6005_v35 = vmax.f32 %v5973_v38, 0.0  ;;  %v5938_v4 = vadd.f32 %v5885_v36, %v5662_v19  ;;  %v16149_v24 = vpack.c.bf16 %v6067_v11, %v6066_v13  ;;  %v10543_v44 = vpop.f32.mrf.mxu0  ;;  %v5683_v2 = vadd.f32 %v10499_v51, %v15994_v63  ;;  %v6077_v20 = vld [vmem:[#allocation2 + $0x100] sm:$0x3]  ;;  %vm17995_vm15 = vmmov %vm17840_vm0 }
 0x5b4   : >> { %6451 = vrot.lane.b32.xlu1 %v6411_v60, %s11724_s15  ;;  %v6234_v22 = vshll.u32 %v16145_v43, 16  ;;  %v6239_v31 = vshll.u32 %v6116_v29, 16  ;;  %v6114_v21 = vpack.c.bf16 %v6068_v47, %v6068_v47  ;;  %v10500_v15 = vpop.f32.mrf.mxu1  ;;  %v6008_v48 = vmax.f32 %v5976_v1, 0.0  ;;  %v6073_v47 = vld [vmem:[#allocation2 + $0xe0] sm:$0xff] }
 0x5b5   : >> { %6037 = vst.msk [vmem:[#allocation2 + $0x139] sm:$0xff] %vm17961_vm1, %v6005_v35  ;;  %v6232_v0 = vshrl.u32 %v16145_v43, 16  ;;  %v5974_v37 = vadd.f32 %v16006_v53, %v5938_v4  ;;  %v6222_v14 = vshll.u32 %v16149_v24, 16  ;;  %v5898_v12 = vpop.f32.mrf.mxu0  ;;  %v6220_v10 = vshrl.u32 %v16149_v24, 16  ;;  %vm17996_vm1 = vmmov %vm17840_vm0 }
 0x5b6   : >> { %6449 = vrot.lane.b32.xlu0 %v6408_v33, %s11724_s15  ;;  %v6236_v42 = vrot.slane %v6234_v22, 1  ;;  %v6227_v61 = vshll.u32 %v6114_v21, 16  ;;  %v5675_v63 = vadd.f32 %v5674_v54, %v15996_v5  ;;  %6040 = vst.msk [vmem:[#allocation2 + $0x159] sm:$0xff] %vm17840_vm0, %v6008_v48  ;;  %v6415_v23 = vrot.slane %v16145_v43, 1  ;;  %v5677_v11 = vpop.f32.mrf.mxu1  ;;  %v6074_v54 = vld [vmem:[#allocation2 + $0xe8] sm:$0x3] }
 0x5b7   : >> { %v6006_v58 = vmax.f32 %v5974_v37, 0.0  ;;  %v6224_v39 = vrot.slane %v6222_v14, 1  ;;  %v6416_v32 = vrot.slane %v6116_v29, 1  ;;  %v6241_v55 = vrot.slane %v6239_v31, 1  ;;  %v10544_v38 = vpop.f32.mrf.mxu0  ;;  %v6072_v22 = vld [vmem:[#allocation2 + $0xd8] sm:$0xff] }
 0x5b8   : >> { %v6237_v46 = vor.u32 %v6236_v42, %v6232_v0  ;;  %v5943_v19 = vadd.f32 %v10543_v44, %v5683_v2  ;;  %v5686_v51 = vadd.f32 %v10500_v15, %v15999_v34  ;;  %v6229_v5 = vrot.slane %v6227_v61, 1  ;;  %v6075_v34 = vld [vmem:[#allocation2 + $0xf0] sm:$0xff] }
 0x5b9   : >> { %6038 = vst.msk [vmem:[#allocation2 + $0x141] sm:$0xff] %vm17962_vm4, %v6006_v58  ;;  %v6225_v26 = vor.u32 %v6224_v39, %v6220_v10  ;;  %v6412_v3 = vrot.slane %v16149_v24, 1  ;;  %v6413_v36 = vrot.slane %v6114_v21, 1  ;;  %v6417_v33 = vsel %vm912_vm3, %v6415_v23, %v6416_v32  ;;  %v5901_v48 = vpop.f32.mrf.mxu0  ;;  %v6082_v32 = vld [vmem:[#allocation2 + $0x128] sm:$0xff]  ;;  %vm17997_vm4 = vmmov %vm17840_vm0 }
 0x5ba   : >> { %v6242_v60 = vsel %vm687_vm2, %v6237_v46, %v6241_v55  ;;  %v5979_v29 = vadd.f32 %v16006_v53, %v5943_v19  ;;  %v5941_v13 = vadd.f32 %v5898_v12, %v5675_v63  ;;  %v5678_v1 = vadd.f32 %v5677_v11, %v16001_v62  ;;  %v6083_v46 = vld [vmem:[#allocation2 + $0x130] sm:$0x3] }
 0x5bb   : >> { %6343 = vrot.lane.b32.xlu1 %v6242_v60, %s11725_s16  ;;  %v6230_v35 = vsel %vm687_vm2, %v6225_v26, %v6229_v5  ;;  %v16172_v4 = vpack.c.bf16 %v6076_v17, %v6075_v34  ;;  %v6120_v44 = vpack.c.bf16 %v6077_v20, %v6077_v20  ;;  %v5944_v21 = vadd.f32 %v10544_v38, %v5686_v51  ;;  %v6079_v17 = vld [vmem:[#allocation2 + $0x110] sm:$0xff] }
 0x5bc   : >> { %6341 = vrot.lane.b32.xlu0 %v6230_v35, %s11725_s16  ;;  %v6011_v31 = vmax.f32 %v5979_v29, 0.0  ;;  %v5977_v2 = vadd.f32 %v16006_v53, %v5941_v13  ;;  %v16176_v15 = vpack.c.bf16 %v6073_v47, %v6072_v22  ;;  %v6414_v0 = vsel %vm912_vm3, %v6412_v3, %v6413_v36  ;;  %v6081_v3 = vld [vmem:[#allocation2 + $0x120] sm:$0xff]  ;;  %v6078_v29 = vld [vmem:[#allocation2 + $0x108] sm:$0xff]  ;;  %v6080_v13 = vld [vmem:[#allocation2 + $0x118] sm:$0x3] }
 0x5bd   : >> { %v6258_v37 = vshll.u32 %v16172_v4, 16  ;;  %v6263_v14 = vshll.u32 %v6120_v44, 16  ;;  %v6118_v12 = vpack.c.bf16 %v6074_v54, %v6074_v54  ;;  %v6256_v42 = vshrl.u32 %v16172_v4, 16 }
 0x5be   : >> { %6043 = vst.msk [vmem:[#allocation2 + $0x181] sm:$0xff] %vm17963_vm5, %v6011_v31  ;;  %v6009_v62 = vmax.f32 %v5977_v2, 0.0  ;;  %v5980_v10 = vadd.f32 %v16006_v53, %v5944_v21  ;;  %v6246_v61 = vshll.u32 %v16176_v15, 16  ;;  %v6244_v58 = vshrl.u32 %v16176_v15, 16  ;;  %v6088_v21 = vld [vmem:[#allocation2 + $0x158] sm:$0xff]  ;;  %vm17998_vm5 = vmmov %vm17840_vm0 }
 0x5bf   : >> { %6455 = vrot.lane.b32.xlu1 %v6417_v33, %s11724_s15  ;;  %v6260_v63 = vrot.slane %v6258_v37, 1  ;;  %v6251_v39 = vshll.u32 %v6118_v12, 16  ;;  %v5942_v23 = vadd.f32 %v5901_v48, %v5678_v1  ;;  %v6265_v55 = vrot.slane %v6263_v14, 1  ;;  %v6089_v48 = vld [vmem:[#allocation2 + $0x160] sm:$0x3] }
 0x5c0   : >> { %6453 = vrot.lane.b32.xlu0 %v6414_v0, %s11724_s15  ;;  %6041 = vst.msk [vmem:[#allocation2 + $0x169] sm:$0xff] %vm17964_vm6, %v6009_v62  ;;  %v6012_v19 = vmax.f32 %v5980_v10, 0.0  ;;  %v6248_v51 = vrot.slane %v6246_v61, 1  ;;  %v6421_v11 = vrot.slane %v16172_v4, 1  ;;  %v6422_v5 = vrot.slane %v6120_v44, 1  ;;  %vm17999_vm6 = vmmov %vm17840_vm0 }
 0x5c1   : >> { %v6261_v20 = vor.u32 %v6260_v63, %v6256_v42  ;;  %v6253_v38 = vrot.slane %v6251_v39, 1  ;;  %v5978_v26 = vadd.f32 %v16006_v53, %v5942_v23  ;;  %v6418_v47 = vrot.slane %v16176_v15, 1  ;;  %v6087_v63 = vld [vmem:[#allocation2 + $0x150] sm:$0xff] }
 0x5c2   : >> { %6044 = vst.msk [vmem:[#allocation2 + $0x189] sm:$0xff] %vm17965_vm9, %v6012_v19  ;;  %v6249_v36 = vor.u32 %v6248_v51, %v6244_v58  ;;  %v6419_v60 = vrot.slane %v6118_v12, 1  ;;  %v16192_v33 = vpack.c.bf16 %v6082_v32, %v6081_v3  ;;  %v6124_v35 = vpack.c.bf16 %v6083_v46, %v6083_v46  ;;  %v6085_v12 = vld [vmem:[#allocation2 + $0x140] sm:$0xff]  ;;  %v6084_v46 = vld [vmem:[#allocation2 + $0x138] sm:$0xff]  ;;  %vm18000_vm9 = vmmov %vm17840_vm0 }
 0x5c3   : >> { %v6266_v34 = vsel %vm687_vm2, %v6261_v20, %v6265_v55  ;;  %v6010_v54 = vmax.f32 %v5978_v26, 0.0  ;;  %v16195_v1 = vpack.c.bf16 %v6079_v17, %v6078_v29  ;;  %v6122_v31 = vpack.c.bf16 %v6080_v13, %v6080_v13  ;;  %v6086_v55 = vld [vmem:[#allocation2 + $0x148] sm:$0x3] }
 0x5c4   : >> { %6347 = vrot.lane.b32.xlu1 %v6266_v34, %s11725_s16  ;;  %v6254_v53 = vsel %vm687_vm2, %v6249_v36, %v6253_v38  ;;  %v6282_v44 = vshll.u32 %v16192_v33, 16  ;;  %v6287_v22 = vshll.u32 %v6124_v35, 16  ;;  %v6423_v0 = vsel %vm912_vm3, %v6421_v11, %v6422_v5 }
 0x5c5   : >> { %6345 = vrot.lane.b32.xlu0 %v6254_v53, %s11725_s16  ;;  %6042 = vst.msk [vmem:[#allocation2 + $0x171] sm:$0xff] %vm17966_vm10, %v6010_v54  ;;  %v6270_v2 = vshll.u32 %v16195_v1, 16  ;;  %v6280_v37 = vshrl.u32 %v16192_v33, 16  ;;  %v6420_v62 = vsel %vm912_vm3, %v6418_v47, %v6419_v60  ;;  %v6268_v42 = vshrl.u32 %v16195_v1, 16  ;;  %vm18001_vm10 = vmmov %vm17840_vm0 }
 0x5c6   : >> { %v6284_v14 = vrot.slane %v6282_v44, 1  ;;  %v6275_v61 = vshll.u32 %v6122_v31, 16  ;;  %v6289_v39 = vrot.slane %v6287_v22, 1  ;;  %v16208_v23 = vpack.c.bf16 %v6088_v21, %v6087_v63 }
 0x5c7   : >> { %v6272_v10 = vrot.slane %v6270_v2, 1  ;;  %v16210_v32 = vpack.c.bf16 %v6089_v48, %v6089_v48  ;;  %v16213_v11 = vpack.c.bf16 %v6085_v12, %v6084_v46  ;;  %v6427_v20 = vrot.slane %v16192_v33, 1  ;;  %v6090_v54 = vld [vmem:[#allocation2 + $0x168] sm:$0xff] }
 0x5c8   : >> { %6459 = vrot.lane.b32.xlu1 %v6423_v0, %s11724_s15  ;;  %v6285_v58 = vor.u32 %v6284_v14, %v6280_v37  ;;  %v6277_v51 = vrot.slane %v6275_v61, 1  ;;  %v6428_v38 = vrot.slane %v6124_v35, 1  ;;  %v6306_v26 = vshll.u32 %v16208_v23, 16  ;;  %v6045_v37 = vld [vmem:[#allocation2] sm:$0xff]  ;;  %v6046_v14 = vld [vmem:[#allocation2 + $0x8] sm:$0xff] }
 0x5c9   : >> { %6457 = vrot.lane.b32.xlu0 %v6420_v62, %s11724_s15  ;;  %v6273_v19 = vor.u32 %v6272_v10, %v6268_v42  ;;  %v6311_v3 = vshll.u32 %v16210_v32, 16  ;;  %v16220_v36 = vpack.c.bf16 %v6086_v55, %v6086_v55  ;;  %v6294_v47 = vshll.u32 %v16213_v11, 16  ;;  %v6094_v21 = vld [vmem:[#allocation2 + $0x188] sm:$0xff]  ;;  %v6093_v42 = vld [vmem:[#allocation2 + $0x180] sm:$0xff] }
 0x5ca   : >> { %v6290_v17 = vsel %vm687_vm2, %v6285_v58, %v6289_v39  ;;  %v6424_v60 = vrot.slane %v16195_v1, 1  ;;  %v6425_v29 = vrot.slane %v6122_v31, 1  ;;  %v6304_v13 = vshrl.u32 %v16208_v23, 16 }
 0x5cb   : >> { %v6278_v5 = vsel %vm687_vm2, %v6273_v19, %v6277_v51  ;;  %v6308_v34 = vrot.slane %v6306_v26, 1  ;;  %v6292_v53 = vshrl.u32 %v16213_v11, 16  ;;  %v6296_v44 = vrot.slane %v6294_v47, 1 }
 0x5cc   : >> { %6351 = vrot.lane.b32.xlu1 %v6290_v17, %s11725_s16  ;;  %v6091_v35 = vld [vmem:[#allocation2 + $0x170] sm:$0xff]  ;;  %v6299_v22 = vshll.u32 %v16220_v36, 16  ;;  %v6092_v2 = vld [vmem:[#allocation2 + $0x178] sm:$0x3]  ;;  %v6429_v31 = vsel %vm912_vm3, %v6427_v20, %v6428_v38  ;;  %v6313_v12 = vrot.slane %v6311_v3, 1  ;;  %v6426_v10 = vsel %vm912_vm3, %v6424_v60, %v6425_v29  ;;  %v6097_v38 = vld [vmem:[#allocation2 + $0x1a0] sm:$0xff] }
 0x5cd   : >> { %6349 = vrot.lane.b32.xlu0 %v6278_v5, %s11725_s16  ;;  %v6309_v48 = vor.u32 %v6308_v34, %v6304_v13  ;;  %v16229_v0 = vpack.c.bf16 %v6091_v35, %v6090_v54  ;;  %v6297_v62 = vor.u32 %v6296_v44, %v6292_v53  ;;  %v6130_v63 = vpack.c.bf16 %v6092_v2, %v6092_v2  ;;  %v6047_v17 = vld [vmem:[#allocation2 + $0x10] sm:$0x3]  ;;  %v6096_v20 = vld [vmem:[#allocation2 + $0x198] sm:$0xff] }
 0x5ce   : >> { %v6301_v61 = vrot.slane %v6299_v22, 1  ;;  %v16234_v58 = vpack.c.bf16 %v6094_v21, %v6093_v42  ;;  %v16239_v55 = vpack.c.bf16 %v6046_v14, %v6045_v37  ;;  %v6433_v51 = vrot.slane %v16208_v23, 1  ;;  %v6095_v60 = vld [vmem:[#allocation2 + $0x190] sm:$0x3]  ;;  %v17967_v54 = vld [vmem:[#allocation61_spill] sm:$0xff]  ;;  %v17971_v42 = vld [vmem:[#allocation59_spill] sm:$0xff] }
 0x5cf   : >> { %v6314_v39 = vsel %vm687_vm2, %v6309_v48, %v6313_v12  ;;  %v6318_v46 = vshll.u32 %v16229_v0, 16  ;;  %v6434_v26 = vrot.slane %v16210_v32, 1  ;;  %v6430_v5 = vrot.slane %v16213_v11, 1  ;;  %v17968_v35 = vld [vmem:[#allocation60_spill] sm:$0xff]  ;;  %v17969_v22 = vld [vmem:[#allocation85_spill] sm:$0xff] }
 0x5d0   : >> { %6463 = vrot.lane.b32.xlu1 %v6429_v31, %s11724_s15  ;;  %v6302_v19 = vsel %vm687_vm2, %v6297_v62, %v6301_v61  ;;  %v6431_v3 = vrot.slane %v16220_v36, 1  ;;  %v6316_v29 = vshrl.u32 %v16229_v0, 16  ;;  %v6323_v13 = vshll.u32 %v6130_v63, 16  ;;  %v17970_v2 = vld [vmem:[#allocation84_spill] sm:$0xff]  ;;  %v6098_v62 = vld [vmem:[#allocation2 + $0x1a8] sm:$0x3] }
 0x5d1   : >> { %6461 = vrot.lane.b32.xlu0 %v6426_v10, %s11724_s15  ;;  %v6320_v47 = vrot.slane %v6318_v46, 1  ;;  %v6538_v34 = vshll.u32 %v16234_v58, 16  ;;  %v9576_v53 = vcombine.low %v17968_v35, %v17967_v54  ;;  %v6100_v44 = vpack.c.bf16 %v6047_v17, %v6047_v17  ;;  %v17972_v10 = vld [vmem:[#allocation58_spill] sm:$0xff] }
 0x5d2   : >> { %v6138_v32 = vshll.u32 %v16239_v55, 16  ;;  %v16255_v36 = vcombine.low %v17970_v2, %v17969_v22  ;;  %v6132_v48 = vpack.c.bf16 %v6095_v60, %v6095_v60  ;;  %v16257_v37 = vpack.c.bf16 %v6097_v38, %v6096_v20  ;;  %v17973_v38 = vld [vmem:[#allocation57_spill] sm:$0xff] }
 0x5d3   : >> { %v6321_v21 = vor.u32 %v6320_v47, %v6316_v29  ;;  %10589 = vmatprep.subr.bf16.mxu0 %v9576_v53  ;;  %v6435_v14 = vsel %vm912_vm3, %v6433_v51, %v6434_v26  ;;  %v6436_v31 = vrot.slane %v16229_v0, 1  ;;  %v6437_v12 = vrot.slane %v6130_v63, 1  ;;  %v17974_v26 = vld [vmem:[#allocation56_spill] sm:$0xff] }
 0x5d4   : >> { %6355 = vrot.lane.b32.xlu1 %v6314_v39, %s11725_s16  ;;  %10590 = vmatpush3.bf16.msra.mxu0 %v9576_v53  ;;  %v9575_v61 = vcombine.low %v17972_v10, %v17971_v42  ;;  %v6432_v39 = vsel %vm912_vm3, %v6430_v5, %v6431_v3  ;;  %v6325_v46 = vrot.slane %v6323_v13, 1  ;;  %v6136_v17 = vshrl.u32 %v16239_v55, 16  ;;  %v17975_v53 = vld [vmem:[#allocation55_spill] sm:$0xff] }
 0x5d5   : >> { %6353 = vrot.lane.b32.xlu0 %v6302_v19, %s11725_s16  ;;  %10633 = vmatprep.subr.bf16.mxu1 %v16255_v36  ;;  %v6540_v19 = vrot.slane %v6538_v34, 1  ;;  %v6536_v51 = vshrl.u32 %v16234_v58, 16  ;;  %v6140_v63 = vrot.slane %v6138_v32, 1  ;;  %v6143_v20 = vshll.u32 %v6100_v44, 16  ;;  %v17976_v32 = vld [vmem:[#allocation54_spill] sm:$0xff] }
 0x5d6   : >> { %10591 = vmatprep.subr.bf16.mxu0 %v9575_v61  ;;  %v9574_v47 = vcombine.low %v17974_v26, %v17973_v38  ;;  %v6326_v60 = vsel %vm687_vm2, %v6321_v21, %v6325_v46  ;;  %v6543_v29 = vshll.u32 %v6132_v48, 16  ;;  %v6134_v54 = vpack.c.bf16 %v6098_v62, %v6098_v62  ;;  %v17978_v46 = vld [vmem:[#allocation52_spill] sm:$0xff]  ;;  %v17979_v26 = vld [vmem:[#allocation51_spill] sm:$0xff] }
 0x5d7   : >> { %v6991_v5 = vshll.u32 %v16257_v37, 16  ;;  %v6438_v3 = vsel %vm912_vm3, %v6436_v31, %v6437_v12  ;;  %v6551_v13 = vrot.slane %v16234_v58, 1  ;;  %v6552_v34 = vrot.slane %v6132_v48, 1 }
 0x5d8   : >> { %6467 = vrot.lane.b32.xlu1 %v6435_v14, %s11724_s15  ;;  %10592 = vmatpush3.bf16.msra.mxu0 %v9575_v61  ;;  %v6541_v35 = vor.u32 %v6540_v19, %v6536_v51  ;;  %v9573_v22 = vcombine.low %v17976_v32, %v17975_v53  ;;  %v6141_v2 = vor.u32 %v6140_v63, %v6136_v17  ;;  %v6145_v21 = vrot.slane %v6143_v20, 1 }
 0x5d9   : >> { %6465 = vrot.lane.b32.xlu0 %v6432_v39, %s11724_s15  ;;  %10593 = vmatprep.subr.bf16.mxu0 %v9574_v47  ;;  %v6391_v14 = vrot.slane %v16239_v55, 1  ;;  %v6392_v62 = vrot.slane %v6100_v44, 1  ;;  %v6545_v42 = vrot.slane %v6543_v29, 1  ;;  %v6989_v31 = vshrl.u32 %v16257_v37, 16  ;;  %v17977_v39 = vld [vmem:[#allocation53_spill] sm:$0xff] }
 0x5da   : >> { %v6993_v12 = vrot.slane %v6991_v5, 1  ;;  %v6996_v48 = vshll.u32 %v6134_v54, 16  ;;  %v6553_v10 = vsel %vm912_vm3, %v6551_v13, %v6552_v34  ;;  %v9572_v19 = vcombine.low %v17978_v46, %v17977_v39 }
 0x5db   : >> { %v6546_v61 = vsel %vm687_vm2, %v6541_v35, %v6545_v42  ;;  %v6393_v44 = vsel %vm912_vm3, %v6391_v14, %v6392_v62  ;;  %v7004_v17 = vrot.slane %v16257_v37, 1  ;;  %v7005_v51 = vrot.slane %v6134_v54, 1  ;;  %v17986_v62 = vld [vmem:[#allocation80_spill] sm:$0xff] }
 0x5dc   : >> { %6469 = vrot.lane.b32.xlu1 %v6438_v3, %s11724_s15  ;;  %10594 = vmatpush3.bf16.msra.mxu0 %v9574_v47  ;;  %v6146_v63 = vsel %vm687_vm2, %v6141_v2, %v6145_v21  ;;  %v6994_v20 = vor.u32 %v6993_v12, %v6989_v31  ;;  %v6998_v38 = vrot.slane %v6996_v48, 1  ;;  %v17980_v47 = vld [vmem:[#allocation50_spill] sm:$0xff]  ;;  %v17987_v12 = vld [vmem:[#allocation79_spill] sm:$0xff] }
 0x5dd   : >> { %6357 = vrot.lane.b32.xlu0 %v6326_v60, %s11725_s16  ;;  %10595 = vmatprep.subr.bf16.mxu0 %v9573_v22  ;;  %v9571_v60 = vcombine.low %v17980_v47, %v17979_v26  ;;  %v7006_v29 = vsel %vm912_vm3, %v7004_v17, %v7005_v51  ;;  %v17984_v2 = vld [vmem:[#allocation82_spill] sm:$0xff]  ;;  %v17992_v17 = vld [vmem:[#allocation76_spill] sm:$0xff] }
 0x5de   : >> { %v6999_v5 = vsel %vm687_vm2, %v6994_v20, %v6998_v38  ;;  %v17988_v48 = vld [vmem:[#allocation78_spill] sm:$0xff] }
 0x5df   : >> { %v17994_v20 = vld [vmem:[#allocation74_spill] sm:$0xff] }
 0x5e0   : >> { %6554 = vrot.lane.b32.xlu1 %v6553_v10, %s11724_s15  ;;  %10596 = vmatpush3.bf16.msra.mxu0 %v9573_v22  ;;  %v17983_v22 = vld [vmem:[#allocation83_spill] sm:$0xff]  ;;  %v9595_v10 = vcombine.low %v17988_v48, %v17987_v12 }
 0x5e1   : >> { %6547 = vrot.lane.b32.xlu0 %v6546_v61, %s11725_s16  ;;  %10597 = vmatprep.subr.bf16.mxu0 %v9572_v19  ;;  %v9597_v21 = vcombine.low %v17984_v2, %v17983_v22 }
 0x5e4   : >> { %6439 = vrot.lane.b32.xlu1 %v6393_v44, %s11724_s15  ;;  %10598 = vmatpush3.bf16.msra.mxu0 %v9572_v19  ;;  %v17991_v44 = vld [vmem:[#allocation77_spill] sm:$0xff] }
 0x5e5   : >> { %6327 = vrot.lane.b32.xlu0 %v6146_v63, %s11725_s16  ;;  %10599 = vmatprep.subr.bf16.mxu0 %v9571_v60  ;;  %v9594_v51 = vcombine.low %v17992_v17, %v17991_v44 }
 0x5e8   : >> { %7007 = vrot.lane.b32.xlu1 %v7006_v29, %s11724_s15  ;;  %10600 = vmatpush3.bf16.msra.mxu0 %v9571_v60 }
 0x5e9   : >> { %7000 = vrot.lane.b32.xlu0 %v6999_v5, %s11725_s16 }
 0x60a   : >> { %v6332_v54 = vpop.permute.xlu1 %6331 }
 0x60b   : >> { %v6476_v53 = vsel %vm17982_vm12, %v16032_v56, %v6332_v54  ;;  %v17985_v56 = vld [vmem:[#allocation81_spill] sm:$0xff]  ;;  %vm18003_vm12 = vmmov %vm17840_vm0 }
 0x60c   : >> { %v9596_v42 = vcombine.low %v17986_v62, %v17985_v56 }
 0x60d   : >> { %v6330_v3 = vpop.permute.xlu0 %6329 }
 0x60e   : >> { %v6444_v13 = vpop.permute.xlu1 %6443  ;;  %v6474_v34 = vsel %vm17981_vm11, %v16045_v49, %v6330_v3  ;;  %vm18002_vm11 = vmmov %vm17840_vm0 }
 0x60f   : >> { %v16308_v14 = vsel %vm5202_vm7, %v6476_v53, %v6444_v13 }
 0x611   : >> { %v6442_v35 = vpop.permute.xlu0 %6441 }
 0x612   : >> { %v16303_v32 = vsel %vm5202_vm7, %v6474_v34, %v6442_v35 }
 0x613   : >> { %10557 = vmatprep.mubr.msk.bf16.mxu1 %vm5296_vm8, %v16303_v32 }
 0x614   : >> { %10558 = vmatmul.mubr.msk.bf16.vlgmr.msra.gmra.mxu1 %vm5296_vm8, %v16308_v14 }
 0x615   : >> { %10634 = vmatpush3.bf16.msra.mxu1 %v16255_v36 }
 0x616   : >> { %v6336_v49 = vpop.permute.xlu1 %6335  ;;  %10635 = vmatprep.subr.bf16.mxu1 %v9597_v21 }
 0x617   : >> { %v6480_v36 = vsel %vm17990_vm14, %v16073_v8, %v6336_v49  ;;  %v17993_v8 = vld [vmem:[#allocation75_spill] sm:$0xff]  ;;  %vm18005_vm14 = vmmov %vm17840_vm0 }
 0x618   : >> { %v9593_v38 = vcombine.low %v17994_v20, %v17993_v8 }
 0x619   : >> { %v6334_v31 = vpop.permute.xlu0 %6333  ;;  %10636 = vmatpush3.bf16.msra.mxu1 %v9597_v21 }
 0x61a   : >> { %10637 = vmatprep.subr.bf16.mxu1 %v9596_v42  ;;  %v6448_v61 = vpop.permute.xlu1 %6447  ;;  %v6478_v39 = vsel %vm17989_vm13, %v16078_v45, %v6334_v31  ;;  %vm18004_vm13 = vmmov %vm17840_vm0 }
 0x61b   : >> { %v16329_v63 = vsel %vm5202_vm7, %v6480_v36, %v6448_v61 }
 0x61d   : >> { %v6446_v46 = vpop.permute.xlu0 %6445  ;;  %10638 = vmatpush3.bf16.msra.mxu1 %v9596_v42 }
 0x61e   : >> { %v16324_v19 = vsel %vm5202_vm7, %v6478_v39, %v6446_v46  ;;  %10639 = vmatprep.subr.bf16.mxu1 %v9595_v10 }
 0x61f   : >> { %10561 = vmatprep.mubr.msk.bf16.mxu1 %vm5296_vm8, %v16324_v19 }
 0x620   : >> { %10562 = vmatmul.mubr.msk.bf16.gmra.mxu1 %vm5296_vm8, %v16329_v63 }
 0x621   : >> { %10640 = vmatpush3.bf16.msra.mxu1 %v9595_v10 }
 0x622   : >> { %v6340_v45 = vpop.permute.xlu1 %6339  ;;  %10641 = vmatprep.subr.bf16.mxu1 %v9594_v51 }
 0x623   : >> { %v6484_v5 = vsel %vm17996_vm1, %v16109_v30, %v6340_v45  ;;  %vm18007_vm1 = vmmov %vm17840_vm0 }
 0x624   : >> { %v6338_v26 = vpop.permute.xlu0 %6337 }
 0x625   : >> { %10642 = vmatpush3.bf16.msra.mxu1 %v9594_v51  ;;  %v6482_v60 = vsel %vm17995_vm15, %v16116_v52, %v6338_v26  ;;  %vm18006_vm15 = vmmov %vm17840_vm0 }
 0x626   : >> { %10643 = vmatprep.subr.bf16.mxu1 %v9593_v38  ;;  %v6452_v47 = vpop.permute.xlu1 %6451 }
 0x627   : >> { %v16345_v3 = vsel %vm5202_vm7, %v6484_v5, %v6452_v47 }
 0x628   : >> { %v6450_v29 = vpop.permute.xlu0 %6449 }
 0x629   : >> { %v16342_v54 = vsel %vm5202_vm7, %v6482_v60, %v6450_v29  ;;  %10644 = vmatpush3.bf16.msra.mxu1 %v9593_v38 }
 0x62a   : >> { %10565 = vmatprep.mubr.msk.bf16.mxu1 %vm5296_vm8, %v16342_v54 }
 0x62b   : >> { %10566 = vmatmul.mubr.msk.bf16.gmra.mxu1 %vm5296_vm8, %v16345_v3 }
 0x62d   : >> { %v6344_v13 = vpop.permute.xlu1 %6343 }
 0x62e   : >> { %v6342_v34 = vpop.permute.xlu0 %6341  ;;  %v6488_v53 = vsel %vm17997_vm4, %v16145_v43, %v6344_v13  ;;  %vm18064_vm4 = vmmov %vm18007_vm1 }
 0x62f   : >> { %v6486_v35 = vsel %vm17840_vm0, %v16149_v24, %v6342_v34  ;;  %vm11728_vm0 = vmmov 0  }
 0x631   : >> { %v6456_v52 = vpop.permute.xlu1 %6455 }
 0x632   : >> { %v6454_v30 = vpop.permute.xlu0 %6453  ;;  %v6520_v2 = vsel %vm5202_vm7, %v6488_v53, %v6456_v52 }
 0x633   : >> { %v6518_v22 = vsel %vm5202_vm7, %v6486_v35, %v6454_v30 }
 0x634   : >> { %10569 = vmatprep.mubr.msk.bf16.mxu1 %vm5296_vm8, %v6518_v22 }
 0x635   : >> { %10570 = vmatmul.mubr.msk.bf16.gmra.mxu1 %vm5296_vm8, %v6520_v2 }
 0x636   : >> { %v6348_v21 = vpop.permute.xlu1 %6347 }
 0x637   : >> { %v6346_v49 = vpop.permute.xlu0 %6345  ;;  %v6492_v24 = vsel %vm17999_vm6, %v16172_v4, %v6348_v21  ;;  %vm7424_vm6 = vcmask 15360  }
 0x638   : >> { %v6490_v62 = vsel %vm17998_vm5, %v16176_v15, %v6346_v49  ;;  %vm7428_vm5 = vcmask 1041408  }
 0x63a   : >> { %v6460_v56 = vpop.permute.xlu1 %6459 }
 0x63b   : >> { %v6458_v42 = vpop.permute.xlu0 %6457  ;;  %v6524_v31 = vsel %vm5202_vm7, %v6492_v24, %v6460_v56 }
 0x63c   : >> { %v6522_v43 = vsel %vm5202_vm7, %v6490_v62, %v6458_v42 }
 0x63d   : >> { %10573 = vmatprep.mubr.msk.bf16.mxu1 %vm5296_vm8, %v6522_v43 }
 0x63e   : >> { %v6352_v12 = vpop.permute.xlu1 %6351  ;;  %10574 = vmatmul.mubr.msk.bf16.gmra.mxu1 %vm5296_vm8, %v6524_v31 }
 0x63f   : >> { %v6350_v48 = vpop.permute.xlu0 %6349  ;;  %v6496_v15 = vsel %vm18001_vm10, %v16192_v33, %v6352_v12  ;;  %v17601_v12 = vmov 0.0  }
 0x640   : >> { %v6494_v61 = vsel %vm18000_vm9, %v16195_v1, %v6350_v48  ;;  %10677 = vmatprep.subr.mxu1 %v17601_v12  ;;  %v18010_v48 = vld [vmem:[#allocation90_spill] sm:$0xff]  ;;  %vm18156_vm9 = vcmask (%p16833_p2), 261120  }
 0x641   : > { %vm18157_vm10 = vmmov (%p16833_p2), %vm18156_vm9 }
 0x642   : >> { %v6464_v10 = vpop.permute.xlu1 %6463 }
 0x643   : >> { %v6462_v39 = vpop.permute.xlu0 %6461  ;;  %v6528_v46 = vsel %vm5202_vm7, %v6496_v15, %v6464_v10  ;;  %v18014_v15 = vld [vmem:[#allocation88_spill] sm:$0xff] }
 0x644   : >> { %v6526_v4 = vsel %vm5202_vm7, %v6494_v61, %v6462_v39  ;;  %v18012_v61 = vld [vmem:[#allocation89_spill] sm:$0xff] }
 0x645   : >> { %10577 = vmatprep.mubr.msk.bf16.mxu1 %vm5296_vm8, %v6526_v4 }
 0x646   : >> { %v6356_v36 = vpop.permute.xlu1 %6355  ;;  %10578 = vmatmul.mubr.msk.bf16.gmra.mxu1 %vm5296_vm8, %v6528_v46 }
 0x647   : >> { %v6354_v44 = vpop.permute.xlu0 %6353  ;;  %v6500_v1 = vsel %vm18003_vm12, %v16208_v23, %v6356_v36  ;;  %vm18159_vm12 = vmmov (%p16833_p2), %vm18156_vm9 }
 0x648   : >> { %v6498_v51 = vsel %vm18002_vm11, %v16213_v11, %v6354_v44  ;;  %vm18158_vm11 = vmmov (%p16833_p2), %vm18156_vm9 }
 0x64a   : >> { %v6468_v17 = vpop.permute.xlu1 %6467 }
 0x64b   : >> { %v6466_v45 = vpop.permute.xlu0 %6465  ;;  %v6532_v8 = vsel %vm5202_vm7, %v6500_v1, %v6468_v17 }
 0x64c   : >> { %v6530_v33 = vsel %vm5202_vm7, %v6498_v51, %v6466_v45 }
 0x64d   : >> { %10581 = vmatprep.mubr.msk.bf16.mxu1 %vm5296_vm8, %v6530_v33 }
 0x64e   : >> { %v6470_v20 = vpop.permute.xlu1 %6469  ;;  %10582 = vmatmul.mubr.msk.bf16.gmra.mxu1 %vm5296_vm8, %v6532_v8 }
 0x64f   : >> { %v6358_v38 = vpop.permute.xlu0 %6357 }
 0x650   : >> { %v6502_v26 = vsel %vm18004_vm13, %v16229_v0, %v6358_v38  ;;  %vm18160_vm13 = vmmov (%p16833_p2), %vm18156_vm9 }
 0x651   : >> { %v6534_v47 = vsel %vm5202_vm7, %v6502_v26, %v6470_v20 }
 0x652   : >> { %v6555_v11 = vpop.permute.xlu1 %6554  ;;  %10585 = vmatprep.mubr.msk.bf16.mxu1 %vm5296_vm8, %v6534_v47 }
 0x653   : >> { %v6548_v60 = vpop.permute.xlu0 %6547 }
 0x654   : >> { %v6557_v23 = vsel %vm18005_vm14, %v16234_v58, %v6548_v60  ;;  %vm18161_vm14 = vmmov (%p16833_p2), %vm18156_vm9 }
 0x655   : >> { %v6559_v29 = vsel %vm5202_vm7, %v6557_v23, %v6555_v11 }
 0x656   : >> { %10586 = vmatmul.mubr.msk.bf16.gmra.mxu1 %vm5296_vm8, %v6559_v29  ;;  %v6440_v5 = vpop.permute.xlu1 %6439 }
 0x657   : >> { %10645 = vmatprep.mubr.msk.bf16.mxu1 %vm5296_vm8, %v16308_v14  ;;  %v6328_v13 = vpop.permute.xlu0 %6327 }
 0x658   : >> { %v6472_v0 = vsel %vm18006_vm15, %v16239_v55, %v6328_v13  ;;  %vm18163_vm15 = vmmov (%p16833_p2), %vm18156_vm9 }
 0x659   : >> { %v6504_v34 = vsel %vm5202_vm7, %v6472_v0, %v6440_v5 }
 0x65a   : >> { %10601 = vmatprep.mubr.msk.bf16.mxu0 %vm5296_vm8, %v6504_v34 }
 0x65b   : >> { %10602 = vmatmul.mubr.msk.bf16.vlgmr.msra.gmra.mxu0 %vm5296_vm8, %v16303_v32  ;;  %v7001_v58 = vpop.permute.xlu0 %7000  ;;  %v7008_v32 = vpop.permute.xlu1 %7007 }
 0x65c   : >> { %10605 = vmatprep.mubr.msk.bf16.mxu0 %vm5296_vm8, %v16308_v14  ;;  %v7010_v55 = vsel %vm18007_vm1, %v16257_v37, %v7001_v58  ;;  %vm18165_vm1 = vmmov (%p16833_p2), %vm18156_vm9 }
 0x65d   : >> { %v7012_v14 = vsel %vm5202_vm7, %v7010_v55, %v7008_v32 }
 0x65e   : >> { %10646 = vmatmul.mubr.msk.bf16.vlgmr.msra.gmra.mxu1 %vm5296_vm8, %v16324_v19 }
 0x65f   : >> { %10649 = vmatprep.mubr.msk.bf16.mxu1 %vm5296_vm8, %v16329_v63  ;;  %10678 = vmatpush3.msra.mxu1 %v18010_v48 }
 0x660   : >> { %10679 = vmatprep.subr.mxu1 %v17601_v12 }
 0x661   : >> { %10680 = vmatpush3.msra.mxu1 %v18012_v61 }
 0x662   : >> { %10681 = vmatprep.subr.mxu1 %v17601_v12 }
 0x663   : >> { %10606 = vmatmul.mubr.msk.bf16.gmra.mxu0 %vm5296_vm8, %v16324_v19  ;;  %10682 = vmatpush3.msra.mxu1 %v18014_v15 }
 0x664   : >> { %10609 = vmatprep.mubr.msk.bf16.mxu0 %vm5296_vm8, %v16329_v63  ;;  %10683 = vmatprep.subr.mxu1 %v17601_v12 }
 0x666   : >> { %10650 = vmatmul.mubr.msk.bf16.gmra.mxu1 %vm5296_vm8, %v16342_v54 }
 0x667   : >> { %10653 = vmatprep.mubr.msk.bf16.mxu1 %vm5296_vm8, %v16345_v3 }
 0x66b   : >> { %10610 = vmatmul.mubr.msk.bf16.gmra.mxu0 %vm5296_vm8, %v16342_v54 }
 0x66c   : >> { %10613 = vmatprep.mubr.msk.bf16.mxu0 %vm5296_vm8, %v16345_v3 }
 0x66e   : >> { %10654 = vmatmul.mubr.msk.bf16.gmra.mxu1 %vm5296_vm8, %v6518_v22 }
 0x66f   : >> { %10657 = vmatprep.mubr.msk.bf16.mxu1 %vm5296_vm8, %v6520_v2 }
 0x673   : >> { %10614 = vmatmul.mubr.msk.bf16.gmra.mxu0 %vm5296_vm8, %v6518_v22 }
 0x674   : >> { %10617 = vmatprep.mubr.msk.bf16.mxu0 %vm5296_vm8, %v6520_v2 }
 0x676   : >> { %10658 = vmatmul.mubr.msk.bf16.gmra.mxu1 %vm5296_vm8, %v6522_v43 }
 0x677   : >> { %10661 = vmatprep.mubr.msk.bf16.mxu1 %vm5296_vm8, %v6524_v31 }
 0x67b   : >> { %10618 = vmatmul.mubr.msk.bf16.gmra.mxu0 %vm5296_vm8, %v6522_v43  ;;  %v17603_v43 = vmov 0.00390625  }
 0x67c   : >> { %10621 = vmatprep.mubr.msk.bf16.mxu0 %vm5296_vm8, %v6524_v31 }
 0x67e   : >> { %10662 = vmatmul.mubr.msk.bf16.gmra.mxu1 %vm5296_vm8, %v6526_v4 }
 0x67f   : >> { %10665 = vmatprep.mubr.msk.bf16.mxu1 %vm5296_vm8, %v6528_v46 }
 0x683   : >> { %10622 = vmatmul.mubr.msk.bf16.gmra.mxu0 %vm5296_vm8, %v6526_v4 }
 0x684   : >> { %10625 = vmatprep.mubr.msk.bf16.mxu0 %vm5296_vm8, %v6528_v46  ;;  %v18015_v46 = vld [vmem:[#allocation87_spill] sm:$0xff] }
 0x685   : >> { %10684 = vmatpush3.msra.mxu1 %v18015_v46 }
 0x686   : >> { %10666 = vmatmul.mubr.msk.bf16.gmra.mxu1 %vm5296_vm8, %v6530_v33 }
 0x687   : >> { %10669 = vmatprep.mubr.msk.bf16.mxu1 %vm5296_vm8, %v6532_v8 }
 0x68b   : >> { %10626 = vmatmul.mubr.msk.bf16.gmra.mxu0 %vm5296_vm8, %v6530_v33 }
 0x68c   : >> { %10629 = vmatprep.mubr.msk.bf16.mxu0 %vm5296_vm8, %v6532_v8 }
 0x68e   : >> { %10670 = vmatmul.mubr.msk.bf16.gmra.mxu1 %vm5296_vm8, %v6534_v47 }
 0x68f   : >> { %10673 = vmatprep.mubr.msk.bf16.mxu1 %vm5296_vm8, %v6559_v29 }
 0x693   : >> { %10630 = vmatmul.mubr.msk.bf16.gmra.mxu0 %vm5296_vm8, %v6534_v47 }
 0x694   : >> { %7344 = vmatprep.mubr.f32.mxu0 %v17603_v43 }
 0x696   : >> { %10674 = vmatmul.mubr.msk.bf16.gmra.mxu1 %vm5296_vm8, %v7012_v14 }
 0x6d4   : >> { %v10559_v19 = vpop.f32.mrf.mxu1 }
 0x6d6   : >> { %v6662_v63 = vpop.f32.mrf.mxu1 }
 0x6d8   : >> { %v10560_v54 = vpop.f32.mrf.mxu1 }
 0x6da   : >> { %v6665_v3 = vpop.f32.mrf.mxu1 }
 0x6e0   : >> { %v10563_v52 = vpop.f32.mrf.mxu1 }
 0x6e2   : >> { %v6678_v35 = vpop.f32.mrf.mxu1 }
 0x6e4   : >> { %v10564_v30 = vpop.f32.mrf.mxu1 }
 0x6e6   : >> { %v16440_v53 = vpop.f32.mrf.mxu1 }
 0x6eb   : >> { %v16442_v22 = vpop.f32.mrf.mxu1 }
 0x6ed   : >> { %v16444_v2 = vpop.f32.mrf.mxu1 }
 0x6ef   : >> { %v16446_v37 = vpop.f32.mrf.mxu1 }
 0x6f1   : >> { %v16448_v21 = vpop.f32.mrf.mxu1 }
 0x6f5   : >> { %v16450_v49 = vpop.f32.mrf.mxu1 }
 0x6f7   : >> { %v16452_v56 = vpop.f32.mrf.mxu1 }
 0x6f9   : >> { %v16454_v62 = vpop.f32.mrf.mxu1 }
 0x6fb   : >> { %v16456_v42 = vpop.f32.mrf.mxu1 }
 0x6fe   : >> { %v16458_v24 = vpop.f32.mrf.mxu1 }
 0x6ff   : >> { %18008 = vst [vmem:[#allocation154_spill] sm:$0xff] %v16458_v24 }
 0x700   : >> { %v16461_v31 = vpop.f32.mrf.mxu1 }
 0x701   : >> { %18009 = vst [vmem:[#allocation155_spill] sm:$0xff] %v16461_v31 }
 0x702   : >> { %v16465_v10 = vpop.f32.mrf.mxu1 }
 0x703   : >> { %18011 = vst [vmem:[#allocation156_spill] sm:$0xff] %v16465_v10 }
 0x704   : >> { %v16469_v39 = vpop.f32.mrf.mxu1 }
 0x705   : >> { %18013 = vst [vmem:[#allocation157_spill] sm:$0xff] %v16469_v39 }
 0x706   : >> { %v16473_v4 = vpop.f32.mrf.mxu1 }
 0x708   : >> { %v16477_v36 = vpop.f32.mrf.mxu1 }
 0x709   : >> { %18016 = vst [vmem:[#allocation158_spill] sm:$0xff] %v16477_v36 }
 0x70a   : >> { %v16479_v44 = vpop.f32.mrf.mxu1 }
 0x70c   : >> { %v16481_v17 = vpop.f32.mrf.mxu1 }
 0x70e   : >> { %v16483_v51 = vpop.f32.mrf.mxu1 }
 0x710   : >> { %v16485_v45 = vpop.f32.mrf.mxu1 }
 0x712   : >> { %v16487_v1 = vpop.f32.mrf.mxu1 }
 0x714   : >> { %v16489_v33 = vpop.f32.mrf.mxu1 }
 0x716   : >> { %v16491_v8 = vpop.f32.mrf.mxu1 }
 0x718   : >> { %v16493_v20 = vpop.f32.mrf.mxu1 }
 0x71a   : >> { %v16495_v38 = vpop.f32.mrf.mxu1 }
 0x71b   : >> { %v10603_v26 = vpop.f32.mrf.mxu0 }
 0x71c   : >> { %v6870_v47 = vadd.f32 %v10603_v26, %v10559_v19  ;;  %v16497_v11 = vpop.f32.mrf.mxu1 }
 0x71d   : >> { %v6861_v60 = vpop.f32.mrf.mxu0 }
 0x71e   : >> { %v6862_v23 = vadd.f32 %v6861_v60, %v6662_v63  ;;  %v10647_v29 = vpop.f32.mrf.mxu1 }
 0x71f   : >> { %v16499_v5 = vadd.f32 %v10647_v29, %v6870_v47  ;;  %v10604_v13 = vpop.f32.mrf.mxu0 }
 0x720   : >> { %v6873_v0 = vadd.f32 %v10604_v13, %v10560_v54  ;;  %v7085_v34 = vpop.f32.mrf.mxu1 }
 0x721   : >> { %18017 = vst [vmem:[#allocation159_spill] sm:$0xff] %v16499_v5  ;;  %v16501_v58 = vadd.f32 %v7085_v34, %v6862_v23  ;;  %v6864_v55 = vpop.f32.mrf.mxu0 }
 0x722   : >> { %v6865_v32 = vadd.f32 %v6864_v55, %v6665_v3  ;;  %v10648_v14 = vpop.f32.mrf.mxu1 }
 0x723   : >> { %18018 = vst [vmem:[#allocation160_spill] sm:$0xff] %v16501_v58  ;;  %v16503_v48 = vadd.f32 %v10648_v14, %v6873_v0  ;;  %v10607_v61 = vpop.f32.mrf.mxu0 }
 0x724   : >> { %v6886_v15 = vadd.f32 %v10607_v61, %v10563_v52  ;;  %v7088_v19 = vpop.f32.mrf.mxu1 }
 0x725   : >> { %18019 = vst [vmem:[#allocation161_spill] sm:$0xff] %v16503_v48  ;;  %v16505_v46 = vadd.f32 %v7088_v19, %v6865_v32  ;;  %v6877_v26 = vpop.f32.mrf.mxu0 }
 0x726   : >> { %v6878_v63 = vadd.f32 %v6877_v26, %v6678_v35  ;;  %v10651_v60 = vpop.f32.mrf.mxu1 }
 0x727   : >> { %18020 = vst [vmem:[#allocation162_spill] sm:$0xff] %v16505_v46  ;;  %v16507_v47 = vadd.f32 %v10651_v60, %v6886_v15  ;;  %v10608_v29 = vpop.f32.mrf.mxu0 }
 0x728   : >> { %v6889_v54 = vadd.f32 %v10608_v29, %v10564_v30  ;;  %v7101_v13 = vpop.f32.mrf.mxu1 }
 0x729   : >> { %18021 = vst [vmem:[#allocation163_spill] sm:$0xff] %v16507_v47  ;;  %v16509_v23 = vadd.f32 %v7101_v13, %v6878_v63  ;;  %v6880_v34 = vpop.f32.mrf.mxu0  ;;  %v7246_v47 = vsub.s32 1, %v15992_v25 }
 0x72a   : >> { %v6881_v3 = vadd.f32 %v6880_v34, %v16440_v53  ;;  %v10652_v0 = vpop.f32.mrf.mxu1 }
 0x72b   : >> { %18022 = vst [vmem:[#allocation164_spill] sm:$0xff] %v16509_v23  ;;  %v16512_v55 = vadd.f32 %v10652_v0, %v6889_v54  ;;  %v16514_v52 = vpop.f32.mrf.mxu0 }
 0x72c   : >> { %v7104_v32 = vpop.f32.mrf.mxu1 }
 0x72d   : >> { %18023 = vst [vmem:[#allocation165_spill] sm:$0xff] %v16512_v55  ;;  %v16516_v14 = vadd.f32 %v7104_v32, %v6881_v3  ;;  %v16518_v35 = vpop.f32.mrf.mxu0 }
 0x72e   : >> { %v16520_v61 = vpop.f32.mrf.mxu1 }
 0x72f   : >> { %18024 = vst [vmem:[#allocation166_spill] sm:$0xff] %v16516_v14  ;;  %v10612_v15 = vpop.f32.mrf.mxu0 }
 0x730   : >> { %v16522_v30 = vpop.f32.mrf.mxu1 }
 0x731   : >> { %v16524_v19 = vpop.f32.mrf.mxu0 }
 0x732   : >> { %v16526_v26 = vpop.f32.mrf.mxu1 }
 0x733   : >> { %v10615_v53 = vpop.f32.mrf.mxu0 }
 0x734   : >> { %v16528_v63 = vpop.f32.mrf.mxu1  ;;  %v6918_v24 = vadd.f32 %v10615_v53, %v16450_v49 }
 0x735   : >> { %v6909_v60 = vpop.f32.mrf.mxu0 }
 0x736   : >> { %v10659_v29 = vpop.f32.mrf.mxu1 }
 0x737   : >> { %v10616_v54 = vpop.f32.mrf.mxu0  ;;  %v7226_v49 = vadd.f32 %v10659_v29, %v6918_v24  ;;  %v6902_v24 = vadd.f32 %v16514_v52, %v16442_v22 }
 0x738   : >> { %v7133_v13 = vpop.f32.mrf.mxu1 }
 0x739   : >> { %v6912_v34 = vpop.f32.mrf.mxu0 }
 0x73a   : >> { %v10660_v3 = vpop.f32.mrf.mxu1  ;;  %v6913_v10 = vadd.f32 %v6912_v34, %v16456_v42  ;;  %v6905_v42 = vadd.f32 %v10612_v15, %v16446_v37 }
 0x73b   : >> { %v16530_v0 = vpop.f32.mrf.mxu0 }
 0x73c   : >> { %18025 = vst [vmem:[#allocation167_spill] sm:$0xff] %v16530_v0  ;;  %v7136_v32 = vpop.f32.mrf.mxu1 }
 0x73d   : >> { %v16532_v6 = vpop.f32.mrf.mxu0 }
 0x73e   : >> { %18026 = vst [vmem:[#allocation168_spill] sm:$0xff] %v16532_v6  ;;  %v16534_v12 = vpop.f32.mrf.mxu1 }
 0x73f   : >> { %18027 = vst [vmem:[#allocation169_spill] sm:$0xff] %v16534_v12  ;;  %v16536_v43 = vpop.f32.mrf.mxu0 }
 0x740   : >> { %18028 = vst [vmem:[#allocation170_spill] sm:$0xff] %v16536_v43  ;;  %v16538_v16 = vpop.f32.mrf.mxu1 }
 0x741   : >> { %18029 = vst [vmem:[#allocation171_spill] sm:$0xff] %v16538_v16  ;;  %v16540_v27 = vpop.f32.mrf.mxu0 }
 0x742   : >> { %18030 = vst [vmem:[#allocation172_spill] sm:$0xff] %v16540_v27  ;;  %v16542_v28 = vpop.f32.mrf.mxu1  ;;  %v6921_v27 = vadd.f32 %v10616_v54, %v16454_v62  ;;  %v16572_v62 = vrot.slane %v17933_v41, %v7246_v47 }
 0x743   : >> { %18031 = vst [vmem:[#allocation173_spill] sm:$0xff] %v16542_v28  ;;  %v16544_v7 = vpop.f32.mrf.mxu0  ;;  %v18045_v34 = vld [vmem:[#allocation167_spill] sm:$0xff] }
 0x744   : >> { %v16546_v40 = vpop.f32.mrf.mxu1 }
 0x745   : >> { %18032 = vst [vmem:[#allocation174_spill] sm:$0xff] %v16546_v40  ;;  %v16548_v9 = vpop.f32.mrf.mxu0 }
 0x746   : >> { %18033 = vst [vmem:[#allocation175_spill] sm:$0xff] %v16548_v9  ;;  %v16550_v18 = vpop.f32.mrf.mxu1 }
 0x747   : >> { %18034 = vst [vmem:[#allocation176_spill] sm:$0xff] %v16550_v18  ;;  %v16552_v57 = vpop.f32.mrf.mxu0  ;;  %v7227_v18 = vadd.f32 %v10660_v3, %v6921_v27 }
 0x748   : >> { %v16554_v50 = vpop.f32.mrf.mxu1 }
 0x749   : >> { %18035 = vst [vmem:[#allocation177_spill] sm:$0xff] %v16554_v50  ;;  %v16556_v59 = vpop.f32.mrf.mxu0 }
 0x74a   : >> { %v16558_v58 = vpop.f32.mrf.mxu1 }
 0x74b   : >> { %v10627_v46 = vpop.f32.mrf.mxu0 }
 0x74c   : >> { %v16560_v5 = vpop.f32.mrf.mxu1 }
 0x74d   : >> { %18036 = vst [vmem:[#allocation178_spill] sm:$0xff] %v16560_v5  ;;  %v6957_v16 = vpop.f32.mrf.mxu0  ;;  %v18038_v52 = vld [vmem:[#allocation175_spill] sm:$0xff] }
 0x74e   : >> { %v10671_v48 = vpop.f32.mrf.mxu1 }
 0x74f   : >> { %v10628_v23 = vpop.f32.mrf.mxu0 }
 0x750   : >> { %v16562_v12 = vpop.f32.mrf.mxu1 }
 0x751   : >> { %v6960_v40 = vpop.f32.mrf.mxu0 }
 0x752   : >> { %v10672_v6 = vpop.f32.mrf.mxu1 }
 0x753   : >> { %v10631_v31 = vpop.f32.mrf.mxu0 }
 0x754   : >> { %v7184_v14 = vpop.f32.mrf.mxu1  ;;  %v6982_v50 = vadd.f32 %v10631_v31, %v16491_v8  ;;  %v6910_v8 = vadd.f32 %v6909_v60, %v16452_v56  ;;  %v18043_v60 = vld [vmem:[#allocation165_spill] sm:$0xff] }
 0x755   : >> { %v6973_v28 = vpop.f32.mrf.mxu0  ;;  %v16673_v29 = vadd.f32 %v16572_v62, %v18043_v60 }
 0x756   : >> { %v10675_v39 = vpop.f32.mrf.mxu1  ;;  %v6974_v54 = vadd.f32 %v6973_v28, %v16493_v20  ;;  %v6966_v28 = vadd.f32 %v10627_v46, %v16483_v51  ;;  %v6958_v51 = vadd.f32 %v6957_v16, %v16485_v45  ;;  %v6953_v20 = vadd.f32 %v16552_v57, %v16479_v44 }
 0x757   : >> { %v10632_v0 = vpop.f32.mrf.mxu0  ;;  %v7242_v25 = vadd.f32 %v10675_v39, %v6982_v50  ;;  %v16592_v39 = vadd.f32 %v16572_v62, %v7226_v49 }
 0x758   : >> { %v6985_v55 = vadd.f32 %v10632_v0, %v16495_v38  ;;  %v7197_v5 = vpop.f32.mrf.mxu1  ;;  %v6969_v38 = vadd.f32 %v10628_v23, %v16487_v1  ;;  %v7238_v1 = vadd.f32 %v10671_v48, %v6966_v28  ;;  %v6950_v48 = vadd.f32 %v16544_v7, %v16473_v4  ;;  %v18037_v4 = vld [vmem:[#allocation158_spill] sm:$0xff] }
 0x759   : >> { %v6976_v43 = vpop.f32.mrf.mxu0  ;;  %v16586_v50 = vadd.f32 %v16572_v62, %v7242_v25  ;;  %v7240_v56 = vadd.f32 %v7197_v5, %v6974_v54  ;;  %v6897_v25 = vadd.f32 %v16524_v19, %v16448_v21  ;;  %v7222_v21 = vadd.f32 %v16520_v61, %v6902_v24  ;;  %v18046_v54 = vld [vmem:[#allocation177_spill] sm:$0xff] }
 0x75a   : >> { %v6977_v9 = vadd.f32 %v6976_v43, %v16497_v11  ;;  %v10676_v36 = vpop.f32.mrf.mxu1  ;;  %v16582_v43 = vadd.f32 %v16572_v62, %v7227_v18  ;;  %v7225_v11 = vadd.f32 %v7136_v32, %v6913_v10  ;;  %v6961_v18 = vadd.f32 %v6960_v40, %v16489_v33 }
 0x75b   : >> { %v7243_v31 = vadd.f32 %v10676_v36, %v6985_v55  ;;  %v7239_v37 = vadd.f32 %v10672_v6, %v6969_v38  ;;  %v7223_v36 = vadd.f32 %v16526_v26, %v6905_v42  ;;  %v16609_v40 = vadd.f32 %v16572_v62, %v7240_v56  ;;  %v18042_v26 = vld [vmem:[#allocation178_spill] sm:$0xff]  ;;  %v18049_v38 = vld [vmem:[#allocation172_spill] sm:$0xff]  ;;  %v18050_v42 = vld [vmem:[#allocation173_spill] sm:$0xff] }
 0x75c   : >> { %v7200_v53 = vpop.f32.mrf.mxu1  ;;  %v16604_v22 = vadd.f32 %v16572_v62, %v7225_v11  ;;  %v6894_v6 = vadd.f32 %v16518_v35, %v16444_v2  ;;  %v7237_v45 = vadd.f32 %v7184_v14, %v6961_v18  ;;  %v7221_v2 = vadd.f32 %v16528_v63, %v6897_v25  ;;  %v18039_v35 = vld [vmem:[#allocation176_spill] sm:$0xff]  ;;  %v18051_v56 = vld [vmem:[#allocation166_spill] sm:$0xff]  ;;  %v18054_v25 = vld [vmem:[#allocation169_spill] sm:$0xff] }
 0x75d   : >> { %v16578_v0 = vadd.f32 %v16572_v62, %v7243_v31  ;;  %v7241_v27 = vadd.f32 %v7200_v53, %v6977_v9  ;;  %v7224_v9 = vadd.f32 %v7133_v13, %v6910_v8  ;;  %v16622_v16 = vadd.f32 %v16572_v62, %v7239_v37  ;;  %v18044_v13 = vld [vmem:[#allocation154_spill] sm:$0xff]  ;;  %v18047_v8 = vld [vmem:[#allocation163_spill] sm:$0xff]  ;;  %v18048_v53 = vld [vmem:[#allocation157_spill] sm:$0xff] }
 0x75e   : >> { %v16626_v5 = vadd.f32 %v16572_v62, %v7223_v36  ;;  %v16633_v46 = vadd.f32 %v16572_v62, %v7238_v1  ;;  %v7236_v57 = vadd.f32 %v16562_v12, %v6958_v51  ;;  %v16638_v44 = vadd.f32 %v16572_v62, %v7222_v21  ;;  %v18053_v18 = vld [vmem:[#allocation168_spill] sm:$0xff] }
 0x75f   : >> { %9981 = vmatprep.subr.mxu0 %v16578_v0  ;;  %v16597_v10 = vadd.f32 %v16572_v62, %v7241_v27  ;;  %v16616_v33 = vadd.f32 %v16572_v62, %v7224_v9  ;;  %v7220_v47 = vadd.f32 %v16522_v30, %v6894_v6  ;;  %v6945_v23 = vadd.f32 %v16556_v59, %v16481_v17  ;;  %v18040_v17 = vld [vmem:[#allocation156_spill] sm:$0xff]  ;;  %v18052_v9 = vld [vmem:[#allocation155_spill] sm:$0xff] }
 0x760   : >> { %9982 = vmatpush3.msra.mxu0 %v16582_v43  ;;  %v7235_v55 = vadd.f32 %v16558_v58, %v6953_v20  ;;  %v16646_v7 = vadd.f32 %v16572_v62, %v7237_v45  ;;  %v16650_v12 = vadd.f32 %v16572_v62, %v7221_v2  ;;  %v6942_v14 = vadd.f32 %v18038_v52, %v18037_v4  ;;  %v18041_v58 = vld [vmem:[#allocation170_spill] sm:$0xff]  ;;  %v18055_v1 = vld [vmem:[#allocation164_spill] sm:$0xff]  ;;  %v18057_v2 = vld [vmem:[#allocation161_spill] sm:$0xff] }
 0x761   : >> { %9983 = vmatprep.subr.mxu0 %v16586_v50  ;;  %v7234_v61 = vadd.f32 %v18039_v35, %v6950_v48  ;;  %v16657_v15 = vadd.f32 %v16572_v62, %v7236_v57  ;;  %v16661_v59 = vadd.f32 %v16572_v62, %v7220_v47  ;;  %v6937_v30 = vadd.f32 %v18041_v58, %v18040_v17  ;;  %v18056_v20 = vld [vmem:[#allocation174_spill] sm:$0xff]  ;;  %v18058_v47 = vld [vmem:[#allocation171_spill] sm:$0xff]  ;;  %v18061_v17 = vld [vmem:[#allocation160_spill] sm:$0xff] }
 0x762   : >> { %9984 = vmatpush3.msra.mxu0 %v16592_v39  ;;  %v16667_v19 = vadd.f32 %v16572_v62, %v7235_v55  ;;  %v7233_v63 = vadd.f32 %v18042_v26, %v6945_v23  ;;  %v6934_v3 = vadd.f32 %v18045_v34, %v18044_v13  ;;  %v7232_v31 = vadd.f32 %v18046_v54, %v6942_v14  ;;  %v18059_v55 = vld [vmem:[#allocation159_spill] sm:$0xff]  ;;  %v18060_v14 = vld [vmem:[#allocation162_spill] sm:$0xff]  ;;  %v18065_v34 = vld [vmem:[#allocation92_spill] sm:$0xff] }
 0x763   : >> { %9985 = vmatprep.subr.mxu0 %v16597_v10  ;;  %v16679_v32 = vadd.f32 %v16572_v62, %v7234_v61  ;;  %v16685_v49 = vadd.f32 %v16572_v62, %v18047_v8  ;;  %v6929_v27 = vadd.f32 %v18049_v38, %v18048_v53  ;;  %v7231_v11 = vadd.f32 %v18050_v42, %v6937_v30  ;;  %v18067_v38 = vld [vmem:[#allocation93_spill] sm:$0xff] }
 0x764   : >> { %9986 = vmatpush3.msra.mxu0 %v16604_v22  ;;  %v16692_v28 = vadd.f32 %v16572_v62, %v7233_v63  ;;  %v7253_v24 = vadd.f32 %v16572_v62, %v18051_v56  ;;  %v6926_v37 = vadd.f32 %v18053_v18, %v18052_v9  ;;  %v7230_v36 = vadd.f32 %v18054_v25, %v6934_v3  ;;  %v18066_v3 = vld [vmem:[#allocation91_spill] sm:$0xff]  ;;  %v18068_v25 = vld [vmem:[#allocation153_spill] sm:$0xff] }
 0x765   : >> { %9987 = vmatprep.subr.mxu0 %v16609_v40  ;;  %v16702_v51 = vadd.f32 %v16572_v62, %v7232_v31  ;;  %v7252_v6 = vadd.f32 %v16572_v62, %v18055_v1  ;;  %v16708_v21 = vadd.f32 %v16572_v62, %v7231_v11  ;;  %v7229_v45 = vadd.f32 %v18056_v20, %v6929_v27 }
 0x766   : >> { %9988 = vmatpush3.msra.mxu0 %v16616_v33  ;;  %v7251_v48 = vadd.f32 %v16572_v62, %v18057_v2  ;;  %v7266_v57 = vadd.f32 %v16572_v62, %v7230_v36  ;;  %v7228_v23 = vadd.f32 %v18058_v47, %v6926_v37  ;;  %v7250_v4 = vadd.f32 %v16572_v62, %v18059_v55 }
 0x767   : >> { %9989 = vmatprep.subr.mxu0 %v16622_v16  ;;  %v7265_v52 = vadd.f32 %v16572_v62, %v7229_v45  ;;  %v7249_v35 = vadd.f32 %v16572_v62, %v18060_v14  ;;  %v7248_v58 = vadd.f32 %v16572_v62, %v18061_v17  ;;  %v18062_v30 = vmov 0.00390625  }
 0x768   : >> { %9990 = vmatpush3.msra.mxu0 %v16626_v5  ;;  %v7264_v61 = vadd.f32 %v16572_v62, %v7228_v23  ;;  %v18063_v26 = vmov 0.0   ;;  %v18069_v36 = vsub.s32 0, %v18068_v25  ;;  %v18096_v25 = vld [vmem:[#allocation139_spill] sm:$0xff] }
 0x769   : >> { %9991 = vmatprep.subr.mxu0 %v16633_v46  ;;  %10685 = vmatprep.mubr.msk.f32.mxu1 %vm11728_vm0, %v18063_v26 }
 0x76a   : >> { %9992 = vmatpush3.msra.mxu0 %v16638_v44 }
 0x76b   : >> { %9993 = vmatprep.subr.mxu0 %v16646_v7 }
 0x76c   : >> { %9994 = vmatpush3.msra.mxu0 %v16650_v12 }
 0x76d   : >> { %9995 = vmatprep.subr.mxu0 %v16657_v15 }
 0x76e   : >> { %9996 = vmatpush3.msra.mxu0 %v16661_v59 }
 0x76f   : >> { %9997 = vmatprep.subr.mxu0 %v16667_v19 }
 0x770   : >> { %9998 = vmatpush3.msra.mxu0 %v16673_v29 }
 0x771   : >> { %9999 = vmatprep.subr.mxu0 %v16679_v32 }
 0x772   : >> { %10000 = vmatpush3.msra.mxu0 %v16685_v49 }
 0x773   : >> { %10001 = vmatprep.subr.mxu0 %v16692_v28 }
 0x774   : >> { %10002 = vmatpush3.msra.mxu0 %v7253_v24 }
 0x775   : >> { %10003 = vmatprep.subr.mxu0 %v16702_v51 }
 0x776   : >> { %10004 = vmatpush3.msra.mxu0 %v7252_v6 }
 0x777   : >> { %10005 = vmatprep.subr.mxu0 %v16708_v21 }
 0x778   : >> { %10006 = vmatpush3.msra.mxu0 %v7251_v48 }
 0x779   : >> { %10007 = vmatprep.subr.mxu0 %v7266_v57 }
 0x77a   : >> { %10008 = vmatpush3.msra.mxu0 %v7250_v4 }
 0x77b   : >> { %10009 = vmatprep.subr.mxu0 %v7265_v52 }
 0x77c   : >> { %10010 = vmatpush3.msra.mxu0 %v7249_v35 }
 0x77d   : >> { %10011 = vmatprep.subr.mxu0 %v7264_v61 }
 0x77e   : >> { %10012 = vmatpush3.msra.mxu0 %v7248_v58 }
 0x77f   : >> { %7345 = vmatmul.mubr.f32.vlgmr.msra.gmra.mxu0 %v18062_v30  ;;  %10688 = vmatprep.subr.mxu0 %v18063_v26 }
 0x780   : >> { %10690 = vmatprep.mubr.msk.f32.mxu0 %vm11728_vm0, %v18063_v26  ;;  %10689 = vmatpush3.msk.msra.mxu0 %vm7428_vm5, %v18065_v34  ;;  %vm18166_vm0 = vmmov (%p16833_p2), %vm18165_vm1 }
 0x781   : > { %vm18168_vm5 = vmmov (%p16833_p2), %vm18166_vm0 }
 0x83f   : >> { %v10013_v63 = vpop.f32.mrf.mxu0 }
 0x841   : >> { %v10014_v60 = vpop.f32.mrf.mxu0 }
 0x842   : >> { %v10015_v13 = vadd.f32 %v10014_v60, %v10013_v63 }
 0x844   : >> { %10686 = vmatmul.mubr.msk.f32.vlgmr.msra.gmra.mxu1 %vm18064_vm4, %v10015_v13  ;;  %vm18167_vm4 = vmmov (%p16833_p2), %vm18166_vm0 }
 0x904   : >> { %v7419_v62 = vpop.f32.mrf.mxu1 }
 0x905   : >> { %v7420_v54 = vadd.f32 %v7419_v62, %v18066_v3  ;;  %v18082_v3 = vld [vmem:[#allocation146_spill] sm:$0xff] }
 0x906   : >> { %v10687_v31 = vpop.f32.mrf.mxu1 }
 0x907   : >> { %v7423_v8 = vmax.f32 %v7420_v54, 0.0 }
 0x909   : >> { %10691 = vmatmul.mubr.msk.f32.vlgmr.msra.gmra.mxu0 %vm7424_vm6, %v7423_v8  ;;  %v18086_v8 = vld [vmem:[#allocation144_spill] sm:$0xff]  ;;  %vm18169_vm6 = vmmov (%p16833_p2), %vm18166_vm0 }
 0x9c9   : >> { %v7498_v53 = vpop.f32.mrf.mxu0 }
 0x9ca   : >> { %v7499_v27 = vadd.f32 %v7498_v53, %v18067_v38 }
 0x9cb   : >> { %v10692_v42 = vpop.f32.mrf.mxu0 }
 0x9cc   : >> { %v7502_v11 = vsub.f32 0.0, %v7499_v27  ;;  %v18090_v42 = vld [vmem:[#allocation142_spill] sm:$0xff] }
 0x9ce   : >> { %v7503_v56 = vmul.f32 1.442695, %v7502_v11 }
 0x9d0   : >> { %11273 = vpow2.f32 %v7503_v56 }
 0x9dd   : >> { %v11274_v9 = vpop.eup %11273 }
 0x9de   : >> { %v7505_v18 = vadd.f32 1.0, %v11274_v9 }
 0x9e0   : >> { %11275 = vrcp.f32 %v7505_v18 }
 0x9ed   : >> { %v11276_v37 = vpop.eup %11275 }
 0x9ee   : >> { %v7511_v1 = vrot.slane %v11276_v37, %v18069_v36 }
 0x9f0   : >> { %v7512_v20 = vmul.f32 %v7511_v1, %v7248_v58  ;;  %v7513_v45 = vmul.f32 %v7511_v1, %v7249_v35  ;;  %v7514_v2 = vmul.f32 %v7511_v1, %v7250_v4  ;;  %v7515_v47 = vmul.f32 %v7511_v1, %v7251_v48 }
 0x9f1   : >> { %v7516_v23 = vmul.f32 %v7511_v1, %v7252_v6  ;;  %v7517_v55 = vmul.f32 %v7511_v1, %v7253_v24  ;;  %v7518_v14 = vmul.f32 %v7511_v1, %v16685_v49  ;;  %v7519_v17 = vmul.f32 %v7511_v1, %v16673_v29 }
 0x9f2   : >> { %v7520_v30 = vmul.f32 %v7511_v1, %v16661_v59  ;;  %v7521_v26 = vmul.f32 %v7511_v1, %v16650_v12  ;;  %v7522_v63 = vmul.f32 %v7511_v1, %v16638_v44  ;;  %v7523_v60 = vmul.f32 %v7511_v1, %v16626_v5 }
 0x9f3   : >> { %v7524_v13 = vmul.f32 %v7511_v1, %v16616_v33  ;;  %v7525_v35 = vmul.f32 %v7511_v1, %v16604_v22  ;;  %v7526_v48 = vmul.f32 %v7511_v1, %v16592_v39  ;;  %v7527_v24 = vmul.f32 %v7511_v1, %v16582_v43 }
 0x9f4   : >> { %v7528_v6 = vmul.f32 %v7511_v1, %v7264_v61  ;;  %v7529_v49 = vmul.f32 %v7511_v1, %v7265_v52  ;;  %v7530_v4 = vmul.f32 %v7511_v1, %v7266_v57  ;;  %v7531_v29 = vmul.f32 %v7511_v1, %v16708_v21  ;;  %v18070_v52 = vld [vmem:[#allocation152_spill] sm:$0xff]  ;;  %v18074_v61 = vld [vmem:[#allocation150_spill] sm:$0xff] }
 0x9f5   : >> { %v7532_v59 = vmul.f32 %v7511_v1, %v16702_v51  ;;  %v7533_v12 = vmul.f32 %v7511_v1, %v16692_v28  ;;  %v7534_v44 = vmul.f32 %v7511_v1, %v16679_v32  ;;  %v7535_v5 = vmul.f32 %v7511_v1, %v16667_v19  ;;  %v18072_v19 = vld [vmem:[#allocation151_spill] sm:$0xff] }
 0x9f6   : >> { %v7536_v33 = vmul.f32 %v7511_v1, %v16657_v15  ;;  %v7537_v22 = vmul.f32 %v7511_v1, %v16646_v7  ;;  %v7538_v39 = vmul.f32 %v7511_v1, %v16633_v46  ;;  %v7539_v43 = vmul.f32 %v7511_v1, %v16622_v16  ;;  %v18076_v46 = vld [vmem:[#allocation149_spill] sm:$0xff]  ;;  %v18078_v16 = vld [vmem:[#allocation148_spill] sm:$0xff] }
 0x9f7   : >> { %v7540_v57 = vmul.f32 %v7511_v1, %v16609_v40  ;;  %v7541_v21 = vmul.f32 %v7511_v1, %v16597_v10  ;;  %v7542_v51 = vmul.f32 %v7511_v1, %v16586_v50  ;;  %v7543_v28 = vmul.f32 %v7511_v1, %v16578_v0  ;;  %v18080_v10 = vld [vmem:[#allocation147_spill] sm:$0xff]  ;;  %v18084_v0 = vld [vmem:[#allocation145_spill] sm:$0xff] }
 0x9f8   : >> { %v16759_v32 = vadd.f32 %v18070_v52, %v7512_v20   ;;  %v16762_v50 = vadd.f32 %v18072_v19, %v7513_v45   ;;  %v16765_v7 = vadd.f32 %v18074_v61, %v7514_v2   ;;  %v16768_v18 = vadd.f32 %v18076_v46, %v7515_v47   ;;  %v18098_v45 = vld [vmem:[#allocation138_spill] sm:$0xff]  ;;  %v18105_v19 = vld [vmem:[#allocation133_spill] sm:$0xff] }
 0x9f9   : >> { %v16771_v9 = vadd.f32 %v18078_v16, %v7516_v23   ;;  %v16774_v40 = vadd.f32 %v18080_v10, %v7517_v55   ;;  %v16780_v54 = vadd.f32 %v18084_v0, %v7519_v17   ;;  %v16783_v27 = vadd.f32 %v18086_v8, %v7520_v30   ;;  %v18100_v55 = vld [vmem:[#allocation137_spill] sm:$0xff]  ;;  %v18103_v30 = vld [vmem:[#allocation135_spill] sm:$0xff] }
 0x9fa   : >> { %18071 = vst [vmem:[#allocation117_spill] sm:$0xff] %v16759_v32  ;;  %18073 = vst [vmem:[#allocation113_spill] sm:$0xff] %v16762_v50  ;;  %v18075_v58 = vmov %v16765_v7  ;;  %v18077_v34 = vmov %v16768_v18  ;;  %v16777_v7 = vadd.f32 %v18082_v3, %v7518_v14   ;;  %v18088_v50 = vld [vmem:[#allocation143_spill] sm:$0xff]  ;;  %v16789_v11 = vadd.f32 %v18090_v42, %v7522_v63   ;;  %v18092_v18 = vld [vmem:[#allocation141_spill] sm:$0xff] }
 0x9fb   : >> { %v18079_v62 = vmov %v16771_v9  ;;  %v18081_v31 = vmov %v16774_v40  ;;  %v18085_v38 = vmov %v16780_v54  ;;  %v18087_v56 = vmov %v16783_v27  ;;  %v18094_v9 = vld [vmem:[#allocation140_spill] sm:$0xff]  ;;  %v18104_v63 = vld [vmem:[#allocation134_spill] sm:$0xff]  ;;  %v18111_v3 = vld [vmem:[#allocation127_spill] sm:$0xff]  ;;  %7616 = vst.msk [vmem:[#allocation2 + $0x31] sm:$0xff] (%p16833_p2), %vm18160_vm13, %v18075_v58 }
 0x9fc   : >> { %v18083_v53 = vmov %v16777_v7  ;;  %v16786_v16 = vadd.f32 %v18088_v50, %v7521_v26   ;;  %v18091_v36 = vmov %v16789_v11  ;;  %v16792_v60 = vadd.f32 %v18092_v18, %v7523_v60   ;;  %v18102_v27 = vld [vmem:[#allocation136_spill] sm:$0xff]  ;;  %v18107_v7 = vld [vmem:[#allocation131_spill] sm:$0xff]  ;;  %v18113_v0 = vld [vmem:[#allocation125_spill] sm:$0xff]  ;;  %7617 = vst.msk [vmem:[#allocation2 + $0x39] sm:$0xff] (%p16833_p2), %vm18161_vm14, %v18077_v34 }
 0x9fd   : >> { %v16795_v40 = vadd.f32 %v18094_v9, %v7524_v13   ;;  %v16798_v1 = vadd.f32 %v18096_v25, %v7525_v35   ;;  %v16801_v13 = vadd.f32 %v18098_v45, %v7526_v48   ;;  %v16804_v24 = vadd.f32 %v18100_v55, %v7527_v24   ;;  %v18108_v35 = vld [vmem:[#allocation130_spill] sm:$0xff]  ;;  %vm18174_vm13 = vmmov (%p16833_p2), %vm18166_vm0  ;;  %7622 = vst.msk [vmem:[#allocation2 + $0x79] sm:$0xff] (%p16833_p2), %vm18166_vm0, %v18087_v56 }
 0x9fe   : >> { %v18089_v37 = vmov %v16786_v16  ;;  %v18093_v20 = vmov %v16792_v60  ;;  %v7560_v17 = vadd.f32 %v18102_v27, %v7528_v6   ;;  %v7561_v26 = vadd.f32 %v18103_v30, %v7529_v49   ;;  %v18106_v60 = vld [vmem:[#allocation132_spill] sm:$0xff]  ;;  %v18109_v16 = vld [vmem:[#allocation129_spill] sm:$0xff]  ;;  %vm18175_vm14 = vmmov (%p16833_p2), %vm18166_vm0 }
 0x9ff   : >> { %v18095_v2 = vmov %v16795_v40  ;;  %v18097_v47 = vmov %v16798_v1  ;;  %v18099_v23 = vmov %v16801_v13  ;;  %v18101_v14 = vmov %v16804_v24  ;;  %v18110_v13 = vld [vmem:[#allocation128_spill] sm:$0xff]  ;;  %v18112_v24 = vld [vmem:[#allocation126_spill] sm:$0xff] }
 0xa00   : >> { %v7562_v52 = vadd.f32 %v18104_v63, %v7530_v4   ;;  %v7563_v61 = vadd.f32 %v18105_v19, %v7531_v29   ;;  %v7564_v46 = vadd.f32 %v18106_v60, %v7532_v59   ;;  %v7565_v10 = vadd.f32 %v18107_v7, %v7533_v12   ;;  %v18114_v49 = vld [vmem:[#allocation124_spill] sm:$0xff]  ;;  %v18116_v4 = vld [vmem:[#allocation123_spill] sm:$0xff]  ;;  %v18118_v29 = vld [vmem:[#allocation122_spill] sm:$0xff]  ;;  %7630 = vst.msk [vmem:[#allocation2 + $0xd9] sm:$0xff] (%p16833_p2), %vm18158_vm11, %v7560_v17 }
 0xa01   : >> { %v7566_v41 = vadd.f32 %v18108_v35, %v7534_v44   ;;  %v7567_v48 = vadd.f32 %v18109_v16, %v7535_v5   ;;  %v7568_v32 = vadd.f32 %v18110_v13, %v7536_v33   ;;  %v7569_v55 = vadd.f32 %v18111_v3, %v7537_v22   ;;  %v18120_v59 = vld [vmem:[#allocation121_spill] sm:$0xff]  ;;  %7631 = vst.msk [vmem:[#allocation2 + $0xe1] sm:$0xff] (%p16833_p2), %vm18159_vm12, %v7561_v26  ;;  %vm18172_vm11 = vmmov (%p16833_p2), %vm18166_vm0 }
 0xa02   : >> { %v7570_v6 = vadd.f32 %v18112_v24, %v7538_v39   ;;  %v7571_v15 = vadd.f32 %v18113_v0, %v7539_v43   ;;  %v16819_v35 = vadd.f32 %v18114_v49, %v7540_v57   ;;  %v16822_v22 = vadd.f32 %v18116_v4, %v7541_v21   ;;  %v18153_v50 = vld [vmem:[#allocation113_spill] sm:$0xff]  ;;  %7632 = vst.msk [vmem:[#allocation2 + $0xf1] sm:$0xff] (%p16833_p2), %vm18156_vm9, %v7562_v52  ;;  %vm18170_vm9 = vmmov (%p16833_p2), %vm18166_vm0 }
 0xa03   : >> { %v16825_v8 = vadd.f32 %v18118_v29, %v7542_v51   ;;  %v16828_v49 = vadd.f32 %v18120_v59, %v7543_v28   ;;  %v18129_v25 = vmov %v7569_v55  ;;  %v18130_v0 = vmov %v7568_v32  ;;  %v18154_v59 = vld [vmem:[#allocation117_spill] sm:$0xff]  ;;  %7633 = vst.msk [vmem:[#allocation2 + $0xf9] sm:$0xff] (%p16833_p2), %vm18157_vm10, %v7563_v61  ;;  %vm18171_vm10 = vmmov (%p16833_p2), %vm18166_vm0 }
 0xa04   : >> { %v18115_v63 = vmov %v16819_v35  ;;  %v18117_v19 = vmov %v16822_v22  ;;  %v18127_v30 = vmov %v7571_v15  ;;  %v18128_v29 = vmov %v7570_v6  ;;  %v18162_v39 = vld [vmem:[#allocation117_spill] sm:$0xff] (%p16833_p2)  ;;  %7634 = vst.msk [vmem:[#allocation2 + $0x109] sm:$0xff] (%p16833_p2), %vm18166_vm0, %v7564_v46  ;;  %vm18173_vm12 = vmmov (%p16833_p2), %vm18166_vm0 }
 0xa05   : >> { %v18119_v12 = vmov %v16825_v8  ;;  %v18121_v5 = vmov %v16828_v49  ;;  %v18125_v22 = vmov %v18117_v19  ;;  %v18126_v35 = vmov %v18115_v63  ;;  %7614 = vst.msk [vmem:[#allocation2 + $0x19] sm:$0xff] (%p16833_p2), %vm18163_vm15, %v18162_v39  ;;  %v18164_v43 = vld [vmem:[#allocation113_spill] sm:$0xff] (%p16833_p2)  ;;  %vm18176_vm15 = vmmov (%p16833_p2), %vm18166_vm0 }
 0xa06   : >> { %v18123_v49 = vmov %v18121_v5  ;;  %v18124_v8 = vmov %v18119_v12  ;;  %v18131_v4 = vmov %v7567_v48  ;;  %v18132_v54 = vmov %v7566_v41  ;;  %7615 = vst.msk [vmem:[#allocation2 + $0x21] sm:$0xff] (%p16833_p2), %vm18165_vm1, %v18164_v43  ;;  %vm18177_vm1 = vmmov (%p16833_p2), %vm18166_vm0 }
 0xa07   : >> { %v18133_v45 = vmov %v7565_v10  ;;  %v18134_v11 = vmov %v7564_v46  ;;  %v18135_v42 = vmov %v7563_v61  ;;  %v18136_v51 = vmov %v7562_v52  ;;  %4677 = sbr.rel (!%p16833_p2) target bundleno = 991 (0x3df), region = 124  ;;  %7635 = vst.msk [vmem:[#allocation2 + $0x111] sm:$0xff] (%p16833_p2), %vm18167_vm4, %v7565_v10  ;;  %vm18178_vm4 = vmmov (%p16833_p2), %vm18166_vm0  ;;  %v7653_v54 = vld [vmem:[#allocation2 + $0x38] sm:$0xff] (%p16833_p2) }
 0xa08   : >> { %v18137_v1 = vmov %v7561_v26  ;;  %v18138_v3 = vmov %v7560_v17  ;;  %v18139_v24 = vmov %v18101_v14  ;;  %v18140_v13 = vmov %v18099_v23  ;;  %7636 = vst.msk [vmem:[#allocation2 + $0x121] sm:$0xff] (%p16833_p2), %vm18168_vm5, %v7566_v41  ;;  %vm18179_vm5 = vmmov (%p16833_p2), %vm18166_vm0  ;;  %v11277_v41 = vld [vmem:[%s17531_s9 + $0x58] sm:$0xff] (%p16833_p2)   ;;  %v11280_v51 = vld [vmem:[%s17531_s9 + $0x40] sm:$0xff] (%p16833_p2)  }
 0xa09   : >> { %v18141_v33 = vmov %v18097_v47  ;;  %v18142_v44 = vmov %v18095_v2  ;;  %v18143_v60 = vmov %v18093_v20  ;;  %v18144_v21 = vmov %v18091_v36  ;;  %7637 = vst.msk [vmem:[#allocation2 + $0x129] sm:$0xff] (%p16833_p2), %vm18169_vm6, %v7567_v48  ;;  %vm18180_vm6 = vmmov (%p16833_p2), %vm18166_vm0  ;;  %10693 = vmatprep.subr.bf16.mxu0 (%p16833_p2), %v11277_v41  ;;  %10829 = vmatprep.subr.bf16.mxu1 (%p16833_p2), %v11277_v41  ;;  %v7676_v22 = vld [vmem:[#allocation2 + $0xf0] sm:$0xff] (%p16833_p2)  ;;  %v11281_v17 = vld [vmem:[%s17531_s9 + $0x38] sm:$0xff] (%p16833_p2)  }
 0xa0a   : >> { %v18145_v16 = vmov %v18089_v37  ;;  %v18146_v27 = vmov %v18087_v56  ;;  %v18147_v28 = vmov %v18085_v38  ;;  %v18148_v7 = vmov %v18083_v53  ;;  %7618 = vst.msk [vmem:[#allocation2 + $0x49] sm:$0xff] (%p16833_p2), %vm18170_vm9, %v18079_v62  ;;  %vm18181_vm9 = vmmov (%p16833_p2), %vm18166_vm0  ;;  %v11278_v44 = vld [vmem:[%s17531_s9 + $0x50] sm:$0xff] (%p16833_p2)   ;;  %10694 = vmatpush3.bf16.msra.mxu0 (%p16833_p2), %v11277_v41  ;;  %10835 = vmatpush3.bf16.msra.mxu1 (%p16833_p2), %v11277_v41  ;;  %v11279_v33 = vld [vmem:[%s17531_s9 + $0x48] sm:$0xff] (%p16833_p2)  }
 0xa0b   : >> { %v18149_v40 = vmov %v18081_v31  ;;  %v18150_v9 = vmov %v18079_v62  ;;  %v18151_v18 = vmov %v18077_v34  ;;  %v18152_v57 = vmov %v18075_v58  ;;  %7619 = vst.msk [vmem:[#allocation2 + $0x51] sm:$0xff] (%p16833_p2), %vm18171_vm10, %v18081_v31  ;;  %vm18182_vm10 = vmmov (%p16833_p2), %vm18166_vm0  ;;  %10695 = vmatprep.subr.bf16.mxu0 (%p16833_p2), %v11278_v44  ;;  %10830 = vmatprep.subr.bf16.mxu1 (%p16833_p2), %v11278_v44  ;;  %v7678_v21 = vld [vmem:[#allocation2 + $0x100] sm:$0x3] (%p16833_p2)  ;;  %v7675_v34 = vld [vmem:[#allocation2 + $0xe8] sm:$0x3] (%p16833_p2) }
 0xa0c   : > { %7620 = vst.msk [vmem:[#allocation2 + $0x61] sm:$0xff] %vm18172_vm11, %v18083_v53  ;;  %vm18183_vm11 = vmmov %vm18166_vm0  ;;  %v7677_v57 = vld [vmem:[#allocation2 + $0xf8] sm:$0xff]  ;;  %v7674_v58 = vld [vmem:[#allocation2 + $0xe0] sm:$0xff]  ;;  %v7719_v31 = vpack.c.bf16 %v7675_v34, %v7675_v34 }
 0xa0d   : > { %7621 = vst.msk [vmem:[#allocation2 + $0x69] sm:$0xff] %vm18173_vm12, %v18085_v38  ;;  %vm18184_vm12 = vmmov %vm18166_vm0  ;;  %v16991_v28 = vpack.c.bf16 %v7677_v57, %v7676_v22  ;;  %v7652_v53 = vld [vmem:[#allocation2 + $0x30] sm:$0xff]  ;;  %v7654_v38 = vld [vmem:[#allocation2 + $0x40] sm:$0x3] }
 0xa0e   : > { %7638 = vst.msk [vmem:[#allocation2 + $0x139] sm:$0xff] %vm18174_vm13, %v7568_v32  ;;  %vm18185_vm13 = vmmov %vm18166_vm0  ;;  %v16993_v32 = vpack.c.bf16 %v7678_v21, %v7678_v21  ;;  %10696 = vmatpush3.bf16.msra.mxu0 %v11278_v44  ;;  %10836 = vmatpush3.bf16.msra.mxu1 %v11278_v44  ;;  %v16999_v50 = vpack.c.bf16 %v7653_v54, %v7652_v53  ;;  %v7649_v42 = vld [vmem:[#allocation2 + $0x18] sm:$0xff]  ;;  %v7650_v11 = vld [vmem:[#allocation2 + $0x20] sm:$0xff]  ;;  %v7852_v26 = vshll.u32 %v7719_v31, 16 }
 0xa0f   : > { %7639 = vst.msk [vmem:[#allocation2 + $0x141] sm:$0xff] %vm18175_vm14, %v7569_v55  ;;  %vm18186_vm14 = vmmov %vm18166_vm0  ;;  %10697 = vmatprep.subr.bf16.mxu0 %v11279_v33  ;;  %10831 = vmatprep.subr.bf16.mxu1 %v11279_v33  ;;  %v8022_v8 = vrot.slane %v16991_v28, 1  ;;  %v17002_v9 = vpack.c.bf16 %v7650_v11, %v7649_v42  ;;  %v7857_v10 = vshrl.u32 %v16991_v28, 16  ;;  %v7679_v35 = vld [vmem:[#allocation2 + $0x108] sm:$0xff]  ;;  %v7680_v16 = vld [vmem:[#allocation2 + $0x110] sm:$0xff]  ;;  %v7859_v3 = vshll.u32 %v16991_v28, 16 }
 0xa10   : > { %7640 = vst.msk [vmem:[#allocation2 + $0x151] sm:$0xff] %vm18176_vm15, %v7570_v6  ;;  %vm18187_vm15 = vmmov %vm18166_vm0  ;;  %v8023_v56 = vrot.slane %v16993_v32, 1  ;;  %v7998_v25 = vrot.slane %v16999_v50, 1  ;;  %v7854_v48 = vrot.slane %v7852_v26, 1  ;;  %v7864_v55 = vshll.u32 %v16993_v32, 16  ;;  %v7682_v4 = vld [vmem:[#allocation2 + $0x120] sm:$0xff] }
 0xa11   : > { %7641 = vst.msk [vmem:[#allocation2 + $0x159] sm:$0xff] %vm18177_vm1, %v7571_v15  ;;  %vm18188_vm1 = vmmov %vm18166_vm0  ;;  %v7673_v15 = vld [vmem:[#allocation2 + $0xd8] sm:$0xff]  ;;  %v7749_v52 = vshrl.u32 %v17002_v9, 16  ;;  %v7751_v61 = vshll.u32 %v17002_v9, 16  ;;  %v7761_v49 = vshrl.u32 %v16999_v50, 16  ;;  %v17027_v41 = vpack.c.bf16 %v7680_v16, %v7679_v35  ;;  %v11282_v16 = vld [vmem:[%s17531_s9 + $0x30] sm:$0xff]  }
 0xa12   : > { %7623 = vst.msk [vmem:[#allocation2 + $0x81] sm:$0xff] %vm18178_vm4, %v18089_v37  ;;  %v16995_v62 = vpack.c.bf16 %v7674_v58, %v7673_v15  ;;  %v7705_v37 = vpack.c.bf16 %v7654_v38, %v7654_v38  ;;  %10698 = vmatpush3.bf16.msra.mxu0 %v11279_v33  ;;  %10837 = vmatpush3.bf16.msra.mxu1 %v11279_v33  ;;  %v7681_v24 = vld [vmem:[#allocation2 + $0x118] sm:$0x3]  ;;  %v7866_v59 = vrot.slane %v7864_v55, 1  ;;  %v7684_v33 = vld [vmem:[#allocation2 + $0x130] sm:$0x3]  ;;  %vm18191_vm4 = vmmov %vm18166_vm0 }
 0xa13   : > { %7624 = vst.msk [vmem:[#allocation2 + $0x91] sm:$0xff] %vm18179_vm5, %v18091_v36  ;;  %v7651_v36 = vld [vmem:[#allocation2 + $0x28] sm:$0x3]  ;;  %10699 = vmatprep.subr.bf16.mxu0 %v11280_v51  ;;  %10832 = vmatprep.subr.bf16.mxu1 %v11280_v51  ;;  %v7753_v13 = vrot.slane %v7751_v61, 1  ;;  %v7723_v44 = vpack.c.bf16 %v7681_v24, %v7681_v24  ;;  %v7869_v15 = vshrl.u32 %v17027_v41, 16  ;;  %v7871_v58 = vshll.u32 %v17027_v41, 16  ;;  %vm18192_vm5 = vmmov %vm18166_vm0 }
 0xa14   : > { %7625 = vst.msk [vmem:[#allocation2 + $0x99] sm:$0xff] %vm18180_vm6, %v18093_v20  ;;  %v8019_v18 = vrot.slane %v16995_v62, 1  ;;  %v8020_v20 = vrot.slane %v7719_v31, 1  ;;  %v7703_v40 = vpack.c.bf16 %v7651_v36, %v7651_v36  ;;  %v7999_v1 = vrot.slane %v7705_v37, 1  ;;  %v7655_v31 = vld [vmem:[#allocation2 + $0x48] sm:$0xff]  ;;  %v7656_v53 = vld [vmem:[#allocation2 + $0x50] sm:$0xff]  ;;  %vm18193_vm6 = vmmov %vm18166_vm0 }
 0xa15   : > { %7642 = vst.msk [vmem:[#allocation2 + $0x169] sm:$0xff] %vm18181_vm9, %v18115_v63  ;;  %v7847_v27 = vshll.u32 %v16995_v62, 16  ;;  %v7763_v63 = vshll.u32 %v16999_v50, 16  ;;  %v7754_v29 = vor.u32 %v7753_v13, %v7749_v52  ;;  %v7876_v34 = vshll.u32 %v7723_v44, 16  ;;  %vm18194_vm9 = vmmov %vm18166_vm0 }
 0xa16   : > { %7643 = vst.msk [vmem:[#allocation2 + $0x171] sm:$0xff] %vm18182_vm10, %v18117_v19  ;;  %v8021_v45 = vsel %vm912_vm3, %v8019_v18, %v8020_v20  ;;  %v8000_v30 = vsel %vm912_vm3, %v7998_v25, %v7999_v1  ;;  %v7756_v7 = vshll.u32 %v7703_v40, 16  ;;  %10700 = vmatpush3.bf16.msra.mxu0 %v11280_v51  ;;  %10838 = vmatpush3.bf16.msra.mxu1 %v11280_v51  ;;  %v7683_v19 = vld [vmem:[#allocation2 + $0x128] sm:$0xff]  ;;  %v7873_v11 = vrot.slane %v7871_v58, 1  ;;  %v7686_v61 = vld [vmem:[#allocation2 + $0x140] sm:$0xff]  ;;  %vm18195_vm10 = vmmov %vm18166_vm0 }
 0xa17   : > { %7644 = vst.msk [vmem:[#allocation2 + $0x181] sm:$0xff] %vm18183_vm11, %v18119_v12  ;;  %8058 = vrot.lane.b32.xlu1 %v8021_v45, %s11729_s23  ;;  %v7849_v46 = vrot.slane %v7847_v27, 1  ;;  %10701 = vmatprep.subr.bf16.mxu0 %v11281_v17  ;;  %v7861_v12 = vrot.slane %v7859_v3, 1  ;;  %v7765_v43 = vrot.slane %v7763_v63, 1  ;;  %v17030_v51 = vpack.c.bf16 %v7683_v19, %v7682_v4  ;;  %v7685_v27 = vld [vmem:[#allocation2 + $0x138] sm:$0xff]  ;;  %v7688_v55 = vld [vmem:[#allocation2 + $0x150] sm:$0xff]  ;;  %vm18196_vm11 = vmmov %vm18166_vm0 }
 0xa18   : > { %7645 = vst.msk [vmem:[#allocation2 + $0x189] sm:$0xff] %vm18184_vm12, %v18121_v5  ;;  %v7758_v0 = vrot.slane %v7756_v7, 1  ;;  %v7768_v5 = vshll.u32 %v7705_v37, 16  ;;  %10833 = vmatprep.subr.bf16.mxu1 %v11281_v17  ;;  %v7725_v38 = vpack.c.bf16 %v7684_v33, %v7684_v33  ;;  %v7657_v37 = vld [vmem:[#allocation2 + $0x58] sm:$0x3]  ;;  %v7878_v36 = vrot.slane %v7876_v34, 1  ;;  %vm18197_vm12 = vmmov %vm18166_vm0 }
 0xa19   : > { %7626 = vst.msk [vmem:[#allocation2 + $0xa9] sm:$0xff] %vm18185_vm13, %v18095_v2  ;;  %v8024_v2 = vsel %vm912_vm3, %v8022_v8, %v8023_v56  ;;  %v7862_v57 = vor.u32 %v7861_v12, %v7857_v10  ;;  %v7766_v32 = vor.u32 %v7765_v43, %v7761_v49  ;;  %v7881_v8 = vshrl.u32 %v17030_v51, 16  ;;  %v7690_v63 = vld [vmem:[#allocation2 + $0x160] sm:$0x3]  ;;  %v7661_v33 = vld [vmem:[#allocation2 + $0x78] sm:$0xff]  ;;  %vm18198_vm13 = vmmov %vm18166_vm0 }
 0xa1a   : > { %7627 = vst.msk [vmem:[#allocation2 + $0xb1] sm:$0xff] %vm18186_vm14, %v18097_v47  ;;  %v7845_v47 = vshrl.u32 %v16995_v62, 16  ;;  %8060 = vrot.lane.b32.xlu0 %v8024_v2, %s11729_s23  ;;  %v7759_v22 = vsel %vm687_vm2, %v7754_v29, %v7758_v0  ;;  %v7770_v21 = vrot.slane %v7768_v5, 1  ;;  %10702 = vmatpush3.bf16.msra.mxu0 %v11281_v17  ;;  %v7883_v56 = vshll.u32 %v17030_v51, 16  ;;  %v7658_v2 = vld [vmem:[#allocation2 + $0x60] sm:$0xff]  ;;  %vm18199_vm14 = vmmov %vm18166_vm0 }
 0xa1b   : > { %7628 = vst.msk [vmem:[#allocation2 + $0xc1] sm:$0xff] %vm18187_vm15, %v18099_v23  ;;  %v7995_v23 = vrot.slane %v17002_v9, 1  ;;  %8044 = vrot.lane.b32.xlu1 %v8000_v30, %s11729_s23  ;;  %10839 = vmatpush3.bf16.msra.mxu1 %v11281_v17  ;;  %v7867_v54 = vsel %vm687_vm2, %v7862_v57, %v7866_v59  ;;  %v7888_v20 = vshll.u32 %v7725_v38, 16  ;;  %v7874_v25 = vor.u32 %v7873_v11, %v7869_v15  ;;  %v7689_v59 = vld [vmem:[#allocation2 + $0x158] sm:$0xff]  ;;  %v7663_v58 = vld [vmem:[#allocation2 + $0x88] sm:$0x3]  ;;  %vm18200_vm15 = vmmov %vm18166_vm0 }
 0xa1c   : > { %7629 = vst.msk [vmem:[#allocation2 + $0xc9] sm:$0xff] %vm18188_vm1, %v18101_v14  ;;  %v7996_v14 = vrot.slane %v7703_v40, 1  ;;  %v7850_v6 = vor.u32 %v7849_v46, %v7845_v47  ;;  %v7771_v42 = vsel %vm687_vm2, %v7766_v32, %v7770_v21  ;;  %v7885_v18 = vrot.slane %v7883_v56, 1  ;;  %10703 = vmatprep.subr.bf16.mxu0 %v11282_v16  ;;  %10834 = vmatprep.subr.bf16.mxu1 %v11282_v16  ;;  %vm18201_vm1 = vmmov %vm18166_vm0 }
 0xa1d   : > { %v17040_v40 = vpack.c.bf16 %v7656_v53, %v7655_v31  ;;  %v8025_v1 = vrot.slane %v17027_v41, 1  ;;  %v8026_v47 = vrot.slane %v7723_v44, 1  ;;  %v17044_v45 = vpack.c.bf16 %v7657_v37, %v7657_v37 }
 0xa1e   : > { %v7997_v60 = vsel %vm912_vm3, %v7995_v23, %v7996_v14  ;;  %v7855_v39 = vsel %vm687_vm2, %v7850_v6, %v7854_v48  ;;  %v7659_v23 = vld [vmem:[#allocation2 + $0x68] sm:$0xff]  ;;  %v7660_v14 = vld [vmem:[#allocation2 + $0x70] sm:$0x3]  ;;  %v7886_v17 = vor.u32 %v7885_v18, %v7881_v8  ;;  %v7890_v30 = vrot.slane %v7888_v20, 1  ;;  %10704 = vmatpush3.bf16.msra.mxu0 %v11282_v16  ;;  %v7666_v18 = vld [vmem:[#allocation2 + $0xa0] sm:$0x3] }
 0xa1f   : > { %8042 = vrot.lane.b32.xlu0 %v7997_v60, %s11729_s23  ;;  %7930 = vrot.lane.b32.xlu1 %v7759_v22, %s11730_s25  ;;  %v8028_v26 = vrot.slane %v17030_v51, 1  ;;  %v8029_v52 = vrot.slane %v7725_v38, 1  ;;  %v7687_v60 = vld [vmem:[#allocation2 + $0x148] sm:$0x3]  ;;  %v7879_v46 = vsel %vm687_vm2, %v7874_v25, %v7878_v36  ;;  %v7773_v7 = vshrl.u32 %v17040_v40, 16  ;;  %v7662_v22 = vld [vmem:[#allocation2 + $0x80] sm:$0xff] }
 0xa20   : > { %v7775_v10 = vshll.u32 %v17040_v40, 16  ;;  %v7780_v35 = vshll.u32 %v17044_v45, 16  ;;  %v7891_v48 = vsel %vm687_vm2, %v7886_v17, %v7890_v30  ;;  %v17056_v13 = vpack.c.bf16 %v7659_v23, %v7658_v2  ;;  %10840 = vmatpush3.bf16.msra.mxu1 %v11282_v16  ;;  %v17100_v17 = vld [vmem:[%s17531_s9 + $0x88] sm:$0xff]  }
 0xa21   : > { %v7709_v3 = vpack.c.bf16 %v7660_v14, %v7660_v14  ;;  %v8027_v24 = vsel %vm912_vm3, %v8025_v1, %v8026_v47  ;;  %v17060_v49 = vpack.c.bf16 %v7686_v61, %v7685_v27  ;;  %v8030_v4 = vsel %vm912_vm3, %v8028_v26, %v8029_v52  ;;  %v7665_v1 = vld [vmem:[#allocation2 + $0x98] sm:$0xff]  ;;  %v17095_v27 = vld [vmem:[%s17531_s9 + $0x28] sm:$0xff]   ;;  %10781 = vmatprep.subr.bf16.mxu0 %v17100_v17 }
 0xa22   : > { %v7777_v6 = vrot.slane %v7775_v10, 1  ;;  %v7782_v0 = vrot.slane %v7780_v35, 1  ;;  %v7785_v19 = vshrl.u32 %v17056_v13, 16  ;;  %v7787_v29 = vshll.u32 %v17056_v13, 16  ;;  %10737 = vmatprep.subr.bf16.mxu1 %v17095_v27 }
 0xa23   : > { %7946 = vrot.lane.b32.xlu0 %v7855_v39, %s11730_s25  ;;  %7932 = vrot.lane.b32.xlu1 %v7771_v42, %s11730_s25  ;;  %v7792_v12 = vshll.u32 %v7709_v3, 16  ;;  %v8001_v39 = vrot.slane %v17040_v40, 1  ;;  %v8002_v43 = vrot.slane %v17044_v45, 1  ;;  %v17068_v44 = vpack.c.bf16 %v7687_v60, %v7687_v60  ;;  %v7664_v42 = vld [vmem:[#allocation2 + $0x90] sm:$0xff]  ;;  %v7691_v60 = vld [vmem:[#allocation2 + $0x168] sm:$0xff] }
 0xa24   : > { %v7778_v5 = vor.u32 %v7777_v6, %v7773_v7  ;;  %v7789_v57 = vrot.slane %v7787_v29, 1  ;;  %v8004_v32 = vrot.slane %v17056_v13, 1  ;;  %v7895_v15 = vshll.u32 %v17060_v49, 16 }
 0xa25   : > { %v7794_v21 = vrot.slane %v7792_v12, 1  ;;  %v8005_v31 = vrot.slane %v7709_v3, 1  ;;  %v7893_v53 = vshrl.u32 %v17060_v49, 16  ;;  %v7900_v56 = vshll.u32 %v17068_v44, 16  ;;  %v7692_v3 = vld [vmem:[#allocation2 + $0x170] sm:$0xff] }
 0xa26   : > { %v7783_v34 = vsel %vm687_vm2, %v7778_v5, %v7782_v0  ;;  %v7790_v38 = vor.u32 %v7789_v57, %v7785_v19  ;;  %v7897_v8 = vrot.slane %v7895_v15, 1  ;;  %v17079_v37 = vpack.c.bf16 %v7690_v63, %v7690_v63  ;;  %v7694_v0 = vld [vmem:[#allocation2 + $0x180] sm:$0xff]  ;;  %v7695_v63 = vld [vmem:[#allocation2 + $0x188] sm:$0xff] }
 0xa27   : > { %7948 = vrot.lane.b32.xlu0 %v7867_v54, %s11730_s25  ;;  %7952 = vrot.lane.b32.xlu1 %v7891_v48, %s11730_s25  ;;  %v17075_v54 = vpack.c.bf16 %v7689_v59, %v7688_v55  ;;  %v17085_v25 = vpack.c.bf16 %v7662_v22, %v7661_v33  ;;  %v8003_v47 = vsel %vm912_vm3, %v8001_v39, %v8002_v43  ;;  %v7902_v26 = vrot.slane %v7900_v56, 1  ;;  %v7693_v55 = vld [vmem:[#allocation2 + $0x178] sm:$0x3]  ;;  %v7696_v56 = vld [vmem:[#allocation2 + $0x190] sm:$0x3] }
 0xa28   : > { %v7795_v20 = vsel %vm687_vm2, %v7790_v38, %v7794_v21  ;;  %v7912_v2 = vshll.u32 %v17079_v37, 16  ;;  %v8006_v45 = vsel %vm912_vm3, %v8004_v32, %v8005_v31  ;;  %v17090_v14 = vpack.c.bf16 %v7663_v58, %v7663_v58  ;;  %v7667_v21 = vld [vmem:[#allocation2 + $0xa8] sm:$0xff]  ;;  %v7668_v32 = vld [vmem:[#allocation2 + $0xb0] sm:$0xff] }
 0xa29   : > { %v7905_v11 = vshrl.u32 %v17075_v54, 16  ;;  %v7907_v36 = vshll.u32 %v17075_v54, 16  ;;  %v7898_v30 = vor.u32 %v7897_v8, %v7893_v53  ;;  %v7799_v61 = vshll.u32 %v17085_v25, 16 }
 0xa2a   : > { %v7914_v52 = vrot.slane %v7912_v2, 1  ;;  %v7797_v7 = vshrl.u32 %v17085_v25, 16  ;;  %v7804_v10 = vshll.u32 %v17090_v14, 16  ;;  %v17106_v35 = vpack.c.bf16 %v7665_v1, %v7664_v42  ;;  %v7669_v42 = vld [vmem:[#allocation2 + $0xb8] sm:$0x3]  ;;  %v7671_v2 = vld [vmem:[#allocation2 + $0xc8] sm:$0xff] }
 0xa2b   : > { %7950 = vrot.lane.b32.xlu0 %v7879_v46, %s11730_s25  ;;  %7934 = vrot.lane.b32.xlu1 %v7783_v34, %s11730_s25  ;;  %v7909_v23 = vrot.slane %v7907_v36, 1  ;;  %v7801_v16 = vrot.slane %v7799_v61, 1  ;;  %v7713_v48 = vpack.c.bf16 %v7666_v18, %v7666_v18  ;;  %v8032_v6 = vrot.slane %v17068_v44, 1 }
 0xa2c   : > { %v7806_v29 = vrot.slane %v7804_v10, 1  ;;  %v7811_v12 = vshll.u32 %v17106_v35, 16  ;;  %v7809_v5 = vshrl.u32 %v17106_v35, 16  ;;  %v17118_v43 = vpack.c.bf16 %v7692_v3, %v7691_v60  ;;  %v7672_v10 = vld [vmem:[#allocation2 + $0xd0] sm:$0x3] }
 0xa2d   : > { %v7910_v46 = vor.u32 %v7909_v23, %v7905_v11  ;;  %v7802_v59 = vor.u32 %v7801_v16, %v7797_v7  ;;  %v7816_v39 = vshll.u32 %v7713_v48, 16  ;;  %v8034_v44 = vrot.slane %v17075_v54, 1 }
 0xa2e   : > { %v7813_v33 = vrot.slane %v7811_v12, 1  ;;  %v8035_v22 = vrot.slane %v17079_v37, 1  ;;  %v7731_v57 = vpack.c.bf16 %v7693_v55, %v7693_v55  ;;  %v7919_v58 = vshll.u32 %v17118_v43, 16 }
 0xa2f   : > { %8062 = vrot.lane.b32.xlu0 %v8027_v24, %s11729_s23  ;;  %7936 = vrot.lane.b32.xlu1 %v7795_v20, %s11730_s25  ;;  %v8031_v24 = vrot.slane %v17060_v49, 1  ;;  %v7915_v19 = vsel %vm687_vm2, %v7910_v46, %v7914_v52  ;;  %v17126_v34 = vpack.c.bf16 %v7695_v63, %v7694_v0  ;;  %v7807_v31 = vsel %vm687_vm2, %v7802_v59, %v7806_v29  ;;  %v7670_v20 = vld [vmem:[#allocation2 + $0xc0] sm:$0xff] }
 0xa30   : > { %v7814_v53 = vor.u32 %v7813_v33, %v7809_v5  ;;  %v7818_v38 = vrot.slane %v7816_v39, 1  ;;  %v8007_v8 = vrot.slane %v17085_v25, 1  ;;  %v8008_v37 = vrot.slane %v17090_v14, 1 }
 0xa31   : > { %v8033_v15 = vsel %vm912_vm3, %v8031_v24, %v8032_v6  ;;  %v8010_v11 = vrot.slane %v17106_v35, 1  ;;  %v8011_v36 = vrot.slane %v7713_v48, 1  ;;  %v17132_v18 = vpack.c.bf16 %v7668_v32, %v7667_v21  ;;  %v7648_v32 = vld [vmem:[#allocation2 + $0x10] sm:$0x3] }
 0xa32   : > { %v8036_v1 = vsel %vm912_vm3, %v8034_v44, %v8035_v22  ;;  %v7921_v23 = vrot.slane %v7919_v58, 1  ;;  %v8140_v14 = vshll.u32 %v17126_v34, 16  ;;  %v7819_v52 = vsel %vm687_vm2, %v7814_v53, %v7818_v38  ;;  %v7697_v38 = vld [vmem:[#allocation2 + $0x198] sm:$0xff] }
 0xa33   : > { %8064 = vrot.lane.b32.xlu0 %v8030_v4, %s11729_s23  ;;  %8048 = vrot.lane.b32.xlu1 %v8006_v45, %s11729_s23  ;;  %v7903_v4 = vsel %vm687_vm2, %v7898_v30, %v7902_v26  ;;  %v7924_v45 = vshll.u32 %v7731_v57, 16  ;;  %v7733_v30 = vpack.c.bf16 %v7696_v56, %v7696_v56  ;;  %v17139_v26 = vpack.c.bf16 %v7669_v42, %v7669_v42 }
 0xa34   : > { %v7823_v61 = vshll.u32 %v17132_v18, 16  ;;  %v17143_v60 = vpack.c.bf16 %v7671_v2, %v7670_v20  ;;  %v8009_v46 = vsel %vm912_vm3, %v8007_v8, %v8008_v37  ;;  %v8012_v7 = vsel %vm912_vm3, %v8010_v11, %v8011_v36  ;;  %v7698_v8 = vld [vmem:[#allocation2 + $0x1a0] sm:$0xff] }
 0xa35   : > { %v7926_v16 = vrot.slane %v7924_v45, 1  ;;  %v8037_v48 = vrot.slane %v17118_v43, 1  ;;  %v8038_v3 = vrot.slane %v7731_v57, 1  ;;  %v8138_v55 = vshrl.u32 %v17126_v34, 16  ;;  %v7699_v45 = vld [vmem:[#allocation2 + $0x1a8] sm:$0x3] }
 0xa36   : > { %v8142_v6 = vrot.slane %v8140_v14, 1  ;;  %v8145_v0 = vshll.u32 %v7733_v30, 16  ;;  %v7828_v63 = vshll.u32 %v17139_v26, 16  ;;  %v7821_v29 = vshrl.u32 %v17132_v18, 16 }
 0xa37   : > { %8046 = vrot.lane.b32.xlu0 %v8003_v47, %s11729_s23  ;;  %7956 = vrot.lane.b32.xlu1 %v7915_v19, %s11730_s25  ;;  %v7917_v47 = vshrl.u32 %v17118_v43, 16  ;;  %v7647_v19 = vld [vmem:[#allocation2 + $0x8] sm:$0xff]  ;;  %v7825_v12 = vrot.slane %v7823_v61, 1  ;;  %v7717_v59 = vpack.c.bf16 %v7672_v10, %v7672_v10  ;;  %v7835_v5 = vshll.u32 %v17143_v60, 16 }
 0xa38   : > { %v8039_v39 = vsel %vm912_vm3, %v8037_v48, %v8038_v3  ;;  %v8143_v22 = vor.u32 %v8142_v6, %v8138_v55  ;;  %v8147_v57 = vrot.slane %v8145_v0, 1  ;;  %v7830_v21 = vrot.slane %v7828_v63, 1 }
 0xa39   : > { %v7922_v24 = vor.u32 %v7921_v23, %v7917_v47  ;;  %v7833_v58 = vshrl.u32 %v17143_v60, 16  ;;  %v7840_v53 = vshll.u32 %v7717_v59, 16  ;;  %v8153_v56 = vrot.slane %v17126_v34, 1 }
 0xa3a   : > { %v8154_v42 = vrot.slane %v7733_v30, 1  ;;  %v7701_v37 = vpack.c.bf16 %v7648_v32, %v7648_v32  ;;  %v8148_v36 = vsel %vm687_vm2, %v8143_v22, %v8147_v57  ;;  %v17166_v20 = vpack.c.bf16 %v7698_v8, %v7697_v38 }
 0xa3b   : > { %7954 = vrot.lane.b32.xlu0 %v7903_v4, %s11730_s25  ;;  %7938 = vrot.lane.b32.xlu1 %v7807_v31, %s11730_s25  ;;  %v7646_v4 = vld [vmem:[#allocation2] sm:$0xff]  ;;  %v7927_v44 = vsel %vm687_vm2, %v7922_v24, %v7926_v16  ;;  %v7837_v31 = vrot.slane %v7835_v5, 1  ;;  %v7842_v47 = vrot.slane %v7840_v53, 1  ;;  %v8013_v61 = vrot.slane %v17132_v18, 1 }
 0xa3c   : > { %v17156_v33 = vpack.c.bf16 %v7647_v19, %v7646_v4  ;;  %v8155_v23 = vsel %vm912_vm3, %v8153_v56, %v8154_v42  ;;  %v8594_v10 = vshll.u32 %v17166_v20, 16  ;;  %v8016_v48 = vrot.slane %v17143_v60, 1 }
 0xa3d   : > { %v8017_v3 = vrot.slane %v7717_v59, 1  ;;  %v8592_v0 = vshrl.u32 %v17166_v20, 16 }
 0xa3e   : > { %v7739_v11 = vshll.u32 %v17156_v33, 16  ;;  %v7737_v30 = vshrl.u32 %v17156_v33, 16  ;;  %v8596_v63 = vrot.slane %v8594_v10, 1  ;;  %v7992_v19 = vrot.slane %v17156_v33, 1 }
 0xa3f   : > { %8066 = vrot.lane.b32.xlu0 %v8033_v15, %s11729_s23  ;;  %7940 = vrot.lane.b32.xlu1 %v7819_v52, %s11730_s25  ;;  %v7826_v15 = vor.u32 %v7825_v12, %v7821_v29  ;;  %v7744_v52 = vshll.u32 %v7701_v37, 16  ;;  %v8018_v4 = vsel %vm912_vm3, %v8016_v48, %v8017_v3  ;;  %v7993_v29 = vrot.slane %v7701_v37, 1  ;;  %v11291_v48 = vld [vmem:[%s17531_s9 + $0x8] sm:$0xff]  }
 0xa40   : > { %v7741_v14 = vrot.slane %v7739_v11, 1  ;;  %v8597_v59 = vor.u32 %v8596_v63, %v8592_v0  ;;  %v11293_v63 = vld [vmem:[%s17531_s9] sm:$0xff]  }
 0xa41   : > { %v7831_v2 = vsel %vm687_vm2, %v7826_v15, %v7830_v21  ;;  %v7746_v24 = vrot.slane %v7744_v52, 1 }
 0xa42   : > { %v7742_v55 = vor.u32 %v7741_v14, %v7737_v30  ;;  %v11288_v30 = vld [vmem:[%s17531_s9 + $0x78] sm:$0xff]  }
 0xa43   : > { %8068 = vrot.lane.b32.xlu0 %v8036_v1, %s11729_s23  ;;  %8052 = vrot.lane.b32.xlu1 %v8012_v7, %s11729_s23  ;;  %v7838_v1 = vor.u32 %v7837_v31, %v7833_v58  ;;  %v7735_v7 = vpack.c.bf16 %v7699_v45, %v7699_v45 }
 0xa44   : > { %v7747_v12 = vsel %vm687_vm2, %v7742_v55, %v7746_v24 }
 0xa45   : > { %v7843_v16 = vsel %vm687_vm2, %v7838_v1, %v7842_v47  ;;  %v8608_v22 = vrot.slane %v7735_v7, 1  ;;  %v11286_v47 = vld [vmem:[%s17531_s9 + $0x80] sm:$0xff]  }
 0xa47   : > { %8050 = vrot.lane.b32.xlu0 %v8009_v46, %s11729_s23  ;;  %8070 = vrot.lane.b32.xlu1 %v8039_v39, %s11729_s23  ;;  %v8014_v46 = vrot.slane %v17139_v26, 1  ;;  %v8599_v26 = vshll.u32 %v7735_v7, 16  ;;  %v7994_v39 = vsel %vm912_vm3, %v7992_v19, %v7993_v29 }
 0xa49   : > { %v8015_v6 = vsel %vm912_vm3, %v8013_v61, %v8014_v46  ;;  %v8601_v5 = vrot.slane %v8599_v26, 1 }
 0xa4b   : > { %7958 = vrot.lane.b32.xlu0 %v7927_v44, %s11730_s25  ;;  %7942 = vrot.lane.b32.xlu1 %v7831_v2, %s11730_s25  ;;  %v8607_v44 = vrot.slane %v17166_v20, 1  ;;  %v8602_v57 = vsel %vm687_vm2, %v8597_v59, %v8601_v5  ;;  %vm18189_vm2 = vmmov %vm18166_vm0  ;;  %v11285_v2 = vld [vmem:[%s17531_s9 + $0x20] sm:$0xff]  }
 0xa4d   : > { %v8609_v21 = vsel %vm912_vm3, %v8607_v44, %v8608_v22  ;;  %vm18190_vm3 = vmmov %vm18166_vm0 }
 0xa4f   : > { %8149 = vrot.lane.b32.xlu0 %v8148_v36, %s11730_s25  ;;  %7944 = vrot.lane.b32.xlu1 %v7843_v16, %s11730_s25 }
 0xa53   : > { %8156 = vrot.lane.b32.xlu0 %v8155_v23, %s11729_s23  ;;  %8056 = vrot.lane.b32.xlu1 %v8018_v4, %s11729_s23 }
 0xa57   : > { %8054 = vrot.lane.b32.xlu0 %v8015_v6, %s11729_s23  ;;  %8040 = vrot.lane.b32.xlu1 %v7994_v39, %s11729_s23 }
 0xa5b   : > { %7928 = vrot.lane.b32.xlu0 %v7747_v12, %s11730_s25  ;;  %8610 = vrot.lane.b32.xlu1 %v8609_v21, %s11729_s23 }
 0xa5f   : > { %8603 = vrot.lane.b32.xlu0 %v8602_v57, %s11730_s25 }
 0xa89   : > { %v8059_v15 = vpop.permute.xlu1 %8058 }
 0xa8c   : > { %v8061_v32 = vpop.permute.xlu0 %8060 }
 0xa8d   : > { %v8045_v31 = vpop.permute.xlu1 %8044 }
 0xa91   : > { %v8043_v58 = vpop.permute.xlu0 %8042  ;;  %v7931_v8 = vpop.permute.xlu1 %7930 }
 0xa92   : > { %v8075_v42 = vsel %vm18189_vm2, %v17002_v9, %v7931_v8  ;;  %vm18202_vm2 = vmmov %vm18166_vm0 }
 0xa93   : > { %v17205_v37 = vsel %vm5202_vm7, %v8075_v42, %v8043_v58 }
 0xa94   : > { %10705 = vmatprep.mubr.msk.bf16.mxu0 %vm5296_vm8, %v17205_v37 }
 0xa95   : > { %v7947_v53 = vpop.permute.xlu0 %7946  ;;  %v7933_v36 = vpop.permute.xlu1 %7932 }
 0xa96   : > { %v8091_v38 = vsel %vm18166_vm0, %v16995_v62, %v7947_v53  ;;  %v8077_v1 = vsel %vm18191_vm4, %v16999_v50, %v7933_v36  ;;  %v11287_v50 = vld [vmem:[%s17531_s9 + $0x18] sm:$0xff]   ;;  %vm18204_vm4 = vmmov %vm18166_vm0 }
 0xa97   : > { %v17198_v56 = vsel %vm5202_vm7, %v8091_v38, %v8059_v15  ;;  %v17223_v45 = vsel %vm5202_vm7, %v8077_v1, %v8045_v31 }
 0xa98   : > { %10721 = vmatprep.mubr.msk.bf16.mxu1 %vm5296_vm8, %v17198_v56  ;;  %10706 = vmatmul.mubr.msk.bf16.vlgmr.msra.gmra.mxu0 %vm5296_vm8, %v17223_v45 }
 0xa99   : > { %v7949_v11 = vpop.permute.xlu0 %7948  ;;  %v7953_v23 = vpop.permute.xlu1 %7952  ;;  %10782 = vmatpush3.bf16.msra.mxu0 %v17100_v17  ;;  %v11289_v17 = vld [vmem:[%s17531_s9 + $0x10] sm:$0xff]  }
 0xa9a   : > { %v8093_v62 = vsel %vm18190_vm3, %v16991_v28, %v7949_v11  ;;  %10783 = vmatprep.subr.bf16.mxu0 %v11286_v47  ;;  %v8097_v46 = vsel %vm18193_vm6, %v17030_v51, %v7953_v23  ;;  %v11292_v51 = vld [vmem:[%s17531_s9 + $0x68] sm:$0xff]   ;;  %vm18203_vm3 = vmmov %vm18166_vm0 }
 0xa9b   : > { %v17215_v9 = vsel %vm5202_vm7, %v8093_v62, %v8061_v32 }
 0xa9c   : > { %10722 = vmatmul.mubr.msk.bf16.vlgmr.msra.gmra.mxu1 %vm5296_vm8, %v17215_v9 }
 0xa9d   : > { %v7951_v28 = vpop.permute.xlu0 %7950  ;;  %10738 = vmatpush3.bf16.msra.mxu1 %v17095_v27  ;;  %v7935_v61 = vpop.permute.xlu1 %7934  ;;  %10784 = vmatpush3.bf16.msra.mxu0 %v11286_v47 }
 0xa9e   : > { %10739 = vmatprep.subr.bf16.mxu1 %v11285_v2  ;;  %v8095_v14 = vsel %vm18192_vm5, %v17027_v41, %v7951_v28  ;;  %10785 = vmatprep.subr.bf16.mxu0 %v11288_v30  ;;  %v11290_v41 = vld [vmem:[%s17531_s9 + $0x70] sm:$0xff]   ;;  %v8079_v3 = vsel %vm18194_vm9, %v17040_v40, %v7935_v61  ;;  %v11294_v40 = vld [vmem:[%s17531_s9 + $0x60] sm:$0xff]  }
 0xaa1   : > { %v8063_v52 = vpop.permute.xlu0 %8062  ;;  %10740 = vmatpush3.bf16.msra.mxu1 %v11285_v2  ;;  %v7937_v16 = vpop.permute.xlu1 %7936  ;;  %10786 = vmatpush3.bf16.msra.mxu0 %v11288_v30 }
 0xaa2   : > { %v17240_v27 = vsel %vm5202_vm7, %v8095_v14, %v8063_v52  ;;  %10741 = vmatprep.subr.bf16.mxu1 %v11287_v50  ;;  %10787 = vmatprep.subr.bf16.mxu0 %v11290_v41  ;;  %v8081_v24 = vsel %vm18195_vm10, %v17056_v13, %v7937_v16 }
 0xaa3   : > { %10725 = vmatprep.mubr.msk.bf16.mxu1 %vm5296_vm8, %v17240_v27 }
 0xaa5   : > { %v8065_v7 = vpop.permute.xlu0 %8064  ;;  %10742 = vmatpush3.bf16.msra.mxu1 %v11287_v50  ;;  %v8049_v0 = vpop.permute.xlu1 %8048  ;;  %10788 = vmatpush3.bf16.msra.mxu0 %v11290_v41 }
 0xaa6   : > { %v17253_v10 = vsel %vm5202_vm7, %v8097_v46, %v8065_v7  ;;  %10743 = vmatprep.subr.bf16.mxu1 %v11289_v17  ;;  %v8114_v26 = vsel %vm5202_vm7, %v8081_v24, %v8049_v0  ;;  %10789 = vmatprep.subr.bf16.mxu0 %v11292_v51 }
 0xaa7   : > { %10726 = vmatmul.mubr.msk.bf16.gmra.mxu1 %vm5296_vm8, %v17253_v10 }
 0xaa9   : > { %v8047_v55 = vpop.permute.xlu0 %8046  ;;  %10744 = vmatpush3.bf16.msra.mxu1 %v11289_v17  ;;  %v7957_v4 = vpop.permute.xlu1 %7956  ;;  %10790 = vmatpush3.bf16.msra.mxu0 %v11292_v51 }
 0xaaa   : > { %v17268_v6 = vsel %vm5202_vm7, %v8079_v3, %v8047_v55  ;;  %10745 = vmatprep.subr.bf16.mxu1 %v11291_v48  ;;  %10791 = vmatprep.subr.bf16.mxu0 %v11294_v40  ;;  %v8101_v5 = vsel %vm18197_vm12, %v17075_v54, %v7957_v4 }
 0xaab   : > { %10709 = vmatprep.mubr.msk.bf16.mxu0 %vm5296_vm8, %v17268_v6 }
 0xaac   : > { %10710 = vmatmul.mubr.msk.bf16.gmra.mxu0 %vm5296_vm8, %v8114_v26 }
 0xaad   : > { %v7955_v13 = vpop.permute.xlu0 %7954  ;;  %10746 = vmatpush3.bf16.msra.mxu1 %v11291_v48  ;;  %v7939_v59 = vpop.permute.xlu1 %7938  ;;  %10792 = vmatpush3.bf16.msra.mxu0 %v11294_v40 }
 0xaae   : > { %10747 = vmatprep.subr.bf16.mxu1 %v11293_v63  ;;  %v8099_v19 = vsel %vm18196_vm11, %v17060_v49, %v7955_v13  ;;  %v8083_v49 = vsel %vm18198_vm13, %v17085_v25, %v7939_v59 }
 0xab1   : > { %v8067_v29 = vpop.permute.xlu0 %8066  ;;  %10748 = vmatpush3.bf16.msra.mxu1 %v11293_v63  ;;  %v7941_v22 = vpop.permute.xlu1 %7940 }
 0xab2   : > { %v17283_v12 = vsel %vm5202_vm7, %v8099_v19, %v8067_v29  ;;  %v8085_v21 = vsel %vm18199_vm14, %v17106_v35, %v7941_v22 }
 0xab3   : > { %10729 = vmatprep.mubr.msk.bf16.mxu1 %vm5296_vm8, %v17283_v12 }
 0xab5   : > { %v8069_v39 = vpop.permute.xlu0 %8068  ;;  %v8053_v15 = vpop.permute.xlu1 %8052 }
 0xab6   : > { %v8134_v44 = vsel %vm5202_vm7, %v8101_v5, %v8069_v39  ;;  %v8118_v58 = vsel %vm5202_vm7, %v8085_v21, %v8053_v15 }
 0xab7   : > { %10730 = vmatmul.mubr.msk.bf16.gmra.mxu1 %vm5296_vm8, %v8134_v44 }
 0xab9   : > { %v8051_v57 = vpop.permute.xlu0 %8050  ;;  %v8071_v53 = vpop.permute.xlu1 %8070 }
 0xaba   : > { %v8116_v32 = vsel %vm5202_vm7, %v8083_v49, %v8051_v57 }
 0xabb   : > { %10713 = vmatprep.mubr.msk.bf16.mxu0 %vm5296_vm8, %v8116_v32 }
 0xabc   : > { %10714 = vmatmul.mubr.msk.bf16.gmra.mxu0 %vm5296_vm8, %v8118_v58 }
 0xabd   : > { %v7959_v54 = vpop.permute.xlu0 %7958  ;;  %v7943_v35 = vpop.permute.xlu1 %7942 }
 0xabe   : > { %v8103_v31 = vsel %vm18200_vm15, %v17118_v43, %v7959_v54  ;;  %v8087_v36 = vsel %vm18166_vm0, %v17132_v18, %v7943_v35 }
 0xabf   : > { %v8136_v25 = vsel %vm5202_vm7, %v8103_v31, %v8071_v53  ;;  %v17420_v31 = vld [vmem:[#allocation10] ss:$0 sm:$0xff] }
 0xac0   : > { %10733 = vmatprep.mubr.msk.bf16.mxu1 %vm5296_vm8, %v8136_v25 }
 0xac1   : > { %v8150_v38 = vpop.permute.xlu0 %8149  ;;  %v7945_v62 = vpop.permute.xlu1 %7944 }
 0xac2   : > { %v8159_v8 = vsel %vm18201_vm1, %v17126_v34, %v8150_v38  ;;  %v8089_v2 = vsel %vm18202_vm2, %v17143_v60, %v7945_v62 }
 0xac5   : > { %v8157_v42 = vpop.permute.xlu0 %8156  ;;  %v8057_v47 = vpop.permute.xlu1 %8056 }
 0xac6   : > { %v8161_v11 = vsel %vm5202_vm7, %v8159_v8, %v8157_v42  ;;  %v8122_v28 = vsel %vm5202_vm7, %v8089_v2, %v8057_v47 }
 0xac7   : > { %10734 = vmatmul.mubr.msk.bf16.gmra.mxu1 %vm5296_vm8, %v8161_v11 }
 0xac9   : > { %v8055_v43 = vpop.permute.xlu0 %8054  ;;  %v8041_v23 = vpop.permute.xlu1 %8040 }
 0xaca   : > { %v8120_v1 = vsel %vm5202_vm7, %v8087_v36, %v8055_v43 }
 0xacb   : > { %10717 = vmatprep.mubr.msk.bf16.mxu0 %vm5296_vm8, %v8120_v1 }
 0xacc   : > { %10718 = vmatmul.mubr.msk.bf16.gmra.mxu0 %vm5296_vm8, %v8122_v28 }
 0xacd   : > { %v7929_v34 = vpop.permute.xlu0 %7928  ;;  %10793 = vmatprep.mubr.msk.bf16.mxu0 %vm5296_vm8, %v17223_v45 }
 0xace   : > { %v8073_v18 = vsel %vm18203_vm3, %v17156_v33, %v7929_v34 }
 0xacf   : > { %v8106_v50 = vsel %vm5202_vm7, %v8073_v18, %v8041_v23 }
 0xad0   : > { %10749 = vmatprep.mubr.msk.bf16.mxu1 %vm5296_vm8, %v8106_v50 }
 0xad1   : > { %10750 = vmatmul.mubr.msk.bf16.vlgmr.msra.gmra.mxu1 %vm5296_vm8, %v17205_v37  ;;  %v8604_v60 = vpop.permute.xlu0 %8603 }
 0xad2   : > { %10753 = vmatprep.mubr.msk.bf16.mxu1 %vm5296_vm8, %v17223_v45  ;;  %v8613_v33 = vsel %vm18204_vm4, %v17166_v20, %v8604_v60 }
 0xad4   : > { %10794 = vmatmul.mubr.msk.bf16.vlgmr.msra.gmra.mxu0 %vm5296_vm8, %v17268_v6 }
 0xad5   : > { %10797 = vmatprep.mubr.msk.bf16.mxu0 %vm5296_vm8, %v8114_v26 }
 0xad9   : > { %10754 = vmatmul.mubr.msk.bf16.gmra.mxu1 %vm5296_vm8, %v17268_v6 }
 0xada   : > { %10757 = vmatprep.mubr.msk.bf16.mxu1 %vm5296_vm8, %v8114_v26 }
 0xadc   : > { %10798 = vmatmul.mubr.msk.bf16.gmra.mxu0 %vm5296_vm8, %v8116_v32 }
 0xadd   : > { %10801 = vmatprep.mubr.msk.bf16.mxu0 %vm5296_vm8, %v8118_v58 }
 0xae1   : > { %10758 = vmatmul.mubr.msk.bf16.gmra.mxu1 %vm5296_vm8, %v8116_v32 }
 0xae2   : > { %10761 = vmatprep.mubr.msk.bf16.mxu1 %vm5296_vm8, %v8118_v58 }
 0xae4   : > { %10802 = vmatmul.mubr.msk.bf16.gmra.mxu0 %vm5296_vm8, %v8120_v1 }
 0xae5   : > { %10805 = vmatprep.mubr.msk.bf16.mxu0 %vm5296_vm8, %v8122_v28 }
 0xae9   : > { %10762 = vmatmul.mubr.msk.bf16.gmra.mxu1 %vm5296_vm8, %v8120_v1 }
 0xaea   : > { %10765 = vmatprep.mubr.msk.bf16.mxu1 %vm5296_vm8, %v8122_v28 }
 0xaec   : > { %10806 = vmatmul.mubr.msk.bf16.gmra.mxu0 %vm5296_vm8, %v17198_v56 }
 0xaed   : > { %10809 = vmatprep.mubr.msk.bf16.mxu0 %vm5296_vm8, %v17215_v9 }
 0xaf1   : > { %10766 = vmatmul.mubr.msk.bf16.gmra.mxu1 %vm5296_vm8, %v17198_v56  ;;  %v8611_v56 = vpop.permute.xlu1 %8610 }
 0xaf2   : > { %10769 = vmatprep.mubr.msk.bf16.mxu1 %vm5296_vm8, %v17215_v9  ;;  %v8615_v37 = vsel %vm5202_vm7, %v8613_v33, %v8611_v56 }
 0xaf4   : > { %10810 = vmatmul.mubr.msk.bf16.gmra.mxu0 %vm5296_vm8, %v17240_v27 }
 0xaf5   : > { %10813 = vmatprep.mubr.msk.bf16.mxu0 %vm5296_vm8, %v17253_v10 }
 0xaf9   : > { %10770 = vmatmul.mubr.msk.bf16.gmra.mxu1 %vm5296_vm8, %v17240_v27 }
 0xafa   : > { %10773 = vmatprep.mubr.msk.bf16.mxu1 %vm5296_vm8, %v17253_v10 }
 0xafc   : > { %10814 = vmatmul.mubr.msk.bf16.gmra.mxu0 %vm5296_vm8, %v17283_v12 }
 0xafd   : > { %10817 = vmatprep.mubr.msk.bf16.mxu0 %vm5296_vm8, %v8134_v44 }
 0xb01   : > { %10774 = vmatmul.mubr.msk.bf16.gmra.mxu1 %vm5296_vm8, %v17283_v12 }
 0xb02   : > { %10777 = vmatprep.mubr.msk.bf16.mxu1 %vm5296_vm8, %v8134_v44 }
 0xb04   : > { %10818 = vmatmul.mubr.msk.bf16.gmra.mxu0 %vm5296_vm8, %v8136_v25 }
 0xb05   : > { %10821 = vmatprep.mubr.msk.bf16.mxu0 %vm5296_vm8, %v8161_v11 }
 0xb09   : > { %10778 = vmatmul.mubr.msk.bf16.gmra.mxu1 %vm5296_vm8, %v8136_v25 }
 0xb0c   : > { %10822 = vmatmul.mubr.msk.bf16.gmra.mxu0 %vm5296_vm8, %v8615_v37 }
 0xb58   : > { %v10707_v30 = vpop.f32.mrf.mxu0 }
 0xb5a   : > { %v8265_v52 = vpop.f32.mrf.mxu0 }
 0xb5c   : > { %v17368_v9 = vpop.f32.mrf.mxu1  ;;  %v10708_v61 = vpop.f32.mrf.mxu0 }
 0xb5e   : > { %v17370_v45 = vpop.f32.mrf.mxu1  ;;  %v8268_v20 = vpop.f32.mrf.mxu0 }
 0xb60   : > { %v17372_v14 = vpop.f32.mrf.mxu1 }
 0xb62   : > { %v17374_v27 = vpop.f32.mrf.mxu1 }
 0xb67   : > { %v17376_v17 = vpop.f32.mrf.mxu1 }
 0xb69   : > { %v17378_v41 = vpop.f32.mrf.mxu1 }
 0xb6b   : > { %v17382_v7 = vpop.f32.mrf.mxu1 }
 0xb6c   : > { %v17380_v46 = vpop.f32.mrf.mxu0 }
 0xb6d   : > { %v17384_v16 = vpop.f32.mrf.mxu1 }
 0xb6e   : > { %v8281_v10 = vpop.f32.mrf.mxu0 }
 0xb70   : > { %v17386_v48 = vpop.f32.mrf.mxu0 }
 0xb72   : > { %v8284_v3 = vpop.f32.mrf.mxu0 }
 0xb77   : > { %v17388_v51 = vpop.f32.mrf.mxu1 }
 0xb79   : > { %v17390_v55 = vpop.f32.mrf.mxu1 }
 0xb7b   : > { %v17394_v6 = vpop.f32.mrf.mxu1 }
 0xb7c   : > { %v17392_v24 = vpop.f32.mrf.mxu0 }
 0xb7d   : > { %v17398_v63 = vpop.f32.mrf.mxu1 }
 0xb7e   : > { %v17396_v0 = vpop.f32.mrf.mxu0 }
 0xb80   : > { %v17400_v26 = vpop.f32.mrf.mxu0 }
 0xb82   : > { %v17406_v4 = vpop.f32.mrf.mxu0 }
 0xb87   : > { %v17402_v40 = vpop.f32.mrf.mxu1 }
 0xb89   : > { %v17404_v13 = vpop.f32.mrf.mxu1 }
 0xb8b   : > { %v17408_v19 = vpop.f32.mrf.mxu1 }
 0xb8c   : > { %v17410_v29 = vpop.f32.mrf.mxu0 }
 0xb8d   : > { %v17414_v59 = vpop.f32.mrf.mxu1 }
 0xb8e   : > { %v17412_v12 = vpop.f32.mrf.mxu0 }
 0xb90   : > { %v17416_v5 = vpop.f32.mrf.mxu0 }
 0xb91   : > { %v10751_v39 = vpop.f32.mrf.mxu1 }
 0xb92   : > { %v17418_v44 = vpop.f32.mrf.mxu0  ;;  %v8473_v49 = vadd.f32 %v10751_v39, %v10707_v30 }
 0xb93   : > { %v8464_v22 = vpop.f32.mrf.mxu1 }
 0xb94   : > { %v8465_v57 = vadd.f32 %v8464_v22, %v8265_v52  ;;  %v10795_v21 = vpop.f32.mrf.mxu0 }
 0xb95   : > { %v10752_v32 = vpop.f32.mrf.mxu1  ;;  %v8817_v53 = vadd.f32 %v10795_v21, %v8473_v49 }
 0xb96   : > { %v8688_v15 = vpop.f32.mrf.mxu0  ;;  %v8476_v35 = vadd.f32 %v10752_v32, %v10708_v61 }
 0xb97   : > { %v8815_v58 = vadd.f32 %v8688_v15, %v8465_v57  ;;  %v8467_v54 = vpop.f32.mrf.mxu1  ;;  %v8855_v2 = vadd.f32 %v17420_v31, %v8817_v53 }
 0xb98   : > { %v8468_v25 = vadd.f32 %v8467_v54, %v8268_v20  ;;  %v10796_v38 = vpop.f32.mrf.mxu0 }
 0xb99   : > { %v10755_v8 = vpop.f32.mrf.mxu1  ;;  %v8853_v42 = vadd.f32 %v17420_v31, %v8815_v58  ;;  %v8818_v47 = vadd.f32 %v10796_v38, %v8476_v35  ;;  %v8887_v56 = vmax.f32 %v8855_v2, 0.0 }
 0xb9a   : > { %v8691_v11 = vpop.f32.mrf.mxu0  ;;  %v8489_v57 = vadd.f32 %v10755_v8, %v17380_v46 }
 0xb9b   : > { %v8816_v62 = vadd.f32 %v8691_v11, %v8468_v25  ;;  %v8480_v36 = vpop.f32.mrf.mxu1  ;;  %v8885_v43 = vmax.f32 %v8853_v42, 0.0  ;;  %v8856_v30 = vadd.f32 %v17420_v31, %v8818_v47  ;;  %v8919_v21 = vmin.f32 %v8887_v56, 1.0 }
 0xb9c   : > { %v10799_v1 = vpop.f32.mrf.mxu0  ;;  %v8481_v34 = vadd.f32 %v8480_v36, %v8281_v10 }
 0xb9d   : > { %v8854_v28 = vadd.f32 %v17420_v31, %v8816_v62  ;;  %v10756_v18 = vpop.f32.mrf.mxu1  ;;  %v8917_v23 = vmin.f32 %v8885_v43, 1.0  ;;  %v8888_v32 = vmax.f32 %v8856_v30, 0.0  ;;  %v8821_v38 = vadd.f32 %v10799_v1, %v8489_v57 }
 0xb9e   : > { %v8704_v50 = vpop.f32.mrf.mxu0 }
 0xb9f   : > { %v8886_v60 = vmax.f32 %v8854_v28, 0.0  ;;  %v8483_v33 = vpop.f32.mrf.mxu1  ;;  %8949 = vxpose.xlu0.b32.start [1/16] (narrow) %v8917_v23, 48  ;;  %v8819_v61 = vadd.f32 %v8704_v50, %v8481_v34  ;;  %v8920_v42 = vmin.f32 %v8888_v32, 1.0  ;;  %v8859_v47 = vadd.f32 %v17420_v31, %v8821_v38 }
 0xba0   : > { %v10800_v37 = vpop.f32.mrf.mxu0  ;;  %v8484_v20 = vadd.f32 %v8483_v33, %v8284_v3  ;;  %v8492_v3 = vadd.f32 %v10756_v18, %v17386_v48 }
 0xba1   : > { %v8918_v52 = vmin.f32 %v8886_v60, 1.0  ;;  %v10759_v39 = vpop.f32.mrf.mxu1  ;;  %v8857_v15 = vadd.f32 %v17420_v31, %v8819_v61  ;;  %v8891_v56 = vmax.f32 %v8859_v47, 0.0 }
 0xba2   : > { %v8707_v22 = vpop.f32.mrf.mxu0  ;;  %v8822_v1 = vadd.f32 %v10800_v37, %v8492_v3  ;;  %v8505_v37 = vadd.f32 %v10759_v39, %v17392_v24 }
 0xba3   : > { %v8496_v49 = vpop.f32.mrf.mxu1  ;;  %8950 = vxpose.xlu0.b32.cont [2/16] (narrow) %v8918_v52, 48  ;;  %v8820_v58 = vadd.f32 %v8707_v22, %v8484_v20  ;;  %v8889_v11 = vmax.f32 %v8857_v15, 0.0  ;;  %v8923_v32 = vmin.f32 %v8891_v56, 1.0 }
 0xba4   : > { %v10803_v10 = vpop.f32.mrf.mxu0  ;;  %v8497_v43 = vadd.f32 %v8496_v49, %v17396_v0  ;;  %v8860_v0 = vadd.f32 %v17420_v31, %v8822_v1 }
 0xba5   : > { %v10760_v54 = vpop.f32.mrf.mxu1  ;;  %v8858_v62 = vadd.f32 %v17420_v31, %v8820_v58  ;;  %v8921_v28 = vmin.f32 %v8889_v11, 1.0 }
 0xba6   : > { %v8720_v53 = vpop.f32.mrf.mxu0  ;;  %v8892_v15 = vmax.f32 %v8860_v0, 0.0  ;;  %v8508_v38 = vadd.f32 %v10760_v54, %v17400_v26 }
 0xba7   : > { %v8499_v25 = vpop.f32.mrf.mxu1  ;;  %8951 = vxpose.xlu0.b32.cont [3/16] (narrow) %v8919_v21, 48  ;;  %v8890_v34 = vmax.f32 %v8858_v62, 0.0  ;;  %v8823_v50 = vadd.f32 %v8720_v53, %v8497_v43 }
 0xba8   : > { %v10804_v35 = vpop.f32.mrf.mxu0  ;;  %v8500_v60 = vadd.f32 %v8499_v25, %v17406_v4  ;;  %v8825_v25 = vadd.f32 %v10803_v10, %v8505_v37 }
 0xba9   : > { %v17430_v36 = vpop.f32.mrf.mxu1  ;;  %v8922_v30 = vmin.f32 %v8890_v34, 1.0  ;;  %v8861_v22 = vadd.f32 %v17420_v31, %v8823_v50  ;;  %v8826_v26 = vadd.f32 %v10804_v35, %v8508_v38 }
 0xbaa   : > { %v8723_v46 = vpop.f32.mrf.mxu0  ;;  %v8863_v10 = vadd.f32 %v17420_v31, %v8825_v25 }
 0xbab   : > { %v8512_v8 = vpop.f32.mrf.mxu1  ;;  %8952 = vxpose.xlu0.b32.cont [4/16] (narrow) %v8920_v42, 48  ;;  %v8824_v49 = vadd.f32 %v8723_v46, %v8500_v60  ;;  %v8893_v24 = vmax.f32 %v8861_v22, 0.0  ;;  %v8924_v46 = vmin.f32 %v8892_v15, 1.0 }
 0xbac   : > { %v17433_v2 = vpop.f32.mrf.mxu0  ;;  %v8513_v56 = vadd.f32 %v8512_v8, %v17412_v12  ;;  %v8895_v35 = vmax.f32 %v8863_v10, 0.0 }
 0xbad   : > { %v17436_v23 = vpop.f32.mrf.mxu1  ;;  %v8862_v39 = vadd.f32 %v17420_v31, %v8824_v49  ;;  %v8925_v50 = vmin.f32 %v8893_v24, 1.0  ;;  %v8864_v49 = vadd.f32 %v17420_v31, %v8826_v26  ;;  %v8521_v24 = vadd.f32 %v17430_v36, %v17410_v29 }
 0xbae   : > { %v8736_v48 = vpop.f32.mrf.mxu0 }
 0xbaf   : > { %v8515_v18 = vpop.f32.mrf.mxu1  ;;  %8953 = vxpose.xlu0.b32.cont [5/16] (narrow) %v8921_v28, 48  ;;  %v8894_v60 = vmax.f32 %v8862_v39, 0.0  ;;  %v8827_v12 = vadd.f32 %v8736_v48, %v8513_v56  ;;  %v8896_v48 = vmax.f32 %v8864_v49, 0.0  ;;  %v8829_v36 = vadd.f32 %v17433_v2, %v8521_v24 }
 0xbb0   : > { %v17439_v33 = vpop.f32.mrf.mxu0  ;;  %v8516_v8 = vadd.f32 %v8515_v18, %v17418_v44 }
 0xbb1   : > { %v10767_v52 = vpop.f32.mrf.mxu1  ;;  %v8865_v44 = vadd.f32 %v17420_v31, %v8827_v12 }
 0xbb2   : > { %v17442_v61 = vpop.f32.mrf.mxu0  ;;  %v8537_v57 = vadd.f32 %v10767_v52, %v17368_v9 }
 0xbb3   : > { %v8528_v20 = vpop.f32.mrf.mxu1  ;;  %8954 = vxpose.xlu0.b32.cont [6/16] (narrow) %v8922_v30, 48  ;;  %v8828_v18 = vadd.f32 %v17442_v61, %v8516_v8  ;;  %v8928_v61 = vmin.f32 %v8896_v48, 1.0 }
 0xbb4   : > { %v8529_v4 = vadd.f32 %v8528_v20, %v17370_v45  ;;  %v10811_v21 = vpop.f32.mrf.mxu0 }
 0xbb5   : > { %v10768_v58 = vpop.f32.mrf.mxu1  ;;  %v8833_v11 = vadd.f32 %v10811_v21, %v8537_v57  ;;  %v8926_v21 = vmin.f32 %v8894_v60, 1.0 }
 0xbb6   : > { %v8752_v53 = vpop.f32.mrf.mxu0  ;;  %v8540_v45 = vadd.f32 %v10768_v58, %v17372_v14 }
 0xbb7   : > { %v8831_v42 = vadd.f32 %v8752_v53, %v8529_v4  ;;  %v8531_v3 = vpop.f32.mrf.mxu1  ;;  %8955 = vxpose.xlu0.b32.cont [7/16] (narrow) %v8923_v32, 48 }
 0xbb8   : > { %v8532_v62 = vadd.f32 %v8531_v3, %v17374_v27  ;;  %v10812_v9 = vpop.f32.mrf.mxu0  ;;  %v8871_v27 = vadd.f32 %v17420_v31, %v8833_v11  ;;  %v8927_v3 = vmin.f32 %v8895_v35, 1.0 }
 0xbb9   : > { %v10771_v43 = vpop.f32.mrf.mxu1  ;;  %v8869_v47 = vadd.f32 %v17420_v31, %v8831_v42  ;;  %v8834_v30 = vadd.f32 %v10812_v9, %v8540_v45 }
 0xbba   : > { %v8755_v28 = vpop.f32.mrf.mxu0  ;;  %v8903_v32 = vmax.f32 %v8871_v27, 0.0  ;;  %v8553_v11 = vadd.f32 %v10771_v43, %v17376_v17  ;;  %v8897_v17 = vmax.f32 %v8865_v44, 0.0  ;;  %v8866_v43 = vadd.f32 %v17420_v31, %v8828_v18 }
 0xbbb   : > { %v8832_v54 = vadd.f32 %v8755_v28, %v8532_v62  ;;  %v8544_v1 = vpop.f32.mrf.mxu1  ;;  %8956 = vxpose.xlu0.b32.cont [8/16] (narrow) %v8924_v46, 48  ;;  %v8901_v34 = vmax.f32 %v8869_v47, 0.0  ;;  %v8872_v58 = vadd.f32 %v17420_v31, %v8834_v30  ;;  %v8524_v28 = vadd.f32 %v17436_v23, %v17416_v5 }
 0xbbc   : > { %v10815_v0 = vpop.f32.mrf.mxu0  ;;  %v8545_v52 = vadd.f32 %v8544_v1, %v17378_v41  ;;  %v8867_v5 = vadd.f32 %v17420_v31, %v8829_v36  ;;  %v8929_v27 = vmin.f32 %v8897_v17, 1.0 }
 0xbbd   : > { %v8870_v14 = vadd.f32 %v17420_v31, %v8832_v54  ;;  %v10772_v37 = vpop.f32.mrf.mxu1  ;;  %v8933_v20 = vmin.f32 %v8901_v34, 1.0  ;;  %v8904_v9 = vmax.f32 %v8872_v58, 0.0  ;;  %v8837_v26 = vadd.f32 %v10815_v0, %v8553_v11 }
 0xbbe   : > { %v8768_v22 = vpop.f32.mrf.mxu0  ;;  %v8556_v34 = vadd.f32 %v10772_v37, %v17382_v7  ;;  %v8830_v30 = vadd.f32 %v17439_v33, %v8524_v28 }
 0xbbf   : > { %v8902_v57 = vmax.f32 %v8870_v14, 0.0  ;;  %v8547_v4 = vpop.f32.mrf.mxu1  ;;  %8981 = vxpose.xlu1.b32.start [1/16] (narrow) %v8933_v20, 48  ;;  %8957 = vxpose.xlu0.b32.cont [9/16] (narrow) %v8925_v50, 48  ;;  %v8835_v41 = vadd.f32 %v8768_v22, %v8545_v52  ;;  %v8936_v1 = vmin.f32 %v8904_v9, 1.0  ;;  %v8898_v14 = vmax.f32 %v8866_v43, 0.0 }
 0xbc0   : > { %v10816_v15 = vpop.f32.mrf.mxu0  ;;  %v8548_v25 = vadd.f32 %v8547_v4, %v17384_v16  ;;  %v8935_v16 = vmin.f32 %v8903_v32, 1.0  ;;  %v8875_v0 = vadd.f32 %v17420_v31, %v8837_v26 }
 0xbc1   : > { %v8934_v53 = vmin.f32 %v8902_v57, 1.0  ;;  %v17462_v38 = vpop.f32.mrf.mxu1  ;;  %v8873_v46 = vadd.f32 %v17420_v31, %v8835_v41  ;;  %v8838_v7 = vadd.f32 %v10816_v15, %v8556_v34  ;;  %v8899_v57 = vmax.f32 %v8867_v5, 0.0 }
 0xbc2   : > { %v8771_v42 = vpop.f32.mrf.mxu0  ;;  %v8930_v12 = vmin.f32 %v8898_v14, 1.0  ;;  %v8907_v8 = vmax.f32 %v8875_v0, 0.0 }
 0xbc3   : > { %v8560_v39 = vpop.f32.mrf.mxu1  ;;  %8982 = vxpose.xlu1.b32.cont [2/16] (narrow) %v8934_v53, 48  ;;  %8958 = vxpose.xlu0.b32.cont [10/16] (narrow) %v8926_v21, 48  ;;  %v8836_v45 = vadd.f32 %v8771_v42, %v8548_v25  ;;  %v8905_v50 = vmax.f32 %v8873_v46, 0.0  ;;  %v8868_v21 = vadd.f32 %v17420_v31, %v8830_v30  ;;  %v8876_v58 = vadd.f32 %v17420_v31, %v8838_v7 }
 0xbc4   : > { %v17469_v62 = vpop.f32.mrf.mxu0  ;;  %v8561_v22 = vadd.f32 %v8560_v39, %v17390_v55  ;;  %v8931_v42 = vmin.f32 %v8899_v57, 1.0  ;;  %v8939_v24 = vmin.f32 %v8907_v8, 1.0  ;;  %v8569_v39 = vadd.f32 %v17462_v38, %v17388_v51 }
 0xbc5   : > { %v17472_v47 = vpop.f32.mrf.mxu1  ;;  %v8874_v60 = vadd.f32 %v17420_v31, %v8836_v45  ;;  %v8937_v20 = vmin.f32 %v8905_v50, 1.0  ;;  %v8908_v48 = vmax.f32 %v8876_v58, 0.0 }
 0xbc6   : > { %v8784_v29 = vpop.f32.mrf.mxu0  ;;  %v8572_v9 = vadd.f32 %v17472_v47, %v17394_v6 }
 0xbc7   : > { %v8563_v10 = vpop.f32.mrf.mxu1  ;;  %8983 = vxpose.xlu1.b32.cont [3/16] (narrow) %v8935_v16, 48  ;;  %8959 = vxpose.xlu0.b32.cont [11/16] (narrow) %v8927_v3, 48  ;;  %v8906_v37 = vmax.f32 %v8874_v60, 0.0  ;;  %v8839_v15 = vadd.f32 %v8784_v29, %v8561_v22  ;;  %v8900_v3 = vmax.f32 %v8868_v21, 0.0  ;;  %v8940_v16 = vmin.f32 %v8908_v48, 1.0 }
 0xbc8   : > { %v10820_v54 = vpop.f32.mrf.mxu0  ;;  %v8564_v41 = vadd.f32 %v8563_v10, %v17398_v63  ;;  %v8841_v63 = vadd.f32 %v17469_v62, %v8569_v39 }
 0xbc9   : > { %v17480_v56 = vpop.f32.mrf.mxu1  ;;  %v8938_v53 = vmin.f32 %v8906_v37, 1.0  ;;  %v8932_v11 = vmin.f32 %v8900_v3, 1.0  ;;  %v8842_v29 = vadd.f32 %v10820_v54, %v8572_v9 }
 0xbca   : > { %v8787_v2 = vpop.f32.mrf.mxu0  ;;  %v8879_v51 = vadd.f32 %v17420_v31, %v8841_v63  ;;  %v8585_v43 = vadd.f32 %v17480_v56, %v17402_v40 }
 0xbcb   : > { %v8576_v23 = vpop.f32.mrf.mxu1  ;;  %8984 = vxpose.xlu1.b32.cont [4/16] (narrow) %v8936_v1, 48  ;;  %8960 = vxpose.xlu0.b32.cont [12/16] (narrow) %v8928_v61, 48  ;;  %v8840_v44 = vadd.f32 %v8787_v2, %v8564_v41  ;;  %v8880_v62 = vadd.f32 %v17420_v31, %v8842_v29 }
 0xbcc   : > { %v10823_v52 = vpop.f32.mrf.mxu0  ;;  %v8577_v28 = vadd.f32 %v8576_v23, %v17404_v13  ;;  %v8911_v10 = vmax.f32 %v8879_v51, 0.0 }
 0xbcd   : > { %v10780_v35 = vpop.f32.mrf.mxu1  ;;  %v8878_v45 = vadd.f32 %v17420_v31, %v8840_v44  ;;  %v8912_v47 = vmax.f32 %v8880_v62, 0.0  ;;  %v8845_v54 = vadd.f32 %v10823_v52, %v8585_v43 }
 0xbce   : > { %v8800_v49 = vpop.f32.mrf.mxu0  ;;  %v8943_v6 = vmin.f32 %v8911_v10, 1.0  ;;  %v8588_v34 = vadd.f32 %v10780_v35, %v17408_v19 }
 0xbcf   : > { %v8579_v4 = vpop.f32.mrf.mxu1  ;;  %8985 = vxpose.xlu1.b32.cont [5/16] (narrow) %v8937_v20, 48  ;;  %8961 = vxpose.xlu0.b32.cont [13/16] (narrow) %v8929_v27, 48  ;;  %v8910_v36 = vmax.f32 %v8878_v45, 0.0  ;;  %v8843_v17 = vadd.f32 %v8800_v49, %v8577_v28  ;;  %v8944_v1 = vmin.f32 %v8912_v47, 1.0  ;;  %v8883_v50 = vadd.f32 %v17420_v31, %v8845_v54 }
 0xbd0   : > { %v8580_v33 = vadd.f32 %v8579_v4, %v17414_v59  ;;  %v10824_v32 = vpop.f32.mrf.mxu0  ;;  %v8877_v59 = vadd.f32 %v17420_v31, %v8839_v15 }
 0xbd1   : > { %v8942_v61 = vmin.f32 %v8910_v36, 1.0  ;;  %v8881_v26 = vadd.f32 %v17420_v31, %v8843_v17  ;;  %v8846_v2 = vadd.f32 %v10824_v32, %v8588_v34  ;;  %v8915_v23 = vmax.f32 %v8883_v50, 0.0 }
 0xbd2   : > { %v8803_v55 = vpop.f32.mrf.mxu0  ;;  %v8909_v46 = vmax.f32 %v8877_v59, 0.0 }
 0xbd3   : > { %v8844_v25 = vadd.f32 %v8803_v55, %v8580_v33  ;;  %8986 = vxpose.xlu1.b32.cont [6/16] (narrow) %v8938_v53, 48  ;;  %8962 = vxpose.xlu0.b32.cont [14/16] (narrow) %v8930_v12, 48  ;;  %v8913_v13 = vmax.f32 %v8881_v26, 0.0  ;;  %v8884_v40 = vadd.f32 %v17420_v31, %v8846_v2  ;;  %v8947_v27 = vmin.f32 %v8915_v23, 1.0 }
 0xbd4   : > { %v8941_v38 = vmin.f32 %v8909_v46, 1.0 }
 0xbd5   : > { %v8882_v18 = vadd.f32 %v17420_v31, %v8844_v25  ;;  %v8945_v60 = vmin.f32 %v8913_v13, 1.0  ;;  %v8916_v19 = vmax.f32 %v8884_v40, 0.0 }
 0xbd7   : > { %8987 = vxpose.xlu1.b32.cont [7/16] (narrow) %v8939_v24, 48  ;;  %8963 = vxpose.xlu0.b32.cont [15/16] (narrow) %v8931_v42, 48  ;;  %v8914_v5 = vmax.f32 %v8882_v18, 0.0  ;;  %v8948_v30 = vmin.f32 %v8916_v19, 1.0 }
 0xbd9   : > { %v8946_v56 = vmin.f32 %v8914_v5, 1.0 }
 0xbdb   : > { %8988 = vxpose.xlu1.b32.cont [8/16] (narrow) %v8940_v16, 48  ;;  %8964 = vxpose.xlu0.b32.end [16/16] (narrow) %v8932_v11, 48 }
 0xbdf   : > { %8989 = vxpose.xlu1.b32.cont [9/16] (narrow) %v8941_v38, 48 }
 0xbe3   : > { %8990 = vxpose.xlu1.b32.cont [10/16] (narrow) %v8942_v61, 48 }
 0xbe7   : > { %8991 = vxpose.xlu1.b32.cont [11/16] (narrow) %v8943_v6, 48 }
 0xbeb   : > { %8992 = vxpose.xlu1.b32.cont [12/16] (narrow) %v8944_v1, 48 }
 0xbef   : > { %8993 = vxpose.xlu1.b32.cont [13/16] (narrow) %v8945_v60, 48 }
 0xbf3   : > { %8994 = vxpose.xlu1.b32.cont [14/16] (narrow) %v8946_v56, 48 }
 0xbf7   : > { %8995 = vxpose.xlu1.b32.cont [15/16] (narrow) %v8947_v27, 48 }
 0xbfb   : > { %8996 = vxpose.xlu1.b32.end [16/16] (narrow) %v8948_v30, 48 }
 0xc1b   : > { %v8965_v14 = vpop.trf.xlu0 }
 0xc1c   : > { %9013 = vst [vmem:[%s11972_s13] sm:$0xff] %v8965_v14 }
 0xc1f   : > { %v8966_v0 = vpop.trf.xlu0 }
 0xc20   : > { %9015 = vst [vmem:[%s11972_s13 + $0x10] sm:$0xff] %v8966_v0 }
 0xc23   : > { %v8967_v52 = vpop.trf.xlu0 }
 0xc24   : > { %9017 = vst [vmem:[%s11972_s13 + $0x20] sm:$0xff] %v8967_v52 }
 0xc27   : > { %v8968_v31 = vpop.trf.xlu0 }
 0xc28   : > { %9019 = vst [vmem:[%s11972_s13 + $0x30] sm:$0xff] %v8968_v31 }
 0xc2b   : > { %v8969_v20 = vpop.trf.xlu0 }
 0xc2c   : > { %9021 = vst [vmem:[%s11972_s13 + $0x40] sm:$0xff] %v8969_v20 }
 0xc2f   : > { %v8970_v7 = vpop.trf.xlu0 }
 0xc30   : > { %9023 = vst [vmem:[%s11972_s13 + $0x50] sm:$0xff] %v8970_v7 }
 0xc3b   : > { %v8997_v37 = vpop.trf.xlu1 }
 0xc3c   : > { %9014 = vst [vmem:[%s11972_s13 + $0x8] sm:$0xff] %v8997_v37 }
 0xc3f   : > { %v8998_v22 = vpop.trf.xlu1 }
 0xc40   : > { %9016 = vst [vmem:[%s11972_s13 + $0x18] sm:$0xff] %v8998_v22 }
 0xc43   : > { %v8999_v35 = vpop.trf.xlu1 }
 0xc44   : > { %9018 = vst [vmem:[%s11972_s13 + $0x28] sm:$0xff] %v8999_v35 }
 0xc47   : > { %v9000_v49 = vpop.trf.xlu1 }
 0xc48   : > { %9020 = vst [vmem:[%s11972_s13 + $0x38] sm:$0xff] %v9000_v49 }
 0xc4b   : > { %v9001_v57 = vpop.trf.xlu1 }
 0xc4c   : > { %9022 = vst [vmem:[%s11972_s13 + $0x48] sm:$0xff] %v9001_v57 }
 0xc4f   : > { %v9002_v4 = vpop.trf.xlu1 }
 0xc50   : > { %9024 = vst [vmem:[%s11972_s13 + $0x58] sm:$0xff] %v9002_v4 }
 0xc51 PF: > { %s24_s17 = sadd.s32 1, %s11575_s17  }
 0xc52   : > { %p21_p5 = scmp.ge.s32.totalorder %s24_s17, 4  }
 0xc54   :  { %23 = sbr.rel (!%p21_p5) target bundleno = 3 (0x3), region = 135 }
 0xc59   :  { %9046 = vsyncpa [#allocation4], 1 }
 0xc5a   :  { %9048 = vsyncpa [#allocation4 + $0x1], 1 }
 0xc5b   :  { %9049 = vsyncpa [#allocation6], 1 }
 0xc5c   :  { %9050 = vsyncpa [#allocation9], 1 }

</bundles_post_ra>
